<compile_context>
chip_gen: v7x
topology: tpu7x:2x2x1
jax: 0.10.0
libtpu: 0.0.40
codegen_flags: <defaults>
</compile_context>

<pallas_src>
import functools
import math

import jax
import jax.numpy as jnp
from jax.experimental import pallas as pl
from jax.experimental.pallas import tpu as pltpu

EPS = 1e-6
NEG_INF = -1e30  # finite mask value: avoids inf-inf NaNs in the online softmax


# ---------------------------------------------------------------------------
# Buffer construction (glue, plain JAX) — mirrors SelfAttention.__init__
# ---------------------------------------------------------------------------
def make_axial_pos(h, w):
    h_pos = jnp.linspace(-1.0, 1.0, h + 1)
    w_pos = jnp.linspace(-1.0, 1.0, w + 1)
    h_pos = (h_pos[:-1] + h_pos[1:]) / 2
    w_pos = (w_pos[:-1] + w_pos[1:]) / 2
    hh, ww = jnp.meshgrid(h_pos, w_pos, indexing="ij")
    return jnp.stack([hh, ww], axis=-1).reshape(h * w, 2)


def make_rope_tables(head_dim):
    """cos/sin exactly as in SelfAttention.__init__: (1025, head_dim//2)."""
    log_min = math.log(math.pi)
    log_max = math.log(10 * math.pi)
    freqs = jnp.exp(jnp.linspace(log_min, log_max, head_dim // 4))
    pos = make_axial_pos(32, 32)
    pos = jnp.concatenate([jnp.zeros((1, 2)), pos], axis=0)          # (1025, 2)
    theta_h = pos[:, 0:1] * freqs
    theta_w = pos[:, 1:2] * freqs
    theta = jnp.concatenate([theta_h, theta_w], axis=-1)             # (1025, hd//2)
    return jnp.cos(theta).astype(jnp.float32), jnp.sin(theta).astype(jnp.float32)


def prepare_rope(cos, sin, n_heads):
    """Tile the (S, head_dim//2) tables across heads -> (S, D//2), matching the
    split-halves q/k layout so in-kernel RoPE is one lane-dense pass."""
    return (jnp.tile(cos, (1, n_heads)).astype(jnp.float32),
            jnp.tile(sin, (1, n_heads)).astype(jnp.float32))


def prepare_params(wqkv, wout, head_dim, dtype):
    """PyTorch (out,in) weights -> kernel layout:
       * transpose to (in, out),
       * fold 1/sqrt(head_dim) into the q columns (softmax scale is free),
       * permute q and k columns into the split-halves layout
         [h0 fh, h1 fh, ..., h0 sh, h1 sh, ...] so RoPE is full-width,
       * cast to the MXU operand dtype.  v columns and Wout stay natural."""
    D = wout.shape[0]
    n_heads = D // head_dim
    half = head_dim // 2
    wqkv_t = jnp.asarray(wqkv, jnp.float32).T                        # (D, 3D)
    wq = wqkv_t[:, 0 * D:1 * D] * (1.0 / math.sqrt(head_dim))
    wk = wqkv_t[:, 1 * D:2 * D]
    wv = wqkv_t[:, 2 * D:3 * D]
    idx = jnp.arange(D).reshape(n_heads, 2, half).transpose(1, 0, 2).reshape(D)
    wqkv_k = jnp.concatenate([wq[:, idx], wk[:, idx], wv], axis=1).astype(dtype)
    wout_k = jnp.asarray(wout, jnp.float32).T.astype(dtype)
    return wqkv_k, wout_k


# ---------------------------------------------------------------------------
# Pallas kernel: fused RMSNorm + QKV + RoPE + flash causal attention
#                + fused out-projection + residual
# ---------------------------------------------------------------------------
def self_attention_kernel(x_ref, scale_ref, wqkv_ref, wout_ref, cos_ref, sin_ref,
                          o_ref, *, head_dim, block):
    dt = wqkv_ref.dtype                               # native MXU operand dtype
    xf = x_ref[0].astype(jnp.float32)                 # (S, D) f32 working copy
    S, D = xf.shape
    half = head_dim // 2
    n_heads = D // head_dim
    Dh = D // 2
    num_q = S // block

    # ---- RMSNorm (f32 math), single cast to the MXU operand dtype ----
    sc = scale_ref[...].astype(jnp.float32)           # (1, D)
    mean_sq = jnp.mean(xf * xf, axis=-1, keepdims=True)
    xn = (xf * (sc * jax.lax.rsqrt(mean_sq + EPS))).astype(dt)

    # ---- fused QKV projection (1/sqrt(head_dim) folded into q columns) ----
    qkv = jnp.dot(xn, wqkv_ref[...], preferred_element_type=jnp.float32)  # (S, 3D)

    # ---- RoPE, hoisted: one lane-dense full-width pass for q, one for k.
    # q/k are in split-halves layout; cos/sin are pre-tiled to (S, D/2).
    cosw = cos_ref[...]                               # (S, D/2) f32
    sinw = sin_ref[...]
    qa, qb = qkv[:, 0 * Dh:1 * Dh], qkv[:, 1 * Dh:2 * Dh]
    ka, kb = qkv[:, 2 * Dh:3 * Dh], qkv[:, 3 * Dh:4 * Dh]
    q_a = (qa * cosw - qb * sinw).astype(dt)          # rotated first halves
    q_b = (qb * cosw + qa * sinw).astype(dt)          # rotated second halves
    k_a = (ka * cosw - kb * sinw).astype(dt)
    k_b = (kb * cosw + ka * sinw).astype(dt)
    v = qkv[:, 2 * D:3 * D].astype(dt)                # (S, D) natural layout

    # Per-tile causal mask: ONE (block, block) triangle, reused by every
    # diagonal tile (q/kv offsets coincide there).  No (S, S) iotas/masks.
    li = jax.lax.broadcasted_iota(jnp.int32, (block, block), 0)
    lj = jax.lax.broadcasted_iota(jnp.int32, (block, block), 1)
    diag_mask = lj <= li

    # ---- flash attention: q tiles x kv tiles, online softmax, causal tile
    # skipping.  Loops are static Python at these tiny trip counts; at
    # production sizes the q-tile loop becomes a grid axis and the head loop a
    # lax.fori_loop to bound vreg live ranges.
    for qi in range(num_q):
        q0 = qi * block
        out_tile = jnp.zeros((block, D), jnp.float32)     # fused out-proj accum
        for h in range(n_heads):
            cs = slice(h * half, (h + 1) * half)          # split-layout columns
            vs = slice(h * head_dim, (h + 1) * head_dim)  # natural columns
            qa_h = q_a[q0:q0 + block, cs]
            qb_h = q_b[q0:q0 + block, cs]
            m = jnp.full((block, 1), NEG_INF, jnp.float32)
            l = jnp.zeros((block, 1), jnp.float32)
            acc = jnp.zeros((block, head_dim), jnp.float32)
            for ki in range(qi + 1):                      # causal tile skipping
                k0 = ki * block
                # scores: head_dim contraction as two K=half MXU dots (split
                # layout); MXU has huge slack at head_dim=16, so this is cheap.
                s = jax.lax.dot_general(
                    qa_h, k_a[k0:k0 + block, cs], (((1,), (1,)), ((), ())),
                    preferred_element_type=jnp.float32)
                s = s + jax.lax.dot_general(
                    qb_h, k_b[k0:k0 + block, cs], (((1,), (1,)), ((), ())),
                    preferred_element_type=jnp.float32)
                if ki == qi:          # static: only diagonal tiles get a mask
                    s = jnp.where(diag_mask, s, NEG_INF)
                m_new = jnp.maximum(m, jnp.max(s, axis=-1, keepdims=True))
                alpha = jnp.exp(m - m_new)
                p = jnp.exp(s - m_new)
                l = alpha * l + jnp.sum(p, axis=-1, keepdims=True)
                acc = alpha * acc + jnp.dot(
                    p.astype(dt), v[k0:k0 + block, vs],
                    preferred_element_type=jnp.float32)
                m = m_new
            # deferred normalization (EUP reciprocal); l >= 1 under causal.
            o_h = acc * pl.reciprocal(l, approx=True)
            # fused output projection: this head's contribution, f32 accum.
            out_tile = out_tile + jnp.dot(
                o_h.astype(dt), wout_ref[vs, :],
                preferred_element_type=jnp.float32)
        # residual + a single full-width store per q tile (no masked per-head
        # column stores; lane-dense for production D >= 128).
        o_ref[0, q0:q0 + block, :] = (
            out_tile + xf[q0:q0 + block, :]).astype(o_ref.dtype)


def self_attention(x, scale, wqkv_k, wout_k, cosw, sinw, *, head_dim, block=None):
    """x: (B, S, D).  wqkv_k: (D, 3D) = Wqkv^T with the softmax scale folded
    into q columns and q/k columns in split-halves layout (prepare_params).
    wout_k: (D, D) = Wout^T.  cosw/sinw: (S, D//2) f32 (prepare_rope)."""
    B, S, D = x.shape
    if block is None:
        block = min(128, S)
    assert S % block == 0 and block % 8 == 0
    Dh = D // 2
    scale2d = scale.reshape(1, D).astype(jnp.float32)
    kern = functools.partial(self_attention_kernel, head_dim=head_dim, block=block)

    def call(single_buffer_consts):
        def const_spec(shape):
            # Grid-invariant operands: single-buffer them (their index_map is
            # constant), halving their VMEM footprint at production sizes.
            if single_buffer_consts:
                return pl.BlockSpec(shape, lambda b: (0,) * len(shape),
                                    pipeline_mode=pl.Buffered(1))
            return pl.BlockSpec(shape, lambda b: (0,) * len(shape))

        return pl.pallas_call(
            kern,
            out_shape=jax.ShapeDtypeStruct((B, S, D), x.dtype),
            grid_spec=pltpu.PrefetchScalarGridSpec(
                num_scalar_prefetch=0,
                grid=(B,),
                in_specs=[
                    pl.BlockSpec((1, S, D), lambda b: (b, 0, 0)),   # x per batch
                    const_spec((1, D)),                             # rms scale
                    const_spec((D, 3 * D)),                         # Wqkv^T
                    const_spec((D, D)),                             # Wout^T
                    const_spec((S, Dh)),                            # cos (tiled)
                    const_spec((S, Dh)),                            # sin (tiled)
                ],
                out_specs=pl.BlockSpec((1, S, D), lambda b: (b, 0, 0)),
            ),
            compiler_params=pltpu.CompilerParams(
                dimension_semantics=("parallel",),      # batch across TCs (v7x)
                # Toy shapes need little VMEM.  Production: derive tiles
                # against <= ~56 MiB on v7x (64 MiB physical); larger tiles /
                # higher limits are fine on v5e/v6e (128 MiB physical).
                vmem_limit_bytes=48 * 1024 * 1024,
            ),
        )(x, scale2d, wqkv_k, wout_k, cosw, sinw)

    try:
        return call(True)
    except Exception:
        # pl.Buffered(1) is a pure VMEM-footprint optimization; fall back to
        # default double-buffering if this JAX/Mosaic build rejects it.
        return call(False)


# ---------------------------------------------------------------------------
# Pure-JAX reference (unfolded, natural-layout weights; explicit softmax scale)
# ---------------------------------------------------------------------------
def reference(x, scale, wqkv_t, wout_t, cos, sin, head_dim):
    B, S, D = x.shape
    H = D // head_dim
    half = head_dim // 2
    xf = x.astype(jnp.float32)
    mean_sq = jnp.mean(xf ** 2, axis=-1, keepdims=True)
    xn = xf * (scale * jax.lax.rsqrt(mean_sq + EPS))
    qkv = xn @ wqkv_t
    q = qkv[..., 0 * D:1 * D].reshape(B, S, H, head_dim)
    k = qkv[..., 1 * D:2 * D].reshape(B, S, H, head_dim)
    v = qkv[..., 2 * D:3 * D].reshape(B, S, H, head_dim)
    c = cos[None, :, None, :]
    s = sin[None, :, None, :]

    def rope(t):
        t1, t2 = t[..., :half], t[..., half:]
        return jnp.concatenate([t1 * c - t2 * s, t2 * c + t1 * s], axis=-1)

    q, k = rope(q), rope(k)
    scores = jnp.einsum("bqhd,bkhd->bhqk", q, k) / math.sqrt(head_dim)
    mask = jnp.tril(jnp.ones((S, S), bool))
    scores = jnp.where(mask[None, None], scores, -jnp.inf)
    attn = jax.nn.softmax(scores, axis=-1)
    out = jnp.einsum("bhqk,bkhd->bqhd", attn, v).reshape(B, S, D)
    return out @ wout_t + xf


# ---------------------------------------------------------------------------
if __name__ == "__main__":
    B, S, dim, head_dim = 2, 64, 64, 16    # n_heads = 4, head_dim//4 = 4 freqs
    block = 32                             # 2 q-tiles x <=2 kv-tiles: exercises
                                           # causal tile skipping + diag masking

    key = jax.random.PRNGKey(0)
    kx, kqkv, kout = jax.random.split(key, 3)

    x = jax.random.normal(kx, (B, S, dim), dtype=jnp.float32)
    # RMSNorm scale = ones (as in __init__).  NOTE: the module zero-inits
    # out_proj; nonzero deterministic weights here so the attention path is
    # actually exercised / checked.
    scale = jnp.ones((dim,), dtype=jnp.float32)
    wqkv = jax.random.normal(kqkv, (3 * dim, dim), dtype=jnp.float32) * 0.05  # (out,in)
    wout = jax.random.normal(kout, (dim, dim), dtype=jnp.float32) * 0.05      # (out,in)

    cos_full, sin_full = make_rope_tables(head_dim)     # (1025, head_dim//2)
    cos, sin = cos_full[:S], sin_full[:S]
    cosw, sinw = prepare_rope(cos, sin, dim // head_dim)  # (S, dim//2)

    # --- f32 path: tight check of the fused-kernel logic ---
    wqkv32, wout32 = prepare_params(wqkv, wout, head_dim, jnp.float32)
    out32 = jax.block_until_ready(
        self_attention(x, scale, wqkv32, wout32, cosw, sinw,
                       head_dim=head_dim, block=block))
    ref32 = jax.block_until_ready(
        reference(x, scale, wqkv.T, wout.T, cos, sin, head_dim))
    err32 = jnp.max(jnp.abs(out32 - ref32))
    assert jnp.allclose(out32, ref32, atol=5e-3, rtol=5e-3), (
        f"f32 path: max abs err {err32}")

    # --- bf16 path: native MXU operand dtype (recommended production path) ---
    x_bf = x.astype(jnp.bfloat16)
    wqkv_b = wqkv.astype(jnp.bfloat16)
    wout_b = wout.astype(jnp.bfloat16)
    wqkv_kbf, wout_kbf = prepare_params(wqkv_b, wout_b, head_dim, jnp.bfloat16)
    out_bf = jax.block_until_ready(
        self_attention(x_bf, scale, wqkv_kbf, wout_kbf, cosw, sinw,
                       head_dim=head_dim, block=block))
    ref_bf = jax.block_until_ready(
        reference(x_bf.astype(jnp.float32), scale,
                  wqkv_b.astype(jnp.float32).T, wout_b.astype(jnp.float32).T,
                  cos, sin, head_dim))
    err_bf = jnp.max(jnp.abs(out_bf.astype(jnp.float32) - ref_bf))
    assert jnp.allclose(out_bf.astype(jnp.float32), ref_bf, atol=5e-2, rtol=5e-2), (
        f"bf16 path: max abs err {err_bf}")

    print("KERNEL_OK")
</pallas_src>

<mosaic_0001>
module attributes {stable_mosaic.version = 11 : i64} {
  func.func @self_attention_kernel(%arg0: i32, %arg1: memref<1x64x64xf32, #tpu.memory_space<vmem>>, %arg2: memref<1x64xf32, #tpu.memory_space<vmem>>, %arg3: memref<64x192xf32, #tpu.memory_space<vmem>>, %arg4: memref<64x64xf32, #tpu.memory_space<vmem>>, %arg5: memref<64x32xf32, #tpu.memory_space<vmem>>, %arg6: memref<64x32xf32, #tpu.memory_space<vmem>>, %arg7: memref<1x64x64xf32, #tpu.memory_space<vmem>>) attributes {dimension_semantics = [#tpu.dimension_semantics<parallel>], iteration_bounds = array<i64: 2>, scalar_prefetch = 0 : i64, scratch_operands = 0 : i64, tpu.core_type = #tpu.core_type<tc>, window_params = [{transform_indices = @transform_0, window_bounds = array<i64: 1, 64, 64>}, {pipeline_mode = #tpu.pipeline_mode<synchronous>, transform_indices = @transform_1, window_bounds = array<i64: 1, 64>}, {pipeline_mode = #tpu.pipeline_mode<synchronous>, transform_indices = @transform_2, window_bounds = array<i64: 64, 192>}, {pipeline_mode = #tpu.pipeline_mode<synchronous>, transform_indices = @transform_3, window_bounds = array<i64: 64, 64>}, {pipeline_mode = #tpu.pipeline_mode<synchronous>, transform_indices = @transform_4, window_bounds = array<i64: 64, 32>}, {pipeline_mode = #tpu.pipeline_mode<synchronous>, transform_indices = @transform_5, window_bounds = array<i64: 64, 32>}, {transform_indices = @transform_6, window_bounds = array<i64: 1, 64, 64>}]} {
    %c0 = arith.constant 0 : index
    %c0_0 = arith.constant 0 : index
    %c0_1 = arith.constant 0 : index
    %0 = vector.load %arg1[%c0, %c0_0, %c0_1] : memref<1x64x64xf32, #tpu.memory_space<vmem>>, vector<1x64x64xf32>
    %1 = vector.shape_cast %0 : vector<1x64x64xf32> to vector<64x64xf32>
    %c0_2 = arith.constant 0 : index
    %c0_3 = arith.constant 0 : index
    %2 = vector.load %arg2[%c0_2, %c0_3] : memref<1x64xf32, #tpu.memory_space<vmem>>, vector<1x64xf32>
    %3 = arith.mulf %1, %1 : vector<64x64xf32>
    %cst = arith.constant dense<0.000000e+00> : vector<64xf32>
    %4 = vector.multi_reduction <add>, %3, %cst [1] : vector<64x64xf32> to vector<64xf32>
    %5 = vector.shape_cast %4 : vector<64xf32> to vector<64x1xf32>
    %cst_4 = arith.constant 6.400000e+01 : f32
    %6 = vector.broadcast %cst_4 : f32 to vector<64x1xf32>
    %7 = arith.divf %5, %6 : vector<64x1xf32>
    %cst_5 = arith.constant 9.99999997E-7 : f32
    %8 = vector.broadcast %cst_5 : f32 to vector<64x1xf32>
    %9 = arith.addf %7, %8 : vector<64x1xf32>
    %10 = math.rsqrt %9 : vector<64x1xf32>
    %11 = vector.broadcast %2 : vector<1x64xf32> to vector<64x64xf32>
    %12 = vector.broadcast %10 : vector<64x1xf32> to vector<64x64xf32>
    %13 = arith.mulf %11, %12 : vector<64x64xf32>
    %14 = arith.mulf %1, %13 : vector<64x64xf32>
    %c0_6 = arith.constant 0 : index
    %c0_7 = arith.constant 0 : index
    %15 = vector.load %arg3[%c0_6, %c0_7] : memref<64x192xf32, #tpu.memory_space<vmem>>, vector<64x192xf32>
    %cst_8 = arith.constant dense<0.000000e+00> : vector<64x192xf32>
    %16 = tpu.matmul %14, %15, %cst_8 {dimension_numbers = #tpu.dot_dimension_numbers<[1], [0], [0], [1], [0, 0, 1, 1], [], []>} : vector<64x64xf32>, vector<64x192xf32>, vector<64x192xf32> -> vector<64x192xf32>
    %c0_9 = arith.constant 0 : index
    %c0_10 = arith.constant 0 : index
    %17 = vector.load %arg5[%c0_9, %c0_10] : memref<64x32xf32, #tpu.memory_space<vmem>>, vector<64x32xf32>
    %c0_11 = arith.constant 0 : index
    %c0_12 = arith.constant 0 : index
    %18 = vector.load %arg6[%c0_11, %c0_12] : memref<64x32xf32, #tpu.memory_space<vmem>>, vector<64x32xf32>
    %19 = vector.extract_strided_slice %16 {offsets = [0, 0], sizes = [64, 32], strides = [1, 1]} : vector<64x192xf32> to vector<64x32xf32>
    %20 = vector.extract_strided_slice %16 {offsets = [0, 32], sizes = [64, 32], strides = [1, 1]} : vector<64x192xf32> to vector<64x32xf32>
    %21 = vector.extract_strided_slice %16 {offsets = [0, 64], sizes = [64, 32], strides = [1, 1]} : vector<64x192xf32> to vector<64x32xf32>
    %22 = vector.extract_strided_slice %16 {offsets = [0, 96], sizes = [64, 32], strides = [1, 1]} : vector<64x192xf32> to vector<64x32xf32>
    %23 = arith.mulf %19, %17 : vector<64x32xf32>
    %24 = arith.mulf %20, %18 : vector<64x32xf32>
    %25 = arith.subf %23, %24 : vector<64x32xf32>
    %26 = arith.mulf %20, %17 : vector<64x32xf32>
    %27 = arith.mulf %19, %18 : vector<64x32xf32>
    %28 = arith.addf %26, %27 : vector<64x32xf32>
    %29 = arith.mulf %21, %17 : vector<64x32xf32>
    %30 = arith.mulf %22, %18 : vector<64x32xf32>
    %31 = arith.subf %29, %30 : vector<64x32xf32>
    %32 = arith.mulf %22, %17 : vector<64x32xf32>
    %33 = arith.mulf %21, %18 : vector<64x32xf32>
    %34 = arith.addf %32, %33 : vector<64x32xf32>
    %35 = vector.extract_strided_slice %16 {offsets = [0, 128], sizes = [64, 64], strides = [1, 1]} : vector<64x192xf32> to vector<64x64xf32>
    %36 = tpu.iota {dimensions = array<i32: 0>} : vector<32x32xi32>
    %37 = tpu.iota {dimensions = array<i32: 1>} : vector<32x32xi32>
    %38 = arith.cmpi sle, %37, %36 : vector<32x32xi32>
    %cst_13 = arith.constant 0.000000e+00 : f32
    %39 = vector.broadcast %cst_13 : f32 to vector<32x64xf32>
    %40 = vector.extract_strided_slice %25 {offsets = [0, 0], sizes = [32, 8], strides = [1, 1]} : vector<64x32xf32> to vector<32x8xf32>
    %41 = vector.extract_strided_slice %28 {offsets = [0, 0], sizes = [32, 8], strides = [1, 1]} : vector<64x32xf32> to vector<32x8xf32>
    %cst_14 = arith.constant -1.000000e+30 : f32
    %42 = vector.broadcast %cst_14 : f32 to vector<32x1xf32>
    %cst_15 = arith.constant 0.000000e+00 : f32
    %43 = vector.broadcast %cst_15 : f32 to vector<32x1xf32>
    %cst_16 = arith.constant 0.000000e+00 : f32
    %44 = vector.broadcast %cst_16 : f32 to vector<32x16xf32>
    %45 = vector.extract_strided_slice %31 {offsets = [0, 0], sizes = [32, 8], strides = [1, 1]} : vector<64x32xf32> to vector<32x8xf32>
    %cst_17 = arith.constant dense<0.000000e+00> : vector<32x32xf32>
    %46 = tpu.matmul %40, %45, %cst_17 {dimension_numbers = #tpu.dot_dimension_numbers<[1], [1], [0], [0], [0, 0, 1, 0], [], []>} : vector<32x8xf32>, vector<32x8xf32>, vector<32x32xf32> -> vector<32x32xf32>
    %47 = vector.extract_strided_slice %34 {offsets = [0, 0], sizes = [32, 8], strides = [1, 1]} : vector<64x32xf32> to vector<32x8xf32>
    %cst_18 = arith.constant dense<0.000000e+00> : vector<32x32xf32>
    %48 = tpu.matmul %41, %47, %cst_18 {dimension_numbers = #tpu.dot_dimension_numbers<[1], [1], [0], [0], [0, 0, 1, 0], [], []>} : vector<32x8xf32>, vector<32x8xf32>, vector<32x32xf32> -> vector<32x32xf32>
    %49 = arith.addf %46, %48 : vector<32x32xf32>
    %cst_19 = arith.constant -1.000000e+30 : f32
    %50 = vector.broadcast %cst_19 : f32 to vector<32x32xf32>
    %51 = arith.select %38, %49, %50 : vector<32x32xi1>, vector<32x32xf32>
    %cst_20 = arith.constant dense<0xFF800000> : vector<32xf32>
    %52 = vector.multi_reduction <maximumf>, %51, %cst_20 [1] : vector<32x32xf32> to vector<32xf32>
    %53 = vector.shape_cast %52 : vector<32xf32> to vector<32x1xf32>
    %54 = arith.maximumf %42, %53 : vector<32x1xf32>
    %55 = arith.subf %42, %54 : vector<32x1xf32>
    %56 = math.exp %55 : vector<32x1xf32>
    %57 = vector.broadcast %54 : vector<32x1xf32> to vector<32x32xf32>
    %58 = arith.subf %51, %57 : vector<32x32xf32>
    %59 = math.exp %58 : vector<32x32xf32>
    %60 = arith.mulf %56, %43 : vector<32x1xf32>
    %cst_21 = arith.constant dense<0.000000e+00> : vector<32xf32>
    %61 = vector.multi_reduction <add>, %59, %cst_21 [1] : vector<32x32xf32> to vector<32xf32>
    %62 = vector.shape_cast %61 : vector<32xf32> to vector<32x1xf32>
    %63 = arith.addf %60, %62 : vector<32x1xf32>
    %64 = vector.broadcast %56 : vector<32x1xf32> to vector<32x16xf32>
    %65 = arith.mulf %64, %44 : vector<32x16xf32>
    %66 = vector.extract_strided_slice %35 {offsets = [0, 0], sizes = [32, 16], strides = [1, 1]} : vector<64x64xf32> to vector<32x16xf32>
    %cst_22 = arith.constant dense<0.000000e+00> : vector<32x16xf32>
    %67 = tpu.matmul %59, %66, %cst_22 {dimension_numbers = #tpu.dot_dimension_numbers<[1], [0], [0], [1], [0, 0, 1, 1], [], []>} : vector<32x32xf32>, vector<32x16xf32>, vector<32x16xf32> -> vector<32x16xf32>
    %68 = arith.addf %65, %67 : vector<32x16xf32>
    %69 = tpu.reciprocal %63 {approx = true} : vector<32x1xf32> -> vector<32x1xf32>
    %70 = vector.broadcast %69 : vector<32x1xf32> to vector<32x16xf32>
    %71 = arith.mulf %68, %70 : vector<32x16xf32>
    %c0_23 = arith.constant 0 : index
    %c0_24 = arith.constant 0 : index
    %72 = vector.load %arg4[%c0_23, %c0_24] : memref<64x64xf32, #tpu.memory_space<vmem>>, vector<16x64xf32>
    %cst_25 = arith.constant dense<0.000000e+00> : vector<32x64xf32>
    %73 = tpu.matmul %71, %72, %cst_25 {dimension_numbers = #tpu.dot_dimension_numbers<[1], [0], [0], [1], [0, 0, 1, 1], [], []>} : vector<32x16xf32>, vector<16x64xf32>, vector<32x64xf32> -> vector<32x64xf32>
    %74 = arith.addf %39, %73 : vector<32x64xf32>
    %75 = vector.extract_strided_slice %25 {offsets = [0, 8], sizes = [32, 8], strides = [1, 1]} : vector<64x32xf32> to vector<32x8xf32>
    %76 = vector.extract_strided_slice %28 {offsets = [0, 8], sizes = [32, 8], strides = [1, 1]} : vector<64x32xf32> to vector<32x8xf32>
    %cst_26 = arith.constant -1.000000e+30 : f32
    %77 = vector.broadcast %cst_26 : f32 to vector<32x1xf32>
    %cst_27 = arith.constant 0.000000e+00 : f32
    %78 = vector.broadcast %cst_27 : f32 to vector<32x1xf32>
    %cst_28 = arith.constant 0.000000e+00 : f32
    %79 = vector.broadcast %cst_28 : f32 to vector<32x16xf32>
    %80 = vector.extract_strided_slice %31 {offsets = [0, 8], sizes = [32, 8], strides = [1, 1]} : vector<64x32xf32> to vector<32x8xf32>
    %cst_29 = arith.constant dense<0.000000e+00> : vector<32x32xf32>
    %81 = tpu.matmul %75, %80, %cst_29 {dimension_numbers = #tpu.dot_dimension_numbers<[1], [1], [0], [0], [0, 0, 1, 0], [], []>} : vector<32x8xf32>, vector<32x8xf32>, vector<32x32xf32> -> vector<32x32xf32>
    %82 = vector.extract_strided_slice %34 {offsets = [0, 8], sizes = [32, 8], strides = [1, 1]} : vector<64x32xf32> to vector<32x8xf32>
    %cst_30 = arith.constant dense<0.000000e+00> : vector<32x32xf32>
    %83 = tpu.matmul %76, %82, %cst_30 {dimension_numbers = #tpu.dot_dimension_numbers<[1], [1], [0], [0], [0, 0, 1, 0], [], []>} : vector<32x8xf32>, vector<32x8xf32>, vector<32x32xf32> -> vector<32x32xf32>
    %84 = arith.addf %81, %83 : vector<32x32xf32>
    %cst_31 = arith.constant -1.000000e+30 : f32
    %85 = vector.broadcast %cst_31 : f32 to vector<32x32xf32>
    %86 = arith.select %38, %84, %85 : vector<32x32xi1>, vector<32x32xf32>
    %cst_32 = arith.constant dense<0xFF800000> : vector<32xf32>
    %87 = vector.multi_reduction <maximumf>, %86, %cst_32 [1] : vector<32x32xf32> to vector<32xf32>
    %88 = vector.shape_cast %87 : vector<32xf32> to vector<32x1xf32>
    %89 = arith.maximumf %77, %88 : vector<32x1xf32>
    %90 = arith.subf %77, %89 : vector<32x1xf32>
    %91 = math.exp %90 : vector<32x1xf32>
    %92 = vector.broadcast %89 : vector<32x1xf32> to vector<32x32xf32>
    %93 = arith.subf %86, %92 : vector<32x32xf32>
    %94 = math.exp %93 : vector<32x32xf32>
    %95 = arith.mulf %91, %78 : vector<32x1xf32>
    %cst_33 = arith.constant dense<0.000000e+00> : vector<32xf32>
    %96 = vector.multi_reduction <add>, %94, %cst_33 [1] : vector<32x32xf32> to vector<32xf32>
    %97 = vector.shape_cast %96 : vector<32xf32> to vector<32x1xf32>
    %98 = arith.addf %95, %97 : vector<32x1xf32>
    %99 = vector.broadcast %91 : vector<32x1xf32> to vector<32x16xf32>
    %100 = arith.mulf %99, %79 : vector<32x16xf32>
    %101 = vector.extract_strided_slice %35 {offsets = [0, 16], sizes = [32, 16], strides = [1, 1]} : vector<64x64xf32> to vector<32x16xf32>
    %cst_34 = arith.constant dense<0.000000e+00> : vector<32x16xf32>
    %102 = tpu.matmul %94, %101, %cst_34 {dimension_numbers = #tpu.dot_dimension_numbers<[1], [0], [0], [1], [0, 0, 1, 1], [], []>} : vector<32x32xf32>, vector<32x16xf32>, vector<32x16xf32> -> vector<32x16xf32>
    %103 = arith.addf %100, %102 : vector<32x16xf32>
    %104 = tpu.reciprocal %98 {approx = true} : vector<32x1xf32> -> vector<32x1xf32>
    %105 = vector.broadcast %104 : vector<32x1xf32> to vector<32x16xf32>
    %106 = arith.mulf %103, %105 : vector<32x16xf32>
    %c16 = arith.constant 16 : index
    %c0_35 = arith.constant 0 : index
    %107 = vector.load %arg4[%c16, %c0_35] : memref<64x64xf32, #tpu.memory_space<vmem>>, vector<16x64xf32>
    %cst_36 = arith.constant dense<0.000000e+00> : vector<32x64xf32>
    %108 = tpu.matmul %106, %107, %cst_36 {dimension_numbers = #tpu.dot_dimension_numbers<[1], [0], [0], [1], [0, 0, 1, 1], [], []>} : vector<32x16xf32>, vector<16x64xf32>, vector<32x64xf32> -> vector<32x64xf32>
    %109 = arith.addf %74, %108 : vector<32x64xf32>
    %110 = vector.extract_strided_slice %25 {offsets = [0, 16], sizes = [32, 8], strides = [1, 1]} : vector<64x32xf32> to vector<32x8xf32>
    %111 = vector.extract_strided_slice %28 {offsets = [0, 16], sizes = [32, 8], strides = [1, 1]} : vector<64x32xf32> to vector<32x8xf32>
    %cst_37 = arith.constant -1.000000e+30 : f32
    %112 = vector.broadcast %cst_37 : f32 to vector<32x1xf32>
    %cst_38 = arith.constant 0.000000e+00 : f32
    %113 = vector.broadcast %cst_38 : f32 to vector<32x1xf32>
    %cst_39 = arith.constant 0.000000e+00 : f32
    %114 = vector.broadcast %cst_39 : f32 to vector<32x16xf32>
    %115 = vector.extract_strided_slice %31 {offsets = [0, 16], sizes = [32, 8], strides = [1, 1]} : vector<64x32xf32> to vector<32x8xf32>
    %cst_40 = arith.constant dense<0.000000e+00> : vector<32x32xf32>
    %116 = tpu.matmul %110, %115, %cst_40 {dimension_numbers = #tpu.dot_dimension_numbers<[1], [1], [0], [0], [0, 0, 1, 0], [], []>} : vector<32x8xf32>, vector<32x8xf32>, vector<32x32xf32> -> vector<32x32xf32>
    %117 = vector.extract_strided_slice %34 {offsets = [0, 16], sizes = [32, 8], strides = [1, 1]} : vector<64x32xf32> to vector<32x8xf32>
    %cst_41 = arith.constant dense<0.000000e+00> : vector<32x32xf32>
    %118 = tpu.matmul %111, %117, %cst_41 {dimension_numbers = #tpu.dot_dimension_numbers<[1], [1], [0], [0], [0, 0, 1, 0], [], []>} : vector<32x8xf32>, vector<32x8xf32>, vector<32x32xf32> -> vector<32x32xf32>
    %119 = arith.addf %116, %118 : vector<32x32xf32>
    %cst_42 = arith.constant -1.000000e+30 : f32
    %120 = vector.broadcast %cst_42 : f32 to vector<32x32xf32>
    %121 = arith.select %38, %119, %120 : vector<32x32xi1>, vector<32x32xf32>
    %cst_43 = arith.constant dense<0xFF800000> : vector<32xf32>
    %122 = vector.multi_reduction <maximumf>, %121, %cst_43 [1] : vector<32x32xf32> to vector<32xf32>
    %123 = vector.shape_cast %122 : vector<32xf32> to vector<32x1xf32>
    %124 = arith.maximumf %112, %123 : vector<32x1xf32>
    %125 = arith.subf %112, %124 : vector<32x1xf32>
    %126 = math.exp %125 : vector<32x1xf32>
    %127 = vector.broadcast %124 : vector<32x1xf32> to vector<32x32xf32>
    %128 = arith.subf %121, %127 : vector<32x32xf32>
    %129 = math.exp %128 : vector<32x32xf32>
    %130 = arith.mulf %126, %113 : vector<32x1xf32>
    %cst_44 = arith.constant dense<0.000000e+00> : vector<32xf32>
    %131 = vector.multi_reduction <add>, %129, %cst_44 [1] : vector<32x32xf32> to vector<32xf32>
    %132 = vector.shape_cast %131 : vector<32xf32> to vector<32x1xf32>
    %133 = arith.addf %130, %132 : vector<32x1xf32>
    %134 = vector.broadcast %126 : vector<32x1xf32> to vector<32x16xf32>
    %135 = arith.mulf %134, %114 : vector<32x16xf32>
    %136 = vector.extract_strided_slice %35 {offsets = [0, 32], sizes = [32, 16], strides = [1, 1]} : vector<64x64xf32> to vector<32x16xf32>
    %cst_45 = arith.constant dense<0.000000e+00> : vector<32x16xf32>
    %137 = tpu.matmul %129, %136, %cst_45 {dimension_numbers = #tpu.dot_dimension_numbers<[1], [0], [0], [1], [0, 0, 1, 1], [], []>} : vector<32x32xf32>, vector<32x16xf32>, vector<32x16xf32> -> vector<32x16xf32>
    %138 = arith.addf %135, %137 : vector<32x16xf32>
    %139 = tpu.reciprocal %133 {approx = true} : vector<32x1xf32> -> vector<32x1xf32>
    %140 = vector.broadcast %139 : vector<32x1xf32> to vector<32x16xf32>
    %141 = arith.mulf %138, %140 : vector<32x16xf32>
    %c32 = arith.constant 32 : index
    %c0_46 = arith.constant 0 : index
    %142 = vector.load %arg4[%c32, %c0_46] : memref<64x64xf32, #tpu.memory_space<vmem>>, vector<16x64xf32>
    %cst_47 = arith.constant dense<0.000000e+00> : vector<32x64xf32>
    %143 = tpu.matmul %141, %142, %cst_47 {dimension_numbers = #tpu.dot_dimension_numbers<[1], [0], [0], [1], [0, 0, 1, 1], [], []>} : vector<32x16xf32>, vector<16x64xf32>, vector<32x64xf32> -> vector<32x64xf32>
    %144 = arith.addf %109, %143 : vector<32x64xf32>
    %145 = vector.extract_strided_slice %25 {offsets = [0, 24], sizes = [32, 8], strides = [1, 1]} : vector<64x32xf32> to vector<32x8xf32>
    %146 = vector.extract_strided_slice %28 {offsets = [0, 24], sizes = [32, 8], strides = [1, 1]} : vector<64x32xf32> to vector<32x8xf32>
    %cst_48 = arith.constant -1.000000e+30 : f32
    %147 = vector.broadcast %cst_48 : f32 to vector<32x1xf32>
    %cst_49 = arith.constant 0.000000e+00 : f32
    %148 = vector.broadcast %cst_49 : f32 to vector<32x1xf32>
    %cst_50 = arith.constant 0.000000e+00 : f32
    %149 = vector.broadcast %cst_50 : f32 to vector<32x16xf32>
    %150 = vector.extract_strided_slice %31 {offsets = [0, 24], sizes = [32, 8], strides = [1, 1]} : vector<64x32xf32> to vector<32x8xf32>
    %cst_51 = arith.constant dense<0.000000e+00> : vector<32x32xf32>
    %151 = tpu.matmul %145, %150, %cst_51 {dimension_numbers = #tpu.dot_dimension_numbers<[1], [1], [0], [0], [0, 0, 1, 0], [], []>} : vector<32x8xf32>, vector<32x8xf32>, vector<32x32xf32> -> vector<32x32xf32>
    %152 = vector.extract_strided_slice %34 {offsets = [0, 24], sizes = [32, 8], strides = [1, 1]} : vector<64x32xf32> to vector<32x8xf32>
    %cst_52 = arith.constant dense<0.000000e+00> : vector<32x32xf32>
    %153 = tpu.matmul %146, %152, %cst_52 {dimension_numbers = #tpu.dot_dimension_numbers<[1], [1], [0], [0], [0, 0, 1, 0], [], []>} : vector<32x8xf32>, vector<32x8xf32>, vector<32x32xf32> -> vector<32x32xf32>
    %154 = arith.addf %151, %153 : vector<32x32xf32>
    %cst_53 = arith.constant -1.000000e+30 : f32
    %155 = vector.broadcast %cst_53 : f32 to vector<32x32xf32>
    %156 = arith.select %38, %154, %155 : vector<32x32xi1>, vector<32x32xf32>
    %cst_54 = arith.constant dense<0xFF800000> : vector<32xf32>
    %157 = vector.multi_reduction <maximumf>, %156, %cst_54 [1] : vector<32x32xf32> to vector<32xf32>
    %158 = vector.shape_cast %157 : vector<32xf32> to vector<32x1xf32>
    %159 = arith.maximumf %147, %158 : vector<32x1xf32>
    %160 = arith.subf %147, %159 : vector<32x1xf32>
    %161 = math.exp %160 : vector<32x1xf32>
    %162 = vector.broadcast %159 : vector<32x1xf32> to vector<32x32xf32>
    %163 = arith.subf %156, %162 : vector<32x32xf32>
    %164 = math.exp %163 : vector<32x32xf32>
    %165 = arith.mulf %161, %148 : vector<32x1xf32>
    %cst_55 = arith.constant dense<0.000000e+00> : vector<32xf32>
    %166 = vector.multi_reduction <add>, %164, %cst_55 [1] : vector<32x32xf32> to vector<32xf32>
    %167 = vector.shape_cast %166 : vector<32xf32> to vector<32x1xf32>
    %168 = arith.addf %165, %167 : vector<32x1xf32>
    %169 = vector.broadcast %161 : vector<32x1xf32> to vector<32x16xf32>
    %170 = arith.mulf %169, %149 : vector<32x16xf32>
    %171 = vector.extract_strided_slice %35 {offsets = [0, 48], sizes = [32, 16], strides = [1, 1]} : vector<64x64xf32> to vector<32x16xf32>
    %cst_56 = arith.constant dense<0.000000e+00> : vector<32x16xf32>
    %172 = tpu.matmul %164, %171, %cst_56 {dimension_numbers = #tpu.dot_dimension_numbers<[1], [0], [0], [1], [0, 0, 1, 1], [], []>} : vector<32x32xf32>, vector<32x16xf32>, vector<32x16xf32> -> vector<32x16xf32>
    %173 = arith.addf %170, %172 : vector<32x16xf32>
    %174 = tpu.reciprocal %168 {approx = true} : vector<32x1xf32> -> vector<32x1xf32>
    %175 = vector.broadcast %174 : vector<32x1xf32> to vector<32x16xf32>
    %176 = arith.mulf %173, %175 : vector<32x16xf32>
    %c48 = arith.constant 48 : index
    %c0_57 = arith.constant 0 : index
    %177 = vector.load %arg4[%c48, %c0_57] : memref<64x64xf32, #tpu.memory_space<vmem>>, vector<16x64xf32>
    %cst_58 = arith.constant dense<0.000000e+00> : vector<32x64xf32>
    %178 = tpu.matmul %176, %177, %cst_58 {dimension_numbers = #tpu.dot_dimension_numbers<[1], [0], [0], [1], [0, 0, 1, 1], [], []>} : vector<32x16xf32>, vector<16x64xf32>, vector<32x64xf32> -> vector<32x64xf32>
    %179 = arith.addf %144, %178 : vector<32x64xf32>
    %180 = vector.extract_strided_slice %1 {offsets = [0, 0], sizes = [32, 64], strides = [1, 1]} : vector<64x64xf32> to vector<32x64xf32>
    %181 = arith.addf %179, %180 : vector<32x64xf32>
    %c0_59 = arith.constant 0 : index
    %c0_60 = arith.constant 0 : index
    %c0_61 = arith.constant 0 : index
    %182 = vector.load %arg7[%c0_59, %c0_60, %c0_61] : memref<1x64x64xf32, #tpu.memory_space<vmem>>, vector<1x32x64xf32>
    %183 = vector.shape_cast %182 : vector<1x32x64xf32> to vector<32x64xf32>
    %184 = vector.shape_cast %181 : vector<32x64xf32> to vector<1x32x64xf32>
    tpu.vector_store %arg7[%c0_59, %c0_60, %c0_61], %184 {strides = array<i32>} : memref<1x64x64xf32, #tpu.memory_space<vmem>>, vector<1x32x64xf32>,
    %cst_62 = arith.constant 0.000000e+00 : f32
    %185 = vector.broadcast %cst_62 : f32 to vector<32x64xf32>
    %186 = vector.extract_strided_slice %25 {offsets = [32, 0], sizes = [32, 8], strides = [1, 1]} : vector<64x32xf32> to vector<32x8xf32>
    %187 = vector.extract_strided_slice %28 {offsets = [32, 0], sizes = [32, 8], strides = [1, 1]} : vector<64x32xf32> to vector<32x8xf32>
    %cst_63 = arith.constant -1.000000e+30 : f32
    %188 = vector.broadcast %cst_63 : f32 to vector<32x1xf32>
    %cst_64 = arith.constant 0.000000e+00 : f32
    %189 = vector.broadcast %cst_64 : f32 to vector<32x1xf32>
    %cst_65 = arith.constant 0.000000e+00 : f32
    %190 = vector.broadcast %cst_65 : f32 to vector<32x16xf32>
    %191 = vector.extract_strided_slice %31 {offsets = [0, 0], sizes = [32, 8], strides = [1, 1]} : vector<64x32xf32> to vector<32x8xf32>
    %cst_66 = arith.constant dense<0.000000e+00> : vector<32x32xf32>
    %192 = tpu.matmul %186, %191, %cst_66 {dimension_numbers = #tpu.dot_dimension_numbers<[1], [1], [0], [0], [0, 0, 1, 0], [], []>} : vector<32x8xf32>, vector<32x8xf32>, vector<32x32xf32> -> vector<32x32xf32>
    %193 = vector.extract_strided_slice %34 {offsets = [0, 0], sizes = [32, 8], strides = [1, 1]} : vector<64x32xf32> to vector<32x8xf32>
    %cst_67 = arith.constant dense<0.000000e+00> : vector<32x32xf32>
    %194 = tpu.matmul %187, %193, %cst_67 {dimension_numbers = #tpu.dot_dimension_numbers<[1], [1], [0], [0], [0, 0, 1, 0], [], []>} : vector<32x8xf32>, vector<32x8xf32>, vector<32x32xf32> -> vector<32x32xf32>
    %195 = arith.addf %192, %194 : vector<32x32xf32>
    %cst_68 = arith.constant dense<0xFF800000> : vector<32xf32>
    %196 = vector.multi_reduction <maximumf>, %195, %cst_68 [1] : vector<32x32xf32> to vector<32xf32>
    %197 = vector.shape_cast %196 : vector<32xf32> to vector<32x1xf32>
    %198 = arith.maximumf %188, %197 : vector<32x1xf32>
    %199 = arith.subf %188, %198 : vector<32x1xf32>
    %200 = math.exp %199 : vector<32x1xf32>
    %201 = vector.broadcast %198 : vector<32x1xf32> to vector<32x32xf32>
    %202 = arith.subf %195, %201 : vector<32x32xf32>
    %203 = math.exp %202 : vector<32x32xf32>
    %204 = arith.mulf %200, %189 : vector<32x1xf32>
    %cst_69 = arith.constant dense<0.000000e+00> : vector<32xf32>
    %205 = vector.multi_reduction <add>, %203, %cst_69 [1] : vector<32x32xf32> to vector<32xf32>
    %206 = vector.shape_cast %205 : vector<32xf32> to vector<32x1xf32>
    %207 = arith.addf %204, %206 : vector<32x1xf32>
    %208 = vector.broadcast %200 : vector<32x1xf32> to vector<32x16xf32>
    %209 = arith.mulf %208, %190 : vector<32x16xf32>
    %210 = vector.extract_strided_slice %35 {offsets = [0, 0], sizes = [32, 16], strides = [1, 1]} : vector<64x64xf32> to vector<32x16xf32>
    %cst_70 = arith.constant dense<0.000000e+00> : vector<32x16xf32>
    %211 = tpu.matmul %203, %210, %cst_70 {dimension_numbers = #tpu.dot_dimension_numbers<[1], [0], [0], [1], [0, 0, 1, 1], [], []>} : vector<32x32xf32>, vector<32x16xf32>, vector<32x16xf32> -> vector<32x16xf32>
    %212 = arith.addf %209, %211 : vector<32x16xf32>
    %213 = vector.extract_strided_slice %31 {offsets = [32, 0], sizes = [32, 8], strides = [1, 1]} : vector<64x32xf32> to vector<32x8xf32>
    %cst_71 = arith.constant dense<0.000000e+00> : vector<32x32xf32>
    %214 = tpu.matmul %186, %213, %cst_71 {dimension_numbers = #tpu.dot_dimension_numbers<[1], [1], [0], [0], [0, 0, 1, 0], [], []>} : vector<32x8xf32>, vector<32x8xf32>, vector<32x32xf32> -> vector<32x32xf32>
    %215 = vector.extract_strided_slice %34 {offsets = [32, 0], sizes = [32, 8], strides = [1, 1]} : vector<64x32xf32> to vector<32x8xf32>
    %cst_72 = arith.constant dense<0.000000e+00> : vector<32x32xf32>
    %216 = tpu.matmul %187, %215, %cst_72 {dimension_numbers = #tpu.dot_dimension_numbers<[1], [1], [0], [0], [0, 0, 1, 0], [], []>} : vector<32x8xf32>, vector<32x8xf32>, vector<32x32xf32> -> vector<32x32xf32>
    %217 = arith.addf %214, %216 : vector<32x32xf32>
    %cst_73 = arith.constant -1.000000e+30 : f32
    %218 = vector.broadcast %cst_73 : f32 to vector<32x32xf32>
    %219 = arith.select %38, %217, %218 : vector<32x32xi1>, vector<32x32xf32>
    %cst_74 = arith.constant dense<0xFF800000> : vector<32xf32>
    %220 = vector.multi_reduction <maximumf>, %219, %cst_74 [1] : vector<32x32xf32> to vector<32xf32>
    %221 = vector.shape_cast %220 : vector<32xf32> to vector<32x1xf32>
    %222 = arith.maximumf %198, %221 : vector<32x1xf32>
    %223 = arith.subf %198, %222 : vector<32x1xf32>
    %224 = math.exp %223 : vector<32x1xf32>
    %225 = vector.broadcast %222 : vector<32x1xf32> to vector<32x32xf32>
    %226 = arith.subf %219, %225 : vector<32x32xf32>
    %227 = math.exp %226 : vector<32x32xf32>
    %228 = arith.mulf %224, %207 : vector<32x1xf32>
    %cst_75 = arith.constant dense<0.000000e+00> : vector<32xf32>
    %229 = vector.multi_reduction <add>, %227, %cst_75 [1] : vector<32x32xf32> to vector<32xf32>
    %230 = vector.shape_cast %229 : vector<32xf32> to vector<32x1xf32>
    %231 = arith.addf %228, %230 : vector<32x1xf32>
    %232 = vector.broadcast %224 : vector<32x1xf32> to vector<32x16xf32>
    %233 = arith.mulf %232, %212 : vector<32x16xf32>
    %234 = vector.extract_strided_slice %35 {offsets = [32, 0], sizes = [32, 16], strides = [1, 1]} : vector<64x64xf32> to vector<32x16xf32>
    %cst_76 = arith.constant dense<0.000000e+00> : vector<32x16xf32>
    %235 = tpu.matmul %227, %234, %cst_76 {dimension_numbers = #tpu.dot_dimension_numbers<[1], [0], [0], [1], [0, 0, 1, 1], [], []>} : vector<32x32xf32>, vector<32x16xf32>, vector<32x16xf32> -> vector<32x16xf32>
    %236 = arith.addf %233, %235 : vector<32x16xf32>
    %237 = tpu.reciprocal %231 {approx = true} : vector<32x1xf32> -> vector<32x1xf32>
    %238 = vector.broadcast %237 : vector<32x1xf32> to vector<32x16xf32>
    %239 = arith.mulf %236, %238 : vector<32x16xf32>
    %c0_77 = arith.constant 0 : index
    %c0_78 = arith.constant 0 : index
    %240 = vector.load %arg4[%c0_77, %c0_78] : memref<64x64xf32, #tpu.memory_space<vmem>>, vector<16x64xf32>
    %cst_79 = arith.constant dense<0.000000e+00> : vector<32x64xf32>
    %241 = tpu.matmul %239, %240, %cst_79 {dimension_numbers = #tpu.dot_dimension_numbers<[1], [0], [0], [1], [0, 0, 1, 1], [], []>} : vector<32x16xf32>, vector<16x64xf32>, vector<32x64xf32> -> vector<32x64xf32>
    %242 = arith.addf %185, %241 : vector<32x64xf32>
    %243 = vector.extract_strided_slice %25 {offsets = [32, 8], sizes = [32, 8], strides = [1, 1]} : vector<64x32xf32> to vector<32x8xf32>
    %244 = vector.extract_strided_slice %28 {offsets = [32, 8], sizes = [32, 8], strides = [1, 1]} : vector<64x32xf32> to vector<32x8xf32>
    %cst_80 = arith.constant -1.000000e+30 : f32
    %245 = vector.broadcast %cst_80 : f32 to vector<32x1xf32>
    %cst_81 = arith.constant 0.000000e+00 : f32
    %246 = vector.broadcast %cst_81 : f32 to vector<32x1xf32>
    %cst_82 = arith.constant 0.000000e+00 : f32
    %247 = vector.broadcast %cst_82 : f32 to vector<32x16xf32>
    %248 = vector.extract_strided_slice %31 {offsets = [0, 8], sizes = [32, 8], strides = [1, 1]} : vector<64x32xf32> to vector<32x8xf32>
    %cst_83 = arith.constant dense<0.000000e+00> : vector<32x32xf32>
    %249 = tpu.matmul %243, %248, %cst_83 {dimension_numbers = #tpu.dot_dimension_numbers<[1], [1], [0], [0], [0, 0, 1, 0], [], []>} : vector<32x8xf32>, vector<32x8xf32>, vector<32x32xf32> -> vector<32x32xf32>
    %250 = vector.extract_strided_slice %34 {offsets = [0, 8], sizes = [32, 8], strides = [1, 1]} : vector<64x32xf32> to vector<32x8xf32>
    %cst_84 = arith.constant dense<0.000000e+00> : vector<32x32xf32>
    %251 = tpu.matmul %244, %250, %cst_84 {dimension_numbers = #tpu.dot_dimension_numbers<[1], [1], [0], [0], [0, 0, 1, 0], [], []>} : vector<32x8xf32>, vector<32x8xf32>, vector<32x32xf32> -> vector<32x32xf32>
    %252 = arith.addf %249, %251 : vector<32x32xf32>
    %cst_85 = arith.constant dense<0xFF800000> : vector<32xf32>
    %253 = vector.multi_reduction <maximumf>, %252, %cst_85 [1] : vector<32x32xf32> to vector<32xf32>
    %254 = vector.shape_cast %253 : vector<32xf32> to vector<32x1xf32>
    %255 = arith.maximumf %245, %254 : vector<32x1xf32>
    %256 = arith.subf %245, %255 : vector<32x1xf32>
    %257 = math.exp %256 : vector<32x1xf32>
    %258 = vector.broadcast %255 : vector<32x1xf32> to vector<32x32xf32>
    %259 = arith.subf %252, %258 : vector<32x32xf32>
    %260 = math.exp %259 : vector<32x32xf32>
    %261 = arith.mulf %257, %246 : vector<32x1xf32>
    %cst_86 = arith.constant dense<0.000000e+00> : vector<32xf32>
    %262 = vector.multi_reduction <add>, %260, %cst_86 [1] : vector<32x32xf32> to vector<32xf32>
    %263 = vector.shape_cast %262 : vector<32xf32> to vector<32x1xf32>
    %264 = arith.addf %261, %263 : vector<32x1xf32>
    %265 = vector.broadcast %257 : vector<32x1xf32> to vector<32x16xf32>
    %266 = arith.mulf %265, %247 : vector<32x16xf32>
    %267 = vector.extract_strided_slice %35 {offsets = [0, 16], sizes = [32, 16], strides = [1, 1]} : vector<64x64xf32> to vector<32x16xf32>
    %cst_87 = arith.constant dense<0.000000e+00> : vector<32x16xf32>
    %268 = tpu.matmul %260, %267, %cst_87 {dimension_numbers = #tpu.dot_dimension_numbers<[1], [0], [0], [1], [0, 0, 1, 1], [], []>} : vector<32x32xf32>, vector<32x16xf32>, vector<32x16xf32> -> vector<32x16xf32>
    %269 = arith.addf %266, %268 : vector<32x16xf32>
    %270 = vector.extract_strided_slice %31 {offsets = [32, 8], sizes = [32, 8], strides = [1, 1]} : vector<64x32xf32> to vector<32x8xf32>
    %cst_88 = arith.constant dense<0.000000e+00> : vector<32x32xf32>
    %271 = tpu.matmul %243, %270, %cst_88 {dimension_numbers = #tpu.dot_dimension_numbers<[1], [1], [0], [0], [0, 0, 1, 0], [], []>} : vector<32x8xf32>, vector<32x8xf32>, vector<32x32xf32> -> vector<32x32xf32>
    %272 = vector.extract_strided_slice %34 {offsets = [32, 8], sizes = [32, 8], strides = [1, 1]} : vector<64x32xf32> to vector<32x8xf32>
    %cst_89 = arith.constant dense<0.000000e+00> : vector<32x32xf32>
    %273 = tpu.matmul %244, %272, %cst_89 {dimension_numbers = #tpu.dot_dimension_numbers<[1], [1], [0], [0], [0, 0, 1, 0], [], []>} : vector<32x8xf32>, vector<32x8xf32>, vector<32x32xf32> -> vector<32x32xf32>
    %274 = arith.addf %271, %273 : vector<32x32xf32>
    %cst_90 = arith.constant -1.000000e+30 : f32
    %275 = vector.broadcast %cst_90 : f32 to vector<32x32xf32>
    %276 = arith.select %38, %274, %275 : vector<32x32xi1>, vector<32x32xf32>
    %cst_91 = arith.constant dense<0xFF800000> : vector<32xf32>
    %277 = vector.multi_reduction <maximumf>, %276, %cst_91 [1] : vector<32x32xf32> to vector<32xf32>
    %278 = vector.shape_cast %277 : vector<32xf32> to vector<32x1xf32>
    %279 = arith.maximumf %255, %278 : vector<32x1xf32>
    %280 = arith.subf %255, %279 : vector<32x1xf32>
    %281 = math.exp %280 : vector<32x1xf32>
    %282 = vector.broadcast %279 : vector<32x1xf32> to vector<32x32xf32>
    %283 = arith.subf %276, %282 : vector<32x32xf32>
    %284 = math.exp %283 : vector<32x32xf32>
    %285 = arith.mulf %281, %264 : vector<32x1xf32>
    %cst_92 = arith.constant dense<0.000000e+00> : vector<32xf32>
    %286 = vector.multi_reduction <add>, %284, %cst_92 [1] : vector<32x32xf32> to vector<32xf32>
    %287 = vector.shape_cast %286 : vector<32xf32> to vector<32x1xf32>
    %288 = arith.addf %285, %287 : vector<32x1xf32>
    %289 = vector.broadcast %281 : vector<32x1xf32> to vector<32x16xf32>
    %290 = arith.mulf %289, %269 : vector<32x16xf32>
    %291 = vector.extract_strided_slice %35 {offsets = [32, 16], sizes = [32, 16], strides = [1, 1]} : vector<64x64xf32> to vector<32x16xf32>
    %cst_93 = arith.constant dense<0.000000e+00> : vector<32x16xf32>
    %292 = tpu.matmul %284, %291, %cst_93 {dimension_numbers = #tpu.dot_dimension_numbers<[1], [0], [0], [1], [0, 0, 1, 1], [], []>} : vector<32x32xf32>, vector<32x16xf32>, vector<32x16xf32> -> vector<32x16xf32>
    %293 = arith.addf %290, %292 : vector<32x16xf32>
    %294 = tpu.reciprocal %288 {approx = true} : vector<32x1xf32> -> vector<32x1xf32>
    %295 = vector.broadcast %294 : vector<32x1xf32> to vector<32x16xf32>
    %296 = arith.mulf %293, %295 : vector<32x16xf32>
    %c16_94 = arith.constant 16 : index
    %c0_95 = arith.constant 0 : index
    %297 = vector.load %arg4[%c16_94, %c0_95] : memref<64x64xf32, #tpu.memory_space<vmem>>, vector<16x64xf32>
    %cst_96 = arith.constant dense<0.000000e+00> : vector<32x64xf32>
    %298 = tpu.matmul %296, %297, %cst_96 {dimension_numbers = #tpu.dot_dimension_numbers<[1], [0], [0], [1], [0, 0, 1, 1], [], []>} : vector<32x16xf32>, vector<16x64xf32>, vector<32x64xf32> -> vector<32x64xf32>
    %299 = arith.addf %242, %298 : vector<32x64xf32>
    %300 = vector.extract_strided_slice %25 {offsets = [32, 16], sizes = [32, 8], strides = [1, 1]} : vector<64x32xf32> to vector<32x8xf32>
    %301 = vector.extract_strided_slice %28 {offsets = [32, 16], sizes = [32, 8], strides = [1, 1]} : vector<64x32xf32> to vector<32x8xf32>
    %cst_97 = arith.constant -1.000000e+30 : f32
    %302 = vector.broadcast %cst_97 : f32 to vector<32x1xf32>
    %cst_98 = arith.constant 0.000000e+00 : f32
    %303 = vector.broadcast %cst_98 : f32 to vector<32x1xf32>
    %cst_99 = arith.constant 0.000000e+00 : f32
    %304 = vector.broadcast %cst_99 : f32 to vector<32x16xf32>
    %305 = vector.extract_strided_slice %31 {offsets = [0, 16], sizes = [32, 8], strides = [1, 1]} : vector<64x32xf32> to vector<32x8xf32>
    %cst_100 = arith.constant dense<0.000000e+00> : vector<32x32xf32>
    %306 = tpu.matmul %300, %305, %cst_100 {dimension_numbers = #tpu.dot_dimension_numbers<[1], [1], [0], [0], [0, 0, 1, 0], [], []>} : vector<32x8xf32>, vector<32x8xf32>, vector<32x32xf32> -> vector<32x32xf32>
    %307 = vector.extract_strided_slice %34 {offsets = [0, 16], sizes = [32, 8], strides = [1, 1]} : vector<64x32xf32> to vector<32x8xf32>
    %cst_101 = arith.constant dense<0.000000e+00> : vector<32x32xf32>
    %308 = tpu.matmul %301, %307, %cst_101 {dimension_numbers = #tpu.dot_dimension_numbers<[1], [1], [0], [0], [0, 0, 1, 0], [], []>} : vector<32x8xf32>, vector<32x8xf32>, vector<32x32xf32> -> vector<32x32xf32>
    %309 = arith.addf %306, %308 : vector<32x32xf32>
    %cst_102 = arith.constant dense<0xFF800000> : vector<32xf32>
    %310 = vector.multi_reduction <maximumf>, %309, %cst_102 [1] : vector<32x32xf32> to vector<32xf32>
    %311 = vector.shape_cast %310 : vector<32xf32> to vector<32x1xf32>
    %312 = arith.maximumf %302, %311 : vector<32x1xf32>
    %313 = arith.subf %302, %312 : vector<32x1xf32>
    %314 = math.exp %313 : vector<32x1xf32>
    %315 = vector.broadcast %312 : vector<32x1xf32> to vector<32x32xf32>
    %316 = arith.subf %309, %315 : vector<32x32xf32>
    %317 = math.exp %316 : vector<32x32xf32>
    %318 = arith.mulf %314, %303 : vector<32x1xf32>
    %cst_103 = arith.constant dense<0.000000e+00> : vector<32xf32>
    %319 = vector.multi_reduction <add>, %317, %cst_103 [1] : vector<32x32xf32> to vector<32xf32>
    %320 = vector.shape_cast %319 : vector<32xf32> to vector<32x1xf32>
    %321 = arith.addf %318, %320 : vector<32x1xf32>
    %322 = vector.broadcast %314 : vector<32x1xf32> to vector<32x16xf32>
    %323 = arith.mulf %322, %304 : vector<32x16xf32>
    %324 = vector.extract_strided_slice %35 {offsets = [0, 32], sizes = [32, 16], strides = [1, 1]} : vector<64x64xf32> to vector<32x16xf32>
    %cst_104 = arith.constant dense<0.000000e+00> : vector<32x16xf32>
    %325 = tpu.matmul %317, %324, %cst_104 {dimension_numbers = #tpu.dot_dimension_numbers<[1], [0], [0], [1], [0, 0, 1, 1], [], []>} : vector<32x32xf32>, vector<32x16xf32>, vector<32x16xf32> -> vector<32x16xf32>
    %326 = arith.addf %323, %325 : vector<32x16xf32>
    %327 = vector.extract_strided_slice %31 {offsets = [32, 16], sizes = [32, 8], strides = [1, 1]} : vector<64x32xf32> to vector<32x8xf32>
    %cst_105 = arith.constant dense<0.000000e+00> : vector<32x32xf32>
    %328 = tpu.matmul %300, %327, %cst_105 {dimension_numbers = #tpu.dot_dimension_numbers<[1], [1], [0], [0], [0, 0, 1, 0], [], []>} : vector<32x8xf32>, vector<32x8xf32>, vector<32x32xf32> -> vector<32x32xf32>
    %329 = vector.extract_strided_slice %34 {offsets = [32, 16], sizes = [32, 8], strides = [1, 1]} : vector<64x32xf32> to vector<32x8xf32>
    %cst_106 = arith.constant dense<0.000000e+00> : vector<32x32xf32>
    %330 = tpu.matmul %301, %329, %cst_106 {dimension_numbers = #tpu.dot_dimension_numbers<[1], [1], [0], [0], [0, 0, 1, 0], [], []>} : vector<32x8xf32>, vector<32x8xf32>, vector<32x32xf32> -> vector<32x32xf32>
    %331 = arith.addf %328, %330 : vector<32x32xf32>
    %cst_107 = arith.constant -1.000000e+30 : f32
    %332 = vector.broadcast %cst_107 : f32 to vector<32x32xf32>
    %333 = arith.select %38, %331, %332 : vector<32x32xi1>, vector<32x32xf32>
    %cst_108 = arith.constant dense<0xFF800000> : vector<32xf32>
    %334 = vector.multi_reduction <maximumf>, %333, %cst_108 [1] : vector<32x32xf32> to vector<32xf32>
    %335 = vector.shape_cast %334 : vector<32xf32> to vector<32x1xf32>
    %336 = arith.maximumf %312, %335 : vector<32x1xf32>
    %337 = arith.subf %312, %336 : vector<32x1xf32>
    %338 = math.exp %337 : vector<32x1xf32>
    %339 = vector.broadcast %336 : vector<32x1xf32> to vector<32x32xf32>
    %340 = arith.subf %333, %339 : vector<32x32xf32>
    %341 = math.exp %340 : vector<32x32xf32>
    %342 = arith.mulf %338, %321 : vector<32x1xf32>
    %cst_109 = arith.constant dense<0.000000e+00> : vector<32xf32>
    %343 = vector.multi_reduction <add>, %341, %cst_109 [1] : vector<32x32xf32> to vector<32xf32>
    %344 = vector.shape_cast %343 : vector<32xf32> to vector<32x1xf32>
    %345 = arith.addf %342, %344 : vector<32x1xf32>
    %346 = vector.broadcast %338 : vector<32x1xf32> to vector<32x16xf32>
    %347 = arith.mulf %346, %326 : vector<32x16xf32>
    %348 = vector.extract_strided_slice %35 {offsets = [32, 32], sizes = [32, 16], strides = [1, 1]} : vector<64x64xf32> to vector<32x16xf32>
    %cst_110 = arith.constant dense<0.000000e+00> : vector<32x16xf32>
    %349 = tpu.matmul %341, %348, %cst_110 {dimension_numbers = #tpu.dot_dimension_numbers<[1], [0], [0], [1], [0, 0, 1, 1], [], []>} : vector<32x32xf32>, vector<32x16xf32>, vector<32x16xf32> -> vector<32x16xf32>
    %350 = arith.addf %347, %349 : vector<32x16xf32>
    %351 = tpu.reciprocal %345 {approx = true} : vector<32x1xf32> -> vector<32x1xf32>
    %352 = vector.broadcast %351 : vector<32x1xf32> to vector<32x16xf32>
    %353 = arith.mulf %350, %352 : vector<32x16xf32>
    %c32_111 = arith.constant 32 : index
    %c0_112 = arith.constant 0 : index
    %354 = vector.load %arg4[%c32_111, %c0_112] : memref<64x64xf32, #tpu.memory_space<vmem>>, vector<16x64xf32>
    %cst_113 = arith.constant dense<0.000000e+00> : vector<32x64xf32>
    %355 = tpu.matmul %353, %354, %cst_113 {dimension_numbers = #tpu.dot_dimension_numbers<[1], [0], [0], [1], [0, 0, 1, 1], [], []>} : vector<32x16xf32>, vector<16x64xf32>, vector<32x64xf32> -> vector<32x64xf32>
    %356 = arith.addf %299, %355 : vector<32x64xf32>
    %357 = vector.extract_strided_slice %25 {offsets = [32, 24], sizes = [32, 8], strides = [1, 1]} : vector<64x32xf32> to vector<32x8xf32>
    %358 = vector.extract_strided_slice %28 {offsets = [32, 24], sizes = [32, 8], strides = [1, 1]} : vector<64x32xf32> to vector<32x8xf32>
    %cst_114 = arith.constant -1.000000e+30 : f32
    %359 = vector.broadcast %cst_114 : f32 to vector<32x1xf32>
    %cst_115 = arith.constant 0.000000e+00 : f32
    %360 = vector.broadcast %cst_115 : f32 to vector<32x1xf32>
    %cst_116 = arith.constant 0.000000e+00 : f32
    %361 = vector.broadcast %cst_116 : f32 to vector<32x16xf32>
    %362 = vector.extract_strided_slice %31 {offsets = [0, 24], sizes = [32, 8], strides = [1, 1]} : vector<64x32xf32> to vector<32x8xf32>
    %cst_117 = arith.constant dense<0.000000e+00> : vector<32x32xf32>
    %363 = tpu.matmul %357, %362, %cst_117 {dimension_numbers = #tpu.dot_dimension_numbers<[1], [1], [0], [0], [0, 0, 1, 0], [], []>} : vector<32x8xf32>, vector<32x8xf32>, vector<32x32xf32> -> vector<32x32xf32>
    %364 = vector.extract_strided_slice %34 {offsets = [0, 24], sizes = [32, 8], strides = [1, 1]} : vector<64x32xf32> to vector<32x8xf32>
    %cst_118 = arith.constant dense<0.000000e+00> : vector<32x32xf32>
    %365 = tpu.matmul %358, %364, %cst_118 {dimension_numbers = #tpu.dot_dimension_numbers<[1], [1], [0], [0], [0, 0, 1, 0], [], []>} : vector<32x8xf32>, vector<32x8xf32>, vector<32x32xf32> -> vector<32x32xf32>
    %366 = arith.addf %363, %365 : vector<32x32xf32>
    %cst_119 = arith.constant dense<0xFF800000> : vector<32xf32>
    %367 = vector.multi_reduction <maximumf>, %366, %cst_119 [1] : vector<32x32xf32> to vector<32xf32>
    %368 = vector.shape_cast %367 : vector<32xf32> to vector<32x1xf32>
    %369 = arith.maximumf %359, %368 : vector<32x1xf32>
    %370 = arith.subf %359, %369 : vector<32x1xf32>
    %371 = math.exp %370 : vector<32x1xf32>
    %372 = vector.broadcast %369 : vector<32x1xf32> to vector<32x32xf32>
    %373 = arith.subf %366, %372 : vector<32x32xf32>
    %374 = math.exp %373 : vector<32x32xf32>
    %375 = arith.mulf %371, %360 : vector<32x1xf32>
    %cst_120 = arith.constant dense<0.000000e+00> : vector<32xf32>
    %376 = vector.multi_reduction <add>, %374, %cst_120 [1] : vector<32x32xf32> to vector<32xf32>
    %377 = vector.shape_cast %376 : vector<32xf32> to vector<32x1xf32>
    %378 = arith.addf %375, %377 : vector<32x1xf32>
    %379 = vector.broadcast %371 : vector<32x1xf32> to vector<32x16xf32>
    %380 = arith.mulf %379, %361 : vector<32x16xf32>
    %381 = vector.extract_strided_slice %35 {offsets = [0, 48], sizes = [32, 16], strides = [1, 1]} : vector<64x64xf32> to vector<32x16xf32>
    %cst_121 = arith.constant dense<0.000000e+00> : vector<32x16xf32>
    %382 = tpu.matmul %374, %381, %cst_121 {dimension_numbers = #tpu.dot_dimension_numbers<[1], [0], [0], [1], [0, 0, 1, 1], [], []>} : vector<32x32xf32>, vector<32x16xf32>, vector<32x16xf32> -> vector<32x16xf32>
    %383 = arith.addf %380, %382 : vector<32x16xf32>
    %384 = vector.extract_strided_slice %31 {offsets = [32, 24], sizes = [32, 8], strides = [1, 1]} : vector<64x32xf32> to vector<32x8xf32>
    %cst_122 = arith.constant dense<0.000000e+00> : vector<32x32xf32>
    %385 = tpu.matmul %357, %384, %cst_122 {dimension_numbers = #tpu.dot_dimension_numbers<[1], [1], [0], [0], [0, 0, 1, 0], [], []>} : vector<32x8xf32>, vector<32x8xf32>, vector<32x32xf32> -> vector<32x32xf32>
    %386 = vector.extract_strided_slice %34 {offsets = [32, 24], sizes = [32, 8], strides = [1, 1]} : vector<64x32xf32> to vector<32x8xf32>
    %cst_123 = arith.constant dense<0.000000e+00> : vector<32x32xf32>
    %387 = tpu.matmul %358, %386, %cst_123 {dimension_numbers = #tpu.dot_dimension_numbers<[1], [1], [0], [0], [0, 0, 1, 0], [], []>} : vector<32x8xf32>, vector<32x8xf32>, vector<32x32xf32> -> vector<32x32xf32>
    %388 = arith.addf %385, %387 : vector<32x32xf32>
    %cst_124 = arith.constant -1.000000e+30 : f32
    %389 = vector.broadcast %cst_124 : f32 to vector<32x32xf32>
    %390 = arith.select %38, %388, %389 : vector<32x32xi1>, vector<32x32xf32>
    %cst_125 = arith.constant dense<0xFF800000> : vector<32xf32>
    %391 = vector.multi_reduction <maximumf>, %390, %cst_125 [1] : vector<32x32xf32> to vector<32xf32>
    %392 = vector.shape_cast %391 : vector<32xf32> to vector<32x1xf32>
    %393 = arith.maximumf %369, %392 : vector<32x1xf32>
    %394 = arith.subf %369, %393 : vector<32x1xf32>
    %395 = math.exp %394 : vector<32x1xf32>
    %396 = vector.broadcast %393 : vector<32x1xf32> to vector<32x32xf32>
    %397 = arith.subf %390, %396 : vector<32x32xf32>
    %398 = math.exp %397 : vector<32x32xf32>
    %399 = arith.mulf %395, %378 : vector<32x1xf32>
    %cst_126 = arith.constant dense<0.000000e+00> : vector<32xf32>
    %400 = vector.multi_reduction <add>, %398, %cst_126 [1] : vector<32x32xf32> to vector<32xf32>
    %401 = vector.shape_cast %400 : vector<32xf32> to vector<32x1xf32>
    %402 = arith.addf %399, %401 : vector<32x1xf32>
    %403 = vector.broadcast %395 : vector<32x1xf32> to vector<32x16xf32>
    %404 = arith.mulf %403, %383 : vector<32x16xf32>
    %405 = vector.extract_strided_slice %35 {offsets = [32, 48], sizes = [32, 16], strides = [1, 1]} : vector<64x64xf32> to vector<32x16xf32>
    %cst_127 = arith.constant dense<0.000000e+00> : vector<32x16xf32>
    %406 = tpu.matmul %398, %405, %cst_127 {dimension_numbers = #tpu.dot_dimension_numbers<[1], [0], [0], [1], [0, 0, 1, 1], [], []>} : vector<32x32xf32>, vector<32x16xf32>, vector<32x16xf32> -> vector<32x16xf32>
    %407 = arith.addf %404, %406 : vector<32x16xf32>
    %408 = tpu.reciprocal %402 {approx = true} : vector<32x1xf32> -> vector<32x1xf32>
    %409 = vector.broadcast %408 : vector<32x1xf32> to vector<32x16xf32>
    %410 = arith.mulf %407, %409 : vector<32x16xf32>
    %c48_128 = arith.constant 48 : index
    %c0_129 = arith.constant 0 : index
    %411 = vector.load %arg4[%c48_128, %c0_129] : memref<64x64xf32, #tpu.memory_space<vmem>>, vector<16x64xf32>
    %cst_130 = arith.constant dense<0.000000e+00> : vector<32x64xf32>
    %412 = tpu.matmul %410, %411, %cst_130 {dimension_numbers = #tpu.dot_dimension_numbers<[1], [0], [0], [1], [0, 0, 1, 1], [], []>} : vector<32x16xf32>, vector<16x64xf32>, vector<32x64xf32> -> vector<32x64xf32>
    %413 = arith.addf %356, %412 : vector<32x64xf32>
    %414 = vector.extract_strided_slice %1 {offsets = [32, 0], sizes = [32, 64], strides = [1, 1]} : vector<64x64xf32> to vector<32x64xf32>
    %415 = arith.addf %413, %414 : vector<32x64xf32>
    %c0_131 = arith.constant 0 : index
    %c32_132 = arith.constant 32 : index
    %c0_133 = arith.constant 0 : index
    %416 = vector.load %arg7[%c0_131, %c32_132, %c0_133] : memref<1x64x64xf32, #tpu.memory_space<vmem>>, vector<1x32x64xf32>
    %417 = vector.shape_cast %416 : vector<1x32x64xf32> to vector<32x64xf32>
    %418 = vector.shape_cast %415 : vector<32x64xf32> to vector<1x32x64xf32>
    tpu.vector_store %arg7[%c0_131, %c32_132, %c0_133], %418 {strides = array<i32>} : memref<1x64x64xf32, #tpu.memory_space<vmem>>, vector<1x32x64xf32>,
    return
  }
  func.func @transform_0(%arg0: i32) -> (i32, i32, i32) {
    %c0_i32 = arith.constant 0 : i32
    %c0_i32_0 = arith.constant 0 : i32
    %c0_i32_1 = arith.constant 0 : i32
    return %arg0, %c0_i32, %c0_i32_0 : i32, i32, i32
  }
  func.func @transform_1(%arg0: i32) -> (i32, i32) {
    %c0_i32 = arith.constant 0 : i32
    %c0_i32_0 = arith.constant 0 : i32
    %c0_i32_1 = arith.constant 0 : i32
    return %c0_i32, %c0_i32_0 : i32, i32
  }
  func.func @transform_2(%arg0: i32) -> (i32, i32) {
    %c0_i32 = arith.constant 0 : i32
    %c0_i32_0 = arith.constant 0 : i32
    %c0_i32_1 = arith.constant 0 : i32
    return %c0_i32, %c0_i32_0 : i32, i32
  }
  func.func @transform_3(%arg0: i32) -> (i32, i32) {
    %c0_i32 = arith.constant 0 : i32
    %c0_i32_0 = arith.constant 0 : i32
    %c0_i32_1 = arith.constant 0 : i32
    return %c0_i32, %c0_i32_0 : i32, i32
  }
  func.func @transform_4(%arg0: i32) -> (i32, i32) {
    %c0_i32 = arith.constant 0 : i32
    %c0_i32_0 = arith.constant 0 : i32
    %c0_i32_1 = arith.constant 0 : i32
    return %c0_i32, %c0_i32_0 : i32, i32
  }
  func.func @transform_5(%arg0: i32) -> (i32, i32) {
    %c0_i32 = arith.constant 0 : i32
    %c0_i32_0 = arith.constant 0 : i32
    %c0_i32_1 = arith.constant 0 : i32
    return %c0_i32, %c0_i32_0 : i32, i32
  }
  func.func @transform_6(%arg0: i32) -> (i32, i32, i32) {
    %c0_i32 = arith.constant 0 : i32
    %c0_i32_0 = arith.constant 0 : i32
    %c0_i32_1 = arith.constant 0 : i32
    return %arg0, %c0_i32, %c0_i32_0 : i32, i32, i32
  }
}

module attributes {stable_mosaic.version = 11 : i64} {
  func.func @self_attention_kernel(%arg0: i32, %arg1: memref<1x64x64xf32, #tpu.memory_space<vmem>>, %arg2: memref<1x64xf32, #tpu.memory_space<vmem>>, %arg3: memref<64x192xf32, #tpu.memory_space<vmem>>, %arg4: memref<64x64xf32, #tpu.memory_space<vmem>>, %arg5: memref<64x32xf32, #tpu.memory_space<vmem>>, %arg6: memref<64x32xf32, #tpu.memory_space<vmem>>, %arg7: memref<1x64x64xf32, #tpu.memory_space<vmem>>) attributes {dimension_semantics = [#tpu.dimension_semantics<parallel>], iteration_bounds = array<i64: 2>, scalar_prefetch = 0 : i64, scratch_operands = 0 : i64, tpu.core_type = #tpu.core_type<tc>, window_params = [{transform_indices = @transform_0, window_bounds = array<i64: 1, 64, 64>}, {pipeline_mode = #tpu.pipeline_mode<synchronous>, transform_indices = @transform_1, window_bounds = array<i64: 1, 64>}, {pipeline_mode = #tpu.pipeline_mode<synchronous>, transform_indices = @transform_2, window_bounds = array<i64: 64, 192>}, {pipeline_mode = #tpu.pipeline_mode<synchronous>, transform_indices = @transform_3, window_bounds = array<i64: 64, 64>}, {pipeline_mode = #tpu.pipeline_mode<synchronous>, transform_indices = @transform_4, window_bounds = array<i64: 64, 32>}, {pipeline_mode = #tpu.pipeline_mode<synchronous>, transform_indices = @transform_5, window_bounds = array<i64: 64, 32>}, {transform_indices = @transform_6, window_bounds = array<i64: 1, 64, 64>}]} {
    %c0 = arith.constant 0 : index
    %c0_0 = arith.constant 0 : index
    %c0_1 = arith.constant 0 : index
    %0 = vector.load %arg1[%c0, %c0_0, %c0_1] : memref<1x64x64xf32, #tpu.memory_space<vmem>>, vector<1x64x64xf32>
    %1 = vector.shape_cast %0 : vector<1x64x64xf32> to vector<64x64xf32>
    %c0_2 = arith.constant 0 : index
    %c0_3 = arith.constant 0 : index
    %2 = vector.load %arg2[%c0_2, %c0_3] : memref<1x64xf32, #tpu.memory_space<vmem>>, vector<1x64xf32>
    %3 = arith.mulf %1, %1 : vector<64x64xf32>
    %cst = arith.constant dense<0.000000e+00> : vector<64xf32>
    %4 = vector.multi_reduction <add>, %3, %cst [1] : vector<64x64xf32> to vector<64xf32>
    %5 = vector.shape_cast %4 : vector<64xf32> to vector<64x1xf32>
    %cst_4 = arith.constant 6.400000e+01 : f32
    %6 = vector.broadcast %cst_4 : f32 to vector<64x1xf32>
    %7 = arith.divf %5, %6 : vector<64x1xf32>
    %cst_5 = arith.constant 9.99999997E-7 : f32
    %8 = vector.broadcast %cst_5 : f32 to vector<64x1xf32>
    %9 = arith.addf %7, %8 : vector<64x1xf32>
    %10 = math.rsqrt %9 : vector<64x1xf32>
    %11 = vector.broadcast %2 : vector<1x64xf32> to vector<64x64xf32>
    %12 = vector.broadcast %10 : vector<64x1xf32> to vector<64x64xf32>
    %13 = arith.mulf %11, %12 : vector<64x64xf32>
    %14 = arith.mulf %1, %13 : vector<64x64xf32>
    %c0_6 = arith.constant 0 : index
    %c0_7 = arith.constant 0 : index
    %15 = vector.load %arg3[%c0_6, %c0_7] : memref<64x192xf32, #tpu.memory_space<vmem>>, vector<64x192xf32>
    %cst_8 = arith.constant dense<0.000000e+00> : vector<64x192xf32>
    %16 = tpu.matmul %14, %15, %cst_8 {dimension_numbers = #tpu.dot_dimension_numbers<[1], [0], [0], [1], [0, 0, 1, 1], [], []>} : vector<64x64xf32>, vector<64x192xf32>, vector<64x192xf32> -> vector<64x192xf32>
    %c0_9 = arith.constant 0 : index
    %c0_10 = arith.constant 0 : index
    %17 = vector.load %arg5[%c0_9, %c0_10] : memref<64x32xf32, #tpu.memory_space<vmem>>, vector<64x32xf32>
    %c0_11 = arith.constant 0 : index
    %c0_12 = arith.constant 0 : index
    %18 = vector.load %arg6[%c0_11, %c0_12] : memref<64x32xf32, #tpu.memory_space<vmem>>, vector<64x32xf32>
    %19 = vector.extract_strided_slice %16 {offsets = [0, 0], sizes = [64, 32], strides = [1, 1]} : vector<64x192xf32> to vector<64x32xf32>
    %20 = vector.extract_strided_slice %16 {offsets = [0, 32], sizes = [64, 32], strides = [1, 1]} : vector<64x192xf32> to vector<64x32xf32>
    %21 = vector.extract_strided_slice %16 {offsets = [0, 64], sizes = [64, 32], strides = [1, 1]} : vector<64x192xf32> to vector<64x32xf32>
    %22 = vector.extract_strided_slice %16 {offsets = [0, 96], sizes = [64, 32], strides = [1, 1]} : vector<64x192xf32> to vector<64x32xf32>
    %23 = arith.mulf %19, %17 : vector<64x32xf32>
    %24 = arith.mulf %20, %18 : vector<64x32xf32>
    %25 = arith.subf %23, %24 : vector<64x32xf32>
    %26 = arith.mulf %20, %17 : vector<64x32xf32>
    %27 = arith.mulf %19, %18 : vector<64x32xf32>
    %28 = arith.addf %26, %27 : vector<64x32xf32>
    %29 = arith.mulf %21, %17 : vector<64x32xf32>
    %30 = arith.mulf %22, %18 : vector<64x32xf32>
    %31 = arith.subf %29, %30 : vector<64x32xf32>
    %32 = arith.mulf %22, %17 : vector<64x32xf32>
    %33 = arith.mulf %21, %18 : vector<64x32xf32>
    %34 = arith.addf %32, %33 : vector<64x32xf32>
    %35 = vector.extract_strided_slice %16 {offsets = [0, 128], sizes = [64, 64], strides = [1, 1]} : vector<64x192xf32> to vector<64x64xf32>
    %36 = tpu.iota {dimensions = array<i32: 0>} : vector<32x32xi32>
    %37 = tpu.iota {dimensions = array<i32: 1>} : vector<32x32xi32>
    %38 = arith.cmpi sle, %37, %36 : vector<32x32xi32>
    %cst_13 = arith.constant 0.000000e+00 : f32
    %39 = vector.broadcast %cst_13 : f32 to vector<32x64xf32>
    %40 = vector.extract_strided_slice %25 {offsets = [0, 0], sizes = [32, 8], strides = [1, 1]} : vector<64x32xf32> to vector<32x8xf32>
    %41 = vector.extract_strided_slice %28 {offsets = [0, 0], sizes = [32, 8], strides = [1, 1]} : vector<64x32xf32> to vector<32x8xf32>
    %cst_14 = arith.constant -1.000000e+30 : f32
    %42 = vector.broadcast %cst_14 : f32 to vector<32x1xf32>
    %cst_15 = arith.constant 0.000000e+00 : f32
    %43 = vector.broadcast %cst_15 : f32 to vector<32x1xf32>
    %cst_16 = arith.constant 0.000000e+00 : f32
    %44 = vector.broadcast %cst_16 : f32 to vector<32x16xf32>
    %45 = vector.extract_strided_slice %31 {offsets = [0, 0], sizes = [32, 8], strides = [1, 1]} : vector<64x32xf32> to vector<32x8xf32>
    %cst_17 = arith.constant dense<0.000000e+00> : vector<32x32xf32>
    %46 = tpu.matmul %40, %45, %cst_17 {dimension_numbers = #tpu.dot_dimension_numbers<[1], [1], [0], [0], [0, 0, 1, 0], [], []>} : vector<32x8xf32>, vector<32x8xf32>, vector<32x32xf32> -> vector<32x32xf32>
    %47 = vector.extract_strided_slice %34 {offsets = [0, 0], sizes = [32, 8], strides = [1, 1]} : vector<64x32xf32> to vector<32x8xf32>
    %cst_18 = arith.constant dense<0.000000e+00> : vector<32x32xf32>
    %48 = tpu.matmul %41, %47, %cst_18 {dimension_numbers = #tpu.dot_dimension_numbers<[1], [1], [0], [0], [0, 0, 1, 0], [], []>} : vector<32x8xf32>, vector<32x8xf32>, vector<32x32xf32> -> vector<32x32xf32>
    %49 = arith.addf %46, %48 : vector<32x32xf32>
    %cst_19 = arith.constant -1.000000e+30 : f32
    %50 = vector.broadcast %cst_19 : f32 to vector<32x32xf32>
    %51 = arith.select %38, %49, %50 : vector<32x32xi1>, vector<32x32xf32>
    %cst_20 = arith.constant dense<0xFF800000> : vector<32xf32>
    %52 = vector.multi_reduction <maximumf>, %51, %cst_20 [1] : vector<32x32xf32> to vector<32xf32>
    %53 = vector.shape_cast %52 : vector<32xf32> to vector<32x1xf32>
    %54 = arith.maximumf %42, %53 : vector<32x1xf32>
    %55 = arith.subf %42, %54 : vector<32x1xf32>
    %56 = math.exp %55 : vector<32x1xf32>
    %57 = vector.broadcast %54 : vector<32x1xf32> to vector<32x32xf32>
    %58 = arith.subf %51, %57 : vector<32x32xf32>
    %59 = math.exp %58 : vector<32x32xf32>
    %60 = arith.mulf %56, %43 : vector<32x1xf32>
    %cst_21 = arith.constant dense<0.000000e+00> : vector<32xf32>
    %61 = vector.multi_reduction <add>, %59, %cst_21 [1] : vector<32x32xf32> to vector<32xf32>
    %62 = vector.shape_cast %61 : vector<32xf32> to vector<32x1xf32>
    %63 = arith.addf %60, %62 : vector<32x1xf32>
    %64 = vector.broadcast %56 : vector<32x1xf32> to vector<32x16xf32>
    %65 = arith.mulf %64, %44 : vector<32x16xf32>
    %66 = vector.extract_strided_slice %35 {offsets = [0, 0], sizes = [32, 16], strides = [1, 1]} : vector<64x64xf32> to vector<32x16xf32>
    %cst_22 = arith.constant dense<0.000000e+00> : vector<32x16xf32>
    %67 = tpu.matmul %59, %66, %cst_22 {dimension_numbers = #tpu.dot_dimension_numbers<[1], [0], [0], [1], [0, 0, 1, 1], [], []>} : vector<32x32xf32>, vector<32x16xf32>, vector<32x16xf32> -> vector<32x16xf32>
    %68 = arith.addf %65, %67 : vector<32x16xf32>
    %69 = tpu.reciprocal %63 {approx = true} : vector<32x1xf32> -> vector<32x1xf32>
    %70 = vector.broadcast %69 : vector<32x1xf32> to vector<32x16xf32>
    %71 = arith.mulf %68, %70 : vector<32x16xf32>
    %c0_23 = arith.constant 0 : index
    %c0_24 = arith.constant 0 : index
    %72 = vector.load %arg4[%c0_23, %c0_24] : memref<64x64xf32, #tpu.memory_space<vmem>>, vector<16x64xf32>
    %cst_25 = arith.constant dense<0.000000e+00> : vector<32x64xf32>
    %73 = tpu.matmul %71, %72, %cst_25 {dimension_numbers = #tpu.dot_dimension_numbers<[1], [0], [0], [1], [0, 0, 1, 1], [], []>} : vector<32x16xf32>, vector<16x64xf32>, vector<32x64xf32> -> vector<32x64xf32>
    %74 = arith.addf %39, %73 : vector<32x64xf32>
    %75 = vector.extract_strided_slice %25 {offsets = [0, 8], sizes = [32, 8], strides = [1, 1]} : vector<64x32xf32> to vector<32x8xf32>
    %76 = vector.extract_strided_slice %28 {offsets = [0, 8], sizes = [32, 8], strides = [1, 1]} : vector<64x32xf32> to vector<32x8xf32>
    %cst_26 = arith.constant -1.000000e+30 : f32
    %77 = vector.broadcast %cst_26 : f32 to vector<32x1xf32>
    %cst_27 = arith.constant 0.000000e+00 : f32
    %78 = vector.broadcast %cst_27 : f32 to vector<32x1xf32>
    %cst_28 = arith.constant 0.000000e+00 : f32
    %79 = vector.broadcast %cst_28 : f32 to vector<32x16xf32>
    %80 = vector.extract_strided_slice %31 {offsets = [0, 8], sizes = [32, 8], strides = [1, 1]} : vector<64x32xf32> to vector<32x8xf32>
    %cst_29 = arith.constant dense<0.000000e+00> : vector<32x32xf32>
    %81 = tpu.matmul %75, %80, %cst_29 {dimension_numbers = #tpu.dot_dimension_numbers<[1], [1], [0], [0], [0, 0, 1, 0], [], []>} : vector<32x8xf32>, vector<32x8xf32>, vector<32x32xf32> -> vector<32x32xf32>
    %82 = vector.extract_strided_slice %34 {offsets = [0, 8], sizes = [32, 8], strides = [1, 1]} : vector<64x32xf32> to vector<32x8xf32>
    %cst_30 = arith.constant dense<0.000000e+00> : vector<32x32xf32>
    %83 = tpu.matmul %76, %82, %cst_30 {dimension_numbers = #tpu.dot_dimension_numbers<[1], [1], [0], [0], [0, 0, 1, 0], [], []>} : vector<32x8xf32>, vector<32x8xf32>, vector<32x32xf32> -> vector<32x32xf32>
    %84 = arith.addf %81, %83 : vector<32x32xf32>
    %cst_31 = arith.constant -1.000000e+30 : f32
    %85 = vector.broadcast %cst_31 : f32 to vector<32x32xf32>
    %86 = arith.select %38, %84, %85 : vector<32x32xi1>, vector<32x32xf32>
    %cst_32 = arith.constant dense<0xFF800000> : vector<32xf32>
    %87 = vector.multi_reduction <maximumf>, %86, %cst_32 [1] : vector<32x32xf32> to vector<32xf32>
    %88 = vector.shape_cast %87 : vector<32xf32> to vector<32x1xf32>
    %89 = arith.maximumf %77, %88 : vector<32x1xf32>
    %90 = arith.subf %77, %89 : vector<32x1xf32>
    %91 = math.exp %90 : vector<32x1xf32>
    %92 = vector.broadcast %89 : vector<32x1xf32> to vector<32x32xf32>
    %93 = arith.subf %86, %92 : vector<32x32xf32>
    %94 = math.exp %93 : vector<32x32xf32>
    %95 = arith.mulf %91, %78 : vector<32x1xf32>
    %cst_33 = arith.constant dense<0.000000e+00> : vector<32xf32>
    %96 = vector.multi_reduction <add>, %94, %cst_33 [1] : vector<32x32xf32> to vector<32xf32>
    %97 = vector.shape_cast %96 : vector<32xf32> to vector<32x1xf32>
    %98 = arith.addf %95, %97 : vector<32x1xf32>
    %99 = vector.broadcast %91 : vector<32x1xf32> to vector<32x16xf32>
    %100 = arith.mulf %99, %79 : vector<32x16xf32>
    %101 = vector.extract_strided_slice %35 {offsets = [0, 16], sizes = [32, 16], strides = [1, 1]} : vector<64x64xf32> to vector<32x16xf32>
    %cst_34 = arith.constant dense<0.000000e+00> : vector<32x16xf32>
    %102 = tpu.matmul %94, %101, %cst_34 {dimension_numbers = #tpu.dot_dimension_numbers<[1], [0], [0], [1], [0, 0, 1, 1], [], []>} : vector<32x32xf32>, vector<32x16xf32>, vector<32x16xf32> -> vector<32x16xf32>
    %103 = arith.addf %100, %102 : vector<32x16xf32>
    %104 = tpu.reciprocal %98 {approx = true} : vector<32x1xf32> -> vector<32x1xf32>
    %105 = vector.broadcast %104 : vector<32x1xf32> to vector<32x16xf32>
    %106 = arith.mulf %103, %105 : vector<32x16xf32>
    %c16 = arith.constant 16 : index
    %c0_35 = arith.constant 0 : index
    %107 = vector.load %arg4[%c16, %c0_35] : memref<64x64xf32, #tpu.memory_space<vmem>>, vector<16x64xf32>
    %cst_36 = arith.constant dense<0.000000e+00> : vector<32x64xf32>
    %108 = tpu.matmul %106, %107, %cst_36 {dimension_numbers = #tpu.dot_dimension_numbers<[1], [0], [0], [1], [0, 0, 1, 1], [], []>} : vector<32x16xf32>, vector<16x64xf32>, vector<32x64xf32> -> vector<32x64xf32>
    %109 = arith.addf %74, %108 : vector<32x64xf32>
    %110 = vector.extract_strided_slice %25 {offsets = [0, 16], sizes = [32, 8], strides = [1, 1]} : vector<64x32xf32> to vector<32x8xf32>
    %111 = vector.extract_strided_slice %28 {offsets = [0, 16], sizes = [32, 8], strides = [1, 1]} : vector<64x32xf32> to vector<32x8xf32>
    %cst_37 = arith.constant -1.000000e+30 : f32
    %112 = vector.broadcast %cst_37 : f32 to vector<32x1xf32>
    %cst_38 = arith.constant 0.000000e+00 : f32
    %113 = vector.broadcast %cst_38 : f32 to vector<32x1xf32>
    %cst_39 = arith.constant 0.000000e+00 : f32
    %114 = vector.broadcast %cst_39 : f32 to vector<32x16xf32>
    %115 = vector.extract_strided_slice %31 {offsets = [0, 16], sizes = [32, 8], strides = [1, 1]} : vector<64x32xf32> to vector<32x8xf32>
    %cst_40 = arith.constant dense<0.000000e+00> : vector<32x32xf32>
    %116 = tpu.matmul %110, %115, %cst_40 {dimension_numbers = #tpu.dot_dimension_numbers<[1], [1], [0], [0], [0, 0, 1, 0], [], []>} : vector<32x8xf32>, vector<32x8xf32>, vector<32x32xf32> -> vector<32x32xf32>
    %117 = vector.extract_strided_slice %34 {offsets = [0, 16], sizes = [32, 8], strides = [1, 1]} : vector<64x32xf32> to vector<32x8xf32>
    %cst_41 = arith.constant dense<0.000000e+00> : vector<32x32xf32>
    %118 = tpu.matmul %111, %117, %cst_41 {dimension_numbers = #tpu.dot_dimension_numbers<[1], [1], [0], [0], [0, 0, 1, 0], [], []>} : vector<32x8xf32>, vector<32x8xf32>, vector<32x32xf32> -> vector<32x32xf32>
    %119 = arith.addf %116, %118 : vector<32x32xf32>
    %cst_42 = arith.constant -1.000000e+30 : f32
    %120 = vector.broadcast %cst_42 : f32 to vector<32x32xf32>
    %121 = arith.select %38, %119, %120 : vector<32x32xi1>, vector<32x32xf32>
    %cst_43 = arith.constant dense<0xFF800000> : vector<32xf32>
    %122 = vector.multi_reduction <maximumf>, %121, %cst_43 [1] : vector<32x32xf32> to vector<32xf32>
    %123 = vector.shape_cast %122 : vector<32xf32> to vector<32x1xf32>
    %124 = arith.maximumf %112, %123 : vector<32x1xf32>
    %125 = arith.subf %112, %124 : vector<32x1xf32>
    %126 = math.exp %125 : vector<32x1xf32>
    %127 = vector.broadcast %124 : vector<32x1xf32> to vector<32x32xf32>
    %128 = arith.subf %121, %127 : vector<32x32xf32>
    %129 = math.exp %128 : vector<32x32xf32>
    %130 = arith.mulf %126, %113 : vector<32x1xf32>
    %cst_44 = arith.constant dense<0.000000e+00> : vector<32xf32>
    %131 = vector.multi_reduction <add>, %129, %cst_44 [1] : vector<32x32xf32> to vector<32xf32>
    %132 = vector.shape_cast %131 : vector<32xf32> to vector<32x1xf32>
    %133 = arith.addf %130, %132 : vector<32x1xf32>
    %134 = vector.broadcast %126 : vector<32x1xf32> to vector<32x16xf32>
    %135 = arith.mulf %134, %114 : vector<32x16xf32>
    %136 = vector.extract_strided_slice %35 {offsets = [0, 32], sizes = [32, 16], strides = [1, 1]} : vector<64x64xf32> to vector<32x16xf32>
    %cst_45 = arith.constant dense<0.000000e+00> : vector<32x16xf32>
    %137 = tpu.matmul %129, %136, %cst_45 {dimension_numbers = #tpu.dot_dimension_numbers<[1], [0], [0], [1], [0, 0, 1, 1], [], []>} : vector<32x32xf32>, vector<32x16xf32>, vector<32x16xf32> -> vector<32x16xf32>
    %138 = arith.addf %135, %137 : vector<32x16xf32>
    %139 = tpu.reciprocal %133 {approx = true} : vector<32x1xf32> -> vector<32x1xf32>
    %140 = vector.broadcast %139 : vector<32x1xf32> to vector<32x16xf32>
    %141 = arith.mulf %138, %140 : vector<32x16xf32>
    %c32 = arith.constant 32 : index
    %c0_46 = arith.constant 0 : index
    %142 = vector.load %arg4[%c32, %c0_46] : memref<64x64xf32, #tpu.memory_space<vmem>>, vector<16x64xf32>
    %cst_47 = arith.constant dense<0.000000e+00> : vector<32x64xf32>
    %143 = tpu.matmul %141, %142, %cst_47 {dimension_numbers = #tpu.dot_dimension_numbers<[1], [0], [0], [1], [0, 0, 1, 1], [], []>} : vector<32x16xf32>, vector<16x64xf32>, vector<32x64xf32> -> vector<32x64xf32>
    %144 = arith.addf %109, %143 : vector<32x64xf32>
    %145 = vector.extract_strided_slice %25 {offsets = [0, 24], sizes = [32, 8], strides = [1, 1]} : vector<64x32xf32> to vector<32x8xf32>
    %146 = vector.extract_strided_slice %28 {offsets = [0, 24], sizes = [32, 8], strides = [1, 1]} : vector<64x32xf32> to vector<32x8xf32>
    %cst_48 = arith.constant -1.000000e+30 : f32
    %147 = vector.broadcast %cst_48 : f32 to vector<32x1xf32>
    %cst_49 = arith.constant 0.000000e+00 : f32
    %148 = vector.broadcast %cst_49 : f32 to vector<32x1xf32>
    %cst_50 = arith.constant 0.000000e+00 : f32
    %149 = vector.broadcast %cst_50 : f32 to vector<32x16xf32>
    %150 = vector.extract_strided_slice %31 {offsets = [0, 24], sizes = [32, 8], strides = [1, 1]} : vector<64x32xf32> to vector<32x8xf32>
    %cst_51 = arith.constant dense<0.000000e+00> : vector<32x32xf32>
    %151 = tpu.matmul %145, %150, %cst_51 {dimension_numbers = #tpu.dot_dimension_numbers<[1], [1], [0], [0], [0, 0, 1, 0], [], []>} : vector<32x8xf32>, vector<32x8xf32>, vector<32x32xf32> -> vector<32x32xf32>
    %152 = vector.extract_strided_slice %34 {offsets = [0, 24], sizes = [32, 8], strides = [1, 1]} : vector<64x32xf32> to vector<32x8xf32>
    %cst_52 = arith.constant dense<0.000000e+00> : vector<32x32xf32>
    %153 = tpu.matmul %146, %152, %cst_52 {dimension_numbers = #tpu.dot_dimension_numbers<[1], [1], [0], [0], [0, 0, 1, 0], [], []>} : vector<32x8xf32>, vector<32x8xf32>, vector<32x32xf32> -> vector<32x32xf32>
    %154 = arith.addf %151, %153 : vector<32x32xf32>
    %cst_53 = arith.constant -1.000000e+30 : f32
    %155 = vector.broadcast %cst_53 : f32 to vector<32x32xf32>
    %156 = arith.select %38, %154, %155 : vector<32x32xi1>, vector<32x32xf32>
    %cst_54 = arith.constant dense<0xFF800000> : vector<32xf32>
    %157 = vector.multi_reduction <maximumf>, %156, %cst_54 [1] : vector<32x32xf32> to vector<32xf32>
    %158 = vector.shape_cast %157 : vector<32xf32> to vector<32x1xf32>
    %159 = arith.maximumf %147, %158 : vector<32x1xf32>
    %160 = arith.subf %147, %159 : vector<32x1xf32>
    %161 = math.exp %160 : vector<32x1xf32>
    %162 = vector.broadcast %159 : vector<32x1xf32> to vector<32x32xf32>
    %163 = arith.subf %156, %162 : vector<32x32xf32>
    %164 = math.exp %163 : vector<32x32xf32>
    %165 = arith.mulf %161, %148 : vector<32x1xf32>
    %cst_55 = arith.constant dense<0.000000e+00> : vector<32xf32>
    %166 = vector.multi_reduction <add>, %164, %cst_55 [1] : vector<32x32xf32> to vector<32xf32>
    %167 = vector.shape_cast %166 : vector<32xf32> to vector<32x1xf32>
    %168 = arith.addf %165, %167 : vector<32x1xf32>
    %169 = vector.broadcast %161 : vector<32x1xf32> to vector<32x16xf32>
    %170 = arith.mulf %169, %149 : vector<32x16xf32>
    %171 = vector.extract_strided_slice %35 {offsets = [0, 48], sizes = [32, 16], strides = [1, 1]} : vector<64x64xf32> to vector<32x16xf32>
    %cst_56 = arith.constant dense<0.000000e+00> : vector<32x16xf32>
    %172 = tpu.matmul %164, %171, %cst_56 {dimension_numbers = #tpu.dot_dimension_numbers<[1], [0], [0], [1], [0, 0, 1, 1], [], []>} : vector<32x32xf32>, vector<32x16xf32>, vector<32x16xf32> -> vector<32x16xf32>
    %173 = arith.addf %170, %172 : vector<32x16xf32>
    %174 = tpu.reciprocal %168 {approx = true} : vector<32x1xf32> -> vector<32x1xf32>
    %175 = vector.broadcast %174 : vector<32x1xf32> to vector<32x16xf32>
    %176 = arith.mulf %173, %175 : vector<32x16xf32>
    %c48 = arith.constant 48 : index
    %c0_57 = arith.constant 0 : index
    %177 = vector.load %arg4[%c48, %c0_57] : memref<64x64xf32, #tpu.memory_space<vmem>>, vector<16x64xf32>
    %cst_58 = arith.constant dense<0.000000e+00> : vector<32x64xf32>
    %178 = tpu.matmul %176, %177, %cst_58 {dimension_numbers = #tpu.dot_dimension_numbers<[1], [0], [0], [1], [0, 0, 1, 1], [], []>} : vector<32x16xf32>, vector<16x64xf32>, vector<32x64xf32> -> vector<32x64xf32>
    %179 = arith.addf %144, %178 : vector<32x64xf32>
    %180 = vector.extract_strided_slice %1 {offsets = [0, 0], sizes = [32, 64], strides = [1, 1]} : vector<64x64xf32> to vector<32x64xf32>
    %181 = arith.addf %179, %180 : vector<32x64xf32>
    %c0_59 = arith.constant 0 : index
    %c0_60 = arith.constant 0 : index
    %c0_61 = arith.constant 0 : index
    %182 = vector.load %arg7[%c0_59, %c0_60, %c0_61] : memref<1x64x64xf32, #tpu.memory_space<vmem>>, vector<1x32x64xf32>
    %183 = vector.shape_cast %182 : vector<1x32x64xf32> to vector<32x64xf32>
    %184 = vector.shape_cast %181 : vector<32x64xf32> to vector<1x32x64xf32>
    tpu.vector_store %arg7[%c0_59, %c0_60, %c0_61], %184 {strides = array<i32>} : memref<1x64x64xf32, #tpu.memory_space<vmem>>, vector<1x32x64xf32>,
    %cst_62 = arith.constant 0.000000e+00 : f32
    %185 = vector.broadcast %cst_62 : f32 to vector<32x64xf32>
    %186 = vector.extract_strided_slice %25 {offsets = [32, 0], sizes = [32, 8], strides = [1, 1]} : vector<64x32xf32> to vector<32x8xf32>
    %187 = vector.extract_strided_slice %28 {offsets = [32, 0], sizes = [32, 8], strides = [1, 1]} : vector<64x32xf32> to vector<32x8xf32>
    %cst_63 = arith.constant -1.000000e+30 : f32
    %188 = vector.broadcast %cst_63 : f32 to vector<32x1xf32>
    %cst_64 = arith.constant 0.000000e+00 : f32
    %189 = vector.broadcast %cst_64 : f32 to vector<32x1xf32>
    %cst_65 = arith.constant 0.000000e+00 : f32
    %190 = vector.broadcast %cst_65 : f32 to vector<32x16xf32>
    %191 = vector.extract_strided_slice %31 {offsets = [0, 0], sizes = [32, 8], strides = [1, 1]} : vector<64x32xf32> to vector<32x8xf32>
    %cst_66 = arith.constant dense<0.000000e+00> : vector<32x32xf32>
    %192 = tpu.matmul %186, %191, %cst_66 {dimension_numbers = #tpu.dot_dimension_numbers<[1], [1], [0], [0], [0, 0, 1, 0], [], []>} : vector<32x8xf32>, vector<32x8xf32>, vector<32x32xf32> -> vector<32x32xf32>
    %193 = vector.extract_strided_slice %34 {offsets = [0, 0], sizes = [32, 8], strides = [1, 1]} : vector<64x32xf32> to vector<32x8xf32>
    %cst_67 = arith.constant dense<0.000000e+00> : vector<32x32xf32>
    %194 = tpu.matmul %187, %193, %cst_67 {dimension_numbers = #tpu.dot_dimension_numbers<[1], [1], [0], [0], [0, 0, 1, 0], [], []>} : vector<32x8xf32>, vector<32x8xf32>, vector<32x32xf32> -> vector<32x32xf32>
    %195 = arith.addf %192, %194 : vector<32x32xf32>
    %cst_68 = arith.constant dense<0xFF800000> : vector<32xf32>
    %196 = vector.multi_reduction <maximumf>, %195, %cst_68 [1] : vector<32x32xf32> to vector<32xf32>
    %197 = vector.shape_cast %196 : vector<32xf32> to vector<32x1xf32>
    %198 = arith.maximumf %188, %197 : vector<32x1xf32>
    %199 = arith.subf %188, %198 : vector<32x1xf32>
    %200 = math.exp %199 : vector<32x1xf32>
    %201 = vector.broadcast %198 : vector<32x1xf32> to vector<32x32xf32>
    %202 = arith.subf %195, %201 : vector<32x32xf32>
    %203 = math.exp %202 : vector<32x32xf32>
    %204 = arith.mulf %200, %189 : vector<32x1xf32>
    %cst_69 = arith.constant dense<0.000000e+00> : vector<32xf32>
    %205 = vector.multi_reduction <add>, %203, %cst_69 [1] : vector<32x32xf32> to vector<32xf32>
    %206 = vector.shape_cast %205 : vector<32xf32> to vector<32x1xf32>
    %207 = arith.addf %204, %206 : vector<32x1xf32>
    %208 = vector.broadcast %200 : vector<32x1xf32> to vector<32x16xf32>
    %209 = arith.mulf %208, %190 : vector<32x16xf32>
    %210 = vector.extract_strided_slice %35 {offsets = [0, 0], sizes = [32, 16], strides = [1, 1]} : vector<64x64xf32> to vector<32x16xf32>
    %cst_70 = arith.constant dense<0.000000e+00> : vector<32x16xf32>
    %211 = tpu.matmul %203, %210, %cst_70 {dimension_numbers = #tpu.dot_dimension_numbers<[1], [0], [0], [1], [0, 0, 1, 1], [], []>} : vector<32x32xf32>, vector<32x16xf32>, vector<32x16xf32> -> vector<32x16xf32>
    %212 = arith.addf %209, %211 : vector<32x16xf32>
    %213 = vector.extract_strided_slice %31 {offsets = [32, 0], sizes = [32, 8], strides = [1, 1]} : vector<64x32xf32> to vector<32x8xf32>
    %cst_71 = arith.constant dense<0.000000e+00> : vector<32x32xf32>
    %214 = tpu.matmul %186, %213, %cst_71 {dimension_numbers = #tpu.dot_dimension_numbers<[1], [1], [0], [0], [0, 0, 1, 0], [], []>} : vector<32x8xf32>, vector<32x8xf32>, vector<32x32xf32> -> vector<32x32xf32>
    %215 = vector.extract_strided_slice %34 {offsets = [32, 0], sizes = [32, 8], strides = [1, 1]} : vector<64x32xf32> to vector<32x8xf32>
    %cst_72 = arith.constant dense<0.000000e+00> : vector<32x32xf32>
    %216 = tpu.matmul %187, %215, %cst_72 {dimension_numbers = #tpu.dot_dimension_numbers<[1], [1], [0], [0], [0, 0, 1, 0], [], []>} : vector<32x8xf32>, vector<32x8xf32>, vector<32x32xf32> -> vector<32x32xf32>
    %217 = arith.addf %214, %216 : vector<32x32xf32>
    %cst_73 = arith.constant -1.000000e+30 : f32
    %218 = vector.broadcast %cst_73 : f32 to vector<32x32xf32>
    %219 = arith.select %38, %217, %218 : vector<32x32xi1>, vector<32x32xf32>
    %cst_74 = arith.constant dense<0xFF800000> : vector<32xf32>
    %220 = vector.multi_reduction <maximumf>, %219, %cst_74 [1] : vector<32x32xf32> to vector<32xf32>
    %221 = vector.shape_cast %220 : vector<32xf32> to vector<32x1xf32>
    %222 = arith.maximumf %198, %221 : vector<32x1xf32>
    %223 = arith.subf %198, %222 : vector<32x1xf32>
    %224 = math.exp %223 : vector<32x1xf32>
    %225 = vector.broadcast %222 : vector<32x1xf32> to vector<32x32xf32>
    %226 = arith.subf %219, %225 : vector<32x32xf32>
    %227 = math.exp %226 : vector<32x32xf32>
    %228 = arith.mulf %224, %207 : vector<32x1xf32>
    %cst_75 = arith.constant dense<0.000000e+00> : vector<32xf32>
    %229 = vector.multi_reduction <add>, %227, %cst_75 [1] : vector<32x32xf32> to vector<32xf32>
    %230 = vector.shape_cast %229 : vector<32xf32> to vector<32x1xf32>
    %231 = arith.addf %228, %230 : vector<32x1xf32>
    %232 = vector.broadcast %224 : vector<32x1xf32> to vector<32x16xf32>
    %233 = arith.mulf %232, %212 : vector<32x16xf32>
    %234 = vector.extract_strided_slice %35 {offsets = [32, 0], sizes = [32, 16], strides = [1, 1]} : vector<64x64xf32> to vector<32x16xf32>
    %cst_76 = arith.constant dense<0.000000e+00> : vector<32x16xf32>
    %235 = tpu.matmul %227, %234, %cst_76 {dimension_numbers = #tpu.dot_dimension_numbers<[1], [0], [0], [1], [0, 0, 1, 1], [], []>} : vector<32x32xf32>, vector<32x16xf32>, vector<32x16xf32> -> vector<32x16xf32>
    %236 = arith.addf %233, %235 : vector<32x16xf32>
    %237 = tpu.reciprocal %231 {approx = true} : vector<32x1xf32> -> vector<32x1xf32>
    %238 = vector.broadcast %237 : vector<32x1xf32> to vector<32x16xf32>
    %239 = arith.mulf %236, %238 : vector<32x16xf32>
    %c0_77 = arith.constant 0 : index
    %c0_78 = arith.constant 0 : index
    %240 = vector.load %arg4[%c0_77, %c0_78] : memref<64x64xf32, #tpu.memory_space<vmem>>, vector<16x64xf32>
    %cst_79 = arith.constant dense<0.000000e+00> : vector<32x64xf32>
    %241 = tpu.matmul %239, %240, %cst_79 {dimension_numbers = #tpu.dot_dimension_numbers<[1], [0], [0], [1], [0, 0, 1, 1], [], []>} : vector<32x16xf32>, vector<16x64xf32>, vector<32x64xf32> -> vector<32x64xf32>
    %242 = arith.addf %185, %241 : vector<32x64xf32>
    %243 = vector.extract_strided_slice %25 {offsets = [32, 8], sizes = [32, 8], strides = [1, 1]} : vector<64x32xf32> to vector<32x8xf32>
    %244 = vector.extract_strided_slice %28 {offsets = [32, 8], sizes = [32, 8], strides = [1, 1]} : vector<64x32xf32> to vector<32x8xf32>
    %cst_80 = arith.constant -1.000000e+30 : f32
    %245 = vector.broadcast %cst_80 : f32 to vector<32x1xf32>
    %cst_81 = arith.constant 0.000000e+00 : f32
    %246 = vector.broadcast %cst_81 : f32 to vector<32x1xf32>
    %cst_82 = arith.constant 0.000000e+00 : f32
    %247 = vector.broadcast %cst_82 : f32 to vector<32x16xf32>
    %248 = vector.extract_strided_slice %31 {offsets = [0, 8], sizes = [32, 8], strides = [1, 1]} : vector<64x32xf32> to vector<32x8xf32>
    %cst_83 = arith.constant dense<0.000000e+00> : vector<32x32xf32>
    %249 = tpu.matmul %243, %248, %cst_83 {dimension_numbers = #tpu.dot_dimension_numbers<[1], [1], [0], [0], [0, 0, 1, 0], [], []>} : vector<32x8xf32>, vector<32x8xf32>, vector<32x32xf32> -> vector<32x32xf32>
    %250 = vector.extract_strided_slice %34 {offsets = [0, 8], sizes = [32, 8], strides = [1, 1]} : vector<64x32xf32> to vector<32x8xf32>
    %cst_84 = arith.constant dense<0.000000e+00> : vector<32x32xf32>
    %251 = tpu.matmul %244, %250, %cst_84 {dimension_numbers = #tpu.dot_dimension_numbers<[1], [1], [0], [0], [0, 0, 1, 0], [], []>} : vector<32x8xf32>, vector<32x8xf32>, vector<32x32xf32> -> vector<32x32xf32>
    %252 = arith.addf %249, %251 : vector<32x32xf32>
    %cst_85 = arith.constant dense<0xFF800000> : vector<32xf32>
    %253 = vector.multi_reduction <maximumf>, %252, %cst_85 [1] : vector<32x32xf32> to vector<32xf32>
    %254 = vector.shape_cast %253 : vector<32xf32> to vector<32x1xf32>
    %255 = arith.maximumf %245, %254 : vector<32x1xf32>
    %256 = arith.subf %245, %255 : vector<32x1xf32>
    %257 = math.exp %256 : vector<32x1xf32>
    %258 = vector.broadcast %255 : vector<32x1xf32> to vector<32x32xf32>
    %259 = arith.subf %252, %258 : vector<32x32xf32>
    %260 = math.exp %259 : vector<32x32xf32>
    %261 = arith.mulf %257, %246 : vector<32x1xf32>
    %cst_86 = arith.constant dense<0.000000e+00> : vector<32xf32>
    %262 = vector.multi_reduction <add>, %260, %cst_86 [1] : vector<32x32xf32> to vector<32xf32>
    %263 = vector.shape_cast %262 : vector<32xf32> to vector<32x1xf32>
    %264 = arith.addf %261, %263 : vector<32x1xf32>
    %265 = vector.broadcast %257 : vector<32x1xf32> to vector<32x16xf32>
    %266 = arith.mulf %265, %247 : vector<32x16xf32>
    %267 = vector.extract_strided_slice %35 {offsets = [0, 16], sizes = [32, 16], strides = [1, 1]} : vector<64x64xf32> to vector<32x16xf32>
    %cst_87 = arith.constant dense<0.000000e+00> : vector<32x16xf32>
    %268 = tpu.matmul %260, %267, %cst_87 {dimension_numbers = #tpu.dot_dimension_numbers<[1], [0], [0], [1], [0, 0, 1, 1], [], []>} : vector<32x32xf32>, vector<32x16xf32>, vector<32x16xf32> -> vector<32x16xf32>
    %269 = arith.addf %266, %268 : vector<32x16xf32>
    %270 = vector.extract_strided_slice %31 {offsets = [32, 8], sizes = [32, 8], strides = [1, 1]} : vector<64x32xf32> to vector<32x8xf32>
    %cst_88 = arith.constant dense<0.000000e+00> : vector<32x32xf32>
    %271 = tpu.matmul %243, %270, %cst_88 {dimension_numbers = #tpu.dot_dimension_numbers<[1], [1], [0], [0], [0, 0, 1, 0], [], []>} : vector<32x8xf32>, vector<32x8xf32>, vector<32x32xf32> -> vector<32x32xf32>
    %272 = vector.extract_strided_slice %34 {offsets = [32, 8], sizes = [32, 8], strides = [1, 1]} : vector<64x32xf32> to vector<32x8xf32>
    %cst_89 = arith.constant dense<0.000000e+00> : vector<32x32xf32>
    %273 = tpu.matmul %244, %272, %cst_89 {dimension_numbers = #tpu.dot_dimension_numbers<[1], [1], [0], [0], [0, 0, 1, 0], [], []>} : vector<32x8xf32>, vector<32x8xf32>, vector<32x32xf32> -> vector<32x32xf32>
    %274 = arith.addf %271, %273 : vector<32x32xf32>
    %cst_90 = arith.constant -1.000000e+30 : f32
    %275 = vector.broadcast %cst_90 : f32 to vector<32x32xf32>
    %276 = arith.select %38, %274, %275 : vector<32x32xi1>, vector<32x32xf32>
    %cst_91 = arith.constant dense<0xFF800000> : vector<32xf32>
    %277 = vector.multi_reduction <maximumf>, %276, %cst_91 [1] : vector<32x32xf32> to vector<32xf32>
    %278 = vector.shape_cast %277 : vector<32xf32> to vector<32x1xf32>
    %279 = arith.maximumf %255, %278 : vector<32x1xf32>
    %280 = arith.subf %255, %279 : vector<32x1xf32>
    %281 = math.exp %280 : vector<32x1xf32>
    %282 = vector.broadcast %279 : vector<32x1xf32> to vector<32x32xf32>
    %283 = arith.subf %276, %282 : vector<32x32xf32>
    %284 = math.exp %283 : vector<32x32xf32>
    %285 = arith.mulf %281, %264 : vector<32x1xf32>
    %cst_92 = arith.constant dense<0.000000e+00> : vector<32xf32>
    %286 = vector.multi_reduction <add>, %284, %cst_92 [1] : vector<32x32xf32> to vector<32xf32>
    %287 = vector.shape_cast %286 : vector<32xf32> to vector<32x1xf32>
    %288 = arith.addf %285, %287 : vector<32x1xf32>
    %289 = vector.broadcast %281 : vector<32x1xf32> to vector<32x16xf32>
    %290 = arith.mulf %289, %269 : vector<32x16xf32>
    %291 = vector.extract_strided_slice %35 {offsets = [32, 16], sizes = [32, 16], strides = [1, 1]} : vector<64x64xf32> to vector<32x16xf32>
    %cst_93 = arith.constant dense<0.000000e+00> : vector<32x16xf32>
    %292 = tpu.matmul %284, %291, %cst_93 {dimension_numbers = #tpu.dot_dimension_numbers<[1], [0], [0], [1], [0, 0, 1, 1], [], []>} : vector<32x32xf32>, vector<32x16xf32>, vector<32x16xf32> -> vector<32x16xf32>
    %293 = arith.addf %290, %292 : vector<32x16xf32>
    %294 = tpu.reciprocal %288 {approx = true} : vector<32x1xf32> -> vector<32x1xf32>
    %295 = vector.broadcast %294 : vector<32x1xf32> to vector<32x16xf32>
    %296 = arith.mulf %293, %295 : vector<32x16xf32>
    %c16_94 = arith.constant 16 : index
    %c0_95 = arith.constant 0 : index
    %297 = vector.load %arg4[%c16_94, %c0_95] : memref<64x64xf32, #tpu.memory_space<vmem>>, vector<16x64xf32>
    %cst_96 = arith.constant dense<0.000000e+00> : vector<32x64xf32>
    %298 = tpu.matmul %296, %297, %cst_96 {dimension_numbers = #tpu.dot_dimension_numbers<[1], [0], [0], [1], [0, 0, 1, 1], [], []>} : vector<32x16xf32>, vector<16x64xf32>, vector<32x64xf32> -> vector<32x64xf32>
    %299 = arith.addf %242, %298 : vector<32x64xf32>
    %300 = vector.extract_strided_slice %25 {offsets = [32, 16], sizes = [32, 8], strides = [1, 1]} : vector<64x32xf32> to vector<32x8xf32>
    %301 = vector.extract_strided_slice %28 {offsets = [32, 16], sizes = [32, 8], strides = [1, 1]} : vector<64x32xf32> to vector<32x8xf32>
    %cst_97 = arith.constant -1.000000e+30 : f32
    %302 = vector.broadcast %cst_97 : f32 to vector<32x1xf32>
    %cst_98 = arith.constant 0.000000e+00 : f32
    %303 = vector.broadcast %cst_98 : f32 to vector<32x1xf32>
    %cst_99 = arith.constant 0.000000e+00 : f32
    %304 = vector.broadcast %cst_99 : f32 to vector<32x16xf32>
    %305 = vector.extract_strided_slice %31 {offsets = [0, 16], sizes = [32, 8], strides = [1, 1]} : vector<64x32xf32> to vector<32x8xf32>
    %cst_100 = arith.constant dense<0.000000e+00> : vector<32x32xf32>
    %306 = tpu.matmul %300, %305, %cst_100 {dimension_numbers = #tpu.dot_dimension_numbers<[1], [1], [0], [0], [0, 0, 1, 0], [], []>} : vector<32x8xf32>, vector<32x8xf32>, vector<32x32xf32> -> vector<32x32xf32>
    %307 = vector.extract_strided_slice %34 {offsets = [0, 16], sizes = [32, 8], strides = [1, 1]} : vector<64x32xf32> to vector<32x8xf32>
    %cst_101 = arith.constant dense<0.000000e+00> : vector<32x32xf32>
    %308 = tpu.matmul %301, %307, %cst_101 {dimension_numbers = #tpu.dot_dimension_numbers<[1], [1], [0], [0], [0, 0, 1, 0], [], []>} : vector<32x8xf32>, vector<32x8xf32>, vector<32x32xf32> -> vector<32x32xf32>
    %309 = arith.addf %306, %308 : vector<32x32xf32>
    %cst_102 = arith.constant dense<0xFF800000> : vector<32xf32>
    %310 = vector.multi_reduction <maximumf>, %309, %cst_102 [1] : vector<32x32xf32> to vector<32xf32>
    %311 = vector.shape_cast %310 : vector<32xf32> to vector<32x1xf32>
    %312 = arith.maximumf %302, %311 : vector<32x1xf32>
    %313 = arith.subf %302, %312 : vector<32x1xf32>
    %314 = math.exp %313 : vector<32x1xf32>
    %315 = vector.broadcast %312 : vector<32x1xf32> to vector<32x32xf32>
    %316 = arith.subf %309, %315 : vector<32x32xf32>
    %317 = math.exp %316 : vector<32x32xf32>
    %318 = arith.mulf %314, %303 : vector<32x1xf32>
    %cst_103 = arith.constant dense<0.000000e+00> : vector<32xf32>
    %319 = vector.multi_reduction <add>, %317, %cst_103 [1] : vector<32x32xf32> to vector<32xf32>
    %320 = vector.shape_cast %319 : vector<32xf32> to vector<32x1xf32>
    %321 = arith.addf %318, %320 : vector<32x1xf32>
    %322 = vector.broadcast %314 : vector<32x1xf32> to vector<32x16xf32>
    %323 = arith.mulf %322, %304 : vector<32x16xf32>
    %324 = vector.extract_strided_slice %35 {offsets = [0, 32], sizes = [32, 16], strides = [1, 1]} : vector<64x64xf32> to vector<32x16xf32>
    %cst_104 = arith.constant dense<0.000000e+00> : vector<32x16xf32>
    %325 = tpu.matmul %317, %324, %cst_104 {dimension_numbers = #tpu.dot_dimension_numbers<[1], [0], [0], [1], [0, 0, 1, 1], [], []>} : vector<32x32xf32>, vector<32x16xf32>, vector<32x16xf32> -> vector<32x16xf32>
    %326 = arith.addf %323, %325 : vector<32x16xf32>
    %327 = vector.extract_strided_slice %31 {offsets = [32, 16], sizes = [32, 8], strides = [1, 1]} : vector<64x32xf32> to vector<32x8xf32>
    %cst_105 = arith.constant dense<0.000000e+00> : vector<32x32xf32>
    %328 = tpu.matmul %300, %327, %cst_105 {dimension_numbers = #tpu.dot_dimension_numbers<[1], [1], [0], [0], [0, 0, 1, 0], [], []>} : vector<32x8xf32>, vector<32x8xf32>, vector<32x32xf32> -> vector<32x32xf32>
    %329 = vector.extract_strided_slice %34 {offsets = [32, 16], sizes = [32, 8], strides = [1, 1]} : vector<64x32xf32> to vector<32x8xf32>
    %cst_106 = arith.constant dense<0.000000e+00> : vector<32x32xf32>
    %330 = tpu.matmul %301, %329, %cst_106 {dimension_numbers = #tpu.dot_dimension_numbers<[1], [1], [0], [0], [0, 0, 1, 0], [], []>} : vector<32x8xf32>, vector<32x8xf32>, vector<32x32xf32> -> vector<32x32xf32>
    %331 = arith.addf %328, %330 : vector<32x32xf32>
    %cst_107 = arith.constant -1.000000e+30 : f32
    %332 = vector.broadcast %cst_107 : f32 to vector<32x32xf32>
    %333 = arith.select %38, %331, %332 : vector<32x32xi1>, vector<32x32xf32>
    %cst_108 = arith.constant dense<0xFF800000> : vector<32xf32>
    %334 = vector.multi_reduction <maximumf>, %333, %cst_108 [1] : vector<32x32xf32> to vector<32xf32>
    %335 = vector.shape_cast %334 : vector<32xf32> to vector<32x1xf32>
    %336 = arith.maximumf %312, %335 : vector<32x1xf32>
    %337 = arith.subf %312, %336 : vector<32x1xf32>
    %338 = math.exp %337 : vector<32x1xf32>
    %339 = vector.broadcast %336 : vector<32x1xf32> to vector<32x32xf32>
    %340 = arith.subf %333, %339 : vector<32x32xf32>
    %341 = math.exp %340 : vector<32x32xf32>
    %342 = arith.mulf %338, %321 : vector<32x1xf32>
    %cst_109 = arith.constant dense<0.000000e+00> : vector<32xf32>
    %343 = vector.multi_reduction <add>, %341, %cst_109 [1] : vector<32x32xf32> to vector<32xf32>
    %344 = vector.shape_cast %343 : vector<32xf32> to vector<32x1xf32>
    %345 = arith.addf %342, %344 : vector<32x1xf32>
    %346 = vector.broadcast %338 : vector<32x1xf32> to vector<32x16xf32>
    %347 = arith.mulf %346, %326 : vector<32x16xf32>
    %348 = vector.extract_strided_slice %35 {offsets = [32, 32], sizes = [32, 16], strides = [1, 1]} : vector<64x64xf32> to vector<32x16xf32>
    %cst_110 = arith.constant dense<0.000000e+00> : vector<32x16xf32>
    %349 = tpu.matmul %341, %348, %cst_110 {dimension_numbers = #tpu.dot_dimension_numbers<[1], [0], [0], [1], [0, 0, 1, 1], [], []>} : vector<32x32xf32>, vector<32x16xf32>, vector<32x16xf32> -> vector<32x16xf32>
    %350 = arith.addf %347, %349 : vector<32x16xf32>
    %351 = tpu.reciprocal %345 {approx = true} : vector<32x1xf32> -> vector<32x1xf32>
    %352 = vector.broadcast %351 : vector<32x1xf32> to vector<32x16xf32>
    %353 = arith.mulf %350, %352 : vector<32x16xf32>
    %c32_111 = arith.constant 32 : index
    %c0_112 = arith.constant 0 : index
    %354 = vector.load %arg4[%c32_111, %c0_112] : memref<64x64xf32, #tpu.memory_space<vmem>>, vector<16x64xf32>
    %cst_113 = arith.constant dense<0.000000e+00> : vector<32x64xf32>
    %355 = tpu.matmul %353, %354, %cst_113 {dimension_numbers = #tpu.dot_dimension_numbers<[1], [0], [0], [1], [0, 0, 1, 1], [], []>} : vector<32x16xf32>, vector<16x64xf32>, vector<32x64xf32> -> vector<32x64xf32>
    %356 = arith.addf %299, %355 : vector<32x64xf32>
    %357 = vector.extract_strided_slice %25 {offsets = [32, 24], sizes = [32, 8], strides = [1, 1]} : vector<64x32xf32> to vector<32x8xf32>
    %358 = vector.extract_strided_slice %28 {offsets = [32, 24], sizes = [32, 8], strides = [1, 1]} : vector<64x32xf32> to vector<32x8xf32>
    %cst_114 = arith.constant -1.000000e+30 : f32
    %359 = vector.broadcast %cst_114 : f32 to vector<32x1xf32>
    %cst_115 = arith.constant 0.000000e+00 : f32
    %360 = vector.broadcast %cst_115 : f32 to vector<32x1xf32>
    %cst_116 = arith.constant 0.000000e+00 : f32
    %361 = vector.broadcast %cst_116 : f32 to vector<32x16xf32>
    %362 = vector.extract_strided_slice %31 {offsets = [0, 24], sizes = [32, 8], strides = [1, 1]} : vector<64x32xf32> to vector<32x8xf32>
    %cst_117 = arith.constant dense<0.000000e+00> : vector<32x32xf32>
    %363 = tpu.matmul %357, %362, %cst_117 {dimension_numbers = #tpu.dot_dimension_numbers<[1], [1], [0], [0], [0, 0, 1, 0], [], []>} : vector<32x8xf32>, vector<32x8xf32>, vector<32x32xf32> -> vector<32x32xf32>
    %364 = vector.extract_strided_slice %34 {offsets = [0, 24], sizes = [32, 8], strides = [1, 1]} : vector<64x32xf32> to vector<32x8xf32>
    %cst_118 = arith.constant dense<0.000000e+00> : vector<32x32xf32>
    %365 = tpu.matmul %358, %364, %cst_118 {dimension_numbers = #tpu.dot_dimension_numbers<[1], [1], [0], [0], [0, 0, 1, 0], [], []>} : vector<32x8xf32>, vector<32x8xf32>, vector<32x32xf32> -> vector<32x32xf32>
    %366 = arith.addf %363, %365 : vector<32x32xf32>
    %cst_119 = arith.constant dense<0xFF800000> : vector<32xf32>
    %367 = vector.multi_reduction <maximumf>, %366, %cst_119 [1] : vector<32x32xf32> to vector<32xf32>
    %368 = vector.shape_cast %367 : vector<32xf32> to vector<32x1xf32>
    %369 = arith.maximumf %359, %368 : vector<32x1xf32>
    %370 = arith.subf %359, %369 : vector<32x1xf32>
    %371 = math.exp %370 : vector<32x1xf32>
    %372 = vector.broadcast %369 : vector<32x1xf32> to vector<32x32xf32>
    %373 = arith.subf %366, %372 : vector<32x32xf32>
    %374 = math.exp %373 : vector<32x32xf32>
    %375 = arith.mulf %371, %360 : vector<32x1xf32>
    %cst_120 = arith.constant dense<0.000000e+00> : vector<32xf32>
    %376 = vector.multi_reduction <add>, %374, %cst_120 [1] : vector<32x32xf32> to vector<32xf32>
    %377 = vector.shape_cast %376 : vector<32xf32> to vector<32x1xf32>
    %378 = arith.addf %375, %377 : vector<32x1xf32>
    %379 = vector.broadcast %371 : vector<32x1xf32> to vector<32x16xf32>
    %380 = arith.mulf %379, %361 : vector<32x16xf32>
    %381 = vector.extract_strided_slice %35 {offsets = [0, 48], sizes = [32, 16], strides = [1, 1]} : vector<64x64xf32> to vector<32x16xf32>
    %cst_121 = arith.constant dense<0.000000e+00> : vector<32x16xf32>
    %382 = tpu.matmul %374, %381, %cst_121 {dimension_numbers = #tpu.dot_dimension_numbers<[1], [0], [0], [1], [0, 0, 1, 1], [], []>} : vector<32x32xf32>, vector<32x16xf32>, vector<32x16xf32> -> vector<32x16xf32>
    %383 = arith.addf %380, %382 : vector<32x16xf32>
    %384 = vector.extract_strided_slice %31 {offsets = [32, 24], sizes = [32, 8], strides = [1, 1]} : vector<64x32xf32> to vector<32x8xf32>
    %cst_122 = arith.constant dense<0.000000e+00> : vector<32x32xf32>
    %385 = tpu.matmul %357, %384, %cst_122 {dimension_numbers = #tpu.dot_dimension_numbers<[1], [1], [0], [0], [0, 0, 1, 0], [], []>} : vector<32x8xf32>, vector<32x8xf32>, vector<32x32xf32> -> vector<32x32xf32>
    %386 = vector.extract_strided_slice %34 {offsets = [32, 24], sizes = [32, 8], strides = [1, 1]} : vector<64x32xf32> to vector<32x8xf32>
    %cst_123 = arith.constant dense<0.000000e+00> : vector<32x32xf32>
    %387 = tpu.matmul %358, %386, %cst_123 {dimension_numbers = #tpu.dot_dimension_numbers<[1], [1], [0], [0], [0, 0, 1, 0], [], []>} : vector<32x8xf32>, vector<32x8xf32>, vector<32x32xf32> -> vector<32x32xf32>
    %388 = arith.addf %385, %387 : vector<32x32xf32>
    %cst_124 = arith.constant -1.000000e+30 : f32
    %389 = vector.broadcast %cst_124 : f32 to vector<32x32xf32>
    %390 = arith.select %38, %388, %389 : vector<32x32xi1>, vector<32x32xf32>
    %cst_125 = arith.constant dense<0xFF800000> : vector<32xf32>
    %391 = vector.multi_reduction <maximumf>, %390, %cst_125 [1] : vector<32x32xf32> to vector<32xf32>
    %392 = vector.shape_cast %391 : vector<32xf32> to vector<32x1xf32>
    %393 = arith.maximumf %369, %392 : vector<32x1xf32>
    %394 = arith.subf %369, %393 : vector<32x1xf32>
    %395 = math.exp %394 : vector<32x1xf32>
    %396 = vector.broadcast %393 : vector<32x1xf32> to vector<32x32xf32>
    %397 = arith.subf %390, %396 : vector<32x32xf32>
    %398 = math.exp %397 : vector<32x32xf32>
    %399 = arith.mulf %395, %378 : vector<32x1xf32>
    %cst_126 = arith.constant dense<0.000000e+00> : vector<32xf32>
    %400 = vector.multi_reduction <add>, %398, %cst_126 [1] : vector<32x32xf32> to vector<32xf32>
    %401 = vector.shape_cast %400 : vector<32xf32> to vector<32x1xf32>
    %402 = arith.addf %399, %401 : vector<32x1xf32>
    %403 = vector.broadcast %395 : vector<32x1xf32> to vector<32x16xf32>
    %404 = arith.mulf %403, %383 : vector<32x16xf32>
    %405 = vector.extract_strided_slice %35 {offsets = [32, 48], sizes = [32, 16], strides = [1, 1]} : vector<64x64xf32> to vector<32x16xf32>
    %cst_127 = arith.constant dense<0.000000e+00> : vector<32x16xf32>
    %406 = tpu.matmul %398, %405, %cst_127 {dimension_numbers = #tpu.dot_dimension_numbers<[1], [0], [0], [1], [0, 0, 1, 1], [], []>} : vector<32x32xf32>, vector<32x16xf32>, vector<32x16xf32> -> vector<32x16xf32>
    %407 = arith.addf %404, %406 : vector<32x16xf32>
    %408 = tpu.reciprocal %402 {approx = true} : vector<32x1xf32> -> vector<32x1xf32>
    %409 = vector.broadcast %408 : vector<32x1xf32> to vector<32x16xf32>
    %410 = arith.mulf %407, %409 : vector<32x16xf32>
    %c48_128 = arith.constant 48 : index
    %c0_129 = arith.constant 0 : index
    %411 = vector.load %arg4[%c48_128, %c0_129] : memref<64x64xf32, #tpu.memory_space<vmem>>, vector<16x64xf32>
    %cst_130 = arith.constant dense<0.000000e+00> : vector<32x64xf32>
    %412 = tpu.matmul %410, %411, %cst_130 {dimension_numbers = #tpu.dot_dimension_numbers<[1], [0], [0], [1], [0, 0, 1, 1], [], []>} : vector<32x16xf32>, vector<16x64xf32>, vector<32x64xf32> -> vector<32x64xf32>
    %413 = arith.addf %356, %412 : vector<32x64xf32>
    %414 = vector.extract_strided_slice %1 {offsets = [32, 0], sizes = [32, 64], strides = [1, 1]} : vector<64x64xf32> to vector<32x64xf32>
    %415 = arith.addf %413, %414 : vector<32x64xf32>
    %c0_131 = arith.constant 0 : index
    %c32_132 = arith.constant 32 : index
    %c0_133 = arith.constant 0 : index
    %416 = vector.load %arg7[%c0_131, %c32_132, %c0_133] : memref<1x64x64xf32, #tpu.memory_space<vmem>>, vector<1x32x64xf32>
    %417 = vector.shape_cast %416 : vector<1x32x64xf32> to vector<32x64xf32>
    %418 = vector.shape_cast %415 : vector<32x64xf32> to vector<1x32x64xf32>
    tpu.vector_store %arg7[%c0_131, %c32_132, %c0_133], %418 {strides = array<i32>} : memref<1x64x64xf32, #tpu.memory_space<vmem>>, vector<1x32x64xf32>,
    return
  }
  func.func @transform_0(%arg0: i32) -> (i32, i32, i32) {
    %c0_i32 = arith.constant 0 : i32
    %c0_i32_0 = arith.constant 0 : i32
    %c0_i32_1 = arith.constant 0 : i32
    return %arg0, %c0_i32, %c0_i32_0 : i32, i32, i32
  }
  func.func @transform_1(%arg0: i32) -> (i32, i32) {
    %c0_i32 = arith.constant 0 : i32
    %c0_i32_0 = arith.constant 0 : i32
    %c0_i32_1 = arith.constant 0 : i32
    return %c0_i32, %c0_i32_0 : i32, i32
  }
  func.func @transform_2(%arg0: i32) -> (i32, i32) {
    %c0_i32 = arith.constant 0 : i32
    %c0_i32_0 = arith.constant 0 : i32
    %c0_i32_1 = arith.constant 0 : i32
    return %c0_i32, %c0_i32_0 : i32, i32
  }
  func.func @transform_3(%arg0: i32) -> (i32, i32) {
    %c0_i32 = arith.constant 0 : i32
    %c0_i32_0 = arith.constant 0 : i32
    %c0_i32_1 = arith.constant 0 : i32
    return %c0_i32, %c0_i32_0 : i32, i32
  }
  func.func @transform_4(%arg0: i32) -> (i32, i32) {
    %c0_i32 = arith.constant 0 : i32
    %c0_i32_0 = arith.constant 0 : i32
    %c0_i32_1 = arith.constant 0 : i32
    return %c0_i32, %c0_i32_0 : i32, i32
  }
  func.func @transform_5(%arg0: i32) -> (i32, i32) {
    %c0_i32 = arith.constant 0 : i32
    %c0_i32_0 = arith.constant 0 : i32
    %c0_i32_1 = arith.constant 0 : i32
    return %c0_i32, %c0_i32_0 : i32, i32
  }
  func.func @transform_6(%arg0: i32) -> (i32, i32, i32) {
    %c0_i32 = arith.constant 0 : i32
    %c0_i32_0 = arith.constant 0 : i32
    %c0_i32_1 = arith.constant 0 : i32
    return %arg0, %c0_i32, %c0_i32_0 : i32, i32, i32
  }
}

</mosaic_0001>

<bundles_post_ra>
// kernel: tpu_custom_call.1
= control target key start
LH: loop header
LB: loop body
LE: loop exit
PB: predicated region body
PF: predicated region fallthrough
CT: control target
= control target key end

     0   :  { %11 = vsyncpa [#allocation3], 0  ;;  %s11272_s0 = inlined_call_operand.vmem [shape: f32[2,64,64], index: 0, kind: input, shape index: {}]   ;;  %s11273_s1 = inlined_call_operand.vmem [shape: f32[1,64], index: 1, kind: input, shape index: {}]   ;;  %s11274_s2 = inlined_call_operand.hbm [shape: f32[64,192], index: 2, kind: input, shape index: {}]   ;;  %s11275_s3 = inlined_call_operand.vmem [shape: f32[64,64], index: 3, kind: input, shape index: {}]   ;;  %s11276_s4 = inlined_call_operand.vmem [shape: f32[64,32], index: 4, kind: input, shape index: {}]   ;;  %s11277_s5 = inlined_call_operand.vmem [shape: f32[64,32], index: 5, kind: input, shape index: {}]   ;;  %s11278_s6 = inlined_call_operand.hbm [shape: f32[2,64,64], index: 6, kind: output, shape index: {}]  }
   0x1   :  { %12 = vsyncpa [#allocation4], 0 }
   0x2   :  { %14 = vsyncpa [#allocation4 + $0x1], 0  ;;  %s8967_s21 = smov 0   ;;  %s8969_s22 = smov 0  }
   0x3   :  { %s8971_s23 = smov 0   ;;  %s8973_s24 = smov 0  }
   0x4 LB: > { %s8988_s25 = sadd.s32 4294967295, %s8909_s24   ;;  %s6525_s26 = sadd.s32 4294967294, %s8909_s24   ;;  %s8909_s24 = sphi %s8973_s24, %s11467_s24   ;;  %s8905_s23 = sphi %s8971_s23, %s11466_s23   ;;  %s8901_s22 = sphi %s8969_s22, %s11465_s22   ;;  %s8897_s21 = sphi %s8967_s21, %s11464_s21  }
   0x5   : > { %s8992_s27 = sadd.s32 1, %s8909_s24   ;;  %s158_s28 = sadd.s32 1, %s8905_s23 }
   0x6   : > { %s155_s29 = ssub.s32 %s8909_s24, %s8992_s27  ;;  %p168_p0 = scmp.ne.s32.totalorder %s8905_s23, %s8901_s22 }
   0x7   : > { %p156_p1 = scmp.eq.s32.totalorder %s155_s29, 0  ;;  %p169_p2 = scmp.eq.s32.totalorder %s8988_s25, 1 }
   0x8   : > { %p174_p3 = scmp.ne.s32.totalorder %s8901_s22, %s8897_s21  ;;  %p175_p4 = scmp.eq.s32.totalorder %s6525_s26, 1 }
   0x9   : > { %s9003_s30 = scalar_select %p156_p1, %s8905_s23, %s158_s28  }
   0xa   : > { %p9005_p5 = por %p169_p2, %p168_p0  ;;  %p9009_p6 = por %p175_p4, %p174_p3 }
   0xb   : > { %p6526_p7 = scmp.ge.s32.totalorder %s8909_s24, 1  ;;  %p182_p8 = scmp.lt.s32.totalorder %s8909_s24, 3 }
   0xc   : > { %s11366_s7 = scalar_select %p9005_p5, 1, 0 }
   0xd   : > { %s11367_s8 = scalar_select %p9009_p6, 1, 0 }
   0xe   : > { %p11279_p9 = scmp.eq.s32.totalorder %s8988_s25, 0  ;;  %p9016_p10 = pnand %p6526_p7, %p182_p8 }
   0xf   : > { %s8911_s10 = smov [#allocation2]   ;;  %s8815_s15 = scalar_lea.hbm %s11274_s2, 2048 }
  0x10   : > { %s11368_s9 = scalar_select %p9016_p10, 1, 0 }
  0x11   : > { %s197_s11 = sshll.u32 %s8911_s10, 4  ;;  %p8252_p11 = pneg %p9016_p10  ;;  %s198_s11 = int_to_ptr.vmem [resolvable:$true] %s197_s11 }
  0x12   : > { %p8816_p13 = scmp.ne.s32.totalorder %s11274_s2, %s8815_s15  ;;  %p8822_p3 = scmp.lt.u32.totalorder %s8815_s15, %s11274_s2 }
  0x13   : > { %p9024_p12 = pnand %p11279_p9, %p8252_p11 }
  0x15   : > { %p8817_p0 = pneg %p9024_p12 }
  0x17   : > { %p8818_p1 = pnand %p8817_p0, %p8816_p13 }
  0x19   : > { %p8819_p2 = pneg %p8818_p1 }
  0x1b   : > { %p8824_p4 = pnand %p8822_p3, %p8819_p2 }
  0x1d   : > { %8827 = shalt.err (!%p8824_p4)
}
  0x1e   : > { %s8828_s20 = scalar_lea.vmem %s198_s11, 2048  ;;  %p8836_p9 = scmp.lt.s32.totalorder %s198_s11, %s198_s11 }
  0x1f   : > { %p8829_p7 = scmp.ne.s32.totalorder %s198_s11, %s8828_s20  ;;  %p8837_p6 = scmp.lt.s32.totalorder %s8828_s20, %s8828_s20 }
  0x21   : > { %p8831_p8 = pnand %p8829_p7, %p8817_p0  ;;  %p8838_p5 = por %p8837_p6, %p8836_p9 }
  0x23   : > { %p8832_p11 = pneg %p8831_p8 }
  0x25   : > { %p8839_p10 = pnand %p8838_p5, %p8832_p11 }
  0x27   : > { %8842 = shalt.err (!%p8839_p10)
}
  0x28   : > { %s8912_s26 = smov 256   ;;  %s8913_s28 = smov 16  }
  0x29   : > { %8255 = dma.hbm_to_vmem [thread:$0]  (!%p9024_p12), %s11274_s2, 2048, %s198_s11, [#allocation3], %s8912_s26, %s8912_s26, %s8913_s28  }
  0x2a   : > { %p11370_p13 = scmp.ne.s32.totalorder %s11368_s9, 0 }
  0x2c   : > { %230 = sbr.rel (%p11370_p13) target bundleno = 5637 (0x1605), region = 44 }
  0x33   : > { %p11371_p1 = scmp.eq.s32.totalorder %s8988_s25, 0 }
  0x35   : > { %8888 = dma.done.wait (%p11371_p1), [#allocation3], 2048   ;;  %p11372_p0 = pmov %p11371_p1 }
  0x36   : > { %p260_p5 = scmp.lt.s32.totalorder %s8988_s25, 1  ;;  %vm282_vm0 = vcmask 523264   ;;  %v355_v12 = vld [vmem:[#allocation2 + $0x8] sm:$0xff]  ;;  %v357_v13 = vld [vmem:[#allocation2 + $0x18] sm:$0xff]  ;;  %v354_v15 = vld [vmem:[#allocation2] sm:$0xff]  ;;  %v8914_v34 = vmov 0.0  }
  0x37   : > { %8890 = vsyncadd (%p11372_p0), [#allocation3], 4294965248  ;;  %v7742_v14 = vpack.c.bf16 %v357_v13, %v355_v12  ;;  %v356_v16 = vld [vmem:[#allocation2 + $0x10] sm:$0xff]  ;;  %v359_v18 = vld [vmem:[#allocation2 + $0x28] sm:$0xff]  ;;  %458 = vmatprep.mubr.f32.mxu0 %v8914_v34  ;;  %s8915_s19 = smov 64   ;;  %s8916_s28 = smov 96  }
  0x38   : > { %s261_s13 = scalar_select %p260_p5, %s8988_s25, 1  ;;  %v7744_v17 = vpack.c.bf16 %v356_v16, %v354_v15  ;;  %v361_v19 = vld [vmem:[#allocation2 + $0x38] sm:$0xff]  ;;  %v358_v21 = vld [vmem:[#allocation2 + $0x20] sm:$0xff]  ;;  %v360_v22 = vld [vmem:[#allocation2 + $0x30] sm:$0xff]  ;;  %vm942_vm1 = vcmask 64512   ;;  %vm1165_vm5 = vcmask 261120  }
  0x39   : > { %7743 = vmatprep.subr.bf16.mxu0 %v7742_v14  ;;  %v7746_v20 = vpack.c.bf16 %v361_v19, %v359_v18  ;;  %v7748_v23 = vpack.c.bf16 %v360_v22, %v358_v21  ;;  %v363_v24 = vld [vmem:[#allocation2 + $0x48] sm:$0xff]  ;;  %v365_v25 = vld [vmem:[#allocation2 + $0x58] sm:$0xff]  ;;  %v362_v27 = vld [vmem:[#allocation2 + $0x40] sm:$0xff]  ;;  %s11307_s10 = smov 24   ;;  %s8920_s15 = smov 88   ;;  %vm1762_vm8 = vcmask 130048  }
  0x3a   : > { %s6820_s14 = sshll.u32 %s261_s13, 6  ;;  %7745 = vmatpush1.bf16.msra.mxu0 %v7744_v17  ;;  %v7750_v26 = vpack.c.bf16 %v365_v25, %v363_v24  ;;  %v364_v28 = vld [vmem:[#allocation2 + $0x50] sm:$0xff]  ;;  %v367_v29 = vld [vmem:[#allocation2 + $0x68] sm:$0xff]  ;;  %v369_v31 = vld [vmem:[#allocation2 + $0x78] sm:$0xff]  ;;  %s8917_s13 = smov 32  }
  0x3b   : > { %s9055_s16 = scalar_lea.vmem %s11272_s0, %s6820_s14  ;;  %7747 = vmatprep.subr.bf16.mxu0 %v7746_v20  ;;  %v7752_v30 = vpack.c.bf16 %v364_v28, %v362_v27  ;;  %v366_v32 = vld [vmem:[#allocation2 + $0x60] sm:$0xff]  ;;  %v368_v33 = vld [vmem:[#allocation2 + $0x70] sm:$0xff]  ;;  %v7754_v35 = vpack.c.bf16 %v369_v31, %v367_v29  ;;  %v9085_v37 = vld [vmem:[%s11277_s5 + $0x8] sm:$0xff]  ;;  %s11305_s14 = smov 56  }
  0x3c   : > { %v9058_v0 = vld [vmem:[%s9055_s16] sm:$0xff]  ;;  %v9061_v1 = vld [vmem:[%s9055_s16 + $0x8] sm:$0xff]  ;;  %v9064_v2 = vld [vmem:[%s9055_s16 + $0x10] sm:$0xff]  ;;  %v7756_v36 = vpack.c.bf16 %v368_v33, %v366_v32  ;;  %s11309_s12 = smov 120   ;;  %s11301_s9 = smov 16  }
  0x3d   : > { %v274_v3 = vmul.f32 %v9058_v0, %v9058_v0  ;;  %v275_v4 = vmul.f32 %v9061_v1, %v9061_v1  ;;  %v276_v5 = vmul.f32 %v9064_v2, %v9064_v2  ;;  %v9073_v6 = vld [vmem:[%s9055_s16 + $0x18] sm:$0xff]  ;;  %v9090_v38 = vld [vmem:[%s11277_s5] sm:$0xff]  ;;  %v9099_v39 = vld [vmem:[%s11277_s5 + $0x10] sm:$0xff]  ;;  %s11299_s11 = smov 48   ;;  %s8924_s17 = smov 80  }
  0x3e   : > { %v277_v7 = vmul.f32 %v9073_v6, %v9073_v6  ;;  %7749 = vmatpush1.bf16.msra.mxu0 %v7748_v23  ;;  %v9108_v40 = vld [vmem:[%s11277_s5 + $0x18] sm:$0xff]  ;;  %v9125_v41 = vld [vmem:[%s11276_s4] sm:$0xff]  ;;  %v9134_v42 = vld [vmem:[%s11276_s4 + $0x10] sm:$0xff]  ;;  %s11303_s18 = smov 112   ;;  %s11311_s20 = smov 8  }
  0x3f   : > { %v283_v8 = vsel %vm282_vm0, %v274_v3, 0.0  ;;  %v289_v9 = vsel %vm282_vm0, %v276_v5, 0.0  ;;  %v286_v10 = vsel %vm282_vm0, %v275_v4, 0.0  ;;  %7751 = vmatprep.subr.bf16.mxu0 %v7750_v26  ;;  %v9143_v43 = vld [vmem:[%s11276_s4 + $0x8] sm:$0xff]  ;;  %v9152_v44 = vld [vmem:[%s11276_s4 + $0x18] sm:$0xff]  ;;  %v9171_v45 = vld [vmem:[%s9055_s16 + $0x20] sm:$0xff] }
  0x40   : > { %284 = vadd.xlane.f32.xlu0 %v283_v8  ;;  %290 = vadd.xlane.f32.xlu1 %v289_v9  ;;  %v292_v11 = vsel %vm282_vm0, %v277_v7, 0.0  ;;  %v278_v46 = vmul.f32 %v9171_v45, %v9171_v45  ;;  %v9177_v48 = vld [vmem:[%s9055_s16 + $0x28] sm:$0xff]  ;;  %v9185_v63 = vld [vmem:[%s11273_s1] ss:$0 sm:$0xff]  ;;  %vm9451_vm2 = vmpackc.low %vm942_vm1, %vm942_vm1  ;;  %s11313_s26 = smov 40   ;;  %s8928_s29 = smov 72  }
  0x41   : > { %v279_v49 = vmul.f32 %v9177_v48, %v9177_v48  ;;  %p11462_p9 = scmp.ne.s32.totalorder %s11366_s7, 0 }
  0x42   : > { %7753 = vmatpush1.bf16.msra.mxu0 %v7752_v30  ;;  %v295_v47 = vsel %vm282_vm0, %v278_v46, 0.0 }
  0x43   : > { %7755 = vmatprep.subr.bf16.mxu0 %v7754_v35  ;;  %v298_v50 = vsel %vm282_vm0, %v279_v49, 0.0 }
  0x44   : > { %287 = vadd.xlane.f32.xlu0 %v286_v10  ;;  %293 = vadd.xlane.f32.xlu1 %v292_v11 }
  0x46   : > { %7757 = vmatpush1.bf16.msra.mxu0 %v7756_v36 }
  0x55   : > { %837 = vrot.lane.b32.xlu1 %v9085_v37, %s8915_s19 }
  0x59   : > { %839 = vrot.lane.b32.xlu1 %v9099_v39, %s8915_s19 }
  0x5a   : > { %835 = vrot.lane.b32.xlu0 %v9090_v38, %s8915_s19 }
  0x5d   : > { %841 = vrot.lane.b32.xlu1 %v9108_v40, %s8915_s19 }
  0x5e   : > { %731 = vrot.lane.b32.xlu0 %v9090_v38, %s8916_s28 }
  0x61   : > { %733 = vrot.lane.b32.xlu1 %v9085_v37, %s8916_s28 }
  0x62   : > { %735 = vrot.lane.b32.xlu0 %v9099_v39, %s8916_s28 }
  0x65   : > { %737 = vrot.lane.b32.xlu1 %v9108_v40, %s8916_s28 }
  0x66   : > { %539 = vrot.lane.b32.xlu0 %v9090_v38, %s8917_s13 }
  0x69   : > { %541 = vrot.lane.b32.xlu1 %v9085_v37, %s8917_s13 }
  0x6a   : > { %543 = vrot.lane.b32.xlu0 %v9099_v39, %s8917_s13 }
  0x6d   : > { %545 = vrot.lane.b32.xlu1 %v9108_v40, %s8917_s13 }
  0x6e   : > { %803 = vrot.lane.b32.xlu0 %v9125_v41, %s8916_s28 }
  0x71   : > { %805 = vrot.lane.b32.xlu1 %v9143_v43, %s8916_s28 }
  0x72   : > { %807 = vrot.lane.b32.xlu0 %v9134_v42, %s8916_s28 }
  0x75   : > { %809 = vrot.lane.b32.xlu1 %v9152_v44, %s8916_s28 }
  0x76   : > { %699 = vrot.lane.b32.xlu0 %v9125_v41, %s8915_s19 }
  0x79   : > { %701 = vrot.lane.b32.xlu1 %v9143_v43, %s8915_s19 }
  0x7a   : > { %619 = vrot.lane.b32.xlu0 %v9125_v41, %s8917_s13 }
  0x7d   : > { %621 = vrot.lane.b32.xlu1 %v9143_v43, %s8917_s13 }
  0x7e   : > { %703 = vrot.lane.b32.xlu0 %v9134_v42, %s8915_s19 }
  0x81   : > { %705 = vrot.lane.b32.xlu1 %v9152_v44, %s8915_s19 }
  0x82   : > { %623 = vrot.lane.b32.xlu0 %v9134_v42, %s8917_s13 }
  0x85   : > { %625 = vrot.lane.b32.xlu1 %v9152_v44, %s8917_s13 }
  0xa1   : > { %296 = vadd.xlane.f32.xlu0 %v295_v47 }
  0xa9   : > { %299 = vadd.xlane.f32.xlu1 %v298_v50 }
  0xcd   : > { %v285_v51 = vpop.xlane.xlu0 %284  ;;  %v291_v52 = vpop.xlane.xlu1 %290 }
  0xce   : > { %v308_v53 = vmul.f32 0.015625, %v285_v51  ;;  %v310_v54 = vmul.f32 0.015625, %v291_v52 }
  0xd0   : > { %v316_v55 = vadd.f32 1e-06, %v308_v53  ;;  %v318_v56 = vadd.f32 1e-06, %v310_v54 }
  0xd1   : > { %v288_v57 = vpop.xlane.xlu0 %287  ;;  %v294_v58 = vpop.xlane.xlu1 %293 }
  0xd2   : > { %8535 = vrsqrt.f32 %v316_v55  ;;  %v309_v59 = vmul.f32 0.015625, %v288_v57  ;;  %v311_v60 = vmul.f32 0.015625, %v294_v58 }
  0xd3   : > { %8537 = vrsqrt.f32 %v318_v56 }
  0xd4   : > { %v317_v61 = vadd.f32 1e-06, %v309_v59  ;;  %v319_v62 = vadd.f32 1e-06, %v311_v60 }
  0xd5   : > { %v838_v15 = vpop.permute.xlu1 %837 }
  0xd6   : > { %8539 = vrsqrt.f32 %v317_v61 }
  0xd7   : > { %8541 = vrsqrt.f32 %v319_v62 }
  0xd9   : > { %v9203_v16 = vpop.permute.xlu1 %839 }
  0xdc   : > { %v8536_v3 = vpop.eup %8535 }
  0xdd   : > { %v338_v4 = vmul.f32 %v8536_v3, %v9185_v63  ;;  %v8538_v5 = vpop.eup %8537 }
  0xde   : > { %v340_v10 = vmul.f32 %v8538_v5, %v9185_v63 }
  0xdf   : > { %v346_v7 = vmul.f32 %v338_v4, %v9058_v0 }
  0xe0   : > { %v8540_v8 = vpop.eup %8539  ;;  %v348_v13 = vmul.f32 %v340_v10, %v9064_v2  ;;  %v9205_v2 = vpop.permute.xlu1 %841 }
  0xe1   : > { %6535 = vmatmul.mubr.msk.f32.vlgmr.msra.gmra.mrb[0].mxu0 %vm282_vm0, %v346_v7  ;;  %v339_v9 = vmul.f32 %v8540_v8, %v9185_v63  ;;  %v8542_v11 = vpop.eup %8541 }
  0xe2   : > { %464 = vmatprep.mubr.f32.mxu0 %v8914_v34  ;;  %v341_v14 = vmul.f32 %v8542_v11, %v9185_v63 }
  0xe3   : > { %v347_v12 = vmul.f32 %v339_v9, %v9061_v1  ;;  %v836_v1 = vpop.permute.xlu0 %835 }
  0xe4   : > { %v349_v0 = vmul.f32 %v341_v14, %v9073_v6  ;;  %v734_v19 = vpop.permute.xlu1 %733 }
  0xe5   : > { %6536 = vmatmul.mubr.msk.f32.gmra.mrb[2].mxu0 %vm282_vm0, %v347_v12 }
  0xe6   : > { %470 = vmatprep.mubr.f32.mxu0 %v8914_v34 }
  0xe7   : > { %v732_v17 = vpop.permute.xlu0 %731 }
  0xe8   : > { %v9209_v21 = vpop.permute.xlu1 %737 }
  0xe9   : > { %6537 = vmatmul.mubr.msk.f32.gmra.mrb[4].mxu0 %vm282_vm0, %v348_v13 }
  0xea   : > { %476 = vmatprep.mubr.f32.mxu0 %v8914_v34 }
  0xeb   : > { %v9207_v18 = vpop.permute.xlu0 %735 }
  0xec   : > { %v542_v22 = vpop.permute.xlu1 %541 }
  0xed   : > { %6538 = vmatmul.mubr.msk.f32.gmra.mrb[6].mxu0 %vm282_vm0, %v349_v0 }
  0xee   : > { %482 = vmatprep.mubr.f32.mxu0 %v8914_v34 }
  0xef   : > { %v540_v20 = vpop.permute.xlu0 %539 }
  0xf0   : > { %v9213_v24 = vpop.permute.xlu1 %545 }
  0xf3   : > { %v544_v6 = vpop.permute.xlu0 %543 }
  0xf4   : > { %v9217_v26 = vpop.permute.xlu1 %805 }
  0xf7   : > { %v9211_v23 = vpop.permute.xlu0 %803 }
  0xf8   : > { %v9221_v28 = vpop.permute.xlu1 %809 }
  0xfb   : > { %v9215_v25 = vpop.permute.xlu0 %807 }
  0xfc   : > { %v9225_v30 = vpop.permute.xlu1 %701 }
  0xff   : > { %v9219_v27 = vpop.permute.xlu0 %699 }
 0x100   : > { %v9229_v32 = vpop.permute.xlu1 %621 }
 0x103   : > { %v9223_v29 = vpop.permute.xlu0 %619 }
 0x104   : > { %v9233_v35 = vpop.permute.xlu1 %705 }
 0x107   : > { %v9227_v31 = vpop.permute.xlu0 %703 }
 0x108   : > { %v9235_v46 = vpop.permute.xlu1 %625 }
 0x10b   : > { %v9231_v33 = vpop.permute.xlu0 %623 }
 0x12e   : > { %v297_v36 = vpop.xlane.xlu0 %296 }
 0x12f   : > { %v312_v47 = vmul.f32 0.015625, %v297_v36 }
 0x131   : > { %v320_v49 = vadd.f32 1e-06, %v312_v47 }
 0x133   : > { %8543 = vrsqrt.f32 %v320_v49 }
 0x136   : > { %v300_v50 = vpop.xlane.xlu1 %299 }
 0x137   : > { %v313_v51 = vmul.f32 0.015625, %v300_v50 }
 0x139   : > { %v321_v52 = vadd.f32 1e-06, %v313_v51 }
 0x13b   : > { %8545 = vrsqrt.f32 %v321_v52 }
 0x13d   : > { %v8544_v53 = vpop.eup %8543 }
 0x13e   : > { %v342_v54 = vmul.f32 %v8544_v53, %v9185_v63 }
 0x140   : > { %v350_v55 = vmul.f32 %v342_v54, %v9171_v45 }
 0x142   : > { %6539 = vmatmul.mubr.msk.f32.gmra.mrb[8].mxu0 %vm282_vm0, %v350_v55 }
 0x143   : > { %488 = vmatprep.mubr.f32.mxu0 %v8914_v34 }
 0x145   : > { %v8546_v57 = vpop.eup %8545 }
 0x146   : > { %v343_v45 = vmul.f32 %v8546_v57, %v9185_v63 }
 0x148   : > { %v351_v10 = vmul.f32 %v343_v45, %v9177_v48 }
 0x14a   : > { %6540 = vmatmul.mubr.msk.f32.gmra.mrb[10].mxu0 %vm282_vm0, %v351_v10 }
 0x14b   : > { %494 = vmatprep.mubr.f32.mxu0 %v8914_v34 }
 0x1b4   : > { %v9239_v56 = vpop.f32.mrb[0].mxu0 }
 0x1b5   : > { %v462_v58 = vpop.f32.mrb[1].mxu0  ;;  %v859_v59 = vmul.f32 %v836_v1, %v9239_v56  ;;  %v755_v60 = vmul.f32 %v732_v17, %v9239_v56  ;;  %v651_v3 = vmul.f32 %v9090_v38, %v9239_v56  ;;  %v563_v4 = vmul.f32 %v540_v20, %v9239_v56 }
 0x1b6   : > { %v723_v51 = vmul.f32 %v9219_v27, %v9239_v56  ;;  %v827_v52 = vmul.f32 %v9211_v23, %v9239_v56 }
 0x1b7   : > { %875 = vrot.lane.b32.xlu0 %v859_v59, %s8917_s13  ;;  %771 = vrot.lane.b32.xlu1 %v755_v60, %s8916_s28 }
 0x1b8   : > { %v9247_v61 = vpop.f32.mrb[2].mxu0 }
 0x1b9   : > { %v468_v62 = vpop.f32.mrb[3].mxu0  ;;  %v756_v8 = vmul.f32 %v734_v19, %v9247_v61  ;;  %v860_v12 = vmul.f32 %v838_v15, %v9247_v61  ;;  %v564_v13 = vmul.f32 %v542_v22, %v9247_v61  ;;  %v652_v14 = vmul.f32 %v9085_v37, %v9247_v61  ;;  %v9309_v22 = vld [vmem:[%s9055_s16 + $0x38] sm:$0xff] }
 0x1ba   : > { %v9253_v5 = vpack.i.bf16 %v468_v62, %v462_v58  ;;  %v9255_v7 = vpack.c.bf16 %v468_v62, %v462_v58  ;;  %v828_v53 = vmul.f32 %v9217_v26, %v9247_v61  ;;  %v724_v54 = vmul.f32 %v9225_v30, %v9247_v61 }
 0x1bb   : > { %667 = vrot.lane.b32.xlu0 %v651_v3, %s8917_s13  ;;  %579 = vrot.lane.b32.xlu1 %v563_v4, %s8916_s28 }
 0x1bc   : > { %11373 = vst [vmem:[#allocation8_spill] sm:$0xff] %v9253_v5  ;;  %11374 = vst [vmem:[#allocation9_spill] sm:$0xff] %v9255_v7  ;;  %v9260_v9 = vpop.f32.mrb[4].mxu0 }
 0x1bd   : > { %v474_v11 = vpop.f32.mrb[5].mxu0  ;;  %v565_v15 = vmul.f32 %v544_v6, %v9260_v9  ;;  %v861_v17 = vmul.f32 %v9203_v16, %v9260_v9  ;;  %v757_v37 = vmul.f32 %v9207_v18, %v9260_v9  ;;  %v653_v20 = vmul.f32 %v9099_v39, %v9260_v9  ;;  %v9303_v6 = vld [vmem:[%s9055_s16 + $0x30] sm:$0xff] }
 0x1be   : > { %v280_v39 = vmul.f32 %v9303_v6, %v9303_v6  ;;  %v829_v30 = vmul.f32 %v9215_v25, %v9260_v9  ;;  %v643_v25 = vmul.f32 %v9223_v29, %v9239_v56 }
 0x1bf   : > { %773 = vrot.lane.b32.xlu0 %v756_v8, %s8916_s28  ;;  %877 = vrot.lane.b32.xlu1 %v860_v12, %s8917_s13 }
 0x1c0   : > { %v9267_v38 = vpop.f32.mrb[6].mxu0 }
 0x1c1   : > { %v480_v0 = vpop.f32.mrb[7].mxu0  ;;  %v862_v19 = vmul.f32 %v9205_v2, %v9267_v38  ;;  %v758_v16 = vmul.f32 %v9209_v21, %v9267_v38  ;;  %v654_v18 = vmul.f32 %v9108_v40, %v9267_v38  ;;  %v566_v2 = vmul.f32 %v9213_v24, %v9267_v38 }
 0x1c2   : > { %v9273_v48 = vpack.i.bf16 %v480_v0, %v474_v11  ;;  %v9275_v1 = vpack.c.bf16 %v480_v0, %v474_v11  ;;  %v301_v21 = vsel %vm282_vm0, %v280_v39, 0.0  ;;  %v281_v40 = vmul.f32 %v9309_v22, %v9309_v22 }
 0x1c3   : > { %581 = vrot.lane.b32.xlu0 %v564_v13, %s8916_s28  ;;  %669 = vrot.lane.b32.xlu1 %v652_v14, %s8917_s13  ;;  %v830_v8 = vmul.f32 %v9221_v28, %v9267_v38  ;;  %v725_v13 = vmul.f32 %v9227_v31, %v9260_v9  ;;  %v726_v14 = vmul.f32 %v9233_v35, %v9267_v38 }
 0x1c4   : > { %11375 = vst [vmem:[#allocation10_spill] sm:$0xff] %v9273_v48  ;;  %11376 = vst [vmem:[#allocation11_spill] sm:$0xff] %v9275_v1  ;;  %v304_v36 = vsel %vm282_vm0, %v281_v40, 0.0  ;;  %v644_v28 = vmul.f32 %v9229_v32, %v9247_v61  ;;  %v525_v40 = vmul.f32 %v9134_v42, %v9260_v9 }
 0x1c7   : > { %879 = vrot.lane.b32.xlu0 %v861_v17, %s8917_s13  ;;  %583 = vrot.lane.b32.xlu1 %v565_v15, %s8916_s28 }
 0x1cb   : > { %775 = vrot.lane.b32.xlu0 %v757_v37, %s8916_s28  ;;  %881 = vrot.lane.b32.xlu1 %v862_v19, %s8917_s13 }
 0x1cf   : > { %671 = vrot.lane.b32.xlu0 %v653_v20, %s8917_s13  ;;  %777 = vrot.lane.b32.xlu1 %v758_v16, %s8916_s28  ;;  %v645_v16 = vmul.f32 %v9231_v33, %v9260_v9  ;;  %v523_v33 = vmul.f32 %v9125_v41, %v9239_v56 }
 0x1d3   : > { %673 = vrot.lane.b32.xlu1 %v654_v18, %s8917_s13  ;;  %v646_v18 = vmul.f32 %v9235_v46, %v9267_v38 }
 0x1d7   : > { %585 = vrot.lane.b32.xlu1 %v566_v2, %s8916_s28 }
 0x1ee   : > { %302 = vadd.xlane.f32.xlu0 %v301_v21  ;;  %v524_v21 = vmul.f32 %v9143_v43, %v9247_v61 }
 0x1fb   : > { %305 = vadd.xlane.f32.xlu1 %v304_v36 }
 0x229   : > { %v772_v47 = vpop.permute.xlu1 %771  ;;  %v876_v24 = vpop.permute.xlu0 %875 }
 0x22a   : > { %v795_v58 = vsub.f32 %v723_v51, %v772_v47  ;;  %v899_v59 = vadd.f32 %v876_v24, %v827_v52  ;;  %v526_v47 = vmul.f32 %v9152_v44, %v9267_v38  ;;  %v9434_v38 = vpop.f32.mrb[8].mxu0 }
 0x22d   : > { %v580_v49 = vpop.permute.xlu1 %579  ;;  %v668_v50 = vpop.permute.xlu0 %667 }
 0x22e   : > { %v9350_v31 = vadd.f32 %v668_v50, %v643_v25  ;;  %v9386_v46 = vsub.f32 %v523_v33, %v580_v49  ;;  %v486_v49 = vpop.f32.mrb[9].mxu0 }
 0x231   : > { %v878_v55 = vpop.permute.xlu1 %877  ;;  %v774_v57 = vpop.permute.xlu0 %773 }
 0x232   : > { %v900_v60 = vadd.f32 %v878_v55, %v828_v53  ;;  %v796_v45 = vsub.f32 %v724_v54, %v774_v57  ;;  %v9440_v54 = vpop.f32.mrb[10].mxu0 }
 0x233   : > { %v492_v55 = vpop.f32.mrb[11].mxu0 }
 0x234   : > { %v9322_v62 = vpack.i.bf16 %v900_v60, %v899_v59  ;;  %v9324_v3 = vpack.i.bf16 %v796_v45, %v795_v58  ;;  %v9442_v57 = vpack.i.bf16 %v492_v55, %v486_v49  ;;  %v9444_v58 = vpack.c.bf16 %v492_v55, %v486_v49 }
 0x235   : > { %v670_v27 = vpop.permute.xlu1 %669  ;;  %v582_v4 = vpop.permute.xlu0 %581 }
 0x236   : > { %8316 = vrot.lane.b32.xlu0 %v9322_v62, %s8917_s13  ;;  %v9352_v35 = vadd.f32 %v670_v27, %v644_v28  ;;  %v9396_v41 = vsub.f32 %v524_v21, %v582_v4  ;;  %11377 = vst [vmem:[#allocation12_spill] sm:$0xff] %v9442_v57 }
 0x239   : > { %v584_v23 = vpop.permute.xlu1 %583  ;;  %v880_v26 = vpop.permute.xlu0 %879 }
 0x23a   : > { %8326 = vrot.lane.b32.xlu0 %v9322_v62, %s11307_s10  ;;  %v901_v11 = vadd.f32 %v880_v26, %v829_v30  ;;  %v9398_v56 = vsub.f32 %v525_v40, %v584_v23 }
 0x23d   : > { %v882_v10 = vpop.permute.xlu1 %881  ;;  %v776_v0 = vpop.permute.xlu0 %775 }
 0x23e   : > { %v902_v12 = vadd.f32 %v882_v10, %v830_v8  ;;  %8331 = vrot.lane.b32.xlu0 %v9324_v3, %s8915_s19  ;;  %v797_v37 = vsub.f32 %v725_v13, %v776_v0 }
 0x240   : > { %v9340_v15 = vpack.i.bf16 %v902_v12, %v901_v11 }
 0x241   : > { %v778_v17 = vpop.permute.xlu1 %777  ;;  %v672_v29 = vpop.permute.xlu0 %671 }
 0x242   : > { %v798_v19 = vsub.f32 %v726_v14, %v778_v17  ;;  %8336 = vrot.lane.b32.xlu0 %v9340_v15, %s11307_s10  ;;  %8321 = vrot.lane.b32.xlu1 %v9340_v15, %s8917_s13  ;;  %v9372_v2 = vadd.f32 %v672_v29, %v645_v16 }
 0x244   : > { %v9354_v20 = vpack.i.bf16 %v798_v19, %v797_v37 }
 0x245   : > { %v674_v32 = vpop.permute.xlu1 %673 }
 0x246   : > { %924 = vrot.lane.b32.xlu0 %v9352_v35, %s8916_s28  ;;  %922 = vrot.lane.b32.xlu1 %v9350_v31, %s8916_s28  ;;  %v9374_v39 = vadd.f32 %v674_v32, %v646_v18 }
 0x249   : > { %v586_v36 = vpop.permute.xlu1 %585 }
 0x24a   : > { %8341 = vrot.lane.b32.xlu0 %v9324_v3, %s11305_s14  ;;  %1337 = vrot.lane.b32.xlu1 %v9350_v31, %s8920_s15  ;;  %v9406_v42 = vsub.f32 %v526_v47, %v586_v36 }
 0x24e   : > { %1339 = vrot.lane.b32.xlu0 %v9352_v35, %s8920_s15  ;;  %8346 = vrot.lane.b32.xlu1 %v9354_v20, %s8915_s19 }
 0x252   : > { %928 = vrot.lane.b32.xlu0 %v9374_v39, %s8916_s28  ;;  %926 = vrot.lane.b32.xlu1 %v9372_v2, %s8916_s28 }
 0x256   : > { %1341 = vrot.lane.b32.xlu0 %v9372_v2, %s8920_s15  ;;  %8351 = vrot.lane.b32.xlu1 %v9354_v20, %s11305_s14  ;;  %s11315_s14 = smov 104  }
 0x25a   : > { %1454 = vrot.lane.b32.xlu0 %v9386_v46, %s11309_s12  ;;  %1343 = vrot.lane.b32.xlu1 %v9374_v39, %s8920_s15 }
 0x25e   : > { %1458 = vrot.lane.b32.xlu0 %v9398_v56, %s11309_s12  ;;  %1456 = vrot.lane.b32.xlu1 %v9396_v41, %s11309_s12 }
 0x262   : > { %8356 = vrot.lane.b32.xlu0 %v9322_v62, %s11301_s9  ;;  %1460 = vrot.lane.b32.xlu1 %v9406_v42, %s11309_s12  ;;  %s11434_s12 = smov 120  }
 0x266   : > { %8366 = vrot.lane.b32.xlu0 %v9324_v3, %s11299_s11  ;;  %8361 = vrot.lane.b32.xlu1 %v9340_v15, %s11301_s9 }
 0x26a   : > { %1959 = vrot.lane.b32.xlu0 %v9352_v35, %s8924_s17  ;;  %1957 = vrot.lane.b32.xlu1 %v9350_v31, %s8924_s17 }
 0x26e   : > { %1961 = vrot.lane.b32.xlu0 %v9372_v2, %s8924_s17  ;;  %8371 = vrot.lane.b32.xlu1 %v9354_v20, %s11299_s11  ;;  %s11449_s11 = smov 48  }
 0x272   : > { %2074 = vrot.lane.b32.xlu0 %v9386_v46, %s11303_s18  ;;  %1963 = vrot.lane.b32.xlu1 %v9374_v39, %s8924_s17 }
 0x276   : > { %2078 = vrot.lane.b32.xlu0 %v9398_v56, %s11303_s18  ;;  %2076 = vrot.lane.b32.xlu1 %v9396_v41, %s11303_s18 }
 0x27a   : > { %2080 = vrot.lane.b32.xlu1 %v9406_v42, %s11303_s18 }
 0x27b   : > { %v303_v43 = vpop.xlane.xlu0 %302 }
 0x27c   : > { %v314_v44 = vmul.f32 0.015625, %v303_v43 }
 0x27e   : > { %v322_v61 = vadd.f32 1e-06, %v314_v44 }
 0x280   : > { %8547 = vrsqrt.f32 %v322_v61 }
 0x288   : > { %v306_v9 = vpop.xlane.xlu1 %305 }
 0x289   : > { %v315_v24 = vmul.f32 0.015625, %v306_v9 }
 0x28a   : > { %v8548_v50 = vpop.eup %8547 }
 0x28b   : > { %v323_v51 = vadd.f32 1e-06, %v315_v24  ;;  %v344_v52 = vmul.f32 %v8548_v50, %v9185_v63 }
 0x28d   : > { %8549 = vrsqrt.f32 %v323_v51  ;;  %v352_v53 = vmul.f32 %v344_v52, %v9303_v6 }
 0x28f   : > { %6541 = vmatmul.mubr.msk.f32.gmra.mrb[12].mxu0 %vm282_vm0, %v352_v53 }
 0x290   : > { %500 = vmatprep.mubr.f32.mxu0 %v8914_v34 }
 0x297   : > { %v8550_v59 = vpop.eup %8549 }
 0x298   : > { %v345_v60 = vmul.f32 %v8550_v59, %v9185_v63 }
 0x29a   : > { %v353_v45 = vmul.f32 %v345_v60, %v9309_v22 }
 0x29c   : > { %6542 = vmatmul.mubr.msk.f32.gmra.mrb[14].mxu0 %vm282_vm0, %v353_v45 }
 0x2a8   : > { %v8317_v6 = vpop.permute.xlu0 %8316 }
 0x2a9   : > { %v8319_v27 = vunpack.i.h.bf16 %v8317_v6  ;;  %v8318_v4 = vunpack.i.l.bf16 %v8317_v6 }
 0x2ab   : > { %v9455_v23 = vpack.c.bf16 %v8319_v27, %v8318_v4 }
 0x2ac   : > { %v8327_v26 = vpop.permute.xlu0 %8326 }
 0x2ad   : > { %v8329_v30 = vunpack.i.h.bf16 %v8327_v26  ;;  %v8328_v8 = vunpack.i.l.bf16 %v8327_v26  ;;  %7760 = vmatprep.subr.msk.bf16.mxu1 %vm9451_vm2, %v9455_v23 }
 0x2ae   : > { %7763 = vmatpush3.bf16.xpose.msk.msra.mxu1 %vm9451_vm2, %v9455_v23 }
 0x2af   : > { %v9463_v63 = vpack.c.bf16 %v8329_v30, %v8328_v8 }
 0x2b0   : > { %v8332_v22 = vpop.permute.xlu0 %8331 }
 0x2b1   : > { %7792 = vmatprep.subr.msk.bf16.mxu0 %vm9451_vm2, %v9463_v63  ;;  %v8334_v10 = vunpack.i.h.bf16 %v8332_v22  ;;  %v8333_v11 = vunpack.i.l.bf16 %v8332_v22 }
 0x2b2   : > { %7795 = vmatpush3.bf16.xpose.msk.msra.mxu0 %vm9451_vm2, %v9463_v63 }
 0x2b3   : > { %v9475_v32 = vpack.c.bf16 %v8334_v10, %v8333_v11 }
 0x2b4   : > { %v8322_v12 = vpop.permute.xlu1 %8321  ;;  %v8337_v13 = vpop.permute.xlu0 %8336 }
 0x2b5   : > { %v8324_v14 = vunpack.i.h.bf16 %v8322_v12  ;;  %v8323_v0 = vunpack.i.l.bf16 %v8322_v12  ;;  %v8339_v25 = vunpack.i.h.bf16 %v8337_v13  ;;  %v8338_v28 = vunpack.i.l.bf16 %v8337_v13 }
 0x2b7   : > { %v9471_v17 = vpack.c.bf16 %v8324_v14, %v8323_v0  ;;  %v9473_v37 = vpack.c.bf16 %v8339_v25, %v8338_v28 }
 0x2b8   : > { %v923_v19 = vpop.permute.xlu1 %922  ;;  %v925_v29 = vpop.permute.xlu0 %924 }
 0x2b9   : > { %11380 = vst [vmem:[#allocation13_spill] sm:$0xff] %v9473_v37  ;;  %7766 = vmatprep.subr.msk.bf16.mxu1 %vm9451_vm2, %v9471_v17  ;;  %7166 = vmatprep.mubr.msk.f32.mxu1 %vm942_vm1, %v923_v19 }
 0x2ba   : > { %7798 = vmatprep.subr.msk.bf16.mxu0 %vm9451_vm2, %v9473_v37  ;;  %7769 = vmatpush3.bf16.xpose.msk.msra.mxu1 %vm9451_vm2, %v9471_v17 }
 0x2bb   : > { %7801 = vmatpush3.bf16.xpose.msk.msra.mxu0 %vm9451_vm2, %v9473_v37  ;;  %7772 = vmatprep.subr.msk.bf16.mxu1 %vm9451_vm2, %v9475_v32 }
 0x2bc   : > { %v1338_v16 = vpop.permute.xlu1 %1337  ;;  %v8342_v18 = vpop.permute.xlu0 %8341 }
 0x2bd   : > { %v8344_v33 = vunpack.i.h.bf16 %v8342_v18  ;;  %v8343_v21 = vunpack.i.l.bf16 %v8342_v18  ;;  %7208 = vmatprep.mubr.msk.f32.mxu0 %vm942_vm1, %v1338_v16 }
 0x2bf   : > { %v9494_v40 = vpack.c.bf16 %v8344_v33, %v8343_v21 }
 0x2c0   : > { %v8347_v36 = vpop.permute.xlu1 %8346  ;;  %v1340_v47 = vpop.permute.xlu0 %1339 }
 0x2c1   : > { %11381 = vst [vmem:[#allocation14_spill] sm:$0xff] %v9494_v40  ;;  %v8349_v43 = vunpack.i.h.bf16 %v8347_v36  ;;  %v8348_v44 = vunpack.i.l.bf16 %v8347_v36  ;;  %7167 = vmatmul.mubr.msk.f32.vlgmr.msra.gmra.mrb[0].mxu1 %vm942_vm1, %v925_v29  ;;  %7804 = vmatprep.subr.msk.bf16.mxu0 %vm9451_vm2, %v9494_v40 }
 0x2c2   : > { %7209 = vmatmul.mubr.msk.f32.vlgmr.msra.gmra.mrb[16].mxu0 %vm942_vm1, %v1340_v47  ;;  %7775 = vmatpush3.bf16.xpose.msk.msra.mxu1 %vm9451_vm2, %v9475_v32 }
 0x2c3   : > { %v9504_v61 = vpack.c.bf16 %v8349_v43, %v8348_v44  ;;  %7807 = vmatpush3.bf16.xpose.msk.msra.mxu0 %vm9451_vm2, %v9494_v40 }
 0x2c4   : > { %v927_v9 = vpop.permute.xlu1 %926  ;;  %v929_v24 = vpop.permute.xlu0 %928 }
 0x2c5   : > { %7169 = vmatprep.mubr.msk.f32.mxu1 %vm942_vm1, %v927_v9  ;;  %7778 = vmatprep.subr.msk.bf16.mxu1 %vm9451_vm2, %v9504_v61 }
 0x2c6   : > { %7170 = vmatmul.mubr.msk.f32.gmra.mrb[2].mxu1 %vm942_vm1, %v929_v24 }
 0x2c7   : > { %7180 = vmatprep.mubr.msk.f32.mxu1 %vm942_vm1, %v9386_v46 }
 0x2c8   : > { %v8352_v49 = vpop.permute.xlu1 %8351  ;;  %v1342_v50 = vpop.permute.xlu0 %1341 }
 0x2c9   : > { %v8354_v51 = vunpack.i.h.bf16 %v8352_v49  ;;  %v8353_v52 = vunpack.i.l.bf16 %v8352_v49  ;;  %7211 = vmatprep.mubr.msk.f32.mxu0 %vm942_vm1, %v1342_v50 }
 0x2ca   : > { %7781 = vmatpush3.bf16.xpose.msk.msra.mxu1 %vm9451_vm2, %v9504_v61 }
 0x2cb   : > { %v9520_v53 = vpack.c.bf16 %v8354_v51, %v8353_v52  ;;  %7783 = vmatprep.subr.bf16.mxu1 %v9255_v7  ;;  %v907_v52 = vlaneseq }
 0x2cc   : > { %v1344_v55 = vpop.permute.xlu1 %1343  ;;  %v1455_v59 = vpop.permute.xlu0 %1454 }
 0x2cd   : > { %11382 = vst [vmem:[#allocation15_spill] sm:$0xff] %v9520_v53  ;;  %7212 = vmatmul.mubr.msk.f32.gmra.mrb[18].mxu0 %vm942_vm1, %v1344_v55  ;;  %7810 = vmatprep.subr.msk.bf16.mxu0 %vm9451_vm2, %v9520_v53  ;;  %v908_v55 = vshrl.u32 %v907_v52, 7 }
 0x2ce   : > { %7813 = vmatpush3.bf16.xpose.msk.msra.mxu0 %vm9451_vm2, %v9520_v53  ;;  %7222 = vmatprep.mubr.msk.f32.mxu0 %vm942_vm1, %v1455_v59 }
 0x2cf   : > { %v909_v59 = vadd.s32 8, %v908_v55 }
 0x2d0   : > { %v1457_v60 = vpop.permute.xlu1 %1456  ;;  %v1459_v45 = vpop.permute.xlu0 %1458 }
 0x2d1   : > { %7181 = vmatmul.mubr.msk.f32.vlgmr.msra.gmra.mrb[0].mxu1 %vm942_vm1, %v9396_v41 }
 0x2d2   : > { %7183 = vmatprep.mubr.msk.f32.mxu1 %vm942_vm1, %v9398_v56  ;;  %7785 = vmatpush3.bf16.msra.mxu1 %v9255_v7 }
 0x2d3   : > { %7787 = vmatprep.subr.bf16.mxu1 %v9275_v1 }
 0x2d4   : > { %v1461_v6 = vpop.permute.xlu1 %1460  ;;  %v8357_v27 = vpop.permute.xlu0 %8356 }
 0x2d5   : > { %v8359_v4 = vunpack.i.h.bf16 %v8357_v27  ;;  %v8358_v26 = vunpack.i.l.bf16 %v8357_v27  ;;  %7184 = vmatmul.mubr.msk.f32.gmra.mrb[2].mxu1 %vm942_vm1, %v9406_v42  ;;  %7223 = vmatmul.mubr.msk.f32.vlgmr.msra.gmra.mrb[16].mxu0 %vm942_vm1, %v1457_v60  ;;  %v913_v60 = vand.u32 127, %v907_v52 }
 0x2d6   : > { %7789 = vmatpush3.bf16.msra.mxu1 %v9275_v1  ;;  %7225 = vmatprep.mubr.msk.f32.mxu0 %vm942_vm1, %v1459_v45 }
 0x2d7   : > { %v9542_v30 = vpack.c.bf16 %v8359_v4, %v8358_v26  ;;  %vm9606_vm3 = vcmp.le.s32.totalorder %v913_v60, %v909_v59  ;;  %vm9610_vm4 = vcmp.le.s32.totalorder %v913_v60, %v908_v55  ;;  %v911_v26 = vadd.s32 24, %v908_v55 }
 0x2d8   : > { %v8362_v8 = vpop.permute.xlu1 %8361  ;;  %v8367_v11 = vpop.permute.xlu0 %8366 }
 0x2d9   : > { %11383 = vst [vmem:[#allocation16_spill] sm:$0xff] %v9542_v30  ;;  %v8364_v22 = vunpack.i.h.bf16 %v8362_v8  ;;  %v8363_v10 = vunpack.i.l.bf16 %v8362_v8  ;;  %7226 = vmatmul.mubr.msk.f32.gmra.mrb[18].mxu0 %vm942_vm1, %v1461_v6  ;;  %7832 = vmatprep.subr.msk.bf16.mxu0 %vm9451_vm2, %v9542_v30  ;;  %v8369_v14 = vunpack.i.h.bf16 %v8367_v11  ;;  %v8368_v0 = vunpack.i.l.bf16 %v8367_v11 }
 0x2da   : > { %7835 = vmatpush3.bf16.xpose.msk.msra.mxu0 %vm9451_vm2, %v9542_v30  ;;  %vm9622_vm6 = vcmp.le.s32.totalorder %v913_v60, %v911_v26 }
 0x2db   : > { %v9551_v12 = vpack.c.bf16 %v8364_v22, %v8363_v10  ;;  %v9557_v25 = vpack.c.bf16 %v8369_v14, %v8368_v0 }
 0x2dc   : > { %v1958_v13 = vpop.permute.xlu1 %1957  ;;  %v1960_v28 = vpop.permute.xlu0 %1959 }
 0x2dd   : > { %11384 = vst [vmem:[#allocation17_spill] sm:$0xff] %v9551_v12  ;;  %7838 = vmatprep.subr.msk.bf16.mxu0 %vm9451_vm2, %v9551_v12  ;;  %7270 = vmatprep.mubr.msk.f32.mxu0 %vm942_vm1, %v1958_v13  ;;  %11385 = vst [vmem:[#allocation18_spill] sm:$0xff] %v9557_v25 }
 0x2e0   : > { %v8372_v19 = vpop.permute.xlu1 %8371  ;;  %v1962_v18 = vpop.permute.xlu0 %1961 }
 0x2e1   : > { %v8374_v29 = vunpack.i.h.bf16 %v8372_v19  ;;  %v8373_v16 = vunpack.i.l.bf16 %v8372_v19 }
 0x2e2   : > { %7841 = vmatpush3.bf16.xpose.msk.msra.mxu0 %vm9451_vm2, %v9551_v12 }
 0x2e3   : > { %7844 = vmatprep.subr.msk.bf16.mxu0 %vm9451_vm2, %v9557_v25  ;;  %v9565_v33 = vpack.c.bf16 %v8374_v29, %v8373_v16 }
 0x2e4   : > { %v1964_v21 = vpop.permute.xlu1 %1963  ;;  %v2075_v36 = vpop.permute.xlu0 %2074 }
 0x2e5   : > { %11386 = vst [vmem:[#allocation19_spill] sm:$0xff] %v9565_v33 }
 0x2e8   : > { %v2077_v47 = vpop.permute.xlu1 %2076  ;;  %v2079_v43 = vpop.permute.xlu0 %2078 }
 0x2e9   : > { %7271 = vmatmul.mubr.msk.f32.vlgmr.msra.gmra.mrb[20].mxu0 %vm942_vm1, %v1960_v28  ;;  %v910_v28 = vadd.s32 16, %v908_v55 }
 0x2ea   : > { %7273 = vmatprep.mubr.msk.f32.mxu0 %vm942_vm1, %v1962_v18  ;;  %7847 = vmatpush3.bf16.xpose.msk.msra.mxu0 %vm9451_vm2, %v9557_v25 }
 0x2eb   : > { %7850 = vmatprep.subr.msk.bf16.mxu0 %vm9451_vm2, %v9565_v33  ;;  %vm9632_vm7 = vcmp.le.s32.totalorder %v913_v60, %v910_v28 }
 0x2ec   : > { %v2081_v44 = vpop.permute.xlu1 %2080 }
 0x2ed   : > { %7274 = vmatmul.mubr.msk.f32.gmra.mrb[22].mxu0 %vm942_vm1, %v1964_v21 }
 0x2ee   : > { %7284 = vmatprep.mubr.msk.f32.mxu0 %vm942_vm1, %v2075_v36 }
 0x2f2   : > { %7853 = vmatpush3.bf16.xpose.msk.msra.mxu0 %vm9451_vm2, %v9565_v33 }
 0x2f3   : > { %7904 = vmatprep.subr.msk.bf16.mxu0 %vm9451_vm2, %v9455_v23 }
 0x2f9   : > { %7285 = vmatmul.mubr.msk.f32.vlgmr.msra.gmra.mrb[20].mxu0 %vm942_vm1, %v2077_v47 }
 0x2fa   : > { %7287 = vmatprep.mubr.msk.f32.mxu0 %vm942_vm1, %v2079_v43  ;;  %7907 = vmatpush3.bf16.xpose.msk.msra.mxu0 %vm9451_vm2, %v9455_v23 }
 0x2fb   : > { %7910 = vmatprep.subr.msk.bf16.mxu0 %vm9451_vm2, %v9471_v17 }
 0x2fd   : > { %7288 = vmatmul.mubr.msk.f32.gmra.mrb[22].mxu0 %vm942_vm1, %v2081_v44 }
 0x302   : > { %7913 = vmatpush3.bf16.xpose.msk.msra.mxu0 %vm9451_vm2, %v9471_v17 }
 0x303   : > { %7916 = vmatprep.subr.msk.bf16.mxu0 %vm9451_vm2, %v9475_v32 }
 0x362   : > { %v9598_v9 = vpop.f32.mrb[12].mxu0 }
 0x363   : > { %v498_v24 = vpop.f32.mrb[13].mxu0 }
 0x36f   : > { %v9600_v49 = vpop.f32.mrb[14].mxu0 }
 0x370   : > { %v504_v23 = vpop.f32.mrb[15].mxu0 }
 0x371   : > { %v9602_v50 = vpack.i.bf16 %v504_v23, %v498_v24  ;;  %v9604_v51 = vpack.c.bf16 %v504_v23, %v498_v24 }
 0x373   : > { %11387 = vst [vmem:[#allocation20_spill] sm:$0xff] %v9602_v50 }
 0x3a4   : > { %v7182_v6 = vpop.f32.mrb[0].mxu1 }
 0x3a5   : > { %v1162_v27 = vsel %vm9606_vm3, %v7182_v6, -1e+30  ;;  %v1142_v4 = vpop.f32.mrb[1].mxu1 }
 0x3a6   : > { %v1161_v8 = vsel %vm9610_vm4, %v1142_v4, -1e+30  ;;  %v1169_v22 = vsel %vm1165_vm5, %v1162_v27, -inf }
 0x3a7   : > { %1170 = vmax.xlane.f32.xlu1 %v1169_v22  ;;  %v1166_v10 = vsel %vm1165_vm5, %v1161_v8, -inf }
 0x3a8   : > { %v7224_v11 = vpop.f32.mrb[16].mxu0  ;;  %1167 = vmax.xlane.f32.xlu0 %v1166_v10  ;;  %v7185_v13 = vpop.f32.mrb[2].mxu1 }
 0x3a9   : > { %v1572_v14 = vsel %vm9606_vm3, %v7224_v11, -1e+30  ;;  %v1152_v19 = vpop.f32.mrb[3].mxu1  ;;  %v1552_v29 = vpop.f32.mrb[17].mxu0  ;;  %v1164_v36 = vsel %vm9622_vm6, %v7185_v13, -1e+30 }
 0x3aa   : > { %v1571_v16 = vsel %vm9610_vm4, %v1552_v29, -1e+30  ;;  %v1578_v18 = vsel %vm1165_vm5, %v1572_v14, -inf  ;;  %v1175_v52 = vsel %vm1165_vm5, %v1164_v36, -inf  ;;  %v1163_v55 = vsel %vm9632_vm7, %v1152_v19, -1e+30 }
 0x3ab   : > { %1579 = vmax.xlane.f32.xlu1 %v1578_v18  ;;  %v1575_v21 = vsel %vm1165_vm5, %v1571_v16, -inf  ;;  %v1172_v59 = vsel %vm1165_vm5, %v1163_v55, -inf }
 0x3ac   : > { %v7227_v47 = vpop.f32.mrb[18].mxu0  ;;  %1576 = vmax.xlane.f32.xlu0 %v1575_v21 }
 0x3ad   : > { %v1574_v44 = vsel %vm9622_vm6, %v7227_v47, -1e+30  ;;  %v1562_v24 = vpop.f32.mrb[19].mxu0 }
 0x3ae   : > { %v1584_v23 = vsel %vm1165_vm5, %v1574_v44, -inf  ;;  %v1573_v60 = vsel %vm9632_vm7, %v1562_v24, -1e+30 }
 0x3af   : > { %1585 = vmax.xlane.f32.xlu1 %v1584_v23  ;;  %v1581_v6 = vsel %vm1165_vm5, %v1573_v60, -inf }
 0x3b0   : > { %1176 = vmax.xlane.f32.xlu0 %v1175_v52 }
 0x3b4   : > { %1173 = vmax.xlane.f32.xlu0 %v1172_v59 }
 0x3b8   : > { %1582 = vmax.xlane.f32.xlu0 %v1581_v6 }
 0x3c0   : > { %8381 = vrot.lane.b32.xlu1 %v9273_v48, %s11303_s18 }
 0x3cc   : > { %v7286_v4 = vpop.f32.mrb[20].mxu0 }
 0x3cd   : > { %v2172_v26 = vpop.f32.mrb[21].mxu0  ;;  %v9652_v11 = vsel %vm9606_vm3, %v7286_v4, -1e+30 }
 0x3ce   : > { %8376 = vrot.lane.b32.xlu0 %v9253_v5, %s11303_s18  ;;  %v2198_v13 = vsel %vm1165_vm5, %v9652_v11, -inf  ;;  %v9664_v29 = vsel %vm9610_vm4, %v2172_v26, -1e+30  ;;  %s11453_s18 = smov 104  }
 0x3cf   : > { %v2195_v18 = vsel %vm1165_vm5, %v9664_v29, -inf }
 0x3d0   : > { %v7289_v22 = vpop.f32.mrb[22].mxu0 }
 0x3d1   : > { %v2182_v10 = vpop.f32.mrb[23].mxu0  ;;  %v9658_v28 = vsel %vm9622_vm6, %v7289_v22, -1e+30 }
 0x3d2   : > { %v2204_v19 = vsel %vm1165_vm5, %v9658_v28, -inf  ;;  %v9670_v21 = vsel %vm9632_vm7, %v2182_v10, -1e+30 }
 0x3d3   : > { %v2201_v47 = vsel %vm1165_vm5, %v9670_v21, -inf }
 0x3e4   : > { %2199 = vmax.xlane.f32.xlu1 %v2198_v13 }
 0x3e8   : > { %2205 = vmax.xlane.f32.xlu1 %v2204_v19 }
 0x3ed   : > { %2196 = vmax.xlane.f32.xlu0 %v2195_v18 }
 0x3f1   : > { %2202 = vmax.xlane.f32.xlu0 %v2201_v47 }
 0x434   : > { %v9674_v24 = vpop.xlane.xlu1 %1170 }
 0x435   : > { %v11282_v23 = vmax.f32 %v9674_v24, -1e+30  ;;  %v9677_v52 = vpop.xlane.xlu0 %1167 }
 0x436   : > { %v11283_v59 = vmax.f32 %v9677_v52, -1e+30 }
 0x437   : > { %v1195_v6 = vsub.f32 %v1162_v27, %v11282_v23 }
 0x438   : > { %v1194_v4 = vsub.f32 %v1161_v8, %v11283_v59  ;;  %v9684_v26 = vpop.xlane.xlu1 %1579 }
 0x439   : > { %v1200_v22 = vmul.f32 1.442695, %v1195_v6  ;;  %v11289_v10 = vmax.f32 %v9684_v26, -1e+30  ;;  %v9687_v13 = vpop.xlane.xlu0 %1576 }
 0x43a   : > { %v1198_v19 = vmul.f32 1.442695, %v1194_v4  ;;  %v11288_v18 = vmax.f32 %v9687_v13, -1e+30 }
 0x43b   : > { %v1604_v47 = vsub.f32 %v1572_v14, %v11289_v10  ;;  %8551 = vpow2.f32 %v1200_v22 }
 0x43c   : > { %v1603_v27 = vsub.f32 %v1571_v16, %v11288_v18  ;;  %v9694_v23 = vpop.xlane.xlu1 %1585  ;;  %8553 = vpow2.f32 %v1198_v19 }
 0x43d   : > { %v1609_v8 = vmul.f32 1.442695, %v1604_v47  ;;  %v11290_v59 = vmax.f32 %v9694_v23, -1e+30  ;;  %v9697_v6 = vpop.xlane.xlu0 %1176 }
 0x43e   : > { %v1607_v33 = vmul.f32 1.442695, %v1603_v27  ;;  %v11292_v4 = vmax.f32 %v9697_v6, -1e+30 }
 0x43f   : > { %v1606_v25 = vsub.f32 %v1574_v44, %v11290_v59  ;;  %8555 = vpow2.f32 %v1609_v8 }
 0x440   : > { %v1197_v14 = vsub.f32 %v1164_v36, %v11292_v4  ;;  %8557 = vpow2.f32 %v1607_v33 }
 0x441   : > { %v1613_v22 = vmul.f32 1.442695, %v1606_v25  ;;  %v9704_v16 = vpop.xlane.xlu0 %1173  ;;  %v8382_v25 = vpop.permute.xlu1 %8381 }
 0x442   : > { %v11291_v47 = vmax.f32 %v9704_v16, -1e+30  ;;  %v1204_v18 = vmul.f32 1.442695, %v1197_v14  ;;  %v8384_v4 = vunpack.i.h.bf16 %v8382_v25 }
 0x443   : > { %8559 = vpow2.f32 %v1613_v22 }
 0x444   : > { %v1196_v19 = vsub.f32 %v1163_v55, %v11291_v47  ;;  %8561 = vpow2.f32 %v1204_v18 }
 0x445   : > { %v9709_v27 = vpop.xlane.xlu0 %1582  ;;  %v8552_v10 = vpop.eup %8551 }
 0x446   : > { %v11298_v44 = vmax.f32 %v9709_v27, -1e+30  ;;  %v1202_v8 = vmul.f32 1.442695, %v1196_v19  ;;  %v1213_v59 = vsel %vm1165_vm5, %v8552_v10, 0.0  ;;  %v8554_v36 = vpop.eup %8553  ;;  %v8383_v19 = vunpack.i.l.bf16 %v8382_v25 }
 0x447   : > { %1214 = vadd.xlane.f32.xlu1 %v1213_v59  ;;  %7194 = vmatprep.mubr.msk.f32.mxu1 %vm1165_vm5, %v8554_v36 }
 0x448   : > { %v1605_v33 = vsub.f32 %v1573_v60, %v11298_v44  ;;  %8563 = vpow2.f32 %v1202_v8  ;;  %7195 = vmatmul.mubr.msk.f32.vlgmr.msra.gmra.mrb[4].mxu1 %vm1165_vm5, %v8552_v10  ;;  %v9721_v44 = vpack.c.bf16 %v8384_v4, %v8383_v19  ;;  %v1210_v10 = vsel %vm1165_vm5, %v8554_v36, 0.0 }
 0x449   : > { %v8377_v14 = vpop.permute.xlu0 %8376  ;;  %v8556_v22 = vpop.eup %8555 }
 0x44a   : > { %v1611_v55 = vmul.f32 1.442695, %v1605_v33  ;;  %v8379_v47 = vunpack.i.h.bf16 %v8377_v14  ;;  %v8378_v12 = vunpack.i.l.bf16 %v8377_v14  ;;  %v1622_v30 = vsel %vm1165_vm5, %v8556_v22, 0.0  ;;  %v8558_v18 = vpop.eup %8557  ;;  %11397 = vst [vmem:[#allocation22_spill] sm:$0xff] %v9721_v44 }
 0x44b   : > { %1623 = vadd.xlane.f32.xlu0 %v1622_v30  ;;  %v1619_v60 = vsel %vm1165_vm5, %v8558_v18, 0.0 }
 0x44c   : > { %8565 = vpow2.f32 %v1611_v55  ;;  %v9718_v57 = vpack.c.bf16 %v8379_v47, %v8378_v12  ;;  %1620 = vadd.xlane.f32.xlu1 %v1619_v60 }
 0x44d   : > { %v8560_v59 = vpop.eup %8559 }
 0x44e   : > { %11396 = vst [vmem:[#allocation21_spill] sm:$0xff] %v9718_v57  ;;  %7815 = vmatprep.subr.bf16.mxu1 %v9718_v57  ;;  %v1628_v8 = vsel %vm1165_vm5, %v8560_v59, 0.0  ;;  %v8562_v30 = vpop.eup %8561 }
 0x44f   : > { %1211 = vadd.xlane.f32.xlu0 %v1210_v10  ;;  %7817 = vmatpush3.bf16.msra.mxu1 %v9718_v57  ;;  %v1219_v4 = vsel %vm1165_vm5, %v8562_v30, 0.0 }
 0x450   : > { %7819 = vmatprep.subr.bf16.mxu1 %v9721_v44  ;;  %1629 = vadd.xlane.f32.xlu1 %v1628_v8 }
 0x452   : > { %v8564_v12 = vpop.eup %8563 }
 0x453   : > { %7821 = vmatpush3.bf16.msra.mxu1 %v9721_v44  ;;  %7197 = vmatprep.mubr.msk.f32.mxu1 %vm1165_vm5, %v8564_v12  ;;  %v1216_v25 = vsel %vm1165_vm5, %v8564_v12, 0.0 }
 0x454   : > { %1220 = vadd.xlane.f32.xlu1 %v1219_v4  ;;  %7198 = vmatmul.mubr.msk.f32.gmra.mrb[6].mxu1 %vm1165_vm5, %v8562_v30 }
 0x455   : > { %7236 = vmatprep.mubr.msk.f32.mxu1 %vm1165_vm5, %v8558_v18 }
 0x456   : > { %v8566_v47 = vpop.eup %8565 }
 0x457   : > { %v1625_v36 = vsel %vm1165_vm5, %v8566_v47, 0.0 }
 0x458   : > { %1626 = vadd.xlane.f32.xlu0 %v1625_v36  ;;  %7237 = vmatmul.mubr.msk.f32.vlgmr.msra.gmra.mrb[8].mxu1 %vm1165_vm5, %v8556_v22 }
 0x459   : > { %7239 = vmatprep.mubr.msk.f32.mxu1 %vm1165_vm5, %v8566_v47 }
 0x45c   : > { %1217 = vadd.xlane.f32.xlu0 %v1216_v25  ;;  %7240 = vmatmul.mubr.msk.f32.gmra.mrb[10].mxu1 %vm1165_vm5, %v8560_v59 }
 0x465   : > { %8391 = vrot.lane.b32.xlu1 %v9273_v48, %s8916_s28 }
 0x471   : > { %v9740_v33 = vpop.xlane.xlu1 %2199 }
 0x472   : > { %8386 = vrot.lane.b32.xlu0 %v9253_v5, %s8916_s28  ;;  %v11320_v55 = vmax.f32 %v9740_v33, -1e+30 }
 0x474   : > { %v2224_v18 = vsub.f32 %v9652_v11, %v11320_v55 }
 0x475   : > { %v9744_v14 = vpop.xlane.xlu1 %2205 }
 0x476   : > { %v11318_v22 = vmax.f32 %v9744_v14, -1e+30  ;;  %v2229_v30 = vmul.f32 1.442695, %v2224_v18 }
 0x478   : > { %v2226_v59 = vsub.f32 %v9658_v28, %v11318_v22 }
 0x47a   : > { %v9748_v19 = vpop.xlane.xlu0 %2196  ;;  %v2233_v47 = vmul.f32 1.442695, %v2226_v59 }
 0x47b   : > { %v11319_v60 = vmax.f32 %v9748_v19, -1e+30 }
 0x47d   : > { %v2223_v10 = vsub.f32 %v9664_v29, %v11319_v60  ;;  %v11406_v60 = vmax.f32 %v9684_v26, -1e+30 }
 0x47e   : > { %v9760_v8 = vpop.xlane.xlu0 %2202 }
 0x47f   : > { %v2227_v12 = vmul.f32 1.442695, %v2223_v10  ;;  %v11317_v4 = vmax.f32 %v9760_v8, -1e+30 }
 0x481   : > { %v2225_v11 = vsub.f32 %v9670_v21, %v11317_v4  ;;  %8567 = vpow2.f32 %v2227_v12  ;;  %v1760_v12 = vld [vmem:[%s11275_s3 + $0x10] sm:$0xff]  ;;  %v11405_v4 = vmax.f32 %v9704_v16, -1e+30  ;;  %v11409_v16 = vmax.f32 %v9709_v27, -1e+30 }
 0x482   : > { %8569 = vpow2.f32 %v2229_v30 }
 0x483   : > { %8571 = vpow2.f32 %v2233_v47  ;;  %v2231_v36 = vmul.f32 1.442695, %v2225_v11  ;;  %v1761_v47 = vld [vmem:[%s11275_s3 + $0x18] sm:$0xff]  ;;  %v9866_v11 = vld [vmem:[%s11276_s4 + $0x30] sm:$0xff]  ;;  %v1184_v22 = vsub.f32 -1e+30, %v11405_v4 }
 0x484   : > { %v1593_v26 = vsub.f32 -1e+30, %v11409_v16 }
 0x485   : > { %8573 = vpow2.f32 %v2231_v36  ;;  %v9871_v36 = vld [vmem:[%s11277_s5 + $0x30] sm:$0xff] }
 0x486   : > { %11401 = vst [vmem:[#allocation26_spill] sm:$0xff] %v9871_v36  ;;  %v1599_v37 = vmul.f32 1.442695, %v1593_v26 }
 0x48b   : > { %v9766_v28 = vpop.eup %8567 }
 0x48c   : > { %v9768_v25 = vpop.eup %8569  ;;  %v2239_v29 = vsel %vm1165_vm5, %v9766_v28, 0.0 }
 0x48d   : > { %v9772_v18 = vpop.eup %8571  ;;  %2240 = vadd.xlane.f32.xlu1 %v2239_v29  ;;  %v2242_v59 = vsel %vm1165_vm5, %v9768_v25, 0.0 }
 0x48e   : > { %v2248_v21 = vsel %vm1165_vm5, %v9772_v18, 0.0 }
 0x48f   : > { %v9778_v10 = vpop.eup %8573 }
 0x490   : > { %v2245_v30 = vsel %vm1165_vm5, %v9778_v10, 0.0 }
 0x491   : > { %2243 = vadd.xlane.f32.xlu0 %v2242_v59  ;;  %2249 = vadd.xlane.f32.xlu1 %v2248_v21  ;;  %v657_v59 = vmul.f32 %v9871_v36, %v9598_v9  ;;  %v11402_v21 = vmax.f32 %v9674_v24, -1e+30  ;;  %v1592_v24 = vsub.f32 -1e+30, %v11406_v60 }
 0x495   : > { %2246 = vadd.xlane.f32.xlu0 %v2245_v30  ;;  %v1183_v30 = vsub.f32 -1e+30, %v11402_v21 }
 0x4a2   : > { %8401 = vrot.lane.b32.xlu1 %v9340_v15, %s11311_s20  ;;  %v7822_v15 = vpack.c.bf16 %v1761_v47, %v1760_v12  ;;  %v11403_v12 = vmax.f32 %v9677_v52, -1e+30  ;;  %v11407_v52 = vmax.f32 %v9687_v13, -1e+30 }
 0x4a4   : > { %7823 = vmatprep.subr.bf16.mxu1 %v7822_v15  ;;  %v1182_v47 = vsub.f32 -1e+30, %v11403_v12  ;;  %v1591_v12 = vsub.f32 -1e+30, %v11407_v52 }
 0x4a5   : > { %7825 = vmatpush3.bf16.msra.mxu1 %v7822_v15  ;;  %v1188_v15 = vmul.f32 1.442695, %v1183_v30  ;;  %v1190_v30 = vmul.f32 1.442695, %v1184_v22 }
 0x4a6   : > { %8406 = vrot.lane.b32.xlu1 %v9324_v3, %s11313_s26  ;;  %v1336_v3 = vld [vmem:[%s11275_s3 + $0x8] sm:$0xff] }
 0x4a7   : > { %8575 = vpow2.f32 %v1188_v15 }
 0x4aa   : > { %2479 = vrot.lane.b32.xlu1 %v9350_v31, %s8928_s29 }
 0x4ab   : > { %8396 = vrot.lane.b32.xlu0 %v9322_v62, %s11311_s20  ;;  %v1335_v62 = vld [vmem:[%s11275_s3] sm:$0xff] }
 0x4ac   : > { %v9806_v31 = vpack.c.bf16 %v1336_v3, %v1335_v62  ;;  %v1186_v62 = vmul.f32 1.442695, %v1182_v47 }
 0x4ae   : > { %8411 = vrot.lane.b32.xlu1 %v9354_v20, %s11313_s26  ;;  %7827 = vmatprep.subr.bf16.mxu1 %v9806_v31  ;;  %v9829_v20 = vld [vmem:[%s11277_s5 + $0x28] sm:$0xff]  ;;  %8577 = vpow2.f32 %v1186_v62  ;;  %v11408_v62 = vmax.f32 %v9694_v23, -1e+30  ;;  %s11439_s26 = smov 56  }
 0x4af   : > { %2481 = vrot.lane.b32.xlu0 %v9352_v35, %s8928_s29  ;;  %v9824_v35 = vld [vmem:[%s11276_s4 + $0x28] sm:$0xff]  ;;  %11398 = vst [vmem:[#allocation23_spill] sm:$0xff] %v9829_v20 }
 0x4b0   : > { %v1594_v50 = vsub.f32 -1e+30, %v11408_v62 }
 0x4b1   : > { %v8576_v15 = vpop.eup %8575 }
 0x4b2   : > { %2485 = vrot.lane.b32.xlu1 %v9374_v39, %s8928_s29  ;;  %v9841_v39 = vld [vmem:[%s11277_s5 + $0x20] sm:$0xff]  ;;  %v1207_v60 = vmul.f32 0.0, %v8576_v15 }
 0x4b3   : > { %2483 = vrot.lane.b32.xlu0 %v9372_v2, %s8928_s29  ;;  %v9836_v2 = vld [vmem:[%s11276_s4 + $0x20] sm:$0xff]  ;;  %11399 = vst [vmem:[#allocation24_spill] sm:$0xff] %v9841_v39 }
 0x4b6   : > { %2598 = vrot.lane.b32.xlu1 %v9396_v41, %s11315_s14  ;;  %v655_v41 = vmul.f32 %v9841_v39, %v9434_v38 }
 0x4b7   : > { %2596 = vrot.lane.b32.xlu0 %v9386_v46, %s11315_s14  ;;  %v656_v46 = vmul.f32 %v9829_v20, %v9440_v54 }
 0x4b8   : > { %v8578_v53 = vpop.eup %8577 }
 0x4b9   : > { %v1206_v13 = vmul.f32 0.0, %v8578_v53 }
 0x4ba   : > { %2602 = vrot.lane.b32.xlu1 %v9406_v42, %s11315_s14  ;;  %v9859_v42 = vld [vmem:[%s11277_s5 + $0x38] sm:$0xff] }
 0x4bb   : > { %2600 = vrot.lane.b32.xlu0 %v9398_v56, %s11315_s14  ;;  %v9854_v56 = vld [vmem:[%s11276_s4 + $0x38] sm:$0xff]  ;;  %11400 = vst [vmem:[#allocation25_spill] sm:$0xff] %v9859_v42  ;;  %v658_v29 = vmul.f32 %v9859_v42, %v9600_v49  ;;  %s11440_s14 = smov 112  }
 0x4be   : > { %629 = vrot.lane.b32.xlu1 %v9824_v35, %s8917_s13 }
 0x4bf   : > { %627 = vrot.lane.b32.xlu0 %v9836_v2, %s8917_s13 }
 0x4c2   : > { %677 = vrot.lane.b32.xlu1 %v656_v46, %s8917_s13 }
 0x4c3   : > { %675 = vrot.lane.b32.xlu0 %v655_v41, %s8917_s13 }
 0x4c6   : > { %633 = vrot.lane.b32.xlu1 %v9854_v56, %s8917_s13 }
 0x4c7   : > { %631 = vrot.lane.b32.xlu0 %v9866_v11, %s8917_s13 }
 0x4ca   : > { %681 = vrot.lane.b32.xlu1 %v658_v29, %s8917_s13  ;;  %v11404_v29 = vmax.f32 %v9697_v6, -1e+30  ;;  %v1597_v6 = vmul.f32 1.442695, %v1592_v24 }
 0x4cb   : > { %679 = vrot.lane.b32.xlu0 %v657_v59, %s8917_s13 }
 0x4cc   : > { %v1185_v59 = vsub.f32 -1e+30, %v11404_v29  ;;  %v1595_v29 = vmul.f32 1.442695, %v1591_v12 }
 0x4ce   : > { %549 = vrot.lane.b32.xlu1 %v9829_v20, %s8917_s13  ;;  %v1192_v21 = vmul.f32 1.442695, %v1185_v59  ;;  %v1601_v59 = vmul.f32 1.442695, %v1594_v50 }
 0x4cf   : > { %547 = vrot.lane.b32.xlu0 %v9841_v39, %s8917_s13 }
 0x4d0   : > { %8579 = vpow2.f32 %v1192_v21 }
 0x4d1   : > { %8581 = vpow2.f32 %v1190_v30 }
 0x4d2   : > { %553 = vrot.lane.b32.xlu1 %v9859_v42, %s8917_s13  ;;  %8583 = vpow2.f32 %v1597_v6 }
 0x4d3   : > { %551 = vrot.lane.b32.xlu0 %v9871_v36, %s8917_s13  ;;  %8585 = vpow2.f32 %v1595_v29 }
 0x4d4   : > { %v1215_v3 = vpop.xlane.xlu1 %1214  ;;  %8587 = vpow2.f32 %v1601_v59 }
 0x4d5   : > { %v1223_v52 = vadd.f32 %v1215_v3, %v1207_v60 }
 0x4d7   : > { %8589 = vrcp.f32 %v1223_v52 }
 0x4d8   : > { %v1624_v46 = vpop.xlane.xlu0 %1623 }
 0x4d9   : > { %v1621_v41 = vpop.xlane.xlu1 %1620 }
 0x4da   : > { %v8580_v21 = vpop.eup %8579 }
 0x4db   : > { %v8582_v27 = vpop.eup %8581  ;;  %v1209_v12 = vmul.f32 0.0, %v8580_v21 }
 0x4dc   : > { %v1212_v47 = vpop.xlane.xlu0 %1211  ;;  %v8584_v53 = vpop.eup %8583  ;;  %v1208_v3 = vmul.f32 0.0, %v8582_v27 }
 0x4dd   : > { %v1630_v55 = vpop.xlane.xlu1 %1629  ;;  %v1222_v40 = vadd.f32 %v1212_v47, %v1206_v13  ;;  %v8586_v15 = vpop.eup %8585 }
 0x4de   : > { %v8588_v6 = vpop.eup %8587  ;;  %v1615_v57 = vmul.f32 0.0, %v8586_v15 }
 0x4df   : > { %8591 = vrcp.f32 %v1222_v40 }
 0x4e0   : > { %8593 = vpow2.f32 %v1599_v37  ;;  %v1616_v37 = vmul.f32 0.0, %v8584_v53  ;;  %v1631_v36 = vadd.f32 %v1621_v41, %v1615_v57 }
 0x4e1   : > { %v1221_v22 = vpop.xlane.xlu1 %1220  ;;  %v8590_v40 = vpop.eup %8589 }
 0x4e2   : > { %v1225_v47 = vadd.f32 %v1221_v22, %v1209_v12  ;;  %v1632_v27 = vadd.f32 %v1624_v46, %v1616_v37 }
 0x4e4   : > { %8595 = vrcp.f32 %v1225_v47 }
 0x4e5   : > { %v1627_v4 = vpop.xlane.xlu0 %1626  ;;  %v9905_v24 = vpop.permute.xlu1 %8391 }
 0x4e9   : > { %v1218_v23 = vpop.xlane.xlu0 %1217  ;;  %v8592_v21 = vpop.eup %8591 }
 0x4ea   : > { %v1224_v29 = vadd.f32 %v1218_v23, %v1208_v3  ;;  %v8594_v7 = vpop.eup %8593  ;;  %v1618_v23 = vmul.f32 0.0, %v8588_v6 }
 0x4ec   : > { %8597 = vrcp.f32 %v1224_v29  ;;  %v1634_v53 = vadd.f32 %v1630_v55, %v1618_v23 }
 0x4ed   : > { %v9907_v30 = vpop.permute.xlu0 %8386  ;;  %8599 = vrcp.f32 %v1632_v27 }
 0x4ee   : > { %8601 = vrcp.f32 %v1631_v36  ;;  %v8596_v29 = vpop.eup %8595 }
 0x4ef   : > { %8603 = vrcp.f32 %v1634_v53 }
 0x51a   : > { %v9909_v50 = vpop.xlane.xlu1 %2240 }
 0x51b   : > { %v7196_v62 = vpop.f32.mrb[4].mxu1 }
 0x51c   : > { %v1324_v16 = vadd.f32 %v7196_v62, %v1207_v60  ;;  %v1304_v26 = vpop.f32.mrb[5].mxu1 }
 0x51d   : > { %v1323_v59 = vadd.f32 %v1304_v26, %v1206_v13  ;;  %v1617_v13 = vmul.f32 0.0, %v8594_v7  ;;  %v8598_v7 = vpop.eup %8597 }
 0x51e   : > { %v9911_v52 = vpop.xlane.xlu1 %2249  ;;  %v9913_v44 = vpop.xlane.xlu0 %2243  ;;  %v9915_v1 = vmul.f32 %v8590_v40, %v1324_v16 }
 0x51f   : > { %v1331_v22 = vmul.f32 %v8592_v21, %v1323_v59  ;;  %v1633_v26 = vadd.f32 %v1627_v4, %v1617_v13  ;;  %v8600_v27 = vpop.eup %8599 }
 0x521   : > { %8605 = vrcp.f32 %v1633_v26  ;;  %v8389_v26 = vunpack.i.h.bf16 %v9907_v30 }
 0x522   : > { %v9917_v60 = vpop.permute.xlu1 %8401  ;;  %v9919_v62 = vpop.xlane.xlu0 %2246 }
 0x526   : > { %v9921_v5 = vpop.permute.xlu1 %8406  ;;  %v9923_v15 = vpop.permute.xlu0 %8396 }
 0x527   : > { %v7199_v46 = vpop.f32.mrb[6].mxu1 }
 0x528   : > { %v1326_v47 = vadd.f32 %v7199_v46, %v1209_v12  ;;  %v1314_v41 = vpop.f32.mrb[7].mxu1  ;;  %v8602_v12 = vpop.eup %8601 }
 0x529   : > { %v1325_v6 = vadd.f32 %v1314_v41, %v1208_v3  ;;  %v8388_v3 = vunpack.i.l.bf16 %v9907_v30 }
 0x52a   : > { %v9925_v16 = vpop.permute.xlu1 %2479  ;;  %v9927_v40 = vpop.permute.xlu0 %2481  ;;  %v1334_v59 = vmul.f32 %v8596_v29, %v1326_v47 }
 0x52b   : > { %v1333_v55 = vmul.f32 %v8598_v7, %v1325_v6  ;;  %v7238_v36 = vpop.f32.mrb[8].mxu1  ;;  %v8604_v6 = vpop.eup %8603 }
 0x52c   : > { %v1749_v4 = vadd.f32 %v7238_v36, %v1616_v37  ;;  %v1729_v21 = vpop.f32.mrb[9].mxu1  ;;  %v8606_v36 = vpop.eup %8605 }
 0x52d   : > { %v1748_v42 = vadd.f32 %v1729_v21, %v1615_v57  ;;  %v9940_v21 = vpack.c.bf16 %v8389_v26, %v8388_v3 }
 0x52e   : > { %v9929_v20 = vpop.permute.xlu1 %8411  ;;  %v9931_v53 = vpop.permute.xlu0 %2483  ;;  %v1757_v46 = vmul.f32 %v8600_v27, %v1749_v4 }
 0x52f   : > { %v1756_v41 = vmul.f32 %v8602_v12, %v1748_v42  ;;  %v7241_v39 = vpop.f32.mrb[10].mxu1  ;;  %v2377_v12 = vld [vmem:[%s11275_s3 + $0x28] sm:$0xff] }
 0x530   : > { %v1751_v47 = vadd.f32 %v7241_v39, %v1618_v23  ;;  %v1739_v29 = vpop.f32.mrb[11].mxu1  ;;  %v8394_v23 = vunpack.i.h.bf16 %v9905_v24 }
 0x531   : > { %v1750_v37 = vadd.f32 %v1739_v29, %v1617_v13  ;;  %7246 = vmatprep.mubr.msk.f32.mxu1 %vm1762_vm8, %v1756_v41  ;;  %v8393_v13 = vunpack.i.l.bf16 %v9905_v24  ;;  %v8398_v41 = vunpack.i.l.bf16 %v9923_v15 }
 0x532   : > { %v9936_v57 = vpop.permute.xlu1 %2485  ;;  %v9938_v7 = vpop.permute.xlu0 %2596  ;;  %v1759_v48 = vmul.f32 %v8604_v6, %v1751_v47  ;;  %7247 = vmatmul.mubr.msk.f32.vlgmr.msra.gmra.mrb[12].mxu1 %vm1762_vm8, %v1757_v46  ;;  %v8399_v46 = vunpack.i.h.bf16 %v9923_v15 }
 0x533   : > { %v1758_v30 = vmul.f32 %v8606_v36, %v1750_v37  ;;  %7829 = vmatpush3.bf16.msra.mxu1 %v9806_v31  ;;  %v2376_v31 = vld [vmem:[%s11275_s3 + $0x20] sm:$0xff]  ;;  %v9962_v26 = vpack.c.bf16 %v8394_v23, %v8393_v13 }
 0x534   : > { %7855 = vmatprep.subr.bf16.mxu1 %v9940_v21  ;;  %v7862_v24 = vpack.c.bf16 %v2377_v12, %v2376_v31  ;;  %v9981_v6 = vpack.c.bf16 %v8399_v46, %v8398_v41  ;;  %v527_v41 = vmul.f32 %v9836_v2, %v9434_v38 }
 0x535   : > { %7249 = vmatprep.mubr.msk.f32.mxu1 %vm1762_vm8, %v1758_v30 }
 0x536   : > { %v9946_v39 = vpop.permute.xlu1 %2598  ;;  %v9948_v42 = vpop.permute.xlu0 %2600  ;;  %7250 = vmatmul.mubr.msk.f32.gmra.mrb[14].mxu1 %vm1762_vm8, %v1759_v48  ;;  %11410 = vst [vmem:[#allocation27_spill] sm:$0xff] %v9981_v6 }
 0x537   : > { %7256 = vmatprep.mubr.msk.f32.mxu1 %vm1762_vm8, %v1331_v22 }
 0x53a   : > { %v9954_v4 = vpop.permute.xlu1 %2602  ;;  %v628_v27 = vpop.permute.xlu0 %627  ;;  %7257 = vmatmul.mubr.msk.f32.vlgmr.msra.gmra.mrb[12].mxu1 %vm1762_vm8, %v9915_v1 }
 0x53b   : > { %7857 = vmatpush3.bf16.msra.mxu1 %v9940_v21  ;;  %7259 = vmatprep.mubr.msk.f32.mxu1 %vm1762_vm8, %v1333_v55  ;;  %v647_v48 = vmul.f32 %v628_v27, %v9434_v38 }
 0x53c   : > { %7859 = vmatprep.subr.bf16.mxu1 %v9962_v26 }
 0x53e   : > { %v630_v22 = vpop.permute.xlu1 %629  ;;  %v676_v3 = vpop.permute.xlu0 %675  ;;  %7260 = vmatmul.mubr.msk.f32.gmra.mrb[14].mxu1 %vm1762_vm8, %v1334_v59 }
 0x53f   : > { %v9972_v47 = vadd.f32 %v676_v3, %v647_v48  ;;  %7861 = vmatpush3.bf16.msra.mxu1 %v9962_v26  ;;  %7298 = vmatprep.mubr.msk.f32.mxu1 %vm1165_vm5, %v9766_v28  ;;  %v648_v1 = vmul.f32 %v630_v22, %v9440_v54 }
 0x540   : > { %7863 = vmatprep.subr.bf16.mxu1 %v7862_v24 }
 0x541   : > { %3013 = vrot.lane.b32.xlu0 %v9972_v47, %s8916_s28 }
 0x542   : > { %v678_v55 = vpop.permute.xlu1 %677  ;;  %v632_v29 = vpop.permute.xlu0 %631  ;;  %7299 = vmatmul.mubr.msk.f32.vlgmr.msra.gmra.mrb[16].mxu1 %vm1165_vm5, %v9768_v25 }
 0x543   : > { %v9983_v15 = vadd.f32 %v678_v55, %v648_v1  ;;  %7865 = vmatpush3.bf16.msra.mxu1 %v7862_v24  ;;  %7301 = vmatprep.mubr.msk.f32.mxu1 %vm1165_vm5, %v9778_v10  ;;  %v649_v28 = vmul.f32 %v632_v29, %v9598_v9 }
 0x544   : > { %7868 = vmatprep.subr.msk.bf16.mxu1 %vm9451_vm2, %v9981_v6 }
 0x545   : > { %3015 = vrot.lane.b32.xlu1 %v9983_v15, %s8916_s28 }
 0x546   : > { %v634_v59 = vpop.permute.xlu1 %633  ;;  %v680_v37 = vpop.permute.xlu0 %679  ;;  %7302 = vmatmul.mubr.msk.f32.gmra.mrb[18].mxu1 %vm1165_vm5, %v9772_v18 }
 0x547   : > { %v9995_v36 = vadd.f32 %v680_v37, %v649_v28  ;;  %v650_v25 = vmul.f32 %v634_v59, %v9600_v49 }
 0x549   : > { %3017 = vrot.lane.b32.xlu0 %v9995_v36, %s8916_s28 }
 0x54a   : > { %v682_v10 = vpop.permute.xlu1 %681  ;;  %v548_v30 = vpop.permute.xlu0 %547 }
 0x54b   : > { %v10002_v23 = vadd.f32 %v682_v10, %v650_v25  ;;  %v567_v13 = vmul.f32 %v548_v30, %v9434_v38  ;;  %v529_v25 = vmul.f32 %v9866_v11, %v9598_v9  ;;  %v530_v10 = vmul.f32 %v9854_v56, %v9600_v49 }
 0x54d   : > { %3019 = vrot.lane.b32.xlu1 %v10002_v23, %s8916_s28  ;;  %587 = vrot.lane.b32.xlu0 %v567_v13, %s8916_s28 }
 0x54e   : > { %v550_v27 = vpop.permute.xlu1 %549  ;;  %v552_v31 = vpop.permute.xlu0 %551 }
 0x54f   : > { %v568_v18 = vmul.f32 %v550_v27, %v9440_v54  ;;  %v569_v12 = vmul.f32 %v552_v31, %v9598_v9  ;;  %v11411_v27 = vmax.f32 %v9740_v33, -1e+30 }
 0x551   : > { %589 = vrot.lane.b32.xlu1 %v568_v18, %s8916_s28  ;;  %591 = vrot.lane.b32.xlu0 %v569_v12, %s8916_s28  ;;  %v2212_v31 = vsub.f32 -1e+30, %v11411_v27  ;;  %v11412_v18 = vmax.f32 %v9748_v19, -1e+30 }
 0x552   : > { %v554_v48 = vpop.permute.xlu1 %553 }
 0x553   : > { %v570_v24 = vmul.f32 %v554_v48, %v9600_v49  ;;  %v2211_v12 = vsub.f32 -1e+30, %v11412_v18  ;;  %v2217_v48 = vmul.f32 1.442695, %v2212_v31 }
 0x555   : > { %593 = vrot.lane.b32.xlu1 %v570_v24, %s8916_s28  ;;  %8607 = vpow2.f32 %v2217_v48 }
 0x5b3   : > { %v10014_v22 = vpop.permute.xlu0 %3013 }
 0x5b4   : > { %7374 = vmatprep.mubr.msk.f32.mxu0 %vm942_vm1, %v10014_v22 }
 0x5b7   : > { %v10018_v3 = vpop.permute.xlu1 %3015 }
 0x5b8   : > { %7375 = vmatmul.mubr.msk.f32.vlgmr.msra.gmra.mrb[24].mxu0 %vm942_vm1, %v10018_v3 }
 0x5b9   : > { %7919 = vmatpush3.bf16.xpose.msk.msra.mxu0 %vm9451_vm2, %v9475_v32  ;;  %v528_v32 = vmul.f32 %v9824_v35, %v9440_v54 }
 0x5ba   : > { %7922 = vmatprep.subr.msk.bf16.mxu0 %vm9451_vm2, %v9504_v61 }
 0x5bb   : > { %v10028_v46 = vpop.permute.xlu0 %3017 }
 0x5bc   : > { %7377 = vmatprep.mubr.msk.f32.mxu0 %vm942_vm1, %v10028_v46 }
 0x5bf   : > { %v10034_v1 = vpop.permute.xlu1 %3019  ;;  %v588_v55 = vpop.permute.xlu0 %587 }
 0x5c0   : > { %v10036_v29 = vsub.f32 %v527_v41, %v588_v55  ;;  %7378 = vmatmul.mubr.msk.f32.gmra.mrb[26].mxu0 %vm942_vm1, %v10034_v1  ;;  %v2215_v41 = vmul.f32 1.442695, %v2211_v12  ;;  %v11414_v55 = vmax.f32 %v9760_v8, -1e+30 }
 0x5c1   : > { %7925 = vmatpush3.bf16.xpose.msk.msra.mxu0 %vm9451_vm2, %v9504_v61 }
 0x5c2   : > { %7959 = vmatprep.subr.bf16.mxu0 %v9444_v58  ;;  %7388 = vmatprep.mubr.msk.f32.mxu0 %vm942_vm1, %v10036_v29  ;;  %8609 = vpow2.f32 %v2215_v41 }
 0x5c3   : > { %v590_v28 = vpop.permute.xlu1 %589  ;;  %v592_v37 = vpop.permute.xlu0 %591 }
 0x5c4   : > { %v10048_v59 = vsub.f32 %v528_v32, %v590_v28  ;;  %v10054_v30 = vsub.f32 %v529_v25, %v592_v37  ;;  %v2213_v32 = vsub.f32 -1e+30, %v11414_v55  ;;  %v8608_v37 = vpop.eup %8607 }
 0x5c5   : > { %v2236_v25 = vmul.f32 0.0, %v8608_v37 }
 0x5c6   : > { %v2219_v28 = vmul.f32 1.442695, %v2213_v32 }
 0x5c7   : > { %v594_v61 = vpop.permute.xlu1 %593  ;;  %v2252_v27 = vadd.f32 %v9913_v44, %v2236_v25  ;;  %v8404_v44 = vunpack.i.h.bf16 %v9917_v60 }
 0x5c8   : > { %v10056_v13 = vsub.f32 %v530_v10, %v594_v61  ;;  %7389 = vmatmul.mubr.msk.f32.vlgmr.msra.gmra.mrb[24].mxu0 %vm942_vm1, %v10048_v59 }
 0x5c9   : > { %7391 = vmatprep.mubr.msk.f32.mxu0 %vm942_vm1, %v10054_v30  ;;  %7961 = vmatpush3.bf16.msra.mxu0 %v9444_v58  ;;  %v11413_v58 = vmax.f32 %v9744_v14, -1e+30 }
 0x5ca   : > { %7963 = vmatprep.subr.bf16.mxu0 %v9604_v51 }
 0x5cb   : > { %v2214_v24 = vsub.f32 -1e+30, %v11413_v58 }
 0x5cc   : > { %7392 = vmatmul.mubr.msk.f32.gmra.mrb[26].mxu0 %vm942_vm1, %v10056_v13  ;;  %v8610_v33 = vpop.eup %8609 }
 0x5cd   : > { %7965 = vmatpush3.bf16.msra.mxu0 %v9604_v51  ;;  %v2221_v51 = vmul.f32 1.442695, %v2214_v24  ;;  %v2235_v19 = vmul.f32 0.0, %v8610_v33 }
 0x5ce   : > { %7968 = vmatprep.subr.msk.bf16.mxu0 %vm9451_vm2, %v9463_v63 }
 0x5cf   : > { %8611 = vpow2.f32 %v2221_v51  ;;  %v2251_v14 = vadd.f32 %v9909_v50, %v2235_v19  ;;  %v8403_v50 = vunpack.i.l.bf16 %v9917_v60  ;;  %v8409_v60 = vunpack.i.h.bf16 %v9921_v5 }
 0x5d0   : > { %8613 = vpow2.f32 %v2219_v28 }
 0x5d1   : > { %8615 = vrcp.f32 %v2252_v27  ;;  %v10085_v27 = vpack.c.bf16 %v8404_v44, %v8403_v50  ;;  %v11418_v44 = vld [vmem:[#allocation10_spill] sm:$0xff]  ;;  %v11419_v50 = vld [vmem:[#allocation24_spill] sm:$0xff] }
 0x5d2   : > { %8617 = vrcp.f32 %v2251_v14  ;;  %v8408_v14 = vunpack.i.l.bf16 %v9921_v5 }
 0x5d3   : > { %11415 = vst [vmem:[#allocation28_spill] sm:$0xff] %v10085_v27 }
 0x5d9   : > { %v8612_v10 = vpop.eup %8611 }
 0x5da   : > { %v8614_v61 = vpop.eup %8613  ;;  %v2238_v31 = vmul.f32 0.0, %v8612_v10 }
 0x5db   : > { %v2237_v18 = vmul.f32 0.0, %v8614_v61  ;;  %v8616_v41 = vpop.eup %8615 }
 0x5dc   : > { %v2254_v8 = vadd.f32 %v9911_v52, %v2238_v31  ;;  %v8618_v32 = vpop.eup %8617 }
 0x5dd   : > { %v2253_v12 = vadd.f32 %v9919_v62, %v2237_v18 }
 0x5de   : > { %8619 = vrcp.f32 %v2254_v8  ;;  %v8413_v8 = vunpack.i.l.bf16 %v9929_v20 }
 0x5df   : > { %8621 = vrcp.f32 %v2253_v12 }
 0x5e8   : > { %v8620_v10 = vpop.eup %8619 }
 0x5e9   : > { %v8622_v62 = vpop.eup %8621 }
 0x615   : > { %v7300_v48 = vpop.f32.mrb[16].mxu1 }
 0x616   : > { %v2365_v58 = vadd.f32 %v7300_v48, %v2236_v25  ;;  %v2345_v24 = vpop.f32.mrb[17].mxu1 }
 0x617   : > { %v2364_v55 = vadd.f32 %v2345_v24, %v2235_v19 }
 0x618   : > { %v2373_v51 = vmul.f32 %v8616_v41, %v2365_v58 }
 0x619   : > { %v2372_v28 = vmul.f32 %v8618_v32, %v2364_v55  ;;  %v7303_v37 = vpop.f32.mrb[18].mxu1 }
 0x61a   : > { %v2367_v52 = vadd.f32 %v7303_v37, %v2238_v31  ;;  %v2355_v33 = vpop.f32.mrb[19].mxu1  ;;  %v10100_v31 = vpack.c.bf16 %v8409_v60, %v8408_v14  ;;  %v11422_v37 = vld [vmem:[#allocation8_spill] sm:$0xff] }
 0x61b   : > { %v2366_v61 = vadd.f32 %v2355_v33, %v2237_v18  ;;  %7308 = vmatprep.mubr.msk.f32.mxu1 %vm1762_vm8, %v2372_v28  ;;  %v8414_v18 = vunpack.i.h.bf16 %v9929_v20  ;;  %v11421_v28 = vld [vmem:[#allocation25_spill] sm:$0xff] }
 0x61c   : > { %v2375_v25 = vmul.f32 %v8620_v10, %v2367_v52  ;;  %7309 = vmatmul.mubr.msk.f32.vlgmr.msra.gmra.mrb[12].mxu1 %vm1762_vm8, %v2373_v51  ;;  %11416 = vst [vmem:[#allocation29_spill] sm:$0xff] %v10100_v31  ;;  %v11420_v51 = vld [vmem:[#allocation23_spill] sm:$0xff]  ;;  %v11423_v52 = vld [vmem:[#allocation26_spill] sm:$0xff] }
 0x61d   : > { %v2374_v19 = vmul.f32 %v8622_v62, %v2366_v61  ;;  %7871 = vmatpush3.bf16.xpose.msk.msra.mxu1 %vm9451_vm2, %v9981_v6  ;;  %v10110_v5 = vpack.c.bf16 %v8414_v18, %v8413_v8 }
 0x61e   : > { %7874 = vmatprep.subr.msk.bf16.mxu1 %vm9451_vm2, %v10085_v27 }
 0x61f   : > { %7311 = vmatprep.mubr.msk.f32.mxu1 %vm1762_vm8, %v2374_v19  ;;  %11417 = vst [vmem:[#allocation30_spill] sm:$0xff] %v10110_v5 }
 0x620   : > { %7312 = vmatmul.mubr.msk.f32.gmra.mrb[14].mxu1 %vm1762_vm8, %v2375_v25 }
 0x621   : > { %7322 = vmatprep.mubr.msk.f32.mxu1 %vm942_vm1, %v9925_v16 }
 0x625   : > { %7877 = vmatpush3.bf16.xpose.msk.msra.mxu1 %vm9451_vm2, %v10085_v27 }
 0x626   : > { %7880 = vmatprep.subr.msk.bf16.mxu1 %vm9451_vm2, %v10100_v31 }
 0x62c   : > { %7323 = vmatmul.mubr.msk.f32.vlgmr.msra.gmra.mrb[20].mxu1 %vm942_vm1, %v9927_v40 }
 0x62d   : > { %7325 = vmatprep.mubr.msk.f32.mxu1 %vm942_vm1, %v9931_v53  ;;  %7883 = vmatpush3.bf16.xpose.msk.msra.mxu1 %vm9451_vm2, %v10100_v31 }
 0x62e   : > { %7886 = vmatprep.subr.msk.bf16.mxu1 %vm9451_vm2, %v10110_v5 }
 0x630   : > { %7326 = vmatmul.mubr.msk.f32.gmra.mrb[22].mxu1 %vm942_vm1, %v9936_v57 }
 0x631   : > { %7336 = vmatprep.mubr.msk.f32.mxu1 %vm942_vm1, %v9938_v7 }
 0x635   : > { %7889 = vmatpush3.bf16.xpose.msk.msra.mxu1 %vm9451_vm2, %v10110_v5 }
 0x63c   : > { %7337 = vmatmul.mubr.msk.f32.vlgmr.msra.gmra.mrb[20].mxu1 %vm942_vm1, %v9946_v39 }
 0x63d   : > { %7339 = vmatprep.mubr.msk.f32.mxu1 %vm942_vm1, %v9948_v42 }
 0x640   : > { %7340 = vmatmul.mubr.msk.f32.gmra.mrb[22].mxu1 %vm942_vm1, %v9954_v4 }
 0x69b   : > { %v10135_v20 = vpop.f32.mrb[24].mxu0 }
 0x69c   : > { %v10137_v16 = vpop.f32.mrb[25].mxu0 }
 0x69f   : > { %v10139_v40 = vpop.f32.mrb[26].mxu0 }
 0x6a0   : > { %v10141_v53 = vpop.f32.mrb[27].mxu0 }
 0x70f   : > { %v7338_v57 = vpop.f32.mrb[20].mxu1 }
 0x710   : > { %v2714_v7 = vsel %vm9606_vm3, %v7338_v57, -1e+30  ;;  %v2694_v12 = vpop.f32.mrb[21].mxu1 }
 0x711   : > { %v2720_v39 = vsel %vm1165_vm5, %v2714_v7, -inf  ;;  %v2713_v42 = vsel %vm9610_vm4, %v2694_v12, -1e+30 }
 0x712   : > { %v2717_v4 = vsel %vm1165_vm5, %v2713_v42, -inf  ;;  %2721 = vmax.xlane.f32.xlu1 %v2720_v39 }
 0x713   : > { %2718 = vmax.xlane.f32.xlu0 %v2717_v4  ;;  %v7341_v48 = vpop.f32.mrb[22].mxu1 }
 0x714   : > { %v2716_v58 = vsel %vm9622_vm6, %v7341_v48, -1e+30  ;;  %v2704_v24 = vpop.f32.mrb[23].mxu1 }
 0x715   : > { %v2726_v41 = vsel %vm1165_vm5, %v2716_v58, -inf  ;;  %v2715_v55 = vsel %vm9632_vm7, %v2704_v24, -1e+30 }
 0x716   : > { %v2723_v32 = vsel %vm1165_vm5, %v2715_v55, -inf }
 0x717   : > { %2727 = vmax.xlane.f32.xlu0 %v2726_v41 }
 0x71b   : > { %2724 = vmax.xlane.f32.xlu0 %v2723_v32 }
 0x723   : > { %8421 = vrot.lane.b32.xlu1 %v11418_v44, %s8924_s17 }
 0x727   : > { %843 = vrot.lane.b32.xlu1 %v11419_v50, %s8915_s19 }
 0x72b   : > { %845 = vrot.lane.b32.xlu1 %v11420_v51, %s8915_s19 }
 0x72f   : > { %849 = vrot.lane.b32.xlu1 %v11421_v28, %s8915_s19 }
 0x731   : > { %8416 = vrot.lane.b32.xlu0 %v11422_v37, %s8924_s17 }
 0x733   : > { %741 = vrot.lane.b32.xlu1 %v11420_v51, %s8916_s28 }
 0x735   : > { %847 = vrot.lane.b32.xlu0 %v11423_v52, %s8915_s19 }
 0x737   : > { %745 = vrot.lane.b32.xlu1 %v11421_v28, %s8916_s28 }
 0x739   : > { %739 = vrot.lane.b32.xlu0 %v11419_v50, %s8916_s28 }
 0x73b   : > { %813 = vrot.lane.b32.xlu1 %v9824_v35, %s8916_s28 }
 0x73d   : > { %743 = vrot.lane.b32.xlu0 %v11423_v52, %s8916_s28 }
 0x741   : > { %811 = vrot.lane.b32.xlu0 %v9836_v2, %s8916_s28 }
 0x79f   : > { %v10179_v33 = vpop.xlane.xlu1 %2721 }
 0x7a0   : > { %v10181_v10 = vpop.xlane.xlu0 %2718  ;;  %v2730_v62 = vmax.f32 %v10179_v33, -1e+30 }
 0x7a1   : > { %v2729_v61 = vmax.f32 %v10181_v10, -1e+30 }
 0x7a2   : > { %v2746_v18 = vsub.f32 %v2714_v7, %v2730_v62 }
 0x7a3   : > { %v2745_v25 = vsub.f32 %v2713_v42, %v2729_v61  ;;  %v8422_v19 = vpop.permute.xlu1 %8421 }
 0x7a4   : > { %v10187_v60 = vpop.xlane.xlu0 %2727  ;;  %v2751_v48 = vmul.f32 1.442695, %v2746_v18  ;;  %v8424_v41 = vunpack.i.h.bf16 %v8422_v19  ;;  %v8423_v50 = vunpack.i.l.bf16 %v8422_v19  ;;  %v2899_v19 = vld [vmem:[%s11275_s3 + $0x38] sm:$0xff] }
 0x7a5   : > { %v2749_v14 = vmul.f32 1.442695, %v2745_v25  ;;  %v2732_v8 = vmax.f32 %v10187_v60, -1e+30  ;;  %v2898_v25 = vld [vmem:[%s11275_s3 + $0x30] sm:$0xff] }
 0x7a7   : > { %v844_v57 = vpop.permute.xlu1 %843  ;;  %8623 = vpow2.f32 %v2749_v14  ;;  %v2748_v42 = vsub.f32 %v2716_v58, %v2732_v8  ;;  %v10213_v14 = vpack.c.bf16 %v8424_v41, %v8423_v50 }
 0x7a8   : > { %v863_v12 = vmul.f32 %v844_v57, %v9434_v38  ;;  %v10193_v39 = vpop.xlane.xlu0 %2724  ;;  %8625 = vpow2.f32 %v2751_v48  ;;  %v7898_v48 = vpack.c.bf16 %v2899_v19, %v2898_v25  ;;  %v3217_v25 = vsel %vm1165_vm5, %v10141_v53, -inf }
 0x7a9   : > { %v2731_v4 = vmax.f32 %v10193_v39, -1e+30  ;;  %v2755_v52 = vmul.f32 1.442695, %v2748_v42  ;;  %11425 = vst [vmem:[#allocation24_spill] sm:$0xff] %v10213_v14 }
 0x7aa   : > { %883 = vrot.lane.b32.xlu0 %v863_v12, %s8917_s13  ;;  %v2736_v39 = vsub.f32 -1e+30, %v2732_v8 }
 0x7ab   : > { %v2747_v24 = vsub.f32 %v2715_v55, %v2731_v4  ;;  %v846_v7 = vpop.permute.xlu1 %845 }
 0x7ac   : > { %v864_v32 = vmul.f32 %v846_v7, %v9440_v54  ;;  %v8417_v44 = vpop.permute.xlu0 %8416 }
 0x7ad   : > { %v2753_v51 = vmul.f32 1.442695, %v2747_v24  ;;  %v8419_v28 = vunpack.i.h.bf16 %v8417_v44  ;;  %v8418_v37 = vunpack.i.l.bf16 %v8417_v44 }
 0x7ae   : > { %885 = vrot.lane.b32.xlu1 %v864_v32, %s8917_s13  ;;  %815 = vrot.lane.b32.xlu0 %v9866_v11, %s8916_s28 }
 0x7af   : > { %v10205_v58 = vpack.c.bf16 %v8419_v28, %v8418_v37  ;;  %8627 = vpow2.f32 %v2753_v51  ;;  %v850_v18 = vpop.permute.xlu1 %849  ;;  %v3211_v37 = vsel %vm1165_vm5, %v10137_v16, -inf }
 0x7b0   : > { %v848_v55 = vpop.permute.xlu0 %847  ;;  %8629 = vpow2.f32 %v2755_v52  ;;  %v866_v42 = vmul.f32 %v850_v18, %v9600_v49 }
 0x7b1   : > { %11424 = vst [vmem:[#allocation10_spill] sm:$0xff] %v10205_v58  ;;  %v865_v57 = vmul.f32 %v848_v55, %v9598_v9  ;;  %7891 = vmatprep.subr.bf16.mxu1 %v10205_v58  ;;  %v8624_v12 = vpop.eup %8623 }
 0x7b2   : > { %817 = vrot.lane.b32.xlu1 %v9854_v56, %s8916_s28  ;;  %7893 = vmatpush3.bf16.msra.mxu1 %v10205_v58  ;;  %v8626_v7 = vpop.eup %8625  ;;  %v2761_v55 = vsel %vm1165_vm5, %v8624_v12, 0.0 }
 0x7b3   : > { %887 = vrot.lane.b32.xlu0 %v865_v57, %s8917_s13  ;;  %7895 = vmatprep.subr.bf16.mxu1 %v10213_v14  ;;  %v742_v41 = vpop.permute.xlu1 %741  ;;  %v2764_v52 = vsel %vm1165_vm5, %v8626_v7, 0.0 }
 0x7b4   : > { %7350 = vmatprep.mubr.msk.f32.mxu1 %vm1165_vm5, %v8624_v12  ;;  %v740_v24 = vpop.permute.xlu0 %739  ;;  %v760_v51 = vmul.f32 %v742_v41, %v9440_v54 }
 0x7b5   : > { %v759_v32 = vmul.f32 %v740_v24, %v9434_v38  ;;  %v3220_v24 = vsel %vm1165_vm5, %v10139_v40, -inf }
 0x7b6   : > { %889 = vrot.lane.b32.xlu1 %v866_v42, %s8917_s13  ;;  %7897 = vmatpush3.bf16.msra.mxu1 %v10213_v14 }
 0x7b7   : > { %707 = vrot.lane.b32.xlu0 %v9836_v2, %s8915_s19  ;;  %7899 = vmatprep.subr.bf16.mxu1 %v7898_v48  ;;  %v11426_v2 = vld [vmem:[#allocation9_spill] sm:$0xff]  ;;  %v746_v19 = vpop.permute.xlu1 %745 }
 0x7b8   : > { %v744_v28 = vpop.permute.xlu0 %743  ;;  %v762_v18 = vmul.f32 %v746_v19, %v9600_v49 }
 0x7b9   : > { %7351 = vmatmul.mubr.msk.f32.vlgmr.msra.gmra.mrb[24].mxu1 %vm1165_vm5, %v8626_v7  ;;  %v8628_v44 = vpop.eup %8627 }
 0x7ba   : > { %709 = vrot.lane.b32.xlu1 %v9824_v35, %s8915_s19  ;;  %7901 = vmatpush3.bf16.msra.mxu1 %v7898_v48  ;;  %v8630_v50 = vpop.eup %8629  ;;  %v761_v35 = vmul.f32 %v744_v28, %v9598_v9 }
 0x7bb   : > { %7353 = vmatprep.mubr.msk.f32.mxu1 %vm1165_vm5, %v8628_v44  ;;  %779 = vrot.lane.b32.xlu0 %v759_v32, %s8916_s28  ;;  %v2770_v12 = vsel %vm1165_vm5, %v8630_v50, 0.0  ;;  %v814_v48 = vpop.permute.xlu1 %813 }
 0x7bc   : > { %7927 = vmatprep.subr.bf16.mxu1 %v11426_v2  ;;  %v812_v57 = vpop.permute.xlu0 %811  ;;  %v832_v7 = vmul.f32 %v814_v48, %v9440_v54 }
 0x7bd   : > { %7354 = vmatmul.mubr.msk.f32.gmra.mrb[26].mxu1 %vm1165_vm5, %v8630_v50  ;;  %v831_v41 = vmul.f32 %v812_v57, %v9434_v38 }
 0x7be   : > { %781 = vrot.lane.b32.xlu1 %v760_v51, %s8916_s28 }
 0x7bf   : > { %711 = vrot.lane.b32.xlu0 %v9866_v11, %s8915_s19  ;;  %v3214_v11 = vsel %vm1165_vm5, %v10135_v20, -inf }
 0x7c2   : > { %713 = vrot.lane.b32.xlu1 %v9854_v56, %s8915_s19  ;;  %v2767_v56 = vsel %vm1165_vm5, %v8628_v44, 0.0 }
 0x7c3   : > { %783 = vrot.lane.b32.xlu0 %v761_v35, %s8916_s28 }
 0x7e2   : > { %3212 = vmax.xlane.f32.xlu0 %v3211_v37 }
 0x7e6   : > { %2765 = vadd.xlane.f32.xlu1 %v2764_v52  ;;  %2762 = vadd.xlane.f32.xlu0 %v2761_v55 }
 0x7ea   : > { %3215 = vmax.xlane.f32.xlu0 %v3214_v11 }
 0x7ee   : > { %3218 = vmax.xlane.f32.xlu0 %v3217_v25 }
 0x7f2   : > { %2768 = vadd.xlane.f32.xlu0 %v2767_v56 }
 0x7f7   : > { %785 = vrot.lane.b32.xlu1 %v762_v18, %s8916_s28 }
 0x81b   : > { %2771 = vadd.xlane.f32.xlu1 %v2770_v12 }
 0x81c   : > { %v884_v42 = vpop.permute.xlu0 %883 }
 0x81d   : > { %v903_v51 = vadd.f32 %v884_v42, %v831_v41 }
 0x81f   : > { %3221 = vmax.xlane.f32.xlu1 %v3220_v24 }
 0x820   : > { %v886_v32 = vpop.permute.xlu1 %885  ;;  %v816_v44 = vpop.permute.xlu0 %815 }
 0x821   : > { %v904_v28 = vadd.f32 %v886_v32, %v832_v7  ;;  %v833_v52 = vmul.f32 %v816_v44, %v9598_v9 }
 0x823   : > { %v10260_v35 = vpack.i.bf16 %v904_v28, %v903_v51  ;;  %v2734_v51 = vsub.f32 -1e+30, %v2730_v62 }
 0x824   : > { %v818_v37 = vpop.permute.xlu1 %817 }
 0x825   : > { %11427 = vst [vmem:[#allocation23_spill] sm:$0xff] %v10260_v35  ;;  %8426 = vrot.lane.b32.xlu0 %v10260_v35, %s8917_s13  ;;  %v888_v50 = vpop.permute.xlu0 %887  ;;  %v834_v55 = vmul.f32 %v818_v37, %v9600_v49 }
 0x826   : > { %v905_v25 = vadd.f32 %v888_v50, %v833_v52  ;;  %v2735_v50 = vsub.f32 -1e+30, %v2731_v4 }
 0x828   : > { %v890_v11 = vpop.permute.xlu1 %889 }
 0x829   : > { %v906_v56 = vadd.f32 %v890_v11, %v834_v55  ;;  %v708_v19 = vpop.permute.xlu0 %707  ;;  %v2741_v11 = vmul.f32 1.442695, %v2735_v50 }
 0x82a   : > { %v727_v48 = vmul.f32 %v708_v19, %v9434_v38  ;;  %v2733_v38 = vsub.f32 -1e+30, %v2729_v61 }
 0x82b   : > { %v10266_v18 = vpack.i.bf16 %v906_v56, %v905_v25 }
 0x82c   : > { %v710_v57 = vpop.permute.xlu1 %709  ;;  %v2737_v37 = vmul.f32 1.442695, %v2733_v38 }
 0x82d   : > { %11428 = vst [vmem:[#allocation25_spill] sm:$0xff] %v10266_v18  ;;  %v780_v12 = vpop.permute.xlu0 %779  ;;  %v728_v42 = vmul.f32 %v710_v57, %v9440_v54  ;;  %v2739_v54 = vmul.f32 1.442695, %v2734_v51 }
 0x82e   : > { %v799_v7 = vsub.f32 %v727_v48, %v780_v12 }
 0x82f   : > { %8631 = vpow2.f32 %v2739_v54 }
 0x830   : > { %v782_v24 = vpop.permute.xlu1 %781  ;;  %8431 = vrot.lane.b32.xlu1 %v10266_v18, %s8917_s13  ;;  %8633 = vpow2.f32 %v2737_v37 }
 0x831   : > { %v800_v41 = vsub.f32 %v728_v42, %v782_v24  ;;  %v712_v44 = vpop.permute.xlu0 %711  ;;  %8635 = vpow2.f32 %v2741_v11  ;;  %v2743_v24 = vmul.f32 1.442695, %v2736_v39 }
 0x832   : > { %v729_v33 = vmul.f32 %v712_v44, %v9598_v9 }
 0x833   : > { %v10272_v32 = vpack.i.bf16 %v800_v41, %v799_v7  ;;  %8637 = vpow2.f32 %v2743_v24 }
 0x834   : > { %v714_v52 = vpop.permute.xlu1 %713 }
 0x835   : > { %11429 = vst [vmem:[#allocation8_spill] sm:$0xff] %v10272_v32  ;;  %8436 = vrot.lane.b32.xlu1 %v10272_v32, %s8915_s19  ;;  %v784_v28 = vpop.permute.xlu0 %783  ;;  %v730_v62 = vmul.f32 %v714_v52, %v9600_v49 }
 0x836   : > { %v801_v19 = vsub.f32 %v729_v33, %v784_v28 }
 0x839   : > { %v8632_v12 = vpop.eup %8631 }
 0x83a   : > { %v8634_v48 = vpop.eup %8633  ;;  %v2758_v7 = vmul.f32 0.0, %v8632_v12 }
 0x83b   : > { %v2757_v9 = vmul.f32 0.0, %v8634_v48  ;;  %v8636_v41 = vpop.eup %8635  ;;  %v11431_v48 = vld [vmem:[#allocation11_spill] sm:$0xff] }
 0x83c   : > { %v2759_v38 = vmul.f32 0.0, %v8636_v41 }
 0x83d   : > { %v8638_v8 = vpop.eup %8637 }
 0x86f   : > { %v3213_v55 = vpop.xlane.xlu0 %3212 }
 0x873   : > { %v2766_v25 = vpop.xlane.xlu1 %2765  ;;  %v2763_v56 = vpop.xlane.xlu0 %2762 }
 0x874   : > { %v2774_v49 = vadd.f32 %v2766_v25, %v2758_v7  ;;  %v2773_v44 = vadd.f32 %v2763_v56, %v2757_v9 }
 0x876   : > { %8639 = vrcp.f32 %v2774_v49  ;;  %v10298_v49 = vmax.f32 %v3213_v55, -1e+30 }
 0x877   : > { %v786_v10 = vpop.permute.xlu1 %785  ;;  %v3216_v61 = vpop.xlane.xlu0 %3215  ;;  %8641 = vrcp.f32 %v2773_v44 }
 0x878   : > { %v802_v57 = vsub.f32 %v730_v62, %v786_v10  ;;  %v2760_v62 = vmul.f32 0.0, %v8638_v8  ;;  %v10300_v44 = vmax.f32 %v3216_v61, -1e+30 }
 0x87a   : > { %v10286_v4 = vpack.i.bf16 %v802_v57, %v801_v19 }
 0x87b   : > { %v3219_v42 = vpop.xlane.xlu0 %3218 }
 0x87c   : > { %11430 = vst [vmem:[#allocation26_spill] sm:$0xff] %v10286_v4  ;;  %8441 = vrot.lane.b32.xlu1 %v10286_v4, %s8915_s19  ;;  %s257_s19 = sand.u32 1, %s8901_s22  }
 0x87d   : > { %s6531_s13 = sshll.u32 %s257_s19, 6 }
 0x87e   : > { %s10370_s10 = scalar_lea.vmem [#allocation5], %s6531_s13  ;;  %s11459_s13 = smov 8  }
 0x87f   : > { %v2769_v51 = vpop.xlane.xlu0 %2768 }
 0x880   : > { %v2775_v60 = vadd.f32 %v2769_v51, %v2759_v38  ;;  %v8640_v50 = vpop.eup %8639  ;;  %v10304_v51 = vmax.f32 %v3219_v42, -1e+30 }
 0x881   : > { %v8642_v11 = vpop.eup %8641 }
 0x882   : > { %8643 = vrcp.f32 %v2775_v60  ;;  %v3240_v60 = vsub.f32 %v10135_v20, %v10300_v44 }
 0x884   : > { %v3245_v55 = vmul.f32 1.442695, %v3240_v60 }
 0x88c   : > { %v7352_v28 = vpop.f32.mrb[24].mxu1  ;;  %v8644_v39 = vpop.eup %8643 }
 0x88d   : > { %v2887_v54 = vadd.f32 %v7352_v28, %v2758_v7  ;;  %v2867_v37 = vpop.f32.mrb[25].mxu1 }
 0x88e   : > { %v2886_v52 = vadd.f32 %v2867_v37, %v2757_v9 }
 0x88f   : > { %v2895_v33 = vmul.f32 %v8640_v50, %v2887_v54  ;;  %v3241_v54 = vsub.f32 %v10141_v53, %v10304_v51 }
 0x890   : > { %v2894_v10 = vmul.f32 %v8642_v11, %v2886_v52  ;;  %v7355_v19 = vpop.f32.mrb[26].mxu1 }
 0x891   : > { %v2889_v25 = vadd.f32 %v7355_v19, %v2760_v62  ;;  %v2877_v56 = vpop.f32.mrb[27].mxu1  ;;  %v3247_v61 = vmul.f32 1.442695, %v3241_v54 }
 0x892   : > { %v2888_v57 = vadd.f32 %v2877_v56, %v2759_v38  ;;  %7360 = vmatprep.mubr.msk.f32.mxu1 %vm1762_vm8, %v2894_v10 }
 0x893   : > { %7361 = vmatmul.mubr.msk.f32.vlgmr.msra.gmra.mrb[12].mxu1 %vm1762_vm8, %v2895_v33 }
 0x894   : > { %v2896_v12 = vmul.f32 %v8644_v39, %v2888_v57  ;;  %7929 = vmatpush3.bf16.msra.mxu1 %v11426_v2  ;;  %v3239_v2 = vsub.f32 %v10137_v16, %v10298_v49 }
 0x895   : > { %7931 = vmatprep.subr.bf16.mxu1 %v11431_v48 }
 0x896   : > { %7363 = vmatprep.mubr.msk.f32.mxu1 %vm1762_vm8, %v2896_v12  ;;  %v3243_v28 = vmul.f32 1.442695, %v3239_v2 }
 0x897   : > { %v8427_v24 = vpop.permute.xlu0 %8426 }
 0x898   : > { %v8429_v7 = vunpack.i.h.bf16 %v8427_v24  ;;  %v8428_v9 = vunpack.i.l.bf16 %v8427_v24  ;;  %7933 = vmatpush3.bf16.msra.mxu1 %v11431_v48 }
 0x89a   : > { %v7934_v41 = vpack.c.bf16 %v8429_v7, %v8428_v9  ;;  %v8807_v9 = vld [vmem:[%s9055_s16 + $0x8] sm:$0xff] }
 0x89c   : > { %7936 = vmatprep.subr.msk.bf16.mxu1 %vm9451_vm2, %v7934_v41 }
 0x8a8   : > { %v2772_v38 = vpop.xlane.xlu1 %2771 }
 0x8a9   : > { %v2776_v8 = vadd.f32 %v2772_v38, %v2760_v62  ;;  %v8808_v38 = vld [vmem:[%s9055_s16] sm:$0xff] }
 0x8ab   : > { %8645 = vrcp.f32 %v2776_v8 }
 0x8ac   : > { %v3222_v37 = vpop.xlane.xlu1 %3221  ;;  %8647 = vpow2.f32 %v3243_v28  ;;  %v8809_v28 = vld [vmem:[%s9055_s16 + $0x18] sm:$0xff] }
 0x8ad   : > { %v10310_v50 = vmax.f32 %v3222_v37, -1e+30  ;;  %8649 = vpow2.f32 %v3245_v55  ;;  %v8810_v55 = vld [vmem:[%s9055_s16 + $0x10] sm:$0xff] }
 0x8ae   : > { %8651 = vpow2.f32 %v3247_v61 }
 0x8af   : > { %v3242_v16 = vsub.f32 %v10139_v40, %v10310_v50 }
 0x8b0   : > { %v8432_v20 = vpop.permute.xlu1 %8431 }
 0x8b1   : > { %v3249_v42 = vmul.f32 1.442695, %v3242_v16  ;;  %v8434_v53 = vunpack.i.h.bf16 %v8432_v20  ;;  %v8433_v62 = vunpack.i.l.bf16 %v8432_v20 }
 0x8b3   : > { %8653 = vpow2.f32 %v3249_v42  ;;  %v7940_v40 = vpack.c.bf16 %v8434_v53, %v8433_v62 }
 0x8b4   : > { %v8437_v56 = vpop.permute.xlu1 %8436 }
 0x8b5   : > { %v8646_v52 = vpop.eup %8645  ;;  %v8439_v57 = vunpack.i.h.bf16 %v8437_v56  ;;  %v8438_v39 = vunpack.i.l.bf16 %v8437_v56 }
 0x8b6   : > { %v2897_v11 = vmul.f32 %v8646_v52, %v2889_v25  ;;  %v10314_v33 = vpop.eup %8647 }
 0x8b7   : > { %v10319_v10 = vpop.eup %8649  ;;  %v7946_v12 = vpack.c.bf16 %v8439_v57, %v8438_v39 }
 0x8b8   : > { %7364 = vmatmul.mubr.msk.f32.gmra.mrb[14].mxu1 %vm1762_vm8, %v2897_v11  ;;  %v10321_v19 = vpop.eup %8651 }
 0x8b9   : > { %7402 = vmatprep.mubr.msk.f32.mxu1 %vm1165_vm5, %v10314_v33 }
 0x8bc   : > { %7403 = vmatmul.mubr.msk.f32.vlgmr.msra.gmra.mrb[28].mxu1 %vm1165_vm5, %v10319_v10 }
 0x8bd   : > { %7939 = vmatpush3.bf16.xpose.msk.msra.mxu1 %vm9451_vm2, %v7934_v41  ;;  %7405 = vmatprep.mubr.msk.f32.mxu1 %vm1165_vm5, %v10321_v19  ;;  %v10331_v25 = vpop.eup %8653 }
 0x8be   : > { %7942 = vmatprep.subr.msk.bf16.mxu1 %vm9451_vm2, %v7940_v40 }
 0x8c0   : > { %7406 = vmatmul.mubr.msk.f32.gmra.mrb[30].mxu1 %vm1165_vm5, %v10331_v25 }
 0x8c1   : > { %7416 = vmatprep.mubr.msk.f32.mxu1 %vm942_vm1, %v10014_v22 }
 0x8c5   : > { %7945 = vmatpush3.bf16.xpose.msk.msra.mxu1 %vm9451_vm2, %v7940_v40 }
 0x8c6   : > { %7948 = vmatprep.subr.msk.bf16.mxu1 %vm9451_vm2, %v7946_v12 }
 0x8cc   : > { %7417 = vmatmul.mubr.msk.f32.vlgmr.msra.gmra.mrb[32].mxu1 %vm942_vm1, %v10018_v3  ;;  %v11432_v3 = vld [vmem:[#allocation21_spill] sm:$0xff] }
 0x8cd   : > { %7419 = vmatprep.mubr.msk.f32.mxu1 %vm942_vm1, %v10028_v46  ;;  %7951 = vmatpush3.bf16.xpose.msk.msra.mxu1 %vm9451_vm2, %v7946_v12  ;;  %v11433_v46 = vld [vmem:[#allocation22_spill] sm:$0xff] }
 0x8d0   : > { %7420 = vmatmul.mubr.msk.f32.gmra.mrb[34].mxu1 %vm942_vm1, %v10034_v1 }
 0x8d1   : > { %7430 = vmatprep.mubr.msk.f32.mxu1 %vm942_vm1, %v10036_v29 }
 0x8ee   : > { %v8442_v22 = vpop.permute.xlu1 %8441 }
 0x8ef   : > { %v8444_v48 = vunpack.i.h.bf16 %v8442_v22  ;;  %v8443_v24 = vunpack.i.l.bf16 %v8442_v22 }
 0x8f1   : > { %v7952_v7 = vpack.c.bf16 %v8444_v48, %v8443_v24 }
 0x8f3   : > { %7954 = vmatprep.subr.msk.bf16.mxu1 %vm9451_vm2, %v7952_v7 }
 0x8f4   : > { %7957 = vmatpush3.bf16.xpose.msk.msra.mxu1 %vm9451_vm2, %v7952_v7 }
 0x8f5   : > { %7991 = vmatprep.subr.bf16.mxu1 %v11432_v3 }
 0x8fb   : > { %7431 = vmatmul.mubr.msk.f32.vlgmr.msra.gmra.mrb[32].mxu1 %vm942_vm1, %v10048_v59 }
 0x8fc   : > { %7433 = vmatprep.mubr.msk.f32.mxu1 %vm942_vm1, %v10054_v30  ;;  %7993 = vmatpush3.bf16.msra.mxu1 %v11432_v3  ;;  %v3228_v3 = vsub.f32 -1e+30, %v10300_v44 }
 0x8fd   : > { %7995 = vmatprep.subr.bf16.mxu1 %v11433_v46 }
 0x8ff   : > { %7434 = vmatmul.mubr.msk.f32.gmra.mrb[34].mxu1 %vm942_vm1, %v10056_v13 }
 0x900   : > { %7997 = vmatpush3.bf16.msra.mxu1 %v11433_v46  ;;  %v3227_v46 = vsub.f32 -1e+30, %v10298_v49 }
 0x966   : > { %v7362_v1 = vpop.f32.mrb[12].mxu1 }
 0x967   : > { %v3002_v41 = vadd.f32 %v8807_v9, %v7362_v1  ;;  %v2978_v2 = vpop.f32.mrb[13].mxu1  ;;  %v3233_v1 = vmul.f32 1.442695, %v3228_v3  ;;  %v3229_v9 = vsub.f32 -1e+30, %v10304_v51 }
 0x968   : > { %v3001_v60 = vadd.f32 %v8808_v38, %v2978_v2  ;;  %v3230_v2 = vsub.f32 -1e+30, %v10310_v50 }
 0x969   : > { %3006 = vst.msk [vmem:[%s10370_s10 + $0x8] sm:$0xff] %vm282_vm0, %v3002_v41  ;;  %v3231_v41 = vmul.f32 1.442695, %v3227_v46  ;;  %8655 = vpow2.f32 %v3233_v1 }
 0x96a   : > { %3005 = vst.msk [vmem:[%s10370_s10] sm:$0xff] %vm282_vm0, %v3001_v60 }
 0x96b   : > { %8657 = vpow2.f32 %v3231_v41 }
 0x98b   : > { %v7365_v8 = vpop.f32.mrb[14].mxu1 }
 0x98c   : > { %v3004_v54 = vadd.f32 %v8809_v28, %v7365_v8  ;;  %v2988_v37 = vpop.f32.mrb[15].mxu1  ;;  %v3235_v28 = vmul.f32 1.442695, %v3229_v9 }
 0x98d   : > { %v3003_v61 = vadd.f32 %v8810_v55, %v2988_v37 }
 0x98e   : > { %3008 = vst.msk [vmem:[%s10370_s10 + $0x18] sm:$0xff] %vm282_vm0, %v3004_v54  ;;  %8659 = vpow2.f32 %v3235_v28 }
 0x98f   : > { %3007 = vst.msk [vmem:[%s10370_s10 + $0x10] sm:$0xff] %vm282_vm0, %v3003_v61  ;;  %v10382_v16 = vpop.f32.mrb[28].mxu1  ;;  %v3237_v61 = vmul.f32 1.442695, %v3230_v2 }
 0x990   : > { %v10384_v42 = vpop.f32.mrb[29].mxu1 }
 0x993   : > { %v10386_v52 = vpop.f32.mrb[30].mxu1 }
 0x994   : > { %v10388_v20 = vpop.f32.mrb[31].mxu1 }
 0x9ce   : > { %v7432_v11 = vpop.f32.mrb[32].mxu1 }
 0x9cf   : > { %v3583_v53 = vsel %vm9606_vm3, %v7432_v11, -1e+30  ;;  %v3563_v62 = vpop.f32.mrb[33].mxu1 }
 0x9d0   : > { %v3589_v40 = vsel %vm1165_vm5, %v3583_v53, -inf  ;;  %v3582_v56 = vsel %vm9610_vm4, %v3563_v62, -1e+30 }
 0x9d1   : > { %v3586_v57 = vsel %vm1165_vm5, %v3582_v56, -inf  ;;  %3590 = vmax.xlane.f32.xlu1 %v3589_v40 }
 0x9d2   : > { %3587 = vmax.xlane.f32.xlu0 %v3586_v57  ;;  %v7435_v39 = vpop.f32.mrb[34].mxu1 }
 0x9d3   : > { %v3573_v12 = vpop.f32.mrb[35].mxu1  ;;  %v3585_v24 = vsel %vm9622_vm6, %v7435_v39, -1e+30 }
 0x9d4   : > { %v3584_v22 = vsel %vm9632_vm7, %v3573_v12, -1e+30  ;;  %v3595_v7 = vsel %vm1165_vm5, %v3585_v24, -inf }
 0x9d5   : > { %v3592_v48 = vsel %vm1165_vm5, %v3584_v22, -inf }
 0x9d6   : > { %3593 = vmax.xlane.f32.xlu0 %v3592_v48 }
 0x9da   : > { %3596 = vmax.xlane.f32.xlu0 %v3595_v7 }
 0x9e2   : > { %3763 = vrot.lane.b32.xlu1 %v9983_v15, %s8920_s15 }
 0x9e6   : > { %3765 = vrot.lane.b32.xlu1 %v9995_v36, %s8920_s15 }
 0x9ea   : > { %3767 = vrot.lane.b32.xlu1 %v10002_v23, %s8920_s15 }
 0x9ee   : > { %3864 = vrot.lane.b32.xlu1 %v10048_v59, %s11434_s12 }
 0x9f0   : > { %3761 = vrot.lane.b32.xlu0 %v9972_v47, %s8920_s15  ;;  %s11438_s15 = smov 24  }
 0x9f2   : > { %3868 = vrot.lane.b32.xlu1 %v10056_v13, %s11434_s12 }
 0x9f4   : > { %3862 = vrot.lane.b32.xlu0 %v10036_v29, %s11434_s12 }
 0x9f8   : > { %3866 = vrot.lane.b32.xlu0 %v10054_v30, %s11434_s12  ;;  %s11460_s12 = smov 40  }
 0xa5e   : > { %v3591_v38 = vpop.xlane.xlu1 %3590 }
 0xa5f   : > { %v3599_v60 = vmax.f32 %v10300_v44, %v3591_v38  ;;  %v3588_v8 = vpop.xlane.xlu0 %3587 }
 0xa60   : > { %v3598_v54 = vmax.f32 %v10298_v49, %v3588_v8 }
 0xa61   : > { %v3603_v37 = vsub.f32 %v10300_v44, %v3599_v60  ;;  %v3615_v55 = vsub.f32 %v3583_v53, %v3599_v60 }
 0xa62   : > { %v3602_v11 = vsub.f32 %v10298_v49, %v3598_v54  ;;  %v3614_v62 = vsub.f32 %v3582_v56, %v3598_v54  ;;  %v8656_v56 = vpop.eup %8655 }
 0xa63   : > { %v3608_v40 = vmul.f32 1.442695, %v3603_v37  ;;  %v3594_v57 = vpop.xlane.xlu0 %3593  ;;  %v3620_v7 = vmul.f32 1.442695, %v3615_v55  ;;  %v8658_v2 = vpop.eup %8657  ;;  %v10430_v38 = vmul.f32 0.0, %v8656_v56 }
 0xa64   : > { %v3606_v39 = vmul.f32 1.442695, %v3602_v11  ;;  %v3618_v12 = vmul.f32 1.442695, %v3614_v62  ;;  %v3600_v48 = vmax.f32 %v10304_v51, %v3594_v57  ;;  %v10434_v28 = vmul.f32 0.0, %v8658_v2 }
 0xa65   : > { %8661 = vpow2.f32 %v3608_v40  ;;  %v3369_v8 = vadd.f32 %v10382_v16, %v10430_v38 }
 0xa66   : > { %8663 = vpow2.f32 %v3237_v61  ;;  %v3604_v3 = vsub.f32 %v10304_v51, %v3600_v48  ;;  %v3616_v46 = vsub.f32 %v3584_v22, %v3600_v48  ;;  %v8660_v22 = vpop.eup %8659  ;;  %v11435_v48 = vld [vmem:[#allocation13_spill] sm:$0xff] }
 0xa67   : > { %8665 = vpow2.f32 %v3606_v39  ;;  %v3597_v44 = vpop.xlane.xlu0 %3596  ;;  %v10443_v61 = vmul.f32 0.0, %v8660_v22 }
 0xa68   : > { %8667 = vpow2.f32 %v3618_v12  ;;  %v3610_v53 = vmul.f32 1.442695, %v3604_v3  ;;  %v3622_v1 = vmul.f32 1.442695, %v3616_v46  ;;  %v3601_v49 = vmax.f32 %v10310_v50, %v3597_v44 }
 0xa69   : > { %8669 = vpow2.f32 %v3620_v7  ;;  %v3370_v40 = vadd.f32 %v10388_v20, %v10443_v61 }
 0xa6a   : > { %8671 = vpow2.f32 %v3610_v53  ;;  %v3605_v9 = vsub.f32 %v10310_v50, %v3601_v49  ;;  %v3617_v41 = vsub.f32 %v3585_v24, %v3601_v49  ;;  %v3368_v50 = vadd.f32 %v10384_v42, %v10434_v28 }
 0xa6b   : > { %8673 = vpow2.f32 %v3622_v1  ;;  %v10478_v44 = vpop.permute.xlu0 %3761  ;;  %v11437_v1 = vld [vmem:[#allocation15_spill] sm:$0xff] }
 0xa6c   : > { %v3612_v60 = vmul.f32 1.442695, %v3605_v9  ;;  %v3624_v51 = vmul.f32 1.442695, %v3617_v41 }
 0xa6e   : > { %8675 = vpow2.f32 %v3612_v60 }
 0xa6f   : > { %v10436_v54 = vpop.eup %8661  ;;  %8677 = vpow2.f32 %v3624_v51  ;;  %v10506_v56 = vpop.permute.xlu0 %3862 }
 0xa70   : > { %v8664_v37 = vpop.eup %8663  ;;  %v3647_v24 = vmul.f32 %v10436_v54, %v3369_v8 }
 0xa71   : > { %v10441_v55 = vpop.eup %8665  ;;  %v10460_v39 = vmul.f32 0.0, %v8664_v37 }
 0xa72   : > { %v10445_v11 = vpop.eup %8667  ;;  %v3646_v16 = vmul.f32 %v10441_v55, %v3368_v50 }
 0xa73   : > { %v10448_v62 = vpop.eup %8669  ;;  %7444 = vmatprep.mubr.msk.f32.mxu0 %vm1165_vm5, %v10445_v11  ;;  %v3371_v20 = vadd.f32 %v10386_v52, %v10460_v39  ;;  %v11436_v52 = vld [vmem:[#allocation14_spill] sm:$0xff]  ;;  %v10517_v41 = vpop.permute.xlu0 %3866 }
 0xa74   : > { %v10454_v57 = vpop.eup %8671  ;;  %7445 = vmatmul.mubr.msk.f32.vlgmr.msra.gmra.mrb[28].mxu0 %vm1165_vm5, %v10448_v62 }
 0xa75   : > { %v10458_v42 = vpop.eup %8673  ;;  %7971 = vmatpush3.bf16.xpose.msk.msra.mxu0 %vm9451_vm2, %v9463_v63  ;;  %v3648_v12 = vmul.f32 %v10454_v57, %v3370_v40  ;;  %v10482_v63 = vpop.permute.xlu1 %3763 }
 0xa76   : > { %7974 = vmatprep.subr.msk.bf16.mxu0 %vm9451_vm2, %v11435_v48  ;;  %7447 = vmatprep.mubr.msk.f32.mxu0 %vm1165_vm5, %v10458_v42 }
 0xa78   : > { %v10473_v7 = vpop.eup %8675 }
 0xa79   : > { %v10475_v3 = vpop.eup %8677  ;;  %v3649_v46 = vmul.f32 %v10473_v7, %v3371_v20  ;;  %v10492_v53 = vpop.permute.xlu1 %3765 }
 0xa7a   : > { %7448 = vmatmul.mubr.msk.f32.gmra.mrb[30].mxu0 %vm1165_vm5, %v10475_v3 }
 0xa7b   : > { %7458 = vmatprep.mubr.msk.f32.mxu0 %vm942_vm1, %v10478_v44 }
 0xa7d   : > { %7977 = vmatpush3.bf16.xpose.msk.msra.mxu0 %vm9451_vm2, %v11435_v48  ;;  %v10504_v49 = vpop.permute.xlu1 %3767 }
 0xa7e   : > { %7980 = vmatprep.subr.msk.bf16.mxu0 %vm9451_vm2, %v11436_v52 }
 0xa81   : > { %v10515_v9 = vpop.permute.xlu1 %3864 }
 0xa84   : > { %7459 = vmatmul.mubr.msk.f32.vlgmr.msra.gmra.mrb[32].mxu0 %vm942_vm1, %v10482_v63 }
 0xa85   : > { %7461 = vmatprep.mubr.msk.f32.mxu0 %vm942_vm1, %v10492_v53  ;;  %7983 = vmatpush3.bf16.xpose.msk.msra.mxu0 %vm9451_vm2, %v11436_v52  ;;  %v10523_v2 = vpop.permute.xlu1 %3868 }
 0xa86   : > { %7986 = vmatprep.subr.msk.bf16.mxu0 %vm9451_vm2, %v11437_v1 }
 0xa88   : > { %7462 = vmatmul.mubr.msk.f32.gmra.mrb[34].mxu0 %vm942_vm1, %v10504_v49 }
 0xa89   : > { %7472 = vmatprep.mubr.msk.f32.mxu0 %vm942_vm1, %v10506_v56 }
 0xa8d   : > { %7989 = vmatpush3.bf16.xpose.msk.msra.mxu0 %vm9451_vm2, %v11437_v1 }
 0xa94   : > { %7473 = vmatmul.mubr.msk.f32.vlgmr.msra.gmra.mrb[32].mxu0 %vm942_vm1, %v10515_v9 }
 0xa95   : > { %7475 = vmatprep.mubr.msk.f32.mxu0 %vm942_vm1, %v10517_v41 }
 0xa98   : > { %7476 = vmatmul.mubr.msk.f32.gmra.mrb[34].mxu0 %vm942_vm1, %v10523_v2 }
 0xb47   : > { %v7446_v60 = vpop.f32.mrb[28].mxu0 }
 0xb48   : > { %v10527_v51 = vadd.f32 %v7446_v60, %v3647_v24  ;;  %v3728_v22 = vpop.f32.mrb[29].mxu0 }
 0xb49   : > { %v10529_v8 = vadd.f32 %v3728_v22, %v3646_v16 }
 0xb4d   : > { %v7449_v37 = vpop.f32.mrb[30].mxu0 }
 0xb4e   : > { %v10531_v50 = vadd.f32 %v7449_v37, %v3649_v46  ;;  %v3738_v40 = vpop.f32.mrb[31].mxu0 }
 0xb4f   : > { %v10533_v48 = vadd.f32 %v3738_v40, %v3648_v12 }
 0xb67   : > { %v7474_v20 = vpop.f32.mrb[32].mxu0 }
 0xb68   : > { %v3944_v52 = vpop.f32.mrb[33].mxu0  ;;  %v3966_v1 = vsel %vm1165_vm5, %v7474_v20, -inf }
 0xb69   : > { %3967 = vmax.xlane.f32.xlu1 %v3966_v1  ;;  %v3963_v14 = vsel %vm1165_vm5, %v3944_v52, -inf }
 0xb6a   : > { %3964 = vmax.xlane.f32.xlu0 %v3963_v14 }
 0xb6b   : > { %v7477_v58 = vpop.f32.mrb[34].mxu0 }
 0xb6c   : > { %v3954_v24 = vpop.f32.mrb[35].mxu0  ;;  %v3972_v60 = vsel %vm1165_vm5, %v7477_v58, -inf }
 0xb6d   : > { %v3969_v16 = vsel %vm1165_vm5, %v3954_v24, -inf }
 0xb6e   : > { %3973 = vmax.xlane.f32.xlu0 %v3972_v60 }
 0xb72   : > { %3970 = vmax.xlane.f32.xlu0 %v3969_v16 }
 0xb7a   : > { %8451 = vrot.lane.b32.xlu1 %v10266_v18, %s11438_s15 }
 0xb7e   : > { %8456 = vrot.lane.b32.xlu1 %v10272_v32, %s11439_s26 }
 0xb82   : > { %8461 = vrot.lane.b32.xlu1 %v10286_v4, %s11439_s26 }
 0xb88   : > { %8446 = vrot.lane.b32.xlu0 %v10260_v35, %s11438_s15 }
 0xbf6   : > { %v3968_v14 = vpop.xlane.xlu1 %3967 }
 0xbf7   : > { %v10547_v12 = vmax.f32 %v3968_v14, -1e+30  ;;  %v3965_v46 = vpop.xlane.xlu0 %3964 }
 0xbf8   : > { %v10549_v22 = vmax.f32 %v3965_v46, -1e+30 }
 0xbf9   : > { %v3992_v37 = vsub.f32 %v7474_v20, %v10547_v12 }
 0xbfa   : > { %v3991_v40 = vsub.f32 %v3944_v52, %v10549_v22  ;;  %v8452_v46 = vpop.permute.xlu1 %8451 }
 0xbfb   : > { %v3997_v1 = vmul.f32 1.442695, %v3992_v37  ;;  %v3974_v60 = vpop.xlane.xlu0 %3973  ;;  %v8454_v37 = vunpack.i.h.bf16 %v8452_v46  ;;  %v8453_v18 = vunpack.i.l.bf16 %v8452_v46 }
 0xbfc   : > { %v3995_v16 = vmul.f32 1.442695, %v3991_v40  ;;  %v10553_v5 = vmax.f32 %v3974_v60, -1e+30 }
 0xbfe   : > { %8679 = vpow2.f32 %v3995_v16  ;;  %v3994_v31 = vsub.f32 %v7477_v58, %v10553_v5 }
 0xbff   : > { %8681 = vpow2.f32 %v3997_v1  ;;  %v3971_v27 = vpop.xlane.xlu0 %3970 }
 0xc00   : > { %v10556_v6 = vmax.f32 %v3971_v27, -1e+30  ;;  %v4001_v35 = vmul.f32 1.442695, %v3994_v31  ;;  %v8004_v27 = vpack.c.bf16 %v8454_v37, %v8453_v18  ;;  %v8457_v31 = vpop.permute.xlu1 %8456 }
 0xc02   : > { %v3993_v14 = vsub.f32 %v3954_v24, %v10556_v6 }
 0xc03   : > { %v8447_v4 = vpop.permute.xlu0 %8446 }
 0xc04   : > { %v3999_v20 = vmul.f32 1.442695, %v3993_v14  ;;  %v8449_v32 = vunpack.i.h.bf16 %v8447_v4  ;;  %v8448_v52 = vunpack.i.l.bf16 %v8447_v4  ;;  %v8462_v18 = vpop.permute.xlu1 %8461 }
 0xc05   : > { %v8464_v16 = vunpack.i.h.bf16 %v8462_v18  ;;  %v8463_v14 = vunpack.i.l.bf16 %v8462_v18 }
 0xc06   : > { %8683 = vpow2.f32 %v3999_v20  ;;  %v7998_v40 = vpack.c.bf16 %v8449_v32, %v8448_v52  ;;  %v8458_v32 = vunpack.i.l.bf16 %v8457_v31 }
 0xc07   : > { %8685 = vpow2.f32 %v4001_v35  ;;  %v8459_v35 = vunpack.i.h.bf16 %v8457_v31  ;;  %v8016_v46 = vpack.c.bf16 %v8464_v16, %v8463_v14 }
 0xc08   : > { %v8680_v60 = vpop.eup %8679  ;;  %8000 = vmatprep.subr.msk.bf16.mxu1 %vm9451_vm2, %v7998_v40 }
 0xc09   : > { %v10561_v58 = vpop.eup %8681  ;;  %7486 = vmatprep.mubr.msk.f32.mxu1 %vm1165_vm5, %v8680_v60  ;;  %v8010_v1 = vpack.c.bf16 %v8459_v35, %v8458_v32  ;;  %v11441_v35 = vld [vmem:[#allocation20_spill] sm:$0xff] }
 0xc0a   : > { %7487 = vmatmul.mubr.msk.f32.vlgmr.msra.gmra.mrb[36].mxu1 %vm1165_vm5, %v10561_v58  ;;  %v11442_v32 = vld [vmem:[#allocation12_spill] sm:$0xff]  ;;  %v4010_v14 = vsel %vm1165_vm5, %v10561_v58, 0.0 }
 0xc0b   : > { %8003 = vmatpush3.bf16.xpose.msk.msra.mxu1 %vm9451_vm2, %v7998_v40 }
 0xc0c   : > { %8006 = vmatprep.subr.msk.bf16.mxu1 %vm9451_vm2, %v8004_v27 }
 0xc10   : > { %v8684_v4 = vpop.eup %8683 }
 0xc11   : > { %v8686_v24 = vpop.eup %8685  ;;  %7489 = vmatprep.mubr.msk.f32.mxu1 %vm1165_vm5, %v8684_v4  ;;  %v4013_v18 = vsel %vm1165_vm5, %v8684_v4, 0.0 }
 0xc12   : > { %7490 = vmatmul.mubr.msk.f32.gmra.mrb[38].mxu1 %vm1165_vm5, %v8686_v24  ;;  %v4016_v16 = vsel %vm1165_vm5, %v8686_v24, 0.0 }
 0xc13   : > { %8009 = vmatpush3.bf16.xpose.msk.msra.mxu1 %vm9451_vm2, %v8004_v27  ;;  %7500 = vmatprep.mubr.msk.f32.mxu1 %vm942_vm1, %v10478_v44 }
 0xc14   : > { %8012 = vmatprep.subr.msk.bf16.mxu1 %vm9451_vm2, %v8010_v1 }
 0xc1a   : > { %7501 = vmatmul.mubr.msk.f32.vlgmr.msra.gmra.mrb[40].mxu1 %vm942_vm1, %v10482_v63 }
 0xc1b   : > { %7503 = vmatprep.mubr.msk.f32.mxu1 %vm942_vm1, %v10492_v53  ;;  %8015 = vmatpush3.bf16.xpose.msk.msra.mxu1 %vm9451_vm2, %v8010_v1  ;;  %v4007_v1 = vsel %vm1165_vm5, %v8680_v60, 0.0  ;;  %v3981_v60 = vsub.f32 -1e+30, %v10556_v6 }
 0xc1c   : > { %8018 = vmatprep.subr.msk.bf16.mxu1 %vm9451_vm2, %v8016_v46 }
 0xc1e   : > { %7504 = vmatmul.mubr.msk.f32.gmra.mrb[42].mxu1 %vm942_vm1, %v10504_v49 }
 0xc1f   : > { %7514 = vmatprep.mubr.msk.f32.mxu1 %vm942_vm1, %v10506_v56 }
 0xc23   : > { %8021 = vmatpush3.bf16.xpose.msk.msra.mxu1 %vm9451_vm2, %v8016_v46  ;;  %v3980_v46 = vsub.f32 -1e+30, %v10547_v12 }
 0xc24   : > { %8063 = vmatprep.subr.bf16.mxu1 %v9940_v21 }
 0xc2a   : > { %7515 = vmatmul.mubr.msk.f32.vlgmr.msra.gmra.mrb[40].mxu1 %vm942_vm1, %v10515_v9 }
 0xc2b   : > { %7517 = vmatprep.mubr.msk.f32.mxu1 %vm942_vm1, %v10517_v41  ;;  %8065 = vmatpush3.bf16.msra.mxu1 %v9940_v21 }
 0xc2c   : > { %8067 = vmatprep.subr.bf16.mxu1 %v9962_v26 }
 0xc2e   : > { %7518 = vmatmul.mubr.msk.f32.gmra.mrb[42].mxu1 %vm942_vm1, %v10523_v2 }
 0xc2f   : > { %8069 = vmatpush3.bf16.msra.mxu1 %v9962_v26 }
 0xcdd   : > { %v10602_v44 = vpop.f32.mrb[36].mxu1 }
 0xcde   : > { %v10604_v63 = vpop.f32.mrb[37].mxu1 }
 0xce5   : > { %v10606_v53 = vpop.f32.mrb[38].mxu1 }
 0xce6   : > { %v10608_v49 = vpop.f32.mrb[39].mxu1 }
 0xcfd   : > { %v7516_v56 = vpop.f32.mrb[40].mxu1 }
 0xcfe   : > { %v4327_v9 = vsel %vm9606_vm3, %v7516_v56, -1e+30  ;;  %v4307_v21 = vpop.f32.mrb[41].mxu1  ;;  %v3979_v56 = vsub.f32 -1e+30, %v10549_v22 }
 0xcff   : > { %v4333_v41 = vsel %vm1165_vm5, %v4327_v9, -inf  ;;  %v4326_v2 = vsel %vm9610_vm4, %v4307_v21, -1e+30  ;;  %v3985_v21 = vmul.f32 1.442695, %v3980_v46 }
 0xd00   : > { %v4330_v26 = vsel %vm1165_vm5, %v4326_v2, -inf  ;;  %4334 = vmax.xlane.f32.xlu1 %v4333_v41  ;;  %v3982_v41 = vsub.f32 -1e+30, %v10553_v5 }
 0xd01   : > { %4331 = vmax.xlane.f32.xlu0 %v4330_v26  ;;  %v7519_v20 = vpop.f32.mrb[42].mxu1  ;;  %v3983_v26 = vmul.f32 1.442695, %v3979_v56  ;;  %8687 = vpow2.f32 %v3985_v21 }
 0xd02   : > { %v10618_v52 = vsel %vm9622_vm6, %v7519_v20, -1e+30  ;;  %v4317_v37 = vpop.f32.mrb[43].mxu1  ;;  %v3989_v20 = vmul.f32 1.442695, %v3982_v41 }
 0xd03   : > { %v4339_v40 = vsel %vm1165_vm5, %v10618_v52, -inf  ;;  %v4328_v27 = vsel %vm9632_vm7, %v4317_v37, -1e+30  ;;  %8689 = vpow2.f32 %v3983_v26 }
 0xd04   : > { %v4336_v31 = vsel %vm1165_vm5, %v4328_v27, -inf  ;;  %8691 = vpow2.f32 %v3989_v20 }
 0xd05   : > { %4340 = vmax.xlane.f32.xlu0 %v4339_v40  ;;  %v3987_v40 = vmul.f32 1.442695, %v3981_v60 }
 0xd07   : > { %8693 = vpow2.f32 %v3987_v40 }
 0xd09   : > { %4337 = vmax.xlane.f32.xlu0 %v4336_v31 }
 0xd11   : > { %8471 = vrot.lane.b32.xlu1 %v11441_v35, %s11440_s14 }
 0xd1f   : > { %8466 = vrot.lane.b32.xlu0 %v11442_v32, %s11440_s14 }
 0xd35   : > { %4008 = vadd.xlane.f32.xlu1 %v4007_v1 }
 0xd39   : > { %4014 = vadd.xlane.f32.xlu1 %v4013_v18 }
 0xd3d   : > { %4017 = vadd.xlane.f32.xlu1 %v4016_v16 }
 0xd3e   : > { %4011 = vadd.xlane.f32.xlu0 %v4010_v14 }
 0xd8d   : > { %v4335_v4 = vpop.xlane.xlu1 %4334 }
 0xd8e   : > { %v4343_v24 = vmax.f32 %v10547_v12, %v4335_v4  ;;  %v4332_v37 = vpop.xlane.xlu0 %4331 }
 0xd8f   : > { %v4342_v58 = vmax.f32 %v10549_v22, %v4332_v37 }
 0xd90   : > { %v4347_v31 = vsub.f32 %v10547_v12, %v4343_v24  ;;  %v4359_v1 = vsub.f32 %v4327_v9, %v4343_v24  ;;  %v8688_v12 = vpop.eup %8687 }
 0xd91   : > { %v4346_v18 = vsub.f32 %v10549_v22, %v4342_v58  ;;  %v4358_v16 = vsub.f32 %v4326_v2, %v4342_v58  ;;  %v8472_v9 = vpop.permute.xlu1 %8471  ;;  %v8690_v40 = vpop.eup %8689  ;;  %v10647_v58 = vmul.f32 0.0, %v8688_v12 }
 0xd92   : > { %v4352_v14 = vmul.f32 1.442695, %v4347_v31  ;;  %v4364_v46 = vmul.f32 1.442695, %v4359_v1  ;;  %v4341_v56 = vpop.xlane.xlu0 %4340  ;;  %v8474_v31 = vunpack.i.h.bf16 %v8472_v9  ;;  %v8473_v1 = vunpack.i.l.bf16 %v8472_v9 }
 0xd93   : > { %v4350_v21 = vmul.f32 1.442695, %v4346_v18  ;;  %v4362_v41 = vmul.f32 1.442695, %v4358_v16  ;;  %v4345_v4 = vmax.f32 %v10553_v5, %v4341_v56  ;;  %v8692_v56 = vpop.eup %8691 }
 0xd94   : > { %8695 = vpow2.f32 %v4352_v14  ;;  %v8026_v12 = vpack.c.bf16 %v8474_v31, %v8473_v1 }
 0xd95   : > { %8697 = vpow2.f32 %v4364_v46  ;;  %v4349_v60 = vsub.f32 %v10553_v5, %v4345_v4  ;;  %v4361_v20 = vsub.f32 %v10618_v52, %v4345_v4  ;;  %v4121_v52 = vadd.f32 %v10602_v44, %v10647_v58 }
 0xd96   : > { %8699 = vpow2.f32 %v4350_v21  ;;  %v4338_v26 = vpop.xlane.xlu0 %4337  ;;  %v10651_v4 = vmul.f32 0.0, %v8690_v40 }
 0xd97   : > { %8701 = vpow2.f32 %v4362_v41  ;;  %v4356_v22 = vmul.f32 1.442695, %v4349_v60  ;;  %v4344_v2 = vmax.f32 %v10556_v6, %v4338_v26  ;;  %v4368_v21 = vmul.f32 1.442695, %v4361_v20  ;;  %v8694_v41 = vpop.eup %8693 }
 0xd98   : > { %v4120_v26 = vadd.f32 %v10604_v63, %v10651_v4  ;;  %v10673_v40 = vmul.f32 0.0, %v8694_v41  ;;  %v3633_v41 = vsel %vm1165_vm5, %v10448_v62, 0.0 }
 0xd99   : > { %8703 = vpow2.f32 %v4356_v22  ;;  %v4348_v24 = vsub.f32 %v10556_v6, %v4344_v2  ;;  %v4360_v37 = vsub.f32 %v4328_v27, %v4344_v2  ;;  %v10662_v2 = vmul.f32 0.0, %v8692_v56 }
 0xd9a   : > { %v8467_v5 = vpop.permute.xlu0 %8466 }
 0xd9b   : > { %v4354_v18 = vmul.f32 1.442695, %v4348_v24  ;;  %v4366_v16 = vmul.f32 1.442695, %v4360_v37  ;;  %v8469_v14 = vunpack.i.h.bf16 %v8467_v5  ;;  %v8468_v46 = vunpack.i.l.bf16 %v8467_v5 }
 0xd9c   : > { %v4123_v63 = vadd.f32 %v10606_v53, %v10662_v2  ;;  %v4122_v5 = vadd.f32 %v10608_v49, %v10673_v40  ;;  %v3258_v49 = vsel %vm1165_vm5, %v10319_v10, 0.0  ;;  %v3636_v10 = vsel %vm1165_vm5, %v10458_v42, 0.0  ;;  %v3759_v42 = vld [vmem:[%s11275_s3] sm:$0xff] }
 0xd9d   : > { %8705 = vpow2.f32 %v4354_v18  ;;  %v8022_v6 = vpack.c.bf16 %v8469_v14, %v8468_v46 }
 0xd9e   : > { %v10653_v27 = vpop.eup %8695  ;;  %8707 = vpow2.f32 %v4366_v16  ;;  %v3255_v16 = vsel %vm1165_vm5, %v10314_v33, 0.0  ;;  %v3630_v33 = vsel %vm1165_vm5, %v10445_v11, 0.0  ;;  %v3639_v11 = vsel %vm1165_vm5, %v10475_v3, 0.0  ;;  %v3760_v3 = vld [vmem:[%s11275_s3 + $0x8] sm:$0xff] }
 0xd9f   : > { %v8698_v60 = vpop.eup %8697  ;;  %8023 = vmatprep.subr.bf16.mxu0 %v8022_v6  ;;  %v10658_v9 = vmul.f32 %v10653_v27, %v4121_v52  ;;  %8709 = vpow2.f32 %v4368_v21  ;;  %v3261_v52 = vsel %vm1165_vm5, %v10321_v19, 0.0  ;;  %v4519_v19 = vld [vmem:[%s11275_s3 + $0x10] sm:$0xff] }
 0xda0   : > { %v10660_v22 = vpop.eup %8699  ;;  %v4377_v44 = vsel %vm1165_vm5, %v8698_v60, 0.0  ;;  %8025 = vmatpush3.bf16.msra.mxu0 %v8022_v6  ;;  %v3264_v6 = vsel %vm1165_vm5, %v10331_v25, 0.0  ;;  %v4520_v25 = vld [vmem:[%s11275_s3 + $0x18] sm:$0xff] }
 0xda1   : > { %v8702_v20 = vpop.eup %8701  ;;  %4378 = vadd.xlane.f32.xlu0 %v4377_v44  ;;  %8027 = vmatprep.subr.bf16.mxu0 %v8026_v12  ;;  %v10666_v24 = vmul.f32 %v10660_v22, %v4120_v26  ;;  %v8030_v62 = vpack.c.bf16 %v4520_v25, %v4519_v19 }
 0xda2   : > { %7528 = vmatprep.mubr.msk.f32.mxu0 %vm1165_vm5, %v8702_v20  ;;  %v4374_v31 = vsel %vm1165_vm5, %v8702_v20, 0.0 }
 0xda3   : > { %v10671_v37 = vpop.eup %8703 }
 0xda4   : > { %8029 = vmatpush3.bf16.msra.mxu0 %v8026_v12  ;;  %v10677_v1 = vmul.f32 %v10671_v37, %v4123_v63 }
 0xda5   : > { %4375 = vadd.xlane.f32.xlu0 %v4374_v31  ;;  %8031 = vmatprep.subr.bf16.mxu0 %v8030_v62 }
 0xda7   : > { %v10681_v18 = vpop.eup %8705  ;;  %7529 = vmatmul.mubr.msk.f32.vlgmr.msra.gmra.mrb[36].mxu0 %vm1165_vm5, %v8698_v60  ;;  %v10735_v60 = vpack.c.bf16 %v3760_v3, %v3759_v42 }
 0xda8   : > { %v8708_v53 = vpop.eup %8707  ;;  %v10687_v14 = vmul.f32 %v10681_v18, %v4122_v5  ;;  %8033 = vmatpush3.bf16.msra.mxu0 %v8030_v62 }
 0xda9   : > { %3256 = vadd.xlane.f32.xlu0 %v3255_v16  ;;  %7531 = vmatprep.mubr.msk.f32.mxu0 %vm1165_vm5, %v8708_v53  ;;  %v4380_v46 = vsel %vm1165_vm5, %v8708_v53, 0.0  ;;  %v8710_v56 = vpop.eup %8709 }
 0xdaa   : > { %4381 = vadd.xlane.f32.xlu1 %v4380_v46  ;;  %v4383_v21 = vsel %vm1165_vm5, %v8710_v56, 0.0  ;;  %8035 = vmatprep.subr.bf16.mxu0 %v10735_v60 }
 0xdab   : > { %7532 = vmatmul.mubr.msk.f32.gmra.mrb[38].mxu0 %vm1165_vm5, %v8710_v56 }
 0xdad   : > { %3259 = vadd.xlane.f32.xlu0 %v3258_v49 }
 0xdae   : > { %4384 = vadd.xlane.f32.xlu1 %v4383_v21 }
 0xdb1   : > { %3631 = vadd.xlane.f32.xlu0 %v3630_v33 }
 0xdb2   : > { %3634 = vadd.xlane.f32.xlu1 %v3633_v41 }
 0xdb5   : > { %3262 = vadd.xlane.f32.xlu0 %v3261_v52 }
 0xdb6   : > { %3265 = vadd.xlane.f32.xlu1 %v3264_v6 }
 0xdb9   : > { %3637 = vadd.xlane.f32.xlu0 %v3636_v10 }
 0xdba   : > { %3640 = vadd.xlane.f32.xlu1 %v3639_v11 }
 0xdc2   : > { %v4009_v26 = vpop.xlane.xlu1 %4008 }
 0xdc6   : > { %v4015_v44 = vpop.xlane.xlu1 %4014 }
 0xdca   : > { %v4018_v31 = vpop.xlane.xlu1 %4017 }
 0xdcb   : > { %4717 = vrot.lane.b32.xlu1 %v9983_v15, %s8924_s17  ;;  %v4012_v12 = vpop.xlane.xlu0 %4011 }
 0xdcf   : > { %4715 = vrot.lane.b32.xlu0 %v9972_v47, %s8924_s17  ;;  %4719 = vrot.lane.b32.xlu1 %v9995_v36, %s8924_s17 }
 0xdd3   : > { %4816 = vrot.lane.b32.xlu0 %v10036_v29, %s11440_s14  ;;  %4721 = vrot.lane.b32.xlu1 %v10002_v23, %s8924_s17 }
 0xdd7   : > { %4820 = vrot.lane.b32.xlu0 %v10054_v30, %s11440_s14  ;;  %4818 = vrot.lane.b32.xlu1 %v10048_v59, %s11440_s14 }
 0xddb   : > { %4822 = vrot.lane.b32.xlu1 %v10056_v13, %s11440_s14  ;;  %s11447_s14 = smov 16  }
 0xe2e   : > { %v4379_v20 = vpop.xlane.xlu0 %4378 }
 0xe32   : > { %v4376_v63 = vpop.xlane.xlu0 %4375 }
 0xe36   : > { %v3257_v5 = vpop.xlane.xlu0 %3256 }
 0xe37   : > { %v4382_v53 = vpop.xlane.xlu1 %4381  ;;  %v3267_v16 = vadd.f32 %v3257_v5, %v10434_v28 }
 0xe39   : > { %v3626_v21 = vmul.f32 %v10441_v55, %v3267_v16 }
 0xe3a   : > { %v3260_v46 = vpop.xlane.xlu0 %3259 }
 0xe3b   : > { %v3268_v56 = vadd.f32 %v3260_v46, %v10430_v38  ;;  %v4385_v49 = vpop.xlane.xlu1 %4384 }
 0xe3d   : > { %v3627_v33 = vmul.f32 %v10436_v54, %v3268_v56 }
 0xe3e   : > { %v3632_v41 = vpop.xlane.xlu0 %3631 }
 0xe3f   : > { %v3642_v52 = vadd.f32 %v3632_v41, %v3626_v21  ;;  %v3635_v6 = vpop.xlane.xlu1 %3634  ;;  %v4022_v41 = vadd.f32 %v4018_v31, %v10662_v2 }
 0xe40   : > { %v3643_v10 = vadd.f32 %v3635_v6, %v3627_v33  ;;  %v4020_v33 = vadd.f32 %v4012_v12, %v10647_v58  ;;  %v4021_v6 = vadd.f32 %v4015_v44, %v10673_v40 }
 0xe41   : > { %8711 = vrcp.f32 %v3642_v52 }
 0xe42   : > { %8713 = vrcp.f32 %v3643_v10  ;;  %v3263_v11 = vpop.xlane.xlu0 %3262  ;;  %v4371_v52 = vmul.f32 %v10653_v27, %v4020_v33  ;;  %v11450_v33 = vld [vmem:[#allocation8_spill] sm:$0xff] }
 0xe43   : > { %v3269_v19 = vadd.f32 %v3263_v11, %v10443_v61  ;;  %v3266_v25 = vpop.xlane.xlu1 %3265  ;;  %v4373_v11 = vmul.f32 %v10671_v37, %v4022_v41  ;;  %v11452_v41 = vld [vmem:[#allocation23_spill] sm:$0xff] }
 0xe44   : > { %v3270_v28 = vadd.f32 %v3266_v25, %v10460_v39  ;;  %v4387_v10 = vadd.f32 %v4379_v20, %v4371_v52 }
 0xe45   : > { %v3628_v62 = vmul.f32 %v10454_v57, %v3269_v19  ;;  %v11445_v19 = vld [vmem:[#allocation18_spill] sm:$0xff] }
 0xe46   : > { %v3638_v38 = vpop.xlane.xlu0 %3637  ;;  %v3629_v42 = vmul.f32 %v10473_v7, %v3270_v28  ;;  %v4019_v7 = vadd.f32 %v4009_v26, %v10651_v4  ;;  %v11446_v28 = vld [vmem:[#allocation19_spill] sm:$0xff] }
 0xe47   : > { %v3644_v55 = vadd.f32 %v3638_v38, %v3628_v62  ;;  %v3641_v3 = vpop.xlane.xlu1 %3640 }
 0xe48   : > { %v3645_v54 = vadd.f32 %v3641_v3, %v3629_v42 }
 0xe49   : > { %8715 = vrcp.f32 %v3644_v55 }
 0xe4a   : > { %8717 = vrcp.f32 %v3645_v54 }
 0xe4b   : > { %v8712_v5 = vpop.eup %8711  ;;  %8719 = vrcp.f32 %v4387_v10 }
 0xe4c   : > { %v8714_v16 = vpop.eup %8713  ;;  %v3755_v46 = vmul.f32 %v8712_v5, %v10529_v8  ;;  %v4370_v8 = vmul.f32 %v10660_v22, %v4019_v7  ;;  %v11451_v7 = vld [vmem:[#allocation26_spill] sm:$0xff] }
 0xe4d   : > { %v3756_v56 = vmul.f32 %v8714_v16, %v10527_v51 }
 0xe4e   : > { %v4386_v51 = vadd.f32 %v4376_v63, %v4370_v8 }
 0xe50   : > { %8721 = vrcp.f32 %v4386_v51 }
 0xe53   : > { %v8716_v61 = vpop.eup %8715 }
 0xe54   : > { %v8718_v21 = vpop.eup %8717  ;;  %v3757_v39 = vmul.f32 %v8716_v61, %v10533_v48  ;;  %v4372_v48 = vmul.f32 %v10681_v18, %v4021_v6 }
 0xe55   : > { %v3758_v57 = vmul.f32 %v8718_v21, %v10531_v50  ;;  %v4389_v50 = vadd.f32 %v4385_v49, %v4373_v11  ;;  %v8720_v26 = vpop.eup %8719 }
 0xe56   : > { %v4388_v58 = vadd.f32 %v4382_v53, %v4372_v48 }
 0xe57   : > { %8723 = vrcp.f32 %v4389_v50 }
 0xe58   : > { %8725 = vrcp.f32 %v4388_v58 }
 0xe5a   : > { %v8722_v22 = vpop.eup %8721 }
 0xe61   : > { %v8724_v63 = vpop.eup %8723 }
 0xe62   : > { %v8726_v53 = vpop.eup %8725 }
 0xe7a   : > { %v7530_v4 = vpop.f32.mrb[36].mxu0 }
 0xe7b   : > { %v4508_v2 = vadd.f32 %v7530_v4, %v10658_v9  ;;  %v4488_v27 = vpop.f32.mrb[37].mxu0 }
 0xe7c   : > { %v4507_v40 = vadd.f32 %v4488_v27, %v10666_v24  ;;  %v11443_v24 = vld [vmem:[#allocation16_spill] sm:$0xff] }
 0xe7d   : > { %v4516_v12 = vmul.f32 %v8720_v26, %v4508_v2 }
 0xe7e   : > { %v4515_v44 = vmul.f32 %v8722_v22, %v4507_v40  ;;  %v7533_v20 = vpop.f32.mrb[38].mxu0 }
 0xe7f   : > { %v4510_v37 = vadd.f32 %v7533_v20, %v10677_v1  ;;  %v4498_v18 = vpop.f32.mrb[39].mxu0  ;;  %v11444_v1 = vld [vmem:[#allocation17_spill] sm:$0xff] }
 0xe80   : > { %v4509_v31 = vadd.f32 %v4498_v18, %v10687_v14  ;;  %7538 = vmatprep.mubr.msk.f32.mxu0 %vm1762_vm8, %v4515_v44  ;;  %v10779_v14 = vpop.permute.xlu0 %4715 }
 0xe81   : > { %v4518_v49 = vmul.f32 %v8724_v63, %v4510_v37  ;;  %7539 = vmatmul.mubr.msk.f32.vlgmr.msra.gmra.mrb[40].mxu0 %vm1762_vm8, %v4516_v12 }
 0xe82   : > { %v4517_v9 = vmul.f32 %v8726_v53, %v4509_v31  ;;  %8037 = vmatpush3.bf16.msra.mxu0 %v10735_v60  ;;  %v10784_v60 = vpop.permute.xlu1 %4717 }
 0xe83   : > { %8040 = vmatprep.subr.msk.bf16.mxu0 %vm9451_vm2, %v11443_v24 }
 0xe84   : > { %7541 = vmatprep.mubr.msk.f32.mxu0 %vm1762_vm8, %v4517_v9  ;;  %v10806_v38 = vpop.permute.xlu0 %4816 }
 0xe85   : > { %7542 = vmatmul.mubr.msk.f32.gmra.mrb[42].mxu0 %vm1762_vm8, %v4518_v49 }
 0xe86   : > { %7548 = vmatprep.mubr.msk.f32.mxu0 %vm1762_vm8, %v3755_v46  ;;  %v10792_v25 = vpop.permute.xlu1 %4719 }
 0xe88   : > { %v10817_v55 = vpop.permute.xlu0 %4820 }
 0xe89   : > { %7549 = vmatmul.mubr.msk.f32.vlgmr.msra.gmra.mrb[40].mxu0 %vm1762_vm8, %v3756_v56 }
 0xe8a   : > { %7551 = vmatprep.mubr.msk.f32.mxu0 %vm1762_vm8, %v3757_v39  ;;  %v10804_v62 = vpop.permute.xlu1 %4721 }
 0xe8b   : > { %8043 = vmatpush3.bf16.xpose.msk.msra.mxu0 %vm9451_vm2, %v11443_v24 }
 0xe8c   : > { %8046 = vmatprep.subr.msk.bf16.mxu0 %vm9451_vm2, %v11444_v1 }
 0xe8d   : > { %7552 = vmatmul.mubr.msk.f32.gmra.mrb[42].mxu0 %vm1762_vm8, %v3758_v57  ;;  %v11448_v57 = vld [vmem:[#allocation25_spill] sm:$0xff] }
 0xe8e   : > { %7562 = vmatprep.mubr.msk.f32.mxu0 %vm942_vm1, %v10779_v14  ;;  %v10815_v42 = vpop.permute.xlu1 %4818 }
 0xe92   : > { %v10823_v3 = vpop.permute.xlu1 %4822 }
 0xe93   : > { %8049 = vmatpush3.bf16.xpose.msk.msra.mxu0 %vm9451_vm2, %v11444_v1 }
 0xe94   : > { %8052 = vmatprep.subr.msk.bf16.mxu0 %vm9451_vm2, %v11445_v19 }
 0xe9a   : > { %7563 = vmatmul.mubr.msk.f32.vlgmr.msra.gmra.mrb[44].mxu0 %vm942_vm1, %v10784_v60 }
 0xe9b   : > { %7565 = vmatprep.mubr.msk.f32.mxu0 %vm942_vm1, %v10792_v25  ;;  %8055 = vmatpush3.bf16.xpose.msk.msra.mxu0 %vm9451_vm2, %v11445_v19 }
 0xe9c   : > { %8058 = vmatprep.subr.msk.bf16.mxu0 %vm9451_vm2, %v11446_v28 }
 0xe9e   : > { %7566 = vmatmul.mubr.msk.f32.gmra.mrb[46].mxu0 %vm942_vm1, %v10804_v62 }
 0xe9f   : > { %7576 = vmatprep.mubr.msk.f32.mxu0 %vm942_vm1, %v10806_v38 }
 0xea3   : > { %8061 = vmatpush3.bf16.xpose.msk.msra.mxu0 %vm9451_vm2, %v11446_v28  ;;  %v11456_v28 = vld [vmem:[#allocation29_spill] sm:$0xff] }
 0xeaa   : > { %7577 = vmatmul.mubr.msk.f32.vlgmr.msra.gmra.mrb[44].mxu0 %vm942_vm1, %v10815_v42 }
 0xeab   : > { %7579 = vmatprep.mubr.msk.f32.mxu0 %vm942_vm1, %v10817_v55 }
 0xeae   : > { %7580 = vmatmul.mubr.msk.f32.gmra.mrb[46].mxu0 %vm942_vm1, %v10823_v3 }
 0xf7d   : > { %v7578_v54 = vpop.f32.mrb[44].mxu0 }
 0xf7e   : > { %v4898_v5 = vpop.f32.mrb[45].mxu0  ;;  %v4920_v16 = vsel %vm1165_vm5, %v7578_v54, -inf }
 0xf7f   : > { %4921 = vmax.xlane.f32.xlu1 %v4920_v16  ;;  %v4917_v46 = vsel %vm1165_vm5, %v4898_v5, -inf }
 0xf80   : > { %4918 = vmax.xlane.f32.xlu0 %v4917_v46 }
 0xf81   : > { %v7581_v56 = vpop.f32.mrb[46].mxu0 }
 0xf82   : > { %v4908_v61 = vpop.f32.mrb[47].mxu0  ;;  %v4926_v21 = vsel %vm1165_vm5, %v7581_v56, -inf }
 0xf83   : > { %v4923_v39 = vsel %vm1165_vm5, %v4908_v61, -inf }
 0xf84   : > { %4927 = vmax.xlane.f32.xlu0 %v4926_v21 }
 0xf88   : > { %4924 = vmax.xlane.f32.xlu0 %v4923_v39 }
 0xf90   : > { %8481 = vrot.lane.b32.xlu1 %v11448_v57, %s11447_s14 }
 0xf94   : > { %8486 = vrot.lane.b32.xlu1 %v11450_v33, %s11449_s11 }
 0xf98   : > { %8491 = vrot.lane.b32.xlu1 %v11451_v7, %s11449_s11  ;;  %s6821_s11 = sshll.u32 %s8988_s25, 10  ;;  %s11230_s25 = scalar_lea.sflag [#allocation4], %s257_s19 }
 0xf99   : > { %s11219_s20 = scalar_lea.hbm %s11278_s6, %s6821_s11 }
 0xf9c   : > { %5574 = vrot.lane.b32.xlu1 %v9983_v15, %s8928_s29 }
 0xf9e   : > { %8476 = vrot.lane.b32.xlu0 %v11452_v41, %s11447_s14 }
 0xfa0   : > { %5578 = vrot.lane.b32.xlu1 %v10002_v23, %s8928_s29 }
 0xfa2   : > { %5572 = vrot.lane.b32.xlu0 %v9972_v47, %s8928_s29 }
 0xfa4   : > { %5675 = vrot.lane.b32.xlu1 %v10048_v59, %s11453_s18 }
 0xfa6   : > { %5576 = vrot.lane.b32.xlu0 %v9995_v36, %s8928_s29 }
 0xfa8   : > { %5679 = vrot.lane.b32.xlu1 %v10056_v13, %s11453_s18 }
 0xfaa   : > { %5673 = vrot.lane.b32.xlu0 %v10036_v29, %s11453_s18 }
 0xfae   : > { %5677 = vrot.lane.b32.xlu0 %v10054_v30, %s11453_s18  ;;  %s6451_s18 = sshll.u32 %s10370_s10, 4  ;;  %s11222_s18 = int_to_ptr.vmem [resolvable:$true] %s6451_s18 }
 0xfaf   : > { %s8843_s9 = scalar_lea.vmem %s11222_s18, 1024 }
 0xfb0   : > { %p8844_p6 = scmp.ne.s32.totalorder %s11222_s18, %s8843_s9 }
 0xfb2   : > { %p8845_p10 = pnand %p8844_p6, %p11462_p9 }
 0xfb4   : > { %p8846_p12 = pneg %p8845_p10 }
0x100c   : > { %v4922_v15 = vpop.xlane.xlu1 %4921 }
0x100d   : > { %v10855_v23 = vmax.f32 %v4922_v15, -1e+30  ;;  %v4919_v52 = vpop.xlane.xlu0 %4918 }
0x100e   : > { %v10857_v47 = vmax.f32 %v4919_v52, -1e+30 }
0x100f   : > { %v4946_v59 = vsub.f32 %v7578_v54, %v10855_v23 }
0x1010   : > { %v4945_v6 = vsub.f32 %v4898_v5, %v10857_v47  ;;  %v8482_v48 = vpop.permute.xlu1 %8481 }
0x1011   : > { %v4951_v36 = vmul.f32 1.442695, %v4946_v59  ;;  %v4928_v8 = vpop.xlane.xlu0 %4927  ;;  %v8484_v26 = vunpack.i.h.bf16 %v8482_v48  ;;  %v8483_v40 = vunpack.i.l.bf16 %v8482_v48 }
0x1012   : > { %v4949_v10 = vmul.f32 1.442695, %v4945_v6  ;;  %v10861_v13 = vmax.f32 %v4928_v8, -1e+30 }
0x1013   : > { %v8076_v20 = vpack.c.bf16 %v8484_v26, %v8483_v40 }
0x1014   : > { %8727 = vpow2.f32 %v4949_v10  ;;  %v4948_v29 = vsub.f32 %v7581_v56, %v10861_v13  ;;  %v8487_v37 = vpop.permute.xlu1 %8486 }
0x1015   : > { %8729 = vpow2.f32 %v4951_v36  ;;  %v4925_v30 = vpop.xlane.xlu0 %4924  ;;  %v8489_v18 = vunpack.i.h.bf16 %v8487_v37  ;;  %v8488_v63 = vunpack.i.l.bf16 %v8487_v37  ;;  %v4933_v37 = vsub.f32 -1e+30, %v10857_v47 }
0x1016   : > { %v10864_v51 = vmax.f32 %v4925_v30, -1e+30  ;;  %v4955_v50 = vmul.f32 1.442695, %v4948_v29 }
0x1017   : > { %v8082_v49 = vpack.c.bf16 %v8489_v18, %v8488_v63 }
0x1018   : > { %v4947_v11 = vsub.f32 %v4908_v61, %v10864_v51  ;;  %v8492_v9 = vpop.permute.xlu1 %8491  ;;  %v4935_v63 = vsub.f32 -1e+30, %v10864_v51 }
0x1019   : > { %v8477_v58 = vpop.permute.xlu0 %8476  ;;  %v8494_v24 = vunpack.i.h.bf16 %v8492_v9  ;;  %v8493_v1 = vunpack.i.l.bf16 %v8492_v9 }
0x101a   : > { %v4953_v4 = vmul.f32 1.442695, %v4947_v11  ;;  %v8479_v2 = vunpack.i.h.bf16 %v8477_v58  ;;  %v8478_v27 = vunpack.i.l.bf16 %v8477_v58 }
0x101b   : > { %v8088_v19 = vpack.c.bf16 %v8494_v24, %v8493_v1  ;;  %v4941_v1 = vmul.f32 1.442695, %v4935_v63 }
0x101c   : > { %8731 = vpow2.f32 %v4953_v4  ;;  %v8070_v22 = vpack.c.bf16 %v8479_v2, %v8478_v27 }
0x101d   : > { %8733 = vpow2.f32 %v4955_v50 }
0x101e   : > { %v10867_v12 = vpop.eup %8727  ;;  %8072 = vmatprep.subr.msk.bf16.mxu1 %vm9451_vm2, %v8070_v22 }
0x101f   : > { %v10871_v44 = vpop.eup %8729  ;;  %7590 = vmatprep.mubr.msk.f32.mxu1 %vm1165_vm5, %v10867_v12  ;;  %v4961_v27 = vsel %vm1165_vm5, %v10867_v12, 0.0  ;;  %v4936_v12 = vsub.f32 -1e+30, %v10861_v13 }
0x1020   : > { %7591 = vmatmul.mubr.msk.f32.vlgmr.msra.gmra.mrb[44].mxu1 %vm1165_vm5, %v10871_v44  ;;  %v4964_v40 = vsel %vm1165_vm5, %v10871_v44, 0.0 }
0x1021   : > { %8075 = vmatpush3.bf16.xpose.msk.msra.mxu1 %vm9451_vm2, %v8070_v22  ;;  %v4943_v9 = vmul.f32 1.442695, %v4936_v12 }
0x1022   : > { %8078 = vmatprep.subr.msk.bf16.mxu1 %vm9451_vm2, %v8076_v20 }
0x1026   : > { %v10881_v31 = vpop.eup %8731 }
0x1027   : > { %v10883_v53 = vpop.eup %8733  ;;  %7593 = vmatprep.mubr.msk.f32.mxu1 %vm1165_vm5, %v10881_v31  ;;  %v4967_v22 = vsel %vm1165_vm5, %v10881_v31, 0.0 }
0x1028   : > { %7594 = vmatmul.mubr.msk.f32.gmra.mrb[46].mxu1 %vm1165_vm5, %v10883_v53  ;;  %v4970_v26 = vsel %vm1165_vm5, %v10883_v53, 0.0 }
0x1029   : > { %8081 = vmatpush3.bf16.xpose.msk.msra.mxu1 %vm9451_vm2, %v8076_v20  ;;  %7604 = vmatprep.mubr.msk.f32.mxu1 %vm942_vm1, %v10779_v14  ;;  %v11454_v14 = vld [vmem:[#allocation27_spill] sm:$0xff]  ;;  %v4934_v20 = vsub.f32 -1e+30, %v10855_v23 }
0x102a   : > { %8084 = vmatprep.subr.msk.bf16.mxu1 %vm9451_vm2, %v8082_v49 }
0x102b   : > { %v4939_v18 = vmul.f32 1.442695, %v4934_v20 }
0x102d   : > { %8735 = vpow2.f32 %v4939_v18 }
0x1030   : > { %7605 = vmatmul.mubr.msk.f32.vlgmr.msra.gmra.mrb[48].mxu1 %vm942_vm1, %v10784_v60  ;;  %v11455_v60 = vld [vmem:[#allocation28_spill] sm:$0xff] }
0x1031   : > { %7607 = vmatprep.mubr.msk.f32.mxu1 %vm942_vm1, %v10792_v25  ;;  %8087 = vmatpush3.bf16.xpose.msk.msra.mxu1 %vm9451_vm2, %v8082_v49  ;;  %v10922_v25 = vpop.permute.xlu0 %5572  ;;  %v4937_v49 = vmul.f32 1.442695, %v4933_v37 }
0x1032   : > { %8090 = vmatprep.subr.msk.bf16.mxu1 %vm9451_vm2, %v8088_v19 }
0x1033   : > { %8737 = vpow2.f32 %v4937_v49 }
0x1034   : > { %7608 = vmatmul.mubr.msk.f32.gmra.mrb[50].mxu1 %vm942_vm1, %v10804_v62  ;;  %v10934_v62 = vpop.permute.xlu1 %5574  ;;  %8739 = vpow2.f32 %v4943_v9 }
0x1035   : > { %7618 = vmatprep.mubr.msk.f32.mxu1 %vm942_vm1, %v10806_v38  ;;  %v10936_v38 = vpop.permute.xlu0 %5576  ;;  %8741 = vpow2.f32 %v4941_v1  ;;  %v5469_v1 = vld [vmem:[%s11275_s3 + $0x20] sm:$0xff] }
0x1039   : > { %8093 = vmatpush3.bf16.xpose.msk.msra.mxu1 %vm9451_vm2, %v8088_v19 }
0x103a   : > { %8108 = vmatprep.subr.msk.bf16.mxu1 %vm9451_vm2, %v11454_v14 }
0x1040   : > { %7619 = vmatmul.mubr.msk.f32.vlgmr.msra.gmra.mrb[48].mxu1 %vm942_vm1, %v10815_v42  ;;  %v11457_v42 = vld [vmem:[#allocation30_spill] sm:$0xff] }
0x1041   : > { %7621 = vmatprep.mubr.msk.f32.mxu1 %vm942_vm1, %v10817_v55  ;;  %8111 = vmatpush3.bf16.xpose.msk.msra.mxu1 %vm9451_vm2, %v11454_v14  ;;  %v10948_v55 = vpop.permute.xlu1 %5578 }
0x1042   : > { %8114 = vmatprep.subr.msk.bf16.mxu1 %vm9451_vm2, %v11455_v60 }
0x1044   : > { %7622 = vmatmul.mubr.msk.f32.gmra.mrb[50].mxu1 %vm942_vm1, %v10823_v3  ;;  %v10950_v3 = vpop.permute.xlu0 %5673 }
0x1045   : > { %7656 = vmatprep.mubr.msk.f32.mxu1 %vm942_vm1, %v10922_v25  ;;  %v10959_v54 = vpop.permute.xlu1 %5675 }
0x1048   : > { %v10961_v5 = vpop.permute.xlu0 %5677 }
0x1049   : > { %8117 = vmatpush3.bf16.xpose.msk.msra.mxu1 %vm9451_vm2, %v11455_v60  ;;  %v10967_v16 = vpop.permute.xlu1 %5679 }
0x104a   : > { %8120 = vmatprep.subr.msk.bf16.mxu1 %vm9451_vm2, %v11456_v28 }
0x1050   : > { %7657 = vmatmul.mubr.msk.f32.vlgmr.msra.gmra.mrb[52].mxu1 %vm942_vm1, %v10934_v62 }
0x1051   : > { %7659 = vmatprep.mubr.msk.f32.mxu1 %vm942_vm1, %v10936_v38  ;;  %8123 = vmatpush3.bf16.xpose.msk.msra.mxu1 %vm9451_vm2, %v11456_v28 }
0x1052   : > { %8126 = vmatprep.subr.msk.bf16.mxu1 %vm9451_vm2, %v11457_v42 }
0x1054   : > { %7660 = vmatmul.mubr.msk.f32.gmra.mrb[54].mxu1 %vm942_vm1, %v10948_v55 }
0x1055   : > { %7670 = vmatprep.mubr.msk.f32.mxu1 %vm942_vm1, %v10950_v3 }
0x1059   : > { %8129 = vmatpush3.bf16.xpose.msk.msra.mxu1 %vm9451_vm2, %v11457_v42 }
0x1060   : > { %7671 = vmatmul.mubr.msk.f32.vlgmr.msra.gmra.mrb[52].mxu1 %vm942_vm1, %v10959_v54 }
0x1061   : > { %7673 = vmatprep.mubr.msk.f32.mxu1 %vm942_vm1, %v10961_v5 }
0x1064   : > { %7674 = vmatmul.mubr.msk.f32.gmra.mrb[54].mxu1 %vm942_vm1, %v10967_v16 }
0x10f3   : > { %v10971_v46 = vpop.f32.mrb[44].mxu1 }
0x10f4   : > { %v10973_v56 = vpop.f32.mrb[45].mxu1 }
0x10fb   : > { %v10975_v61 = vpop.f32.mrb[46].mxu1 }
0x10fc   : > { %v10977_v21 = vpop.f32.mrb[47].mxu1 }
0x1113   : > { %v7620_v39 = vpop.f32.mrb[48].mxu1 }
0x1114   : > { %v5281_v15 = vsel %vm9606_vm3, %v7620_v39, -1e+30  ;;  %v5261_v52 = vpop.f32.mrb[49].mxu1 }
0x1115   : > { %v5287_v59 = vsel %vm1165_vm5, %v5281_v15, -inf  ;;  %v5280_v6 = vsel %vm9610_vm4, %v5261_v52, -1e+30 }
0x1116   : > { %v5284_v36 = vsel %vm1165_vm5, %v5280_v6, -inf  ;;  %5288 = vmax.xlane.f32.xlu1 %v5287_v59 }
0x1117   : > { %5285 = vmax.xlane.f32.xlu0 %v5284_v36  ;;  %v7623_v8 = vpop.f32.mrb[50].mxu1 }
0x1118   : > { %v5283_v10 = vsel %vm9622_vm6, %v7623_v8, -1e+30  ;;  %v5271_v29 = vpop.f32.mrb[51].mxu1 }
0x1119   : > { %v5293_v30 = vsel %vm1165_vm5, %v5283_v10, -inf  ;;  %v10990_v11 = vsel %vm9632_vm7, %v5271_v29, -1e+30 }
0x111a   : > { %v5290_v48 = vsel %vm1165_vm5, %v10990_v11, -inf }
0x111b   : > { %5294 = vmax.xlane.f32.xlu0 %v5293_v30 }
0x111f   : > { %5291 = vmax.xlane.f32.xlu0 %v5290_v48 }
0x1127   : > { %8501 = vrot.lane.b32.xlu1 %v11441_v35, %s8916_s28 }
0x1133   : > { %v10996_v50 = vpop.f32.mrb[52].mxu1 }
0x1134   : > { %v10998_v58 = vpop.f32.mrb[53].mxu1 }
0x1135   : > { %8496 = vrot.lane.b32.xlu0 %v11442_v32, %s8916_s28 }
0x1137   : > { %v11002_v4 = vpop.f32.mrb[54].mxu1 }
0x1138   : > { %v11004_v2 = vpop.f32.mrb[55].mxu1 }
0x114b   : > { %4962 = vadd.xlane.f32.xlu1 %v4961_v27 }
0x114f   : > { %4971 = vadd.xlane.f32.xlu1 %v4970_v26 }
0x1154   : > { %4965 = vadd.xlane.f32.xlu0 %v4964_v40 }
0x1158   : > { %4968 = vadd.xlane.f32.xlu0 %v4967_v22 }
0x11a3   : > { %v5289_v53 = vpop.xlane.xlu1 %5288 }
0x11a4   : > { %v5297_v44 = vmax.f32 %v10855_v23, %v5289_v53  ;;  %v5286_v24 = vpop.xlane.xlu0 %5285 }
0x11a5   : > { %v5296_v31 = vmax.f32 %v10857_v47, %v5286_v24 }
0x11a6   : > { %v5301_v19 = vsub.f32 %v10855_v23, %v5297_v44  ;;  %v5313_v14 = vsub.f32 %v5281_v15, %v5297_v44  ;;  %v8736_v15 = vpop.eup %8735 }
0x11a7   : > { %v5300_v60 = vsub.f32 %v10857_v47, %v5296_v31  ;;  %v5312_v28 = vsub.f32 %v5280_v6, %v5296_v31  ;;  %v8502_v47 = vpop.permute.xlu1 %8501  ;;  %v8738_v22 = vpop.eup %8737  ;;  %v11027_v20 = vmul.f32 0.0, %v8736_v15  ;;  %v5470_v31 = vld [vmem:[%s11275_s3 + $0x28] sm:$0xff]  ;;  %v5777_v15 = vsel %vm1165_vm5, %v10996_v50, -inf }
0x11a8   : > { %v5306_v42 = vmul.f32 1.442695, %v5301_v19  ;;  %v5318_v39 = vmul.f32 1.442695, %v5313_v14  ;;  %v5295_v52 = vpop.xlane.xlu0 %5294  ;;  %v8504_v37 = vunpack.i.h.bf16 %v8502_v47  ;;  %v8740_v53 = vpop.eup %8739  ;;  %v11031_v24 = vmul.f32 0.0, %v8738_v22 }
0x11a9   : > { %v5304_v59 = vmul.f32 1.442695, %v5300_v60  ;;  %v5316_v36 = vmul.f32 1.442695, %v5312_v28  ;;  %v5299_v8 = vmax.f32 %v10861_v13, %v5295_v52  ;;  %v8742_v9 = vpop.eup %8741  ;;  %v5075_v44 = vadd.f32 %v10971_v46, %v11027_v20 }
0x11aa   : > { %8743 = vpow2.f32 %v5306_v42  ;;  %v5074_v14 = vadd.f32 %v10973_v56, %v11031_v24  ;;  %v4960_v42 = vmul.f32 0.0, %v8740_v53  ;;  %v5780_v22 = vsel %vm1165_vm5, %v11004_v2, -inf }
0x11ab   : > { %8745 = vpow2.f32 %v5318_v39  ;;  %v5303_v29 = vsub.f32 %v10861_v13, %v5299_v8  ;;  %v5315_v30 = vsub.f32 %v5283_v10, %v5299_v8  ;;  %v8503_v13 = vunpack.i.l.bf16 %v8502_v47 }
0x11ac   : > { %8747 = vpow2.f32 %v5304_v59  ;;  %v5292_v23 = vpop.xlane.xlu0 %5291  ;;  %v8102_v59 = vpack.c.bf16 %v5470_v31, %v5469_v1  ;;  %v5077_v8 = vadd.f32 %v10975_v61, %v4960_v42  ;;  %v5774_v61 = vsel %vm1165_vm5, %v10998_v58, -inf }
0x11ad   : > { %8749 = vpow2.f32 %v5316_v36  ;;  %v5310_v6 = vmul.f32 1.442695, %v5303_v29  ;;  %v5322_v48 = vmul.f32 1.442695, %v5315_v30  ;;  %v5298_v27 = vmax.f32 %v10864_v51, %v5292_v23 }
0x11ae   : > { %v8098_v46 = vpack.c.bf16 %v8504_v37, %v8503_v13  ;;  %v4959_v23 = vmul.f32 0.0, %v8742_v9  ;;  %v5783_v37 = vsel %vm1165_vm5, %v11002_v4, -inf }
0x11af   : > { %8751 = vpow2.f32 %v5310_v6  ;;  %v5302_v26 = vsub.f32 %v10864_v51, %v5298_v27  ;;  %v5314_v40 = vsub.f32 %v10990_v11, %v5298_v27 }
0x11b0   : > { %8753 = vpow2.f32 %v5322_v48  ;;  %v8497_v10 = vpop.permute.xlu0 %8496  ;;  %v5076_v6 = vadd.f32 %v10977_v21, %v4959_v23  ;;  %v11458_v21 = vld [vmem:[#allocation10_spill] sm:$0xff] }
0x11b1   : > { %v5308_v18 = vmul.f32 1.442695, %v5302_v26  ;;  %v5320_v12 = vmul.f32 1.442695, %v5314_v40  ;;  %v8499_v63 = vunpack.i.h.bf16 %v8497_v10  ;;  %v8498_v49 = vunpack.i.l.bf16 %v8497_v10 }
0x11b3   : > { %8755 = vpow2.f32 %v5308_v18  ;;  %v8094_v51 = vpack.c.bf16 %v8499_v63, %v8498_v49 }
0x11b4   : > { %v11033_v11 = vpop.eup %8743  ;;  %8757 = vpow2.f32 %v5320_v12 }
0x11b5   : > { %v8746_v19 = vpop.eup %8745  ;;  %8095 = vmatprep.subr.bf16.mxu0 %v8094_v51  ;;  %v11044_v60 = vmul.f32 %v11033_v11, %v5075_v44 }
0x11b6   : > { %v8748_v28 = vpop.eup %8747  ;;  %v5331_v39 = vsel %vm1165_vm5, %v8746_v19, 0.0  ;;  %8097 = vmatpush3.bf16.msra.mxu0 %v8094_v51 }
0x11b7   : > { %v8750_v52 = vpop.eup %8749  ;;  %5332 = vadd.xlane.f32.xlu1 %v5331_v39  ;;  %8099 = vmatprep.subr.bf16.mxu0 %v8098_v46  ;;  %v11047_v36 = vmul.f32 %v8748_v28, %v5074_v14 }
0x11b8   : > { %7632 = vmatprep.mubr.msk.f32.mxu0 %vm1165_vm5, %v8750_v52  ;;  %v5328_v56 = vsel %vm1165_vm5, %v8750_v52, 0.0 }
0x11b9   : > { %v8752_v29 = vpop.eup %8751  ;;  %5329 = vadd.xlane.f32.xlu0 %v5328_v56 }
0x11ba   : > { %v8754_v30 = vpop.eup %8753  ;;  %8101 = vmatpush3.bf16.msra.mxu0 %v8098_v46  ;;  %v11054_v47 = vmul.f32 %v8752_v29, %v5077_v8 }
0x11bb   : > { %5778 = vmax.xlane.f32.xlu1 %v5777_v15  ;;  %8103 = vmatprep.subr.bf16.mxu0 %v8102_v59  ;;  %v5337_v26 = vsel %vm1165_vm5, %v8754_v30, 0.0 }
0x11bd   : > { %v8756_v48 = vpop.eup %8755  ;;  %5775 = vmax.xlane.f32.xlu0 %v5774_v61  ;;  %7633 = vmatmul.mubr.msk.f32.vlgmr.msra.gmra.mrb[48].mxu0 %vm1165_vm5, %v8746_v19 }
0x11be   : > { %v8758_v27 = vpop.eup %8757  ;;  %8105 = vmatpush3.bf16.msra.mxu0 %v8102_v59  ;;  %v11061_v40 = vmul.f32 %v8756_v48, %v5076_v6 }
0x11bf   : > { %5338 = vadd.xlane.f32.xlu1 %v5337_v26  ;;  %7635 = vmatprep.mubr.msk.f32.mxu0 %vm1165_vm5, %v8758_v27  ;;  %v5334_v13 = vsel %vm1165_vm5, %v8758_v27, 0.0 }
0x11c0   : > { %8131 = vmatprep.subr.bf16.mxu0 %v11458_v21 }
0x11c1   : > { %5781 = vmax.xlane.f32.xlu0 %v5780_v22  ;;  %7636 = vmatmul.mubr.msk.f32.gmra.mrb[50].mxu0 %vm1165_vm5, %v8754_v30 }
0x11c3   : > { %5784 = vmax.xlane.f32.xlu1 %v5783_v37 }
0x11c5   : > { %5335 = vadd.xlane.f32.xlu0 %v5334_v13 }
0x11d4   : > { %8511 = vrot.lane.b32.xlu1 %v11448_v57, %s11459_s13 }
0x11d8   : > { %8516 = vrot.lane.b32.xlu1 %v11450_v33, %s11460_s12  ;;  %v4963_v18 = vpop.xlane.xlu1 %4962 }
0x11d9   : > { %v4973_v57 = vadd.f32 %v4963_v18, %v11031_v24 }
0x11db   : > { %8506 = vrot.lane.b32.xlu0 %v11452_v41, %s11459_s13  ;;  %v5324_v19 = vmul.f32 %v8748_v28, %v4973_v57  ;;  %v11461_v57 = vld [vmem:[#allocation24_spill] sm:$0xff] }
0x11dc   : > { %8521 = vrot.lane.b32.xlu1 %v11451_v7, %s11460_s12  ;;  %v4972_v63 = vpop.xlane.xlu1 %4971  ;;  %s8930_s12 = smov [#allocation5]  }
0x11dd   : > { %v4976_v33 = vadd.f32 %v4972_v63, %v4960_v42 }
0x11df   : > { %v5327_v52 = vmul.f32 %v8752_v29, %v4976_v33 }
0x11e1   : > { %v4966_v10 = vpop.xlane.xlu0 %4965 }
0x11e2   : > { %v4974_v51 = vadd.f32 %v4966_v10, %v11027_v20 }
0x11e4   : > { %v5325_v31 = vmul.f32 %v11033_v11, %v4974_v51 }
0x11e5   : > { %v4969_v12 = vpop.xlane.xlu0 %4968 }
0x11e6   : > { %v4975_v41 = vadd.f32 %v4969_v12, %v4959_v23 }
0x11e8   : > { %v5326_v8 = vmul.f32 %v8756_v48, %v4975_v41 }
0x1244   : > { %v5333_v53 = vpop.xlane.xlu1 %5332 }
0x1245   : > { %v5341_v7 = vadd.f32 %v5333_v53, %v5325_v31 }
0x1246   : > { %v5330_v49 = vpop.xlane.xlu0 %5329 }
0x1247   : > { %v5340_v46 = vadd.f32 %v5330_v49, %v5324_v19  ;;  %8759 = vrcp.f32 %v5341_v7 }
0x1248   : > { %v5779_v44 = vpop.xlane.xlu1 %5778 }
0x1249   : > { %v11084_v56 = vmax.f32 %v5779_v44, -1e+30  ;;  %8761 = vrcp.f32 %v5340_v46 }
0x124a   : > { %v5776_v9 = vpop.xlane.xlu0 %5775 }
0x124b   : > { %v11082_v39 = vmax.f32 %v5776_v9, -1e+30  ;;  %v5803_v30 = vsub.f32 %v10996_v50, %v11084_v56 }
0x124c   : > { %v5339_v14 = vpop.xlane.xlu1 %5338 }
0x124d   : > { %v5343_v20 = vadd.f32 %v5339_v14, %v5327_v52  ;;  %v5802_v24 = vsub.f32 %v10998_v58, %v11082_v39  ;;  %v5808_v6 = vmul.f32 1.442695, %v5803_v30 }
0x124e   : > { %v5782_v1 = vpop.xlane.xlu0 %5781 }
0x124f   : > { %v11088_v42 = vmax.f32 %v5782_v1, -1e+30  ;;  %8763 = vrcp.f32 %v5343_v20  ;;  %v5806_v29 = vmul.f32 1.442695, %v5802_v24 }
0x1250   : > { %v5785_v11 = vpop.xlane.xlu1 %5784 }
0x1251   : > { %v11092_v23 = vmax.f32 %v5785_v11, -1e+30  ;;  %v5804_v15 = vsub.f32 %v11004_v2, %v11088_v42  ;;  %v8760_v22 = vpop.eup %8759 }
0x1252   : > { %v5336_v59 = vpop.xlane.xlu0 %5335 }
0x1253   : > { %v5342_v28 = vadd.f32 %v5336_v59, %v5326_v8  ;;  %v5805_v61 = vsub.f32 %v11002_v4, %v11092_v23  ;;  %v5810_v48 = vmul.f32 1.442695, %v5804_v15  ;;  %v8762_v37 = vpop.eup %8761 }
0x1255   : > { %8765 = vrcp.f32 %v5342_v28  ;;  %v5812_v10 = vmul.f32 1.442695, %v5805_v61 }
0x1256   : > { %8767 = vpow2.f32 %v5806_v29  ;;  %v8507_v18 = vpop.permute.xlu0 %8506 }
0x1257   : > { %8769 = vpow2.f32 %v5808_v6  ;;  %v8509_v9 = vunpack.i.h.bf16 %v8507_v18  ;;  %v8508_v44 = vunpack.i.l.bf16 %v8507_v18 }
0x1258   : > { %8771 = vpow2.f32 %v5810_v48  ;;  %v5791_v48 = vsub.f32 -1e+30, %v11084_v56 }
0x1259   : > { %v8764_v49 = vpop.eup %8763  ;;  %8773 = vpow2.f32 %v5812_v10  ;;  %v8138_v1 = vpack.c.bf16 %v8509_v9, %v8508_v44 }
0x1290   : > { %v7634_v58 = vpop.f32.mrb[48].mxu0 }
0x1291   : > { %v5458_v27 = vadd.f32 %v7634_v58, %v11044_v60  ;;  %v5438_v26 = vpop.f32.mrb[49].mxu0  ;;  %v8766_v60 = vpop.eup %8765 }
0x1292   : > { %v5457_v50 = vadd.f32 %v5438_v26, %v11047_v36  ;;  %v5793_v26 = vsub.f32 -1e+30, %v11092_v23 }
0x1293   : > { %v5466_v13 = vmul.f32 %v8760_v22, %v5458_v27  ;;  %v5790_v27 = vsub.f32 -1e+30, %v11082_v39  ;;  %v5792_v22 = vsub.f32 -1e+30, %v11088_v42 }
0x1294   : > { %v5465_v2 = vmul.f32 %v8762_v37, %v5457_v50  ;;  %v7637_v12 = vpop.f32.mrb[50].mxu0  ;;  %v5800_v10 = vmul.f32 1.442695, %v5793_v26 }
0x1295   : > { %v5460_v63 = vadd.f32 %v7637_v12, %v11054_v47  ;;  %v5448_v4 = vpop.f32.mrb[51].mxu0  ;;  %v8768_v47 = vpop.eup %8767 }
0x1296   : > { %v5459_v53 = vadd.f32 %v5448_v4, %v11061_v40  ;;  %7642 = vmatprep.mubr.msk.f32.mxu0 %vm1762_vm8, %v5465_v2  ;;  %v8512_v40 = vpop.permute.xlu1 %8511  ;;  %v8770_v33 = vpop.eup %8769  ;;  %v5818_v45 = vsel %vm1165_vm5, %v8768_v47, 0.0 }
0x1297   : > { %v5468_v36 = vmul.f32 %v8764_v49, %v5460_v63  ;;  %7643 = vmatmul.mubr.msk.f32.vlgmr.msra.gmra.mrb[40].mxu0 %vm1762_vm8, %v5466_v13  ;;  %v8772_v31 = vpop.eup %8771  ;;  %v8513_v41 = vunpack.i.l.bf16 %v8512_v40  ;;  %v5821_v0 = vsel %vm1165_vm5, %v8770_v33, 0.0  ;;  %v5798_v63 = vmul.f32 1.442695, %v5792_v22  ;;  %v6327_v22 = vld [vmem:[%s11275_s3 + $0x38] sm:$0xff] }
0x1298   : > { %v5467_v51 = vmul.f32 %v8766_v60, %v5459_v53  ;;  %8133 = vmatpush3.bf16.msra.mxu0 %v11458_v21  ;;  %v8514_v21 = vunpack.i.h.bf16 %v8512_v40  ;;  %v8774_v19 = vpop.eup %8773  ;;  %v5824_v58 = vsel %vm1165_vm5, %v8772_v31, 0.0 }
0x1299   : > { %8135 = vmatprep.subr.bf16.mxu0 %v11461_v57  ;;  %v5827_v43 = vsel %vm1165_vm5, %v8774_v19, 0.0 }
0x129a   : > { %7645 = vmatprep.mubr.msk.f32.mxu0 %vm1762_vm8, %v5467_v51  ;;  %v8144_v14 = vpack.c.bf16 %v8514_v21, %v8513_v41  ;;  %v8517_v7 = vpop.permute.xlu1 %8516 }
0x129b   : > { %7646 = vmatmul.mubr.msk.f32.gmra.mrb[42].mxu0 %vm1762_vm8, %v5468_v36  ;;  %v8519_v46 = vunpack.i.h.bf16 %v8517_v7  ;;  %v8518_v52 = vunpack.i.l.bf16 %v8517_v7 }
0x129c   : > { %8137 = vmatpush3.bf16.msra.mxu0 %v11461_v57  ;;  %7684 = vmatprep.mubr.msk.f32.mxu0 %vm1165_vm5, %v8768_v47 }
0x129d   : > { %8140 = vmatprep.subr.msk.bf16.mxu0 %vm9451_vm2, %v8138_v1  ;;  %v8150_v59 = vpack.c.bf16 %v8519_v46, %v8518_v52 }
0x129e   : > { %v8522_v8 = vpop.permute.xlu1 %8521 }
0x129f   : > { %7685 = vmatmul.mubr.msk.f32.vlgmr.msra.gmra.mrb[52].mxu0 %vm1165_vm5, %v8770_v33  ;;  %v8524_v20 = vunpack.i.h.bf16 %v8522_v8  ;;  %v8523_v24 = vunpack.i.l.bf16 %v8522_v8 }
0x12a0   : > { %7687 = vmatprep.mubr.msk.f32.mxu0 %vm1165_vm5, %v8772_v31 }
0x12a3   : > { %7688 = vmatmul.mubr.msk.f32.gmra.mrb[54].mxu0 %vm1165_vm5, %v8774_v19 }
0x12a4   : > { %7698 = vmatprep.mubr.msk.f32.mxu0 %vm942_vm1, %v10922_v25  ;;  %v8156_v25 = vpack.c.bf16 %v8524_v20, %v8523_v24 }
0x12a5   : > { %8143 = vmatpush3.bf16.xpose.msk.msra.mxu0 %vm9451_vm2, %v8138_v1 }
0x12a6   : > { %8146 = vmatprep.subr.msk.bf16.mxu0 %vm9451_vm2, %v8144_v14 }
0x12ad   : > { %8149 = vmatpush3.bf16.xpose.msk.msra.mxu0 %vm9451_vm2, %v8144_v14 }
0x12ae   : > { %8152 = vmatprep.subr.msk.bf16.mxu0 %vm9451_vm2, %v8150_v59 }
0x12b4   : > { %7699 = vmatmul.mubr.msk.f32.vlgmr.msra.gmra.mrb[56].mxu0 %vm942_vm1, %v10934_v62 }
0x12b5   : > { %7701 = vmatprep.mubr.msk.f32.mxu0 %vm942_vm1, %v10936_v38  ;;  %8155 = vmatpush3.bf16.xpose.msk.msra.mxu0 %vm9451_vm2, %v8150_v59 }
0x12b6   : > { %8158 = vmatprep.subr.msk.bf16.mxu0 %vm9451_vm2, %v8156_v25 }
0x12b8   : > { %7702 = vmatmul.mubr.msk.f32.gmra.mrb[58].mxu0 %vm942_vm1, %v10948_v55 }
0x12b9   : > { %7712 = vmatprep.mubr.msk.f32.mxu0 %vm942_vm1, %v10950_v3 }
0x12bd   : > { %8161 = vmatpush3.bf16.xpose.msk.msra.mxu0 %vm9451_vm2, %v8156_v25 }
0x12c4   : > { %7713 = vmatmul.mubr.msk.f32.vlgmr.msra.gmra.mrb[56].mxu0 %vm942_vm1, %v10959_v54 }
0x12c5   : > { %7715 = vmatprep.mubr.msk.f32.mxu0 %vm942_vm1, %v10961_v5 }
0x12c8   : > { %7716 = vmatmul.mubr.msk.f32.gmra.mrb[58].mxu0 %vm942_vm1, %v10967_v16 }
0x1372   : > { %v11145_v62 = vpop.f32.mrb[52].mxu0 }
0x1373   : > { %v11147_v38 = vpop.f32.mrb[53].mxu0 }
0x1376   : > { %v11149_v55 = vpop.f32.mrb[54].mxu0 }
0x1377   : > { %v11151_v11 = vpop.f32.mrb[55].mxu0 }
0x1397   : > { %v7714_v3 = vpop.f32.mrb[56].mxu0 }
0x1398   : > { %v6138_v34 = vsel %vm9606_vm3, %v7714_v3, -1e+30  ;;  %v6118_v28 = vpop.f32.mrb[57].mxu0 }
0x1399   : > { %v6144_v54 = vsel %vm1165_vm5, %v6138_v34, -inf  ;;  %v6137_v5 = vsel %vm9610_vm4, %v6118_v28, -1e+30 }
0x139a   : > { %v6141_v16 = vsel %vm1165_vm5, %v6137_v5, -inf  ;;  %6145 = vmax.xlane.f32.xlu1 %v6144_v54 }
0x139b   : > { %6142 = vmax.xlane.f32.xlu0 %v6141_v16  ;;  %v7717_v30 = vpop.f32.mrb[58].mxu0 }
0x139c   : > { %v6140_v29 = vsel %vm9622_vm6, %v7717_v30, -1e+30  ;;  %v6128_v15 = vpop.f32.mrb[59].mxu0 }
0x139d   : > { %v6150_v6 = vsel %vm1165_vm5, %v6140_v29, -inf  ;;  %v6139_v17 = vsel %vm9632_vm7, %v6128_v15, -1e+30 }
0x139e   : > { %v6147_v61 = vsel %vm1165_vm5, %v6139_v17, -inf }
0x139f   : > { %6151 = vmax.xlane.f32.xlu0 %v6150_v6 }
0x13a3   : > { %6148 = vmax.xlane.f32.xlu0 %v6147_v61 }
0x13ab   : > { %8531 = vrot.lane.b32.xlu1 %v11441_v35, %s8924_s17  ;;  %v5796_v35 = vmul.f32 1.442695, %v5791_v48 }
0x13ad   : > { %8775 = vpow2.f32 %v5796_v35 }
0x13b7   : > { %v8776_v1 = vpop.eup %8775 }
0x13b8   : > { %v5815_v14 = vmul.f32 0.0, %v8776_v1 }
0x13b9   : > { %8526 = vrot.lane.b32.xlu0 %v11442_v32, %s8924_s17  ;;  %v5794_v32 = vmul.f32 1.442695, %v5790_v27 }
0x13ba   : > { %v5932_v25 = vadd.f32 %v11145_v62, %v5815_v14 }
0x13bb   : > { %8777 = vpow2.f32 %v5794_v32 }
0x13bc   : > { %8779 = vpow2.f32 %v5800_v10 }
0x13c5   : > { %v8778_v19 = vpop.eup %8777 }
0x13c6   : > { %v8780_v24 = vpop.eup %8779  ;;  %v5814_v3 = vmul.f32 0.0, %v8778_v19 }
0x13c8   : > { %v5931_v54 = vadd.f32 %v11147_v38, %v5814_v3 }
0x13cf   : > { %5819 = vadd.xlane.f32.xlu1 %v5818_v45 }
0x13d8   : > { %5822 = vadd.xlane.f32.xlu0 %v5821_v0 }
0x13dc   : > { %5825 = vadd.xlane.f32.xlu0 %v5824_v58 }
0x13e0   : > { %5828 = vadd.xlane.f32.xlu0 %v5827_v43 }
0x1427   : > { %v6146_v50 = vpop.xlane.xlu1 %6145 }
0x1428   : > { %v6154_v37 = vmax.f32 %v11084_v56, %v6146_v50  ;;  %v6143_v13 = vpop.xlane.xlu0 %6142 }
0x1429   : > { %v6153_v18 = vmax.f32 %v11082_v39, %v6143_v13 }
0x142a   : > { %v6158_v2 = vsub.f32 %v11084_v56, %v6154_v37  ;;  %v6170_v12 = vsub.f32 %v6138_v34, %v6154_v37 }
0x142b   : > { %v6157_v4 = vsub.f32 %v11082_v39, %v6153_v18  ;;  %v6169_v49 = vsub.f32 %v6137_v5, %v6153_v18  ;;  %v8532_v40 = vpop.permute.xlu1 %8531 }
0x142c   : > { %v6163_v53 = vmul.f32 1.442695, %v6158_v2  ;;  %v6152_v60 = vpop.xlane.xlu0 %6151  ;;  %v6175_v51 = vmul.f32 1.442695, %v6170_v12  ;;  %v8534_v7 = vunpack.i.h.bf16 %v8532_v40  ;;  %v8533_v46 = vunpack.i.l.bf16 %v8532_v40 }
0x142d   : > { %v6161_v9 = vmul.f32 1.442695, %v6157_v4  ;;  %v6173_v44 = vmul.f32 1.442695, %v6169_v49  ;;  %v6156_v36 = vmax.f32 %v11092_v23, %v6152_v60 }
0x142e   : > { %8781 = vpow2.f32 %v6163_v53  ;;  %v8166_v5 = vpack.c.bf16 %v8534_v7, %v8533_v46 }
0x142f   : > { %8783 = vpow2.f32 %v5798_v63  ;;  %v6160_v57 = vsub.f32 %v11092_v23, %v6156_v36  ;;  %v6172_v47 = vsub.f32 %v6140_v29, %v6156_v36  ;;  %v5817_v29 = vmul.f32 0.0, %v8780_v24 }
0x1430   : > { %8785 = vpow2.f32 %v6161_v9  ;;  %v6149_v56 = vpop.xlane.xlu0 %6148 }
0x1431   : > { %8787 = vpow2.f32 %v6173_v44  ;;  %v6167_v39 = vmul.f32 1.442695, %v6160_v57  ;;  %v6155_v33 = vmax.f32 %v11088_v42, %v6149_v56  ;;  %v6179_v31 = vmul.f32 1.442695, %v6172_v47 }
0x1432   : > { %8789 = vpow2.f32 %v6175_v51  ;;  %v5934_v62 = vadd.f32 %v11149_v55, %v5817_v29 }
0x1433   : > { %8791 = vpow2.f32 %v6167_v39  ;;  %v6159_v21 = vsub.f32 %v11088_v42, %v6155_v33  ;;  %v6171_v41 = vsub.f32 %v6139_v17, %v6155_v33 }
0x1434   : > { %v8527_v23 = vpop.permute.xlu0 %8526  ;;  %8793 = vpow2.f32 %v6179_v31 }
0x1435   : > { %v6165_v52 = vmul.f32 1.442695, %v6159_v21  ;;  %v6177_v59 = vmul.f32 1.442695, %v6171_v41  ;;  %v8529_v8 = vunpack.i.h.bf16 %v8527_v23  ;;  %v8528_v20 = vunpack.i.l.bf16 %v8527_v23 }
0x1437   : > { %8795 = vpow2.f32 %v6165_v52  ;;  %v8162_v34 = vpack.c.bf16 %v8529_v8, %v8528_v20 }
0x1438   : > { %v8782_v28 = vpop.eup %8781  ;;  %8797 = vpow2.f32 %v6177_v59 }
0x1439   : > { %v8784_v42 = vpop.eup %8783  ;;  %8163 = vmatprep.subr.bf16.mxu1 %v8162_v34  ;;  %v6202_v16 = vmul.f32 %v8782_v28, %v5932_v25 }
0x143a   : > { %v8786_v30 = vpop.eup %8785  ;;  %8165 = vmatpush3.bf16.msra.mxu1 %v8162_v34  ;;  %v5816_v0 = vmul.f32 0.0, %v8784_v42  ;;  %v8811_v34 = vld [vmem:[%s9055_s16 + $0x28] sm:$0xff] }
0x143b   : > { %v8788_v15 = vpop.eup %8787  ;;  %8167 = vmatprep.subr.bf16.mxu1 %v8166_v5  ;;  %v6201_v6 = vmul.f32 %v8786_v30, %v5931_v54  ;;  %v8812_v54 = vld [vmem:[%s9055_s16 + $0x20] sm:$0xff] }
0x143c   : > { %v8790_v17 = vpop.eup %8789  ;;  %7726 = vmatprep.mubr.msk.f32.mxu1 %vm1165_vm5, %v8788_v15  ;;  %v6185_v61 = vsel %vm1165_vm5, %v8788_v15, 0.0  ;;  %v5933_v43 = vadd.f32 %v11151_v11, %v5816_v0  ;;  %v6326_v11 = vld [vmem:[%s11275_s3 + $0x30] sm:$0xff] }
0x143d   : > { %v8792_v45 = vpop.eup %8791  ;;  %6186 = vadd.xlane.f32.xlu1 %v6185_v61  ;;  %v6188_v48 = vsel %vm1165_vm5, %v8790_v17, 0.0  ;;  %v8170_v50 = vpack.c.bf16 %v6327_v22, %v6326_v11 }
0x143e   : > { %8169 = vmatpush3.bf16.msra.mxu1 %v8166_v5  ;;  %v6204_v38 = vmul.f32 %v8792_v45, %v5934_v62  ;;  %v8794_v58 = vpop.eup %8793 }
0x143f   : > { %v6194_v32 = vsel %vm1165_vm5, %v8794_v58, 0.0  ;;  %8171 = vmatprep.subr.bf16.mxu0 %v8170_v50 }
0x1440   : > { %8173 = vmatpush3.bf16.msra.mxu0 %v8170_v50 }
0x1441   : > { %v8796_v27 = vpop.eup %8795  ;;  %6189 = vadd.xlane.f32.xlu1 %v6188_v48  ;;  %7727 = vmatmul.mubr.msk.f32.vlgmr.msra.gmra.mrb[56].mxu1 %vm1165_vm5, %v8790_v17 }
0x1442   : > { %v8798_v35 = vpop.eup %8797  ;;  %v6203_v55 = vmul.f32 %v8796_v27, %v5933_v43 }
0x1443   : > { %7729 = vmatprep.mubr.msk.f32.mxu1 %vm1165_vm5, %v8798_v35  ;;  %v6191_v26 = vsel %vm1165_vm5, %v8798_v35, 0.0 }
0x1444   : > { %6192 = vadd.xlane.f32.xlu0 %v6191_v26 }
0x1445   : > { %6195 = vadd.xlane.f32.xlu1 %v6194_v32  ;;  %7730 = vmatmul.mubr.msk.f32.gmra.mrb[58].mxu1 %vm1165_vm5, %v8794_v58 }
0x145c   : > { %v5820_v13 = vpop.xlane.xlu1 %5819 }
0x145d   : > { %v5830_v12 = vadd.f32 %v5820_v13, %v5814_v3 }
0x145f   : > { %v6181_v9 = vmul.f32 %v8786_v30, %v5830_v12  ;;  %v8813_v30 = vld [vmem:[%s9055_s16 + $0x38] sm:$0xff] }
0x1465   : > { %v5823_v37 = vpop.xlane.xlu0 %5822 }
0x1466   : > { %v5831_v2 = vadd.f32 %v5823_v37, %v5815_v14 }
0x1468   : > { %v6182_v53 = vmul.f32 %v8782_v28, %v5831_v2 }
0x1469   : > { %v5826_v10 = vpop.xlane.xlu0 %5825 }
0x146a   : > { %v5832_v60 = vadd.f32 %v5826_v10, %v5816_v0 }
0x146c   : > { %v6183_v56 = vmul.f32 %v8796_v27, %v5832_v60 }
0x146d   : > { %v5829_v63 = vpop.xlane.xlu0 %5828 }
0x146e   : > { %v5833_v49 = vadd.f32 %v5829_v63, %v5817_v29 }
0x1470   : > { %v6184_v57 = vmul.f32 %v8792_v45, %v5833_v49 }
0x14ca   : > { %v6187_v18 = vpop.xlane.xlu1 %6186 }
0x14cb   : > { %v6197_v36 = vadd.f32 %v6187_v18, %v6181_v9 }
0x14ce   : > { %v6190_v4 = vpop.xlane.xlu1 %6189 }
0x14cf   : > { %v6198_v44 = vadd.f32 %v6190_v4, %v6182_v53 }
0x14d1   : > { %v6193_v47 = vpop.xlane.xlu0 %6192  ;;  %8799 = vrcp.f32 %v6198_v44 }
0x14d2   : > { %v6196_v51 = vpop.xlane.xlu1 %6195  ;;  %8801 = vrcp.f32 %v6197_v36  ;;  %v6199_v40 = vadd.f32 %v6193_v47, %v6183_v56 }
0x14d3   : > { %v6200_v1 = vadd.f32 %v6196_v51, %v6184_v57 }
0x14d5   : > { %8803 = vrcp.f32 %v6200_v1 }
0x14d6   : > { %8805 = vrcp.f32 %v6199_v40 }
0x14db   : > { %v8800_v21 = vpop.eup %8799 }
0x14dc   : > { %v8802_v19 = vpop.eup %8801 }
0x14df   : > { %v8804_v59 = vpop.eup %8803 }
0x14e0   : > { %v8806_v20 = vpop.eup %8805 }
0x1514   : > { %v7728_v39 = vpop.f32.mrb[56].mxu1 }
0x1515   : > { %v6315_v33 = vadd.f32 %v7728_v39, %v6202_v16  ;;  %v6295_v31 = vpop.f32.mrb[57].mxu1 }
0x1516   : > { %v6314_v41 = vadd.f32 %v6295_v31, %v6201_v6  ;;  %v8814_v6 = vld [vmem:[%s9055_s16 + $0x30] sm:$0xff]  ;;  %s8847_s16 = sshll.u32 %s8930_s12, 4  ;;  %s8848_s16 = int_to_ptr.vmem [resolvable:$false] %s8847_s16 }
0x1517   : > { %v6323_v14 = vmul.f32 %v8800_v21, %v6315_v33  ;;  %s8849_s17 = scalar_lea.vmem %s8848_s16, 2048  ;;  %p8850_p2 = scmp.lt.s32.totalorder %s11222_s18, %s8848_s16 }
0x1518   : > { %v6322_v7 = vmul.f32 %v8802_v19, %v6314_v41  ;;  %v7731_v46 = vpop.f32.mrb[58].mxu1  ;;  %p8851_p3 = scmp.lt.s32.totalorder %s8849_s17, %s8843_s9 }
0x1519   : > { %v6317_v23 = vadd.f32 %v7731_v46, %v6204_v38  ;;  %v6305_v52 = vpop.f32.mrb[59].mxu1 }
0x151a   : > { %v6316_v8 = vadd.f32 %v6305_v52, %v6203_v55  ;;  %7736 = vmatprep.mubr.msk.f32.mxu0 %vm1762_vm8, %v6322_v7  ;;  %p8852_p4 = por %p8851_p3, %p8850_p2 }
0x151b   : > { %v6325_v24 = vmul.f32 %v8804_v59, %v6317_v23  ;;  %7737 = vmatmul.mubr.msk.f32.vlgmr.msra.gmra.mrb[40].mxu0 %vm1762_vm8, %v6323_v14 }
0x151c   : > { %v6324_v25 = vmul.f32 %v8806_v20, %v6316_v8  ;;  %p8853_p7 = pnand %p8852_p4, %p8846_p12 }
0x151e   : > { %7739 = vmatprep.mubr.msk.f32.mxu0 %vm1762_vm8, %v6324_v25 }
0x151f   : > { %7740 = vmatmul.mubr.msk.f32.gmra.mrb[42].mxu0 %vm1762_vm8, %v6325_v24 }
0x15ee   : > { %v7738_v3 = vpop.f32.mrb[40].mxu0 }
0x15ef   : > { %v6430_v28 = vadd.f32 %v8811_v34, %v7738_v3  ;;  %v6406_v42 = vpop.f32.mrb[41].mxu0 }
0x15f0   : > { %v6429_v5 = vadd.f32 %v8812_v54, %v6406_v42 }
0x15f1   : > { %6434 = vst.msk [vmem:[%s10370_s10 + $0x28] sm:$0xff] %vm282_vm0, %v6430_v28 }
0x15f2   : > { %6433 = vst.msk [vmem:[%s10370_s10 + $0x20] sm:$0xff] %vm282_vm0, %v6429_v5  ;;  %v7741_v16 = vpop.f32.mrb[42].mxu0 }
0x15f3   : > { %v6432_v29 = vadd.f32 %v8813_v30, %v7741_v16  ;;  %v6416_v15 = vpop.f32.mrb[43].mxu0 }
0x15f4   : > { %v6431_v17 = vadd.f32 %v8814_v6, %v6416_v15 }
0x15f5   : > { %6436 = vst.msk [vmem:[%s10370_s10 + $0x38] sm:$0xff] %vm282_vm0, %v6432_v29 }
0x15f6   : > { %6435 = vst.msk [vmem:[%s10370_s10 + $0x30] sm:$0xff] %vm282_vm0, %v6431_v17 }
0x15f7   : > { %8856 = shalt.err (!%p8853_p7)
}
0x15f8   : > { %s8857_s19 = scalar_lea.hbm %s11219_s20, 1024  ;;  %s8861_s26 = scalar_lea.hbm %s11278_s6, 2048 }
0x15f9   : > { %p8858_p8 = scmp.ne.s32.totalorder %s11219_s20, %s8857_s19  ;;  %p8862_p1 = scmp.lt.u32.totalorder %s11219_s20, %s11278_s6 }
0x15fa   : > { %p8863_p0 = scmp.lt.u32.totalorder %s8861_s26, %s8857_s19  ;;  %p8865_p6 = scmp.lt.u32.totalorder %s8857_s19, %s11219_s20 }
0x15fb   : > { %p8859_p11 = pnand %p8858_p8, %p11462_p9 }
0x15fc   : > { %p8864_p5 = por %p8863_p0, %p8862_p1 }
0x15fd   : > { %p8860_p13 = pneg %p8859_p11 }
0x15fe   : > { %p8866_p10 = por %p8865_p6, %p8864_p5 }
0x1600   : > { %p8867_p12 = pnand %p8866_p10, %p8860_p13 }
0x1602   : > { %8870 = shalt.err (!%p8867_p12)
}
0x1603   : > { %s8931_s28 = smov 128  }
0x1604   : > { %8250 = dma.vmem_to_hbm [thread:$0]  (%p11462_p9), %s11222_s18, 1024, %s11219_s20, %s11230_s25, %s8931_s28, %s8931_s28, %s11459_s13  }
0x1605 PF: > { %p8262_p2 = scmp.ge.s32.totalorder %s8909_s24, 2  ;;  %s6466_s29 = sand.u32 1, %s8897_s21  }
0x1606   : > { %p11463_p3 = scmp.ne.s32.totalorder %s11367_s8, 0  ;;  %s6467_s9 = scalar_lea.sflag [#allocation4], %s6466_s29 }
0x1608   : > { %p8257_p4 = pnand %p8262_p2, %p11463_p3 }
0x160a   : > { %8892 = dma.done.wait (!%p8257_p4), %s6467_s9, 1024  }
0x160b   : > { %8894 = vsyncadd (!%p8257_p4), %s6467_s9, 4294966272  ;;  %p17_p7 = scmp.ge.s32.totalorder %s8992_s27, 4   ;;  %s11464_s21 = smov %s8901_s22 }
0x160c   : > { %s11465_s22 = smov %s8905_s23  ;;  %s11466_s23 = smov %s9003_s30 }
0x160d   : > { %s11467_s24 = smov %s8992_s27  ;;  %19 = sbr.rel (!%p17_p7) target bundleno = 4 (0x4), region = 84 }
0x1614   :  { %6472 = vsyncpa [#allocation3], 1 }
0x1615   :  { %6474 = vsyncpa [#allocation3 + $0x1], 1 }
0x1616   :  { %6475 = vsyncpa [#allocation4], 1 }
0x1617   :  { %6477 = vsyncpa [#allocation4 + $0x1], 1 }

// kernel: tpu_custom_call.1
= control target key start
LH: loop header
LB: loop body
LE: loop exit
PB: predicated region body
PF: predicated region fallthrough
CT: control target
= control target key end

     0   :  { %11 = vsyncpa [#allocation3], 0  ;;  %s11272_s0 = inlined_call_operand.vmem [shape: f32[2,64,64], index: 0, kind: input, shape index: {}]   ;;  %s11273_s1 = inlined_call_operand.vmem [shape: f32[1,64], index: 1, kind: input, shape index: {}]   ;;  %s11274_s2 = inlined_call_operand.hbm [shape: f32[64,192], index: 2, kind: input, shape index: {}]   ;;  %s11275_s3 = inlined_call_operand.vmem [shape: f32[64,64], index: 3, kind: input, shape index: {}]   ;;  %s11276_s4 = inlined_call_operand.vmem [shape: f32[64,32], index: 4, kind: input, shape index: {}]   ;;  %s11277_s5 = inlined_call_operand.vmem [shape: f32[64,32], index: 5, kind: input, shape index: {}]   ;;  %s11278_s6 = inlined_call_operand.hbm [shape: f32[2,64,64], index: 6, kind: output, shape index: {}]  }
   0x1   :  { %12 = vsyncpa [#allocation4], 0 }
   0x2   :  { %14 = vsyncpa [#allocation4 + $0x1], 0  ;;  %s8967_s21 = smov 0   ;;  %s8969_s22 = smov 0  }
   0x3   :  { %s8971_s23 = smov 0   ;;  %s8973_s24 = smov 0  }
   0x4 LB: > { %s8988_s25 = sadd.s32 4294967295, %s8909_s24   ;;  %s6525_s26 = sadd.s32 4294967294, %s8909_s24   ;;  %s8909_s24 = sphi %s8973_s24, %s11467_s24   ;;  %s8905_s23 = sphi %s8971_s23, %s11466_s23   ;;  %s8901_s22 = sphi %s8969_s22, %s11465_s22   ;;  %s8897_s21 = sphi %s8967_s21, %s11464_s21  }
   0x5   : > { %s8992_s27 = sadd.s32 1, %s8909_s24   ;;  %s158_s28 = sadd.s32 1, %s8905_s23 }
   0x6   : > { %s155_s29 = ssub.s32 %s8909_s24, %s8992_s27  ;;  %p168_p0 = scmp.ne.s32.totalorder %s8905_s23, %s8901_s22 }
   0x7   : > { %p156_p1 = scmp.eq.s32.totalorder %s155_s29, 0  ;;  %p169_p2 = scmp.eq.s32.totalorder %s8988_s25, 1 }
   0x8   : > { %p174_p3 = scmp.ne.s32.totalorder %s8901_s22, %s8897_s21  ;;  %p175_p4 = scmp.eq.s32.totalorder %s6525_s26, 1 }
   0x9   : > { %s9003_s30 = scalar_select %p156_p1, %s8905_s23, %s158_s28  }
   0xa   : > { %p9005_p5 = por %p169_p2, %p168_p0  ;;  %p9009_p6 = por %p175_p4, %p174_p3 }
   0xb   : > { %p6526_p7 = scmp.ge.s32.totalorder %s8909_s24, 1  ;;  %p182_p8 = scmp.lt.s32.totalorder %s8909_s24, 3 }
   0xc   : > { %s11366_s7 = scalar_select %p9005_p5, 1, 0 }
   0xd   : > { %s11367_s8 = scalar_select %p9009_p6, 1, 0 }
   0xe   : > { %p11279_p9 = scmp.eq.s32.totalorder %s8988_s25, 0  ;;  %p9016_p10 = pnand %p6526_p7, %p182_p8 }
   0xf   : > { %s8911_s10 = smov [#allocation2]   ;;  %s8815_s15 = scalar_lea.hbm %s11274_s2, 2048 }
  0x10   : > { %s11368_s9 = scalar_select %p9016_p10, 1, 0 }
  0x11   : > { %s197_s11 = sshll.u32 %s8911_s10, 4  ;;  %p8252_p11 = pneg %p9016_p10  ;;  %s198_s11 = int_to_ptr.vmem [resolvable:$true] %s197_s11 }
  0x12   : > { %p8816_p13 = scmp.ne.s32.totalorder %s11274_s2, %s8815_s15  ;;  %p8822_p3 = scmp.lt.u32.totalorder %s8815_s15, %s11274_s2 }
  0x13   : > { %p9024_p12 = pnand %p11279_p9, %p8252_p11 }
  0x15   : > { %p8817_p0 = pneg %p9024_p12 }
  0x17   : > { %p8818_p1 = pnand %p8817_p0, %p8816_p13 }
  0x19   : > { %p8819_p2 = pneg %p8818_p1 }
  0x1b   : > { %p8824_p4 = pnand %p8822_p3, %p8819_p2 }
  0x1d   : > { %8827 = shalt.err (!%p8824_p4)
}
  0x1e   : > { %s8828_s20 = scalar_lea.vmem %s198_s11, 2048  ;;  %p8836_p9 = scmp.lt.s32.totalorder %s198_s11, %s198_s11 }
  0x1f   : > { %p8829_p7 = scmp.ne.s32.totalorder %s198_s11, %s8828_s20  ;;  %p8837_p6 = scmp.lt.s32.totalorder %s8828_s20, %s8828_s20 }
  0x21   : > { %p8831_p8 = pnand %p8829_p7, %p8817_p0  ;;  %p8838_p5 = por %p8837_p6, %p8836_p9 }
  0x23   : > { %p8832_p11 = pneg %p8831_p8 }
  0x25   : > { %p8839_p10 = pnand %p8838_p5, %p8832_p11 }
  0x27   : > { %8842 = shalt.err (!%p8839_p10)
}
  0x28   : > { %s8912_s26 = smov 256   ;;  %s8913_s28 = smov 16  }
  0x29   : > { %8255 = dma.hbm_to_vmem [thread:$0]  (!%p9024_p12), %s11274_s2, 2048, %s198_s11, [#allocation3], %s8912_s26, %s8912_s26, %s8913_s28  }
  0x2a   : > { %p11370_p13 = scmp.ne.s32.totalorder %s11368_s9, 0 }
  0x2c   : > { %230 = sbr.rel (%p11370_p13) target bundleno = 5637 (0x1605), region = 44 }
  0x33   : > { %p11371_p1 = scmp.eq.s32.totalorder %s8988_s25, 0 }
  0x35   : > { %8888 = dma.done.wait (%p11371_p1), [#allocation3], 2048   ;;  %p11372_p0 = pmov %p11371_p1 }
  0x36   : > { %p260_p5 = scmp.lt.s32.totalorder %s8988_s25, 1  ;;  %vm282_vm0 = vcmask 523264   ;;  %v355_v12 = vld [vmem:[#allocation2 + $0x8] sm:$0xff]  ;;  %v357_v13 = vld [vmem:[#allocation2 + $0x18] sm:$0xff]  ;;  %v354_v15 = vld [vmem:[#allocation2] sm:$0xff]  ;;  %v8914_v34 = vmov 0.0  }
  0x37   : > { %8890 = vsyncadd (%p11372_p0), [#allocation3], 4294965248  ;;  %v7742_v14 = vpack.c.bf16 %v357_v13, %v355_v12  ;;  %v356_v16 = vld [vmem:[#allocation2 + $0x10] sm:$0xff]  ;;  %v359_v18 = vld [vmem:[#allocation2 + $0x28] sm:$0xff]  ;;  %458 = vmatprep.mubr.f32.mxu0 %v8914_v34  ;;  %s8915_s19 = smov 64   ;;  %s8916_s28 = smov 96  }
  0x38   : > { %s261_s13 = scalar_select %p260_p5, %s8988_s25, 1  ;;  %v7744_v17 = vpack.c.bf16 %v356_v16, %v354_v15  ;;  %v361_v19 = vld [vmem:[#allocation2 + $0x38] sm:$0xff]  ;;  %v358_v21 = vld [vmem:[#allocation2 + $0x20] sm:$0xff]  ;;  %v360_v22 = vld [vmem:[#allocation2 + $0x30] sm:$0xff]  ;;  %vm942_vm1 = vcmask 64512   ;;  %vm1165_vm5 = vcmask 261120  }
  0x39   : > { %7743 = vmatprep.subr.bf16.mxu0 %v7742_v14  ;;  %v7746_v20 = vpack.c.bf16 %v361_v19, %v359_v18  ;;  %v7748_v23 = vpack.c.bf16 %v360_v22, %v358_v21  ;;  %v363_v24 = vld [vmem:[#allocation2 + $0x48] sm:$0xff]  ;;  %v365_v25 = vld [vmem:[#allocation2 + $0x58] sm:$0xff]  ;;  %v362_v27 = vld [vmem:[#allocation2 + $0x40] sm:$0xff]  ;;  %s11307_s10 = smov 24   ;;  %s8920_s15 = smov 88   ;;  %vm1762_vm8 = vcmask 130048  }
  0x3a   : > { %s6820_s14 = sshll.u32 %s261_s13, 6  ;;  %7745 = vmatpush1.bf16.msra.mxu0 %v7744_v17  ;;  %v7750_v26 = vpack.c.bf16 %v365_v25, %v363_v24  ;;  %v364_v28 = vld [vmem:[#allocation2 + $0x50] sm:$0xff]  ;;  %v367_v29 = vld [vmem:[#allocation2 + $0x68] sm:$0xff]  ;;  %v369_v31 = vld [vmem:[#allocation2 + $0x78] sm:$0xff]  ;;  %s8917_s13 = smov 32  }
  0x3b   : > { %s9055_s16 = scalar_lea.vmem %s11272_s0, %s6820_s14  ;;  %7747 = vmatprep.subr.bf16.mxu0 %v7746_v20  ;;  %v7752_v30 = vpack.c.bf16 %v364_v28, %v362_v27  ;;  %v366_v32 = vld [vmem:[#allocation2 + $0x60] sm:$0xff]  ;;  %v368_v33 = vld [vmem:[#allocation2 + $0x70] sm:$0xff]  ;;  %v7754_v35 = vpack.c.bf16 %v369_v31, %v367_v29  ;;  %v9085_v37 = vld [vmem:[%s11277_s5 + $0x8] sm:$0xff]  ;;  %s11305_s14 = smov 56  }
  0x3c   : > { %v9058_v0 = vld [vmem:[%s9055_s16] sm:$0xff]  ;;  %v9061_v1 = vld [vmem:[%s9055_s16 + $0x8] sm:$0xff]  ;;  %v9064_v2 = vld [vmem:[%s9055_s16 + $0x10] sm:$0xff]  ;;  %v7756_v36 = vpack.c.bf16 %v368_v33, %v366_v32  ;;  %s11309_s12 = smov 120   ;;  %s11301_s9 = smov 16  }
  0x3d   : > { %v274_v3 = vmul.f32 %v9058_v0, %v9058_v0  ;;  %v275_v4 = vmul.f32 %v9061_v1, %v9061_v1  ;;  %v276_v5 = vmul.f32 %v9064_v2, %v9064_v2  ;;  %v9073_v6 = vld [vmem:[%s9055_s16 + $0x18] sm:$0xff]  ;;  %v9090_v38 = vld [vmem:[%s11277_s5] sm:$0xff]  ;;  %v9099_v39 = vld [vmem:[%s11277_s5 + $0x10] sm:$0xff]  ;;  %s11299_s11 = smov 48   ;;  %s8924_s17 = smov 80  }
  0x3e   : > { %v277_v7 = vmul.f32 %v9073_v6, %v9073_v6  ;;  %7749 = vmatpush1.bf16.msra.mxu0 %v7748_v23  ;;  %v9108_v40 = vld [vmem:[%s11277_s5 + $0x18] sm:$0xff]  ;;  %v9125_v41 = vld [vmem:[%s11276_s4] sm:$0xff]  ;;  %v9134_v42 = vld [vmem:[%s11276_s4 + $0x10] sm:$0xff]  ;;  %s11303_s18 = smov 112   ;;  %s11311_s20 = smov 8  }
  0x3f   : > { %v283_v8 = vsel %vm282_vm0, %v274_v3, 0.0  ;;  %v289_v9 = vsel %vm282_vm0, %v276_v5, 0.0  ;;  %v286_v10 = vsel %vm282_vm0, %v275_v4, 0.0  ;;  %7751 = vmatprep.subr.bf16.mxu0 %v7750_v26  ;;  %v9143_v43 = vld [vmem:[%s11276_s4 + $0x8] sm:$0xff]  ;;  %v9152_v44 = vld [vmem:[%s11276_s4 + $0x18] sm:$0xff]  ;;  %v9171_v45 = vld [vmem:[%s9055_s16 + $0x20] sm:$0xff] }
  0x40   : > { %284 = vadd.xlane.f32.xlu0 %v283_v8  ;;  %290 = vadd.xlane.f32.xlu1 %v289_v9  ;;  %v292_v11 = vsel %vm282_vm0, %v277_v7, 0.0  ;;  %v278_v46 = vmul.f32 %v9171_v45, %v9171_v45  ;;  %v9177_v48 = vld [vmem:[%s9055_s16 + $0x28] sm:$0xff]  ;;  %v9185_v63 = vld [vmem:[%s11273_s1] ss:$0 sm:$0xff]  ;;  %vm9451_vm2 = vmpackc.low %vm942_vm1, %vm942_vm1  ;;  %s11313_s26 = smov 40   ;;  %s8928_s29 = smov 72  }
  0x41   : > { %v279_v49 = vmul.f32 %v9177_v48, %v9177_v48  ;;  %p11462_p9 = scmp.ne.s32.totalorder %s11366_s7, 0 }
  0x42   : > { %7753 = vmatpush1.bf16.msra.mxu0 %v7752_v30  ;;  %v295_v47 = vsel %vm282_vm0, %v278_v46, 0.0 }
  0x43   : > { %7755 = vmatprep.subr.bf16.mxu0 %v7754_v35  ;;  %v298_v50 = vsel %vm282_vm0, %v279_v49, 0.0 }
  0x44   : > { %287 = vadd.xlane.f32.xlu0 %v286_v10  ;;  %293 = vadd.xlane.f32.xlu1 %v292_v11 }
  0x46   : > { %7757 = vmatpush1.bf16.msra.mxu0 %v7756_v36 }
  0x55   : > { %837 = vrot.lane.b32.xlu1 %v9085_v37, %s8915_s19 }
  0x59   : > { %839 = vrot.lane.b32.xlu1 %v9099_v39, %s8915_s19 }
  0x5a   : > { %835 = vrot.lane.b32.xlu0 %v9090_v38, %s8915_s19 }
  0x5d   : > { %841 = vrot.lane.b32.xlu1 %v9108_v40, %s8915_s19 }
  0x5e   : > { %731 = vrot.lane.b32.xlu0 %v9090_v38, %s8916_s28 }
  0x61   : > { %733 = vrot.lane.b32.xlu1 %v9085_v37, %s8916_s28 }
  0x62   : > { %735 = vrot.lane.b32.xlu0 %v9099_v39, %s8916_s28 }
  0x65   : > { %737 = vrot.lane.b32.xlu1 %v9108_v40, %s8916_s28 }
  0x66   : > { %539 = vrot.lane.b32.xlu0 %v9090_v38, %s8917_s13 }
  0x69   : > { %541 = vrot.lane.b32.xlu1 %v9085_v37, %s8917_s13 }
  0x6a   : > { %543 = vrot.lane.b32.xlu0 %v9099_v39, %s8917_s13 }
  0x6d   : > { %545 = vrot.lane.b32.xlu1 %v9108_v40, %s8917_s13 }
  0x6e   : > { %803 = vrot.lane.b32.xlu0 %v9125_v41, %s8916_s28 }
  0x71   : > { %805 = vrot.lane.b32.xlu1 %v9143_v43, %s8916_s28 }
  0x72   : > { %807 = vrot.lane.b32.xlu0 %v9134_v42, %s8916_s28 }
  0x75   : > { %809 = vrot.lane.b32.xlu1 %v9152_v44, %s8916_s28 }
  0x76   : > { %699 = vrot.lane.b32.xlu0 %v9125_v41, %s8915_s19 }
  0x79   : > { %701 = vrot.lane.b32.xlu1 %v9143_v43, %s8915_s19 }
  0x7a   : > { %619 = vrot.lane.b32.xlu0 %v9125_v41, %s8917_s13 }
  0x7d   : > { %621 = vrot.lane.b32.xlu1 %v9143_v43, %s8917_s13 }
  0x7e   : > { %703 = vrot.lane.b32.xlu0 %v9134_v42, %s8915_s19 }
  0x81   : > { %705 = vrot.lane.b32.xlu1 %v9152_v44, %s8915_s19 }
  0x82   : > { %623 = vrot.lane.b32.xlu0 %v9134_v42, %s8917_s13 }
  0x85   : > { %625 = vrot.lane.b32.xlu1 %v9152_v44, %s8917_s13 }
  0xa1   : > { %296 = vadd.xlane.f32.xlu0 %v295_v47 }
  0xa9   : > { %299 = vadd.xlane.f32.xlu1 %v298_v50 }
  0xcd   : > { %v285_v51 = vpop.xlane.xlu0 %284  ;;  %v291_v52 = vpop.xlane.xlu1 %290 }
  0xce   : > { %v308_v53 = vmul.f32 0.015625, %v285_v51  ;;  %v310_v54 = vmul.f32 0.015625, %v291_v52 }
  0xd0   : > { %v316_v55 = vadd.f32 1e-06, %v308_v53  ;;  %v318_v56 = vadd.f32 1e-06, %v310_v54 }
  0xd1   : > { %v288_v57 = vpop.xlane.xlu0 %287  ;;  %v294_v58 = vpop.xlane.xlu1 %293 }
  0xd2   : > { %8535 = vrsqrt.f32 %v316_v55  ;;  %v309_v59 = vmul.f32 0.015625, %v288_v57  ;;  %v311_v60 = vmul.f32 0.015625, %v294_v58 }
  0xd3   : > { %8537 = vrsqrt.f32 %v318_v56 }
  0xd4   : > { %v317_v61 = vadd.f32 1e-06, %v309_v59  ;;  %v319_v62 = vadd.f32 1e-06, %v311_v60 }
  0xd5   : > { %v838_v15 = vpop.permute.xlu1 %837 }
  0xd6   : > { %8539 = vrsqrt.f32 %v317_v61 }
  0xd7   : > { %8541 = vrsqrt.f32 %v319_v62 }
  0xd9   : > { %v9203_v16 = vpop.permute.xlu1 %839 }
  0xdc   : > { %v8536_v3 = vpop.eup %8535 }
  0xdd   : > { %v338_v4 = vmul.f32 %v8536_v3, %v9185_v63  ;;  %v8538_v5 = vpop.eup %8537 }
  0xde   : > { %v340_v10 = vmul.f32 %v8538_v5, %v9185_v63 }
  0xdf   : > { %v346_v7 = vmul.f32 %v338_v4, %v9058_v0 }
  0xe0   : > { %v8540_v8 = vpop.eup %8539  ;;  %v348_v13 = vmul.f32 %v340_v10, %v9064_v2  ;;  %v9205_v2 = vpop.permute.xlu1 %841 }
  0xe1   : > { %6535 = vmatmul.mubr.msk.f32.vlgmr.msra.gmra.mrb[0].mxu0 %vm282_vm0, %v346_v7  ;;  %v339_v9 = vmul.f32 %v8540_v8, %v9185_v63  ;;  %v8542_v11 = vpop.eup %8541 }
  0xe2   : > { %464 = vmatprep.mubr.f32.mxu0 %v8914_v34  ;;  %v341_v14 = vmul.f32 %v8542_v11, %v9185_v63 }
  0xe3   : > { %v347_v12 = vmul.f32 %v339_v9, %v9061_v1  ;;  %v836_v1 = vpop.permute.xlu0 %835 }
  0xe4   : > { %v349_v0 = vmul.f32 %v341_v14, %v9073_v6  ;;  %v734_v19 = vpop.permute.xlu1 %733 }
  0xe5   : > { %6536 = vmatmul.mubr.msk.f32.gmra.mrb[2].mxu0 %vm282_vm0, %v347_v12 }
  0xe6   : > { %470 = vmatprep.mubr.f32.mxu0 %v8914_v34 }
  0xe7   : > { %v732_v17 = vpop.permute.xlu0 %731 }
  0xe8   : > { %v9209_v21 = vpop.permute.xlu1 %737 }
  0xe9   : > { %6537 = vmatmul.mubr.msk.f32.gmra.mrb[4].mxu0 %vm282_vm0, %v348_v13 }
  0xea   : > { %476 = vmatprep.mubr.f32.mxu0 %v8914_v34 }
  0xeb   : > { %v9207_v18 = vpop.permute.xlu0 %735 }
  0xec   : > { %v542_v22 = vpop.permute.xlu1 %541 }
  0xed   : > { %6538 = vmatmul.mubr.msk.f32.gmra.mrb[6].mxu0 %vm282_vm0, %v349_v0 }
  0xee   : > { %482 = vmatprep.mubr.f32.mxu0 %v8914_v34 }
  0xef   : > { %v540_v20 = vpop.permute.xlu0 %539 }
  0xf0   : > { %v9213_v24 = vpop.permute.xlu1 %545 }
  0xf3   : > { %v544_v6 = vpop.permute.xlu0 %543 }
  0xf4   : > { %v9217_v26 = vpop.permute.xlu1 %805 }
  0xf7   : > { %v9211_v23 = vpop.permute.xlu0 %803 }
  0xf8   : > { %v9221_v28 = vpop.permute.xlu1 %809 }
  0xfb   : > { %v9215_v25 = vpop.permute.xlu0 %807 }
  0xfc   : > { %v9225_v30 = vpop.permute.xlu1 %701 }
  0xff   : > { %v9219_v27 = vpop.permute.xlu0 %699 }
 0x100   : > { %v9229_v32 = vpop.permute.xlu1 %621 }
 0x103   : > { %v9223_v29 = vpop.permute.xlu0 %619 }
 0x104   : > { %v9233_v35 = vpop.permute.xlu1 %705 }
 0x107   : > { %v9227_v31 = vpop.permute.xlu0 %703 }
 0x108   : > { %v9235_v46 = vpop.permute.xlu1 %625 }
 0x10b   : > { %v9231_v33 = vpop.permute.xlu0 %623 }
 0x12e   : > { %v297_v36 = vpop.xlane.xlu0 %296 }
 0x12f   : > { %v312_v47 = vmul.f32 0.015625, %v297_v36 }
 0x131   : > { %v320_v49 = vadd.f32 1e-06, %v312_v47 }
 0x133   : > { %8543 = vrsqrt.f32 %v320_v49 }
 0x136   : > { %v300_v50 = vpop.xlane.xlu1 %299 }
 0x137   : > { %v313_v51 = vmul.f32 0.015625, %v300_v50 }
 0x139   : > { %v321_v52 = vadd.f32 1e-06, %v313_v51 }
 0x13b   : > { %8545 = vrsqrt.f32 %v321_v52 }
 0x13d   : > { %v8544_v53 = vpop.eup %8543 }
 0x13e   : > { %v342_v54 = vmul.f32 %v8544_v53, %v9185_v63 }
 0x140   : > { %v350_v55 = vmul.f32 %v342_v54, %v9171_v45 }
 0x142   : > { %6539 = vmatmul.mubr.msk.f32.gmra.mrb[8].mxu0 %vm282_vm0, %v350_v55 }
 0x143   : > { %488 = vmatprep.mubr.f32.mxu0 %v8914_v34 }
 0x145   : > { %v8546_v57 = vpop.eup %8545 }
 0x146   : > { %v343_v45 = vmul.f32 %v8546_v57, %v9185_v63 }
 0x148   : > { %v351_v10 = vmul.f32 %v343_v45, %v9177_v48 }
 0x14a   : > { %6540 = vmatmul.mubr.msk.f32.gmra.mrb[10].mxu0 %vm282_vm0, %v351_v10 }
 0x14b   : > { %494 = vmatprep.mubr.f32.mxu0 %v8914_v34 }
 0x1b4   : > { %v9239_v56 = vpop.f32.mrb[0].mxu0 }
 0x1b5   : > { %v462_v58 = vpop.f32.mrb[1].mxu0  ;;  %v859_v59 = vmul.f32 %v836_v1, %v9239_v56  ;;  %v755_v60 = vmul.f32 %v732_v17, %v9239_v56  ;;  %v651_v3 = vmul.f32 %v9090_v38, %v9239_v56  ;;  %v563_v4 = vmul.f32 %v540_v20, %v9239_v56 }
 0x1b6   : > { %v723_v51 = vmul.f32 %v9219_v27, %v9239_v56  ;;  %v827_v52 = vmul.f32 %v9211_v23, %v9239_v56 }
 0x1b7   : > { %875 = vrot.lane.b32.xlu0 %v859_v59, %s8917_s13  ;;  %771 = vrot.lane.b32.xlu1 %v755_v60, %s8916_s28 }
 0x1b8   : > { %v9247_v61 = vpop.f32.mrb[2].mxu0 }
 0x1b9   : > { %v468_v62 = vpop.f32.mrb[3].mxu0  ;;  %v756_v8 = vmul.f32 %v734_v19, %v9247_v61  ;;  %v860_v12 = vmul.f32 %v838_v15, %v9247_v61  ;;  %v564_v13 = vmul.f32 %v542_v22, %v9247_v61  ;;  %v652_v14 = vmul.f32 %v9085_v37, %v9247_v61  ;;  %v9309_v22 = vld [vmem:[%s9055_s16 + $0x38] sm:$0xff] }
 0x1ba   : > { %v9253_v5 = vpack.i.bf16 %v468_v62, %v462_v58  ;;  %v9255_v7 = vpack.c.bf16 %v468_v62, %v462_v58  ;;  %v828_v53 = vmul.f32 %v9217_v26, %v9247_v61  ;;  %v724_v54 = vmul.f32 %v9225_v30, %v9247_v61 }
 0x1bb   : > { %667 = vrot.lane.b32.xlu0 %v651_v3, %s8917_s13  ;;  %579 = vrot.lane.b32.xlu1 %v563_v4, %s8916_s28 }
 0x1bc   : > { %11373 = vst [vmem:[#allocation8_spill] sm:$0xff] %v9253_v5  ;;  %11374 = vst [vmem:[#allocation9_spill] sm:$0xff] %v9255_v7  ;;  %v9260_v9 = vpop.f32.mrb[4].mxu0 }
 0x1bd   : > { %v474_v11 = vpop.f32.mrb[5].mxu0  ;;  %v565_v15 = vmul.f32 %v544_v6, %v9260_v9  ;;  %v861_v17 = vmul.f32 %v9203_v16, %v9260_v9  ;;  %v757_v37 = vmul.f32 %v9207_v18, %v9260_v9  ;;  %v653_v20 = vmul.f32 %v9099_v39, %v9260_v9  ;;  %v9303_v6 = vld [vmem:[%s9055_s16 + $0x30] sm:$0xff] }
 0x1be   : > { %v280_v39 = vmul.f32 %v9303_v6, %v9303_v6  ;;  %v829_v30 = vmul.f32 %v9215_v25, %v9260_v9  ;;  %v643_v25 = vmul.f32 %v9223_v29, %v9239_v56 }
 0x1bf   : > { %773 = vrot.lane.b32.xlu0 %v756_v8, %s8916_s28  ;;  %877 = vrot.lane.b32.xlu1 %v860_v12, %s8917_s13 }
 0x1c0   : > { %v9267_v38 = vpop.f32.mrb[6].mxu0 }
 0x1c1   : > { %v480_v0 = vpop.f32.mrb[7].mxu0  ;;  %v862_v19 = vmul.f32 %v9205_v2, %v9267_v38  ;;  %v758_v16 = vmul.f32 %v9209_v21, %v9267_v38  ;;  %v654_v18 = vmul.f32 %v9108_v40, %v9267_v38  ;;  %v566_v2 = vmul.f32 %v9213_v24, %v9267_v38 }
 0x1c2   : > { %v9273_v48 = vpack.i.bf16 %v480_v0, %v474_v11  ;;  %v9275_v1 = vpack.c.bf16 %v480_v0, %v474_v11  ;;  %v301_v21 = vsel %vm282_vm0, %v280_v39, 0.0  ;;  %v281_v40 = vmul.f32 %v9309_v22, %v9309_v22 }
 0x1c3   : > { %581 = vrot.lane.b32.xlu0 %v564_v13, %s8916_s28  ;;  %669 = vrot.lane.b32.xlu1 %v652_v14, %s8917_s13  ;;  %v830_v8 = vmul.f32 %v9221_v28, %v9267_v38  ;;  %v725_v13 = vmul.f32 %v9227_v31, %v9260_v9  ;;  %v726_v14 = vmul.f32 %v9233_v35, %v9267_v38 }
 0x1c4   : > { %11375 = vst [vmem:[#allocation10_spill] sm:$0xff] %v9273_v48  ;;  %11376 = vst [vmem:[#allocation11_spill] sm:$0xff] %v9275_v1  ;;  %v304_v36 = vsel %vm282_vm0, %v281_v40, 0.0  ;;  %v644_v28 = vmul.f32 %v9229_v32, %v9247_v61  ;;  %v525_v40 = vmul.f32 %v9134_v42, %v9260_v9 }
 0x1c7   : > { %879 = vrot.lane.b32.xlu0 %v861_v17, %s8917_s13  ;;  %583 = vrot.lane.b32.xlu1 %v565_v15, %s8916_s28 }
 0x1cb   : > { %775 = vrot.lane.b32.xlu0 %v757_v37, %s8916_s28  ;;  %881 = vrot.lane.b32.xlu1 %v862_v19, %s8917_s13 }
 0x1cf   : > { %671 = vrot.lane.b32.xlu0 %v653_v20, %s8917_s13  ;;  %777 = vrot.lane.b32.xlu1 %v758_v16, %s8916_s28  ;;  %v645_v16 = vmul.f32 %v9231_v33, %v9260_v9  ;;  %v523_v33 = vmul.f32 %v9125_v41, %v9239_v56 }
 0x1d3   : > { %673 = vrot.lane.b32.xlu1 %v654_v18, %s8917_s13  ;;  %v646_v18 = vmul.f32 %v9235_v46, %v9267_v38 }
 0x1d7   : > { %585 = vrot.lane.b32.xlu1 %v566_v2, %s8916_s28 }
 0x1ee   : > { %302 = vadd.xlane.f32.xlu0 %v301_v21  ;;  %v524_v21 = vmul.f32 %v9143_v43, %v9247_v61 }
 0x1fb   : > { %305 = vadd.xlane.f32.xlu1 %v304_v36 }
 0x229   : > { %v772_v47 = vpop.permute.xlu1 %771  ;;  %v876_v24 = vpop.permute.xlu0 %875 }
 0x22a   : > { %v795_v58 = vsub.f32 %v723_v51, %v772_v47  ;;  %v899_v59 = vadd.f32 %v876_v24, %v827_v52  ;;  %v526_v47 = vmul.f32 %v9152_v44, %v9267_v38  ;;  %v9434_v38 = vpop.f32.mrb[8].mxu0 }
 0x22d   : > { %v580_v49 = vpop.permute.xlu1 %579  ;;  %v668_v50 = vpop.permute.xlu0 %667 }
 0x22e   : > { %v9350_v31 = vadd.f32 %v668_v50, %v643_v25  ;;  %v9386_v46 = vsub.f32 %v523_v33, %v580_v49  ;;  %v486_v49 = vpop.f32.mrb[9].mxu0 }
 0x231   : > { %v878_v55 = vpop.permute.xlu1 %877  ;;  %v774_v57 = vpop.permute.xlu0 %773 }
 0x232   : > { %v900_v60 = vadd.f32 %v878_v55, %v828_v53  ;;  %v796_v45 = vsub.f32 %v724_v54, %v774_v57  ;;  %v9440_v54 = vpop.f32.mrb[10].mxu0 }
 0x233   : > { %v492_v55 = vpop.f32.mrb[11].mxu0 }
 0x234   : > { %v9322_v62 = vpack.i.bf16 %v900_v60, %v899_v59  ;;  %v9324_v3 = vpack.i.bf16 %v796_v45, %v795_v58  ;;  %v9442_v57 = vpack.i.bf16 %v492_v55, %v486_v49  ;;  %v9444_v58 = vpack.c.bf16 %v492_v55, %v486_v49 }
 0x235   : > { %v670_v27 = vpop.permute.xlu1 %669  ;;  %v582_v4 = vpop.permute.xlu0 %581 }
 0x236   : > { %8316 = vrot.lane.b32.xlu0 %v9322_v62, %s8917_s13  ;;  %v9352_v35 = vadd.f32 %v670_v27, %v644_v28  ;;  %v9396_v41 = vsub.f32 %v524_v21, %v582_v4  ;;  %11377 = vst [vmem:[#allocation12_spill] sm:$0xff] %v9442_v57 }
 0x239   : > { %v584_v23 = vpop.permute.xlu1 %583  ;;  %v880_v26 = vpop.permute.xlu0 %879 }
 0x23a   : > { %8326 = vrot.lane.b32.xlu0 %v9322_v62, %s11307_s10  ;;  %v901_v11 = vadd.f32 %v880_v26, %v829_v30  ;;  %v9398_v56 = vsub.f32 %v525_v40, %v584_v23 }
 0x23d   : > { %v882_v10 = vpop.permute.xlu1 %881  ;;  %v776_v0 = vpop.permute.xlu0 %775 }
 0x23e   : > { %v902_v12 = vadd.f32 %v882_v10, %v830_v8  ;;  %8331 = vrot.lane.b32.xlu0 %v9324_v3, %s8915_s19  ;;  %v797_v37 = vsub.f32 %v725_v13, %v776_v0 }
 0x240   : > { %v9340_v15 = vpack.i.bf16 %v902_v12, %v901_v11 }
 0x241   : > { %v778_v17 = vpop.permute.xlu1 %777  ;;  %v672_v29 = vpop.permute.xlu0 %671 }
 0x242   : > { %v798_v19 = vsub.f32 %v726_v14, %v778_v17  ;;  %8336 = vrot.lane.b32.xlu0 %v9340_v15, %s11307_s10  ;;  %8321 = vrot.lane.b32.xlu1 %v9340_v15, %s8917_s13  ;;  %v9372_v2 = vadd.f32 %v672_v29, %v645_v16 }
 0x244   : > { %v9354_v20 = vpack.i.bf16 %v798_v19, %v797_v37 }
 0x245   : > { %v674_v32 = vpop.permute.xlu1 %673 }
 0x246   : > { %924 = vrot.lane.b32.xlu0 %v9352_v35, %s8916_s28  ;;  %922 = vrot.lane.b32.xlu1 %v9350_v31, %s8916_s28  ;;  %v9374_v39 = vadd.f32 %v674_v32, %v646_v18 }
 0x249   : > { %v586_v36 = vpop.permute.xlu1 %585 }
 0x24a   : > { %8341 = vrot.lane.b32.xlu0 %v9324_v3, %s11305_s14  ;;  %1337 = vrot.lane.b32.xlu1 %v9350_v31, %s8920_s15  ;;  %v9406_v42 = vsub.f32 %v526_v47, %v586_v36 }
 0x24e   : > { %1339 = vrot.lane.b32.xlu0 %v9352_v35, %s8920_s15  ;;  %8346 = vrot.lane.b32.xlu1 %v9354_v20, %s8915_s19 }
 0x252   : > { %928 = vrot.lane.b32.xlu0 %v9374_v39, %s8916_s28  ;;  %926 = vrot.lane.b32.xlu1 %v9372_v2, %s8916_s28 }
 0x256   : > { %1341 = vrot.lane.b32.xlu0 %v9372_v2, %s8920_s15  ;;  %8351 = vrot.lane.b32.xlu1 %v9354_v20, %s11305_s14  ;;  %s11315_s14 = smov 104  }
 0x25a   : > { %1454 = vrot.lane.b32.xlu0 %v9386_v46, %s11309_s12  ;;  %1343 = vrot.lane.b32.xlu1 %v9374_v39, %s8920_s15 }
 0x25e   : > { %1458 = vrot.lane.b32.xlu0 %v9398_v56, %s11309_s12  ;;  %1456 = vrot.lane.b32.xlu1 %v9396_v41, %s11309_s12 }
 0x262   : > { %8356 = vrot.lane.b32.xlu0 %v9322_v62, %s11301_s9  ;;  %1460 = vrot.lane.b32.xlu1 %v9406_v42, %s11309_s12  ;;  %s11434_s12 = smov 120  }
 0x266   : > { %8366 = vrot.lane.b32.xlu0 %v9324_v3, %s11299_s11  ;;  %8361 = vrot.lane.b32.xlu1 %v9340_v15, %s11301_s9 }
 0x26a   : > { %1959 = vrot.lane.b32.xlu0 %v9352_v35, %s8924_s17  ;;  %1957 = vrot.lane.b32.xlu1 %v9350_v31, %s8924_s17 }
 0x26e   : > { %1961 = vrot.lane.b32.xlu0 %v9372_v2, %s8924_s17  ;;  %8371 = vrot.lane.b32.xlu1 %v9354_v20, %s11299_s11  ;;  %s11449_s11 = smov 48  }
 0x272   : > { %2074 = vrot.lane.b32.xlu0 %v9386_v46, %s11303_s18  ;;  %1963 = vrot.lane.b32.xlu1 %v9374_v39, %s8924_s17 }
 0x276   : > { %2078 = vrot.lane.b32.xlu0 %v9398_v56, %s11303_s18  ;;  %2076 = vrot.lane.b32.xlu1 %v9396_v41, %s11303_s18 }
 0x27a   : > { %2080 = vrot.lane.b32.xlu1 %v9406_v42, %s11303_s18 }
 0x27b   : > { %v303_v43 = vpop.xlane.xlu0 %302 }
 0x27c   : > { %v314_v44 = vmul.f32 0.015625, %v303_v43 }
 0x27e   : > { %v322_v61 = vadd.f32 1e-06, %v314_v44 }
 0x280   : > { %8547 = vrsqrt.f32 %v322_v61 }
 0x288   : > { %v306_v9 = vpop.xlane.xlu1 %305 }
 0x289   : > { %v315_v24 = vmul.f32 0.015625, %v306_v9 }
 0x28a   : > { %v8548_v50 = vpop.eup %8547 }
 0x28b   : > { %v323_v51 = vadd.f32 1e-06, %v315_v24  ;;  %v344_v52 = vmul.f32 %v8548_v50, %v9185_v63 }
 0x28d   : > { %8549 = vrsqrt.f32 %v323_v51  ;;  %v352_v53 = vmul.f32 %v344_v52, %v9303_v6 }
 0x28f   : > { %6541 = vmatmul.mubr.msk.f32.gmra.mrb[12].mxu0 %vm282_vm0, %v352_v53 }
 0x290   : > { %500 = vmatprep.mubr.f32.mxu0 %v8914_v34 }
 0x297   : > { %v8550_v59 = vpop.eup %8549 }
 0x298   : > { %v345_v60 = vmul.f32 %v8550_v59, %v9185_v63 }
 0x29a   : > { %v353_v45 = vmul.f32 %v345_v60, %v9309_v22 }
 0x29c   : > { %6542 = vmatmul.mubr.msk.f32.gmra.mrb[14].mxu0 %vm282_vm0, %v353_v45 }
 0x2a8   : > { %v8317_v6 = vpop.permute.xlu0 %8316 }
 0x2a9   : > { %v8319_v27 = vunpack.i.h.bf16 %v8317_v6  ;;  %v8318_v4 = vunpack.i.l.bf16 %v8317_v6 }
 0x2ab   : > { %v9455_v23 = vpack.c.bf16 %v8319_v27, %v8318_v4 }
 0x2ac   : > { %v8327_v26 = vpop.permute.xlu0 %8326 }
 0x2ad   : > { %v8329_v30 = vunpack.i.h.bf16 %v8327_v26  ;;  %v8328_v8 = vunpack.i.l.bf16 %v8327_v26  ;;  %7760 = vmatprep.subr.msk.bf16.mxu1 %vm9451_vm2, %v9455_v23 }
 0x2ae   : > { %7763 = vmatpush3.bf16.xpose.msk.msra.mxu1 %vm9451_vm2, %v9455_v23 }
 0x2af   : > { %v9463_v63 = vpack.c.bf16 %v8329_v30, %v8328_v8 }
 0x2b0   : > { %v8332_v22 = vpop.permute.xlu0 %8331 }
 0x2b1   : > { %7792 = vmatprep.subr.msk.bf16.mxu0 %vm9451_vm2, %v9463_v63  ;;  %v8334_v10 = vunpack.i.h.bf16 %v8332_v22  ;;  %v8333_v11 = vunpack.i.l.bf16 %v8332_v22 }
 0x2b2   : > { %7795 = vmatpush3.bf16.xpose.msk.msra.mxu0 %vm9451_vm2, %v9463_v63 }
 0x2b3   : > { %v9475_v32 = vpack.c.bf16 %v8334_v10, %v8333_v11 }
 0x2b4   : > { %v8322_v12 = vpop.permute.xlu1 %8321  ;;  %v8337_v13 = vpop.permute.xlu0 %8336 }
 0x2b5   : > { %v8324_v14 = vunpack.i.h.bf16 %v8322_v12  ;;  %v8323_v0 = vunpack.i.l.bf16 %v8322_v12  ;;  %v8339_v25 = vunpack.i.h.bf16 %v8337_v13  ;;  %v8338_v28 = vunpack.i.l.bf16 %v8337_v13 }
 0x2b7   : > { %v9471_v17 = vpack.c.bf16 %v8324_v14, %v8323_v0  ;;  %v9473_v37 = vpack.c.bf16 %v8339_v25, %v8338_v28 }
 0x2b8   : > { %v923_v19 = vpop.permute.xlu1 %922  ;;  %v925_v29 = vpop.permute.xlu0 %924 }
 0x2b9   : > { %11380 = vst [vmem:[#allocation13_spill] sm:$0xff] %v9473_v37  ;;  %7766 = vmatprep.subr.msk.bf16.mxu1 %vm9451_vm2, %v9471_v17  ;;  %7166 = vmatprep.mubr.msk.f32.mxu1 %vm942_vm1, %v923_v19 }
 0x2ba   : > { %7798 = vmatprep.subr.msk.bf16.mxu0 %vm9451_vm2, %v9473_v37  ;;  %7769 = vmatpush3.bf16.xpose.msk.msra.mxu1 %vm9451_vm2, %v9471_v17 }
 0x2bb   : > { %7801 = vmatpush3.bf16.xpose.msk.msra.mxu0 %vm9451_vm2, %v9473_v37  ;;  %7772 = vmatprep.subr.msk.bf16.mxu1 %vm9451_vm2, %v9475_v32 }
 0x2bc   : > { %v1338_v16 = vpop.permute.xlu1 %1337  ;;  %v8342_v18 = vpop.permute.xlu0 %8341 }
 0x2bd   : > { %v8344_v33 = vunpack.i.h.bf16 %v8342_v18  ;;  %v8343_v21 = vunpack.i.l.bf16 %v8342_v18  ;;  %7208 = vmatprep.mubr.msk.f32.mxu0 %vm942_vm1, %v1338_v16 }
 0x2bf   : > { %v9494_v40 = vpack.c.bf16 %v8344_v33, %v8343_v21 }
 0x2c0   : > { %v8347_v36 = vpop.permute.xlu1 %8346  ;;  %v1340_v47 = vpop.permute.xlu0 %1339 }
 0x2c1   : > { %11381 = vst [vmem:[#allocation14_spill] sm:$0xff] %v9494_v40  ;;  %v8349_v43 = vunpack.i.h.bf16 %v8347_v36  ;;  %v8348_v44 = vunpack.i.l.bf16 %v8347_v36  ;;  %7167 = vmatmul.mubr.msk.f32.vlgmr.msra.gmra.mrb[0].mxu1 %vm942_vm1, %v925_v29  ;;  %7804 = vmatprep.subr.msk.bf16.mxu0 %vm9451_vm2, %v9494_v40 }
 0x2c2   : > { %7209 = vmatmul.mubr.msk.f32.vlgmr.msra.gmra.mrb[16].mxu0 %vm942_vm1, %v1340_v47  ;;  %7775 = vmatpush3.bf16.xpose.msk.msra.mxu1 %vm9451_vm2, %v9475_v32 }
 0x2c3   : > { %v9504_v61 = vpack.c.bf16 %v8349_v43, %v8348_v44  ;;  %7807 = vmatpush3.bf16.xpose.msk.msra.mxu0 %vm9451_vm2, %v9494_v40 }
 0x2c4   : > { %v927_v9 = vpop.permute.xlu1 %926  ;;  %v929_v24 = vpop.permute.xlu0 %928 }
 0x2c5   : > { %7169 = vmatprep.mubr.msk.f32.mxu1 %vm942_vm1, %v927_v9  ;;  %7778 = vmatprep.subr.msk.bf16.mxu1 %vm9451_vm2, %v9504_v61 }
 0x2c6   : > { %7170 = vmatmul.mubr.msk.f32.gmra.mrb[2].mxu1 %vm942_vm1, %v929_v24 }
 0x2c7   : > { %7180 = vmatprep.mubr.msk.f32.mxu1 %vm942_vm1, %v9386_v46 }
 0x2c8   : > { %v8352_v49 = vpop.permute.xlu1 %8351  ;;  %v1342_v50 = vpop.permute.xlu0 %1341 }
 0x2c9   : > { %v8354_v51 = vunpack.i.h.bf16 %v8352_v49  ;;  %v8353_v52 = vunpack.i.l.bf16 %v8352_v49  ;;  %7211 = vmatprep.mubr.msk.f32.mxu0 %vm942_vm1, %v1342_v50 }
 0x2ca   : > { %7781 = vmatpush3.bf16.xpose.msk.msra.mxu1 %vm9451_vm2, %v9504_v61 }
 0x2cb   : > { %v9520_v53 = vpack.c.bf16 %v8354_v51, %v8353_v52  ;;  %7783 = vmatprep.subr.bf16.mxu1 %v9255_v7  ;;  %v907_v52 = vlaneseq }
 0x2cc   : > { %v1344_v55 = vpop.permute.xlu1 %1343  ;;  %v1455_v59 = vpop.permute.xlu0 %1454 }
 0x2cd   : > { %11382 = vst [vmem:[#allocation15_spill] sm:$0xff] %v9520_v53  ;;  %7212 = vmatmul.mubr.msk.f32.gmra.mrb[18].mxu0 %vm942_vm1, %v1344_v55  ;;  %7810 = vmatprep.subr.msk.bf16.mxu0 %vm9451_vm2, %v9520_v53  ;;  %v908_v55 = vshrl.u32 %v907_v52, 7 }
 0x2ce   : > { %7813 = vmatpush3.bf16.xpose.msk.msra.mxu0 %vm9451_vm2, %v9520_v53  ;;  %7222 = vmatprep.mubr.msk.f32.mxu0 %vm942_vm1, %v1455_v59 }
 0x2cf   : > { %v909_v59 = vadd.s32 8, %v908_v55 }
 0x2d0   : > { %v1457_v60 = vpop.permute.xlu1 %1456  ;;  %v1459_v45 = vpop.permute.xlu0 %1458 }
 0x2d1   : > { %7181 = vmatmul.mubr.msk.f32.vlgmr.msra.gmra.mrb[0].mxu1 %vm942_vm1, %v9396_v41 }
 0x2d2   : > { %7183 = vmatprep.mubr.msk.f32.mxu1 %vm942_vm1, %v9398_v56  ;;  %7785 = vmatpush3.bf16.msra.mxu1 %v9255_v7 }
 0x2d3   : > { %7787 = vmatprep.subr.bf16.mxu1 %v9275_v1 }
 0x2d4   : > { %v1461_v6 = vpop.permute.xlu1 %1460  ;;  %v8357_v27 = vpop.permute.xlu0 %8356 }
 0x2d5   : > { %v8359_v4 = vunpack.i.h.bf16 %v8357_v27  ;;  %v8358_v26 = vunpack.i.l.bf16 %v8357_v27  ;;  %7184 = vmatmul.mubr.msk.f32.gmra.mrb[2].mxu1 %vm942_vm1, %v9406_v42  ;;  %7223 = vmatmul.mubr.msk.f32.vlgmr.msra.gmra.mrb[16].mxu0 %vm942_vm1, %v1457_v60  ;;  %v913_v60 = vand.u32 127, %v907_v52 }
 0x2d6   : > { %7789 = vmatpush3.bf16.msra.mxu1 %v9275_v1  ;;  %7225 = vmatprep.mubr.msk.f32.mxu0 %vm942_vm1, %v1459_v45 }
 0x2d7   : > { %v9542_v30 = vpack.c.bf16 %v8359_v4, %v8358_v26  ;;  %vm9606_vm3 = vcmp.le.s32.totalorder %v913_v60, %v909_v59  ;;  %vm9610_vm4 = vcmp.le.s32.totalorder %v913_v60, %v908_v55  ;;  %v911_v26 = vadd.s32 24, %v908_v55 }
 0x2d8   : > { %v8362_v8 = vpop.permute.xlu1 %8361  ;;  %v8367_v11 = vpop.permute.xlu0 %8366 }
 0x2d9   : > { %11383 = vst [vmem:[#allocation16_spill] sm:$0xff] %v9542_v30  ;;  %v8364_v22 = vunpack.i.h.bf16 %v8362_v8  ;;  %v8363_v10 = vunpack.i.l.bf16 %v8362_v8  ;;  %7226 = vmatmul.mubr.msk.f32.gmra.mrb[18].mxu0 %vm942_vm1, %v1461_v6  ;;  %7832 = vmatprep.subr.msk.bf16.mxu0 %vm9451_vm2, %v9542_v30  ;;  %v8369_v14 = vunpack.i.h.bf16 %v8367_v11  ;;  %v8368_v0 = vunpack.i.l.bf16 %v8367_v11 }
 0x2da   : > { %7835 = vmatpush3.bf16.xpose.msk.msra.mxu0 %vm9451_vm2, %v9542_v30  ;;  %vm9622_vm6 = vcmp.le.s32.totalorder %v913_v60, %v911_v26 }
 0x2db   : > { %v9551_v12 = vpack.c.bf16 %v8364_v22, %v8363_v10  ;;  %v9557_v25 = vpack.c.bf16 %v8369_v14, %v8368_v0 }
 0x2dc   : > { %v1958_v13 = vpop.permute.xlu1 %1957  ;;  %v1960_v28 = vpop.permute.xlu0 %1959 }
 0x2dd   : > { %11384 = vst [vmem:[#allocation17_spill] sm:$0xff] %v9551_v12  ;;  %7838 = vmatprep.subr.msk.bf16.mxu0 %vm9451_vm2, %v9551_v12  ;;  %7270 = vmatprep.mubr.msk.f32.mxu0 %vm942_vm1, %v1958_v13  ;;  %11385 = vst [vmem:[#allocation18_spill] sm:$0xff] %v9557_v25 }
 0x2e0   : > { %v8372_v19 = vpop.permute.xlu1 %8371  ;;  %v1962_v18 = vpop.permute.xlu0 %1961 }
 0x2e1   : > { %v8374_v29 = vunpack.i.h.bf16 %v8372_v19  ;;  %v8373_v16 = vunpack.i.l.bf16 %v8372_v19 }
 0x2e2   : > { %7841 = vmatpush3.bf16.xpose.msk.msra.mxu0 %vm9451_vm2, %v9551_v12 }
 0x2e3   : > { %7844 = vmatprep.subr.msk.bf16.mxu0 %vm9451_vm2, %v9557_v25  ;;  %v9565_v33 = vpack.c.bf16 %v8374_v29, %v8373_v16 }
 0x2e4   : > { %v1964_v21 = vpop.permute.xlu1 %1963  ;;  %v2075_v36 = vpop.permute.xlu0 %2074 }
 0x2e5   : > { %11386 = vst [vmem:[#allocation19_spill] sm:$0xff] %v9565_v33 }
 0x2e8   : > { %v2077_v47 = vpop.permute.xlu1 %2076  ;;  %v2079_v43 = vpop.permute.xlu0 %2078 }
 0x2e9   : > { %7271 = vmatmul.mubr.msk.f32.vlgmr.msra.gmra.mrb[20].mxu0 %vm942_vm1, %v1960_v28  ;;  %v910_v28 = vadd.s32 16, %v908_v55 }
 0x2ea   : > { %7273 = vmatprep.mubr.msk.f32.mxu0 %vm942_vm1, %v1962_v18  ;;  %7847 = vmatpush3.bf16.xpose.msk.msra.mxu0 %vm9451_vm2, %v9557_v25 }
 0x2eb   : > { %7850 = vmatprep.subr.msk.bf16.mxu0 %vm9451_vm2, %v9565_v33  ;;  %vm9632_vm7 = vcmp.le.s32.totalorder %v913_v60, %v910_v28 }
 0x2ec   : > { %v2081_v44 = vpop.permute.xlu1 %2080 }
 0x2ed   : > { %7274 = vmatmul.mubr.msk.f32.gmra.mrb[22].mxu0 %vm942_vm1, %v1964_v21 }
 0x2ee   : > { %7284 = vmatprep.mubr.msk.f32.mxu0 %vm942_vm1, %v2075_v36 }
 0x2f2   : > { %7853 = vmatpush3.bf16.xpose.msk.msra.mxu0 %vm9451_vm2, %v9565_v33 }
 0x2f3   : > { %7904 = vmatprep.subr.msk.bf16.mxu0 %vm9451_vm2, %v9455_v23 }
 0x2f9   : > { %7285 = vmatmul.mubr.msk.f32.vlgmr.msra.gmra.mrb[20].mxu0 %vm942_vm1, %v2077_v47 }
 0x2fa   : > { %7287 = vmatprep.mubr.msk.f32.mxu0 %vm942_vm1, %v2079_v43  ;;  %7907 = vmatpush3.bf16.xpose.msk.msra.mxu0 %vm9451_vm2, %v9455_v23 }
 0x2fb   : > { %7910 = vmatprep.subr.msk.bf16.mxu0 %vm9451_vm2, %v9471_v17 }
 0x2fd   : > { %7288 = vmatmul.mubr.msk.f32.gmra.mrb[22].mxu0 %vm942_vm1, %v2081_v44 }
 0x302   : > { %7913 = vmatpush3.bf16.xpose.msk.msra.mxu0 %vm9451_vm2, %v9471_v17 }
 0x303   : > { %7916 = vmatprep.subr.msk.bf16.mxu0 %vm9451_vm2, %v9475_v32 }
 0x362   : > { %v9598_v9 = vpop.f32.mrb[12].mxu0 }
 0x363   : > { %v498_v24 = vpop.f32.mrb[13].mxu0 }
 0x36f   : > { %v9600_v49 = vpop.f32.mrb[14].mxu0 }
 0x370   : > { %v504_v23 = vpop.f32.mrb[15].mxu0 }
 0x371   : > { %v9602_v50 = vpack.i.bf16 %v504_v23, %v498_v24  ;;  %v9604_v51 = vpack.c.bf16 %v504_v23, %v498_v24 }
 0x373   : > { %11387 = vst [vmem:[#allocation20_spill] sm:$0xff] %v9602_v50 }
 0x3a4   : > { %v7182_v6 = vpop.f32.mrb[0].mxu1 }
 0x3a5   : > { %v1162_v27 = vsel %vm9606_vm3, %v7182_v6, -1e+30  ;;  %v1142_v4 = vpop.f32.mrb[1].mxu1 }
 0x3a6   : > { %v1161_v8 = vsel %vm9610_vm4, %v1142_v4, -1e+30  ;;  %v1169_v22 = vsel %vm1165_vm5, %v1162_v27, -inf }
 0x3a7   : > { %1170 = vmax.xlane.f32.xlu1 %v1169_v22  ;;  %v1166_v10 = vsel %vm1165_vm5, %v1161_v8, -inf }
 0x3a8   : > { %v7224_v11 = vpop.f32.mrb[16].mxu0  ;;  %1167 = vmax.xlane.f32.xlu0 %v1166_v10  ;;  %v7185_v13 = vpop.f32.mrb[2].mxu1 }
 0x3a9   : > { %v1572_v14 = vsel %vm9606_vm3, %v7224_v11, -1e+30  ;;  %v1152_v19 = vpop.f32.mrb[3].mxu1  ;;  %v1552_v29 = vpop.f32.mrb[17].mxu0  ;;  %v1164_v36 = vsel %vm9622_vm6, %v7185_v13, -1e+30 }
 0x3aa   : > { %v1571_v16 = vsel %vm9610_vm4, %v1552_v29, -1e+30  ;;  %v1578_v18 = vsel %vm1165_vm5, %v1572_v14, -inf  ;;  %v1175_v52 = vsel %vm1165_vm5, %v1164_v36, -inf  ;;  %v1163_v55 = vsel %vm9632_vm7, %v1152_v19, -1e+30 }
 0x3ab   : > { %1579 = vmax.xlane.f32.xlu1 %v1578_v18  ;;  %v1575_v21 = vsel %vm1165_vm5, %v1571_v16, -inf  ;;  %v1172_v59 = vsel %vm1165_vm5, %v1163_v55, -inf }
 0x3ac   : > { %v7227_v47 = vpop.f32.mrb[18].mxu0  ;;  %1576 = vmax.xlane.f32.xlu0 %v1575_v21 }
 0x3ad   : > { %v1574_v44 = vsel %vm9622_vm6, %v7227_v47, -1e+30  ;;  %v1562_v24 = vpop.f32.mrb[19].mxu0 }
 0x3ae   : > { %v1584_v23 = vsel %vm1165_vm5, %v1574_v44, -inf  ;;  %v1573_v60 = vsel %vm9632_vm7, %v1562_v24, -1e+30 }
 0x3af   : > { %1585 = vmax.xlane.f32.xlu1 %v1584_v23  ;;  %v1581_v6 = vsel %vm1165_vm5, %v1573_v60, -inf }
 0x3b0   : > { %1176 = vmax.xlane.f32.xlu0 %v1175_v52 }
 0x3b4   : > { %1173 = vmax.xlane.f32.xlu0 %v1172_v59 }
 0x3b8   : > { %1582 = vmax.xlane.f32.xlu0 %v1581_v6 }
 0x3c0   : > { %8381 = vrot.lane.b32.xlu1 %v9273_v48, %s11303_s18 }
 0x3cc   : > { %v7286_v4 = vpop.f32.mrb[20].mxu0 }
 0x3cd   : > { %v2172_v26 = vpop.f32.mrb[21].mxu0  ;;  %v9652_v11 = vsel %vm9606_vm3, %v7286_v4, -1e+30 }
 0x3ce   : > { %8376 = vrot.lane.b32.xlu0 %v9253_v5, %s11303_s18  ;;  %v2198_v13 = vsel %vm1165_vm5, %v9652_v11, -inf  ;;  %v9664_v29 = vsel %vm9610_vm4, %v2172_v26, -1e+30  ;;  %s11453_s18 = smov 104  }
 0x3cf   : > { %v2195_v18 = vsel %vm1165_vm5, %v9664_v29, -inf }
 0x3d0   : > { %v7289_v22 = vpop.f32.mrb[22].mxu0 }
 0x3d1   : > { %v2182_v10 = vpop.f32.mrb[23].mxu0  ;;  %v9658_v28 = vsel %vm9622_vm6, %v7289_v22, -1e+30 }
 0x3d2   : > { %v2204_v19 = vsel %vm1165_vm5, %v9658_v28, -inf  ;;  %v9670_v21 = vsel %vm9632_vm7, %v2182_v10, -1e+30 }
 0x3d3   : > { %v2201_v47 = vsel %vm1165_vm5, %v9670_v21, -inf }
 0x3e4   : > { %2199 = vmax.xlane.f32.xlu1 %v2198_v13 }
 0x3e8   : > { %2205 = vmax.xlane.f32.xlu1 %v2204_v19 }
 0x3ed   : > { %2196 = vmax.xlane.f32.xlu0 %v2195_v18 }
 0x3f1   : > { %2202 = vmax.xlane.f32.xlu0 %v2201_v47 }
 0x434   : > { %v9674_v24 = vpop.xlane.xlu1 %1170 }
 0x435   : > { %v11282_v23 = vmax.f32 %v9674_v24, -1e+30  ;;  %v9677_v52 = vpop.xlane.xlu0 %1167 }
 0x436   : > { %v11283_v59 = vmax.f32 %v9677_v52, -1e+30 }
 0x437   : > { %v1195_v6 = vsub.f32 %v1162_v27, %v11282_v23 }
 0x438   : > { %v1194_v4 = vsub.f32 %v1161_v8, %v11283_v59  ;;  %v9684_v26 = vpop.xlane.xlu1 %1579 }
 0x439   : > { %v1200_v22 = vmul.f32 1.442695, %v1195_v6  ;;  %v11289_v10 = vmax.f32 %v9684_v26, -1e+30  ;;  %v9687_v13 = vpop.xlane.xlu0 %1576 }
 0x43a   : > { %v1198_v19 = vmul.f32 1.442695, %v1194_v4  ;;  %v11288_v18 = vmax.f32 %v9687_v13, -1e+30 }
 0x43b   : > { %v1604_v47 = vsub.f32 %v1572_v14, %v11289_v10  ;;  %8551 = vpow2.f32 %v1200_v22 }
 0x43c   : > { %v1603_v27 = vsub.f32 %v1571_v16, %v11288_v18  ;;  %v9694_v23 = vpop.xlane.xlu1 %1585  ;;  %8553 = vpow2.f32 %v1198_v19 }
 0x43d   : > { %v1609_v8 = vmul.f32 1.442695, %v1604_v47  ;;  %v11290_v59 = vmax.f32 %v9694_v23, -1e+30  ;;  %v9697_v6 = vpop.xlane.xlu0 %1176 }
 0x43e   : > { %v1607_v33 = vmul.f32 1.442695, %v1603_v27  ;;  %v11292_v4 = vmax.f32 %v9697_v6, -1e+30 }
 0x43f   : > { %v1606_v25 = vsub.f32 %v1574_v44, %v11290_v59  ;;  %8555 = vpow2.f32 %v1609_v8 }
 0x440   : > { %v1197_v14 = vsub.f32 %v1164_v36, %v11292_v4  ;;  %8557 = vpow2.f32 %v1607_v33 }
 0x441   : > { %v1613_v22 = vmul.f32 1.442695, %v1606_v25  ;;  %v9704_v16 = vpop.xlane.xlu0 %1173  ;;  %v8382_v25 = vpop.permute.xlu1 %8381 }
 0x442   : > { %v11291_v47 = vmax.f32 %v9704_v16, -1e+30  ;;  %v1204_v18 = vmul.f32 1.442695, %v1197_v14  ;;  %v8384_v4 = vunpack.i.h.bf16 %v8382_v25 }
 0x443   : > { %8559 = vpow2.f32 %v1613_v22 }
 0x444   : > { %v1196_v19 = vsub.f32 %v1163_v55, %v11291_v47  ;;  %8561 = vpow2.f32 %v1204_v18 }
 0x445   : > { %v9709_v27 = vpop.xlane.xlu0 %1582  ;;  %v8552_v10 = vpop.eup %8551 }
 0x446   : > { %v11298_v44 = vmax.f32 %v9709_v27, -1e+30  ;;  %v1202_v8 = vmul.f32 1.442695, %v1196_v19  ;;  %v1213_v59 = vsel %vm1165_vm5, %v8552_v10, 0.0  ;;  %v8554_v36 = vpop.eup %8553  ;;  %v8383_v19 = vunpack.i.l.bf16 %v8382_v25 }
 0x447   : > { %1214 = vadd.xlane.f32.xlu1 %v1213_v59  ;;  %7194 = vmatprep.mubr.msk.f32.mxu1 %vm1165_vm5, %v8554_v36 }
 0x448   : > { %v1605_v33 = vsub.f32 %v1573_v60, %v11298_v44  ;;  %8563 = vpow2.f32 %v1202_v8  ;;  %7195 = vmatmul.mubr.msk.f32.vlgmr.msra.gmra.mrb[4].mxu1 %vm1165_vm5, %v8552_v10  ;;  %v9721_v44 = vpack.c.bf16 %v8384_v4, %v8383_v19  ;;  %v1210_v10 = vsel %vm1165_vm5, %v8554_v36, 0.0 }
 0x449   : > { %v8377_v14 = vpop.permute.xlu0 %8376  ;;  %v8556_v22 = vpop.eup %8555 }
 0x44a   : > { %v1611_v55 = vmul.f32 1.442695, %v1605_v33  ;;  %v8379_v47 = vunpack.i.h.bf16 %v8377_v14  ;;  %v8378_v12 = vunpack.i.l.bf16 %v8377_v14  ;;  %v1622_v30 = vsel %vm1165_vm5, %v8556_v22, 0.0  ;;  %v8558_v18 = vpop.eup %8557  ;;  %11397 = vst [vmem:[#allocation22_spill] sm:$0xff] %v9721_v44 }
 0x44b   : > { %1623 = vadd.xlane.f32.xlu0 %v1622_v30  ;;  %v1619_v60 = vsel %vm1165_vm5, %v8558_v18, 0.0 }
 0x44c   : > { %8565 = vpow2.f32 %v1611_v55  ;;  %v9718_v57 = vpack.c.bf16 %v8379_v47, %v8378_v12  ;;  %1620 = vadd.xlane.f32.xlu1 %v1619_v60 }
 0x44d   : > { %v8560_v59 = vpop.eup %8559 }
 0x44e   : > { %11396 = vst [vmem:[#allocation21_spill] sm:$0xff] %v9718_v57  ;;  %7815 = vmatprep.subr.bf16.mxu1 %v9718_v57  ;;  %v1628_v8 = vsel %vm1165_vm5, %v8560_v59, 0.0  ;;  %v8562_v30 = vpop.eup %8561 }
 0x44f   : > { %1211 = vadd.xlane.f32.xlu0 %v1210_v10  ;;  %7817 = vmatpush3.bf16.msra.mxu1 %v9718_v57  ;;  %v1219_v4 = vsel %vm1165_vm5, %v8562_v30, 0.0 }
 0x450   : > { %7819 = vmatprep.subr.bf16.mxu1 %v9721_v44  ;;  %1629 = vadd.xlane.f32.xlu1 %v1628_v8 }
 0x452   : > { %v8564_v12 = vpop.eup %8563 }
 0x453   : > { %7821 = vmatpush3.bf16.msra.mxu1 %v9721_v44  ;;  %7197 = vmatprep.mubr.msk.f32.mxu1 %vm1165_vm5, %v8564_v12  ;;  %v1216_v25 = vsel %vm1165_vm5, %v8564_v12, 0.0 }
 0x454   : > { %1220 = vadd.xlane.f32.xlu1 %v1219_v4  ;;  %7198 = vmatmul.mubr.msk.f32.gmra.mrb[6].mxu1 %vm1165_vm5, %v8562_v30 }
 0x455   : > { %7236 = vmatprep.mubr.msk.f32.mxu1 %vm1165_vm5, %v8558_v18 }
 0x456   : > { %v8566_v47 = vpop.eup %8565 }
 0x457   : > { %v1625_v36 = vsel %vm1165_vm5, %v8566_v47, 0.0 }
 0x458   : > { %1626 = vadd.xlane.f32.xlu0 %v1625_v36  ;;  %7237 = vmatmul.mubr.msk.f32.vlgmr.msra.gmra.mrb[8].mxu1 %vm1165_vm5, %v8556_v22 }
 0x459   : > { %7239 = vmatprep.mubr.msk.f32.mxu1 %vm1165_vm5, %v8566_v47 }
 0x45c   : > { %1217 = vadd.xlane.f32.xlu0 %v1216_v25  ;;  %7240 = vmatmul.mubr.msk.f32.gmra.mrb[10].mxu1 %vm1165_vm5, %v8560_v59 }
 0x465   : > { %8391 = vrot.lane.b32.xlu1 %v9273_v48, %s8916_s28 }
 0x471   : > { %v9740_v33 = vpop.xlane.xlu1 %2199 }
 0x472   : > { %8386 = vrot.lane.b32.xlu0 %v9253_v5, %s8916_s28  ;;  %v11320_v55 = vmax.f32 %v9740_v33, -1e+30 }
 0x474   : > { %v2224_v18 = vsub.f32 %v9652_v11, %v11320_v55 }
 0x475   : > { %v9744_v14 = vpop.xlane.xlu1 %2205 }
 0x476   : > { %v11318_v22 = vmax.f32 %v9744_v14, -1e+30  ;;  %v2229_v30 = vmul.f32 1.442695, %v2224_v18 }
 0x478   : > { %v2226_v59 = vsub.f32 %v9658_v28, %v11318_v22 }
 0x47a   : > { %v9748_v19 = vpop.xlane.xlu0 %2196  ;;  %v2233_v47 = vmul.f32 1.442695, %v2226_v59 }
 0x47b   : > { %v11319_v60 = vmax.f32 %v9748_v19, -1e+30 }
 0x47d   : > { %v2223_v10 = vsub.f32 %v9664_v29, %v11319_v60  ;;  %v11406_v60 = vmax.f32 %v9684_v26, -1e+30 }
 0x47e   : > { %v9760_v8 = vpop.xlane.xlu0 %2202 }
 0x47f   : > { %v2227_v12 = vmul.f32 1.442695, %v2223_v10  ;;  %v11317_v4 = vmax.f32 %v9760_v8, -1e+30 }
 0x481   : > { %v2225_v11 = vsub.f32 %v9670_v21, %v11317_v4  ;;  %8567 = vpow2.f32 %v2227_v12  ;;  %v1760_v12 = vld [vmem:[%s11275_s3 + $0x10] sm:$0xff]  ;;  %v11405_v4 = vmax.f32 %v9704_v16, -1e+30  ;;  %v11409_v16 = vmax.f32 %v9709_v27, -1e+30 }
 0x482   : > { %8569 = vpow2.f32 %v2229_v30 }
 0x483   : > { %8571 = vpow2.f32 %v2233_v47  ;;  %v2231_v36 = vmul.f32 1.442695, %v2225_v11  ;;  %v1761_v47 = vld [vmem:[%s11275_s3 + $0x18] sm:$0xff]  ;;  %v9866_v11 = vld [vmem:[%s11276_s4 + $0x30] sm:$0xff]  ;;  %v1184_v22 = vsub.f32 -1e+30, %v11405_v4 }
 0x484   : > { %v1593_v26 = vsub.f32 -1e+30, %v11409_v16 }
 0x485   : > { %8573 = vpow2.f32 %v2231_v36  ;;  %v9871_v36 = vld [vmem:[%s11277_s5 + $0x30] sm:$0xff] }
 0x486   : > { %11401 = vst [vmem:[#allocation26_spill] sm:$0xff] %v9871_v36  ;;  %v1599_v37 = vmul.f32 1.442695, %v1593_v26 }
 0x48b   : > { %v9766_v28 = vpop.eup %8567 }
 0x48c   : > { %v9768_v25 = vpop.eup %8569  ;;  %v2239_v29 = vsel %vm1165_vm5, %v9766_v28, 0.0 }
 0x48d   : > { %v9772_v18 = vpop.eup %8571  ;;  %2240 = vadd.xlane.f32.xlu1 %v2239_v29  ;;  %v2242_v59 = vsel %vm1165_vm5, %v9768_v25, 0.0 }
 0x48e   : > { %v2248_v21 = vsel %vm1165_vm5, %v9772_v18, 0.0 }
 0x48f   : > { %v9778_v10 = vpop.eup %8573 }
 0x490   : > { %v2245_v30 = vsel %vm1165_vm5, %v9778_v10, 0.0 }
 0x491   : > { %2243 = vadd.xlane.f32.xlu0 %v2242_v59  ;;  %2249 = vadd.xlane.f32.xlu1 %v2248_v21  ;;  %v657_v59 = vmul.f32 %v9871_v36, %v9598_v9  ;;  %v11402_v21 = vmax.f32 %v9674_v24, -1e+30  ;;  %v1592_v24 = vsub.f32 -1e+30, %v11406_v60 }
 0x495   : > { %2246 = vadd.xlane.f32.xlu0 %v2245_v30  ;;  %v1183_v30 = vsub.f32 -1e+30, %v11402_v21 }
 0x4a2   : > { %8401 = vrot.lane.b32.xlu1 %v9340_v15, %s11311_s20  ;;  %v7822_v15 = vpack.c.bf16 %v1761_v47, %v1760_v12  ;;  %v11403_v12 = vmax.f32 %v9677_v52, -1e+30  ;;  %v11407_v52 = vmax.f32 %v9687_v13, -1e+30 }
 0x4a4   : > { %7823 = vmatprep.subr.bf16.mxu1 %v7822_v15  ;;  %v1182_v47 = vsub.f32 -1e+30, %v11403_v12  ;;  %v1591_v12 = vsub.f32 -1e+30, %v11407_v52 }
 0x4a5   : > { %7825 = vmatpush3.bf16.msra.mxu1 %v7822_v15  ;;  %v1188_v15 = vmul.f32 1.442695, %v1183_v30  ;;  %v1190_v30 = vmul.f32 1.442695, %v1184_v22 }
 0x4a6   : > { %8406 = vrot.lane.b32.xlu1 %v9324_v3, %s11313_s26  ;;  %v1336_v3 = vld [vmem:[%s11275_s3 + $0x8] sm:$0xff] }
 0x4a7   : > { %8575 = vpow2.f32 %v1188_v15 }
 0x4aa   : > { %2479 = vrot.lane.b32.xlu1 %v9350_v31, %s8928_s29 }
 0x4ab   : > { %8396 = vrot.lane.b32.xlu0 %v9322_v62, %s11311_s20  ;;  %v1335_v62 = vld [vmem:[%s11275_s3] sm:$0xff] }
 0x4ac   : > { %v9806_v31 = vpack.c.bf16 %v1336_v3, %v1335_v62  ;;  %v1186_v62 = vmul.f32 1.442695, %v1182_v47 }
 0x4ae   : > { %8411 = vrot.lane.b32.xlu1 %v9354_v20, %s11313_s26  ;;  %7827 = vmatprep.subr.bf16.mxu1 %v9806_v31  ;;  %v9829_v20 = vld [vmem:[%s11277_s5 + $0x28] sm:$0xff]  ;;  %8577 = vpow2.f32 %v1186_v62  ;;  %v11408_v62 = vmax.f32 %v9694_v23, -1e+30  ;;  %s11439_s26 = smov 56  }
 0x4af   : > { %2481 = vrot.lane.b32.xlu0 %v9352_v35, %s8928_s29  ;;  %v9824_v35 = vld [vmem:[%s11276_s4 + $0x28] sm:$0xff]  ;;  %11398 = vst [vmem:[#allocation23_spill] sm:$0xff] %v9829_v20 }
 0x4b0   : > { %v1594_v50 = vsub.f32 -1e+30, %v11408_v62 }
 0x4b1   : > { %v8576_v15 = vpop.eup %8575 }
 0x4b2   : > { %2485 = vrot.lane.b32.xlu1 %v9374_v39, %s8928_s29  ;;  %v9841_v39 = vld [vmem:[%s11277_s5 + $0x20] sm:$0xff]  ;;  %v1207_v60 = vmul.f32 0.0, %v8576_v15 }
 0x4b3   : > { %2483 = vrot.lane.b32.xlu0 %v9372_v2, %s8928_s29  ;;  %v9836_v2 = vld [vmem:[%s11276_s4 + $0x20] sm:$0xff]  ;;  %11399 = vst [vmem:[#allocation24_spill] sm:$0xff] %v9841_v39 }
 0x4b6   : > { %2598 = vrot.lane.b32.xlu1 %v9396_v41, %s11315_s14  ;;  %v655_v41 = vmul.f32 %v9841_v39, %v9434_v38 }
 0x4b7   : > { %2596 = vrot.lane.b32.xlu0 %v9386_v46, %s11315_s14  ;;  %v656_v46 = vmul.f32 %v9829_v20, %v9440_v54 }
 0x4b8   : > { %v8578_v53 = vpop.eup %8577 }
 0x4b9   : > { %v1206_v13 = vmul.f32 0.0, %v8578_v53 }
 0x4ba   : > { %2602 = vrot.lane.b32.xlu1 %v9406_v42, %s11315_s14  ;;  %v9859_v42 = vld [vmem:[%s11277_s5 + $0x38] sm:$0xff] }
 0x4bb   : > { %2600 = vrot.lane.b32.xlu0 %v9398_v56, %s11315_s14  ;;  %v9854_v56 = vld [vmem:[%s11276_s4 + $0x38] sm:$0xff]  ;;  %11400 = vst [vmem:[#allocation25_spill] sm:$0xff] %v9859_v42  ;;  %v658_v29 = vmul.f32 %v9859_v42, %v9600_v49  ;;  %s11440_s14 = smov 112  }
 0x4be   : > { %629 = vrot.lane.b32.xlu1 %v9824_v35, %s8917_s13 }
 0x4bf   : > { %627 = vrot.lane.b32.xlu0 %v9836_v2, %s8917_s13 }
 0x4c2   : > { %677 = vrot.lane.b32.xlu1 %v656_v46, %s8917_s13 }
 0x4c3   : > { %675 = vrot.lane.b32.xlu0 %v655_v41, %s8917_s13 }
 0x4c6   : > { %633 = vrot.lane.b32.xlu1 %v9854_v56, %s8917_s13 }
 0x4c7   : > { %631 = vrot.lane.b32.xlu0 %v9866_v11, %s8917_s13 }
 0x4ca   : > { %681 = vrot.lane.b32.xlu1 %v658_v29, %s8917_s13  ;;  %v11404_v29 = vmax.f32 %v9697_v6, -1e+30  ;;  %v1597_v6 = vmul.f32 1.442695, %v1592_v24 }
 0x4cb   : > { %679 = vrot.lane.b32.xlu0 %v657_v59, %s8917_s13 }
 0x4cc   : > { %v1185_v59 = vsub.f32 -1e+30, %v11404_v29  ;;  %v1595_v29 = vmul.f32 1.442695, %v1591_v12 }
 0x4ce   : > { %549 = vrot.lane.b32.xlu1 %v9829_v20, %s8917_s13  ;;  %v1192_v21 = vmul.f32 1.442695, %v1185_v59  ;;  %v1601_v59 = vmul.f32 1.442695, %v1594_v50 }
 0x4cf   : > { %547 = vrot.lane.b32.xlu0 %v9841_v39, %s8917_s13 }
 0x4d0   : > { %8579 = vpow2.f32 %v1192_v21 }
 0x4d1   : > { %8581 = vpow2.f32 %v1190_v30 }
 0x4d2   : > { %553 = vrot.lane.b32.xlu1 %v9859_v42, %s8917_s13  ;;  %8583 = vpow2.f32 %v1597_v6 }
 0x4d3   : > { %551 = vrot.lane.b32.xlu0 %v9871_v36, %s8917_s13  ;;  %8585 = vpow2.f32 %v1595_v29 }
 0x4d4   : > { %v1215_v3 = vpop.xlane.xlu1 %1214  ;;  %8587 = vpow2.f32 %v1601_v59 }
 0x4d5   : > { %v1223_v52 = vadd.f32 %v1215_v3, %v1207_v60 }
 0x4d7   : > { %8589 = vrcp.f32 %v1223_v52 }
 0x4d8   : > { %v1624_v46 = vpop.xlane.xlu0 %1623 }
 0x4d9   : > { %v1621_v41 = vpop.xlane.xlu1 %1620 }
 0x4da   : > { %v8580_v21 = vpop.eup %8579 }
 0x4db   : > { %v8582_v27 = vpop.eup %8581  ;;  %v1209_v12 = vmul.f32 0.0, %v8580_v21 }
 0x4dc   : > { %v1212_v47 = vpop.xlane.xlu0 %1211  ;;  %v8584_v53 = vpop.eup %8583  ;;  %v1208_v3 = vmul.f32 0.0, %v8582_v27 }
 0x4dd   : > { %v1630_v55 = vpop.xlane.xlu1 %1629  ;;  %v1222_v40 = vadd.f32 %v1212_v47, %v1206_v13  ;;  %v8586_v15 = vpop.eup %8585 }
 0x4de   : > { %v8588_v6 = vpop.eup %8587  ;;  %v1615_v57 = vmul.f32 0.0, %v8586_v15 }
 0x4df   : > { %8591 = vrcp.f32 %v1222_v40 }
 0x4e0   : > { %8593 = vpow2.f32 %v1599_v37  ;;  %v1616_v37 = vmul.f32 0.0, %v8584_v53  ;;  %v1631_v36 = vadd.f32 %v1621_v41, %v1615_v57 }
 0x4e1   : > { %v1221_v22 = vpop.xlane.xlu1 %1220  ;;  %v8590_v40 = vpop.eup %8589 }
 0x4e2   : > { %v1225_v47 = vadd.f32 %v1221_v22, %v1209_v12  ;;  %v1632_v27 = vadd.f32 %v1624_v46, %v1616_v37 }
 0x4e4   : > { %8595 = vrcp.f32 %v1225_v47 }
 0x4e5   : > { %v1627_v4 = vpop.xlane.xlu0 %1626  ;;  %v9905_v24 = vpop.permute.xlu1 %8391 }
 0x4e9   : > { %v1218_v23 = vpop.xlane.xlu0 %1217  ;;  %v8592_v21 = vpop.eup %8591 }
 0x4ea   : > { %v1224_v29 = vadd.f32 %v1218_v23, %v1208_v3  ;;  %v8594_v7 = vpop.eup %8593  ;;  %v1618_v23 = vmul.f32 0.0, %v8588_v6 }
 0x4ec   : > { %8597 = vrcp.f32 %v1224_v29  ;;  %v1634_v53 = vadd.f32 %v1630_v55, %v1618_v23 }
 0x4ed   : > { %v9907_v30 = vpop.permute.xlu0 %8386  ;;  %8599 = vrcp.f32 %v1632_v27 }
 0x4ee   : > { %8601 = vrcp.f32 %v1631_v36  ;;  %v8596_v29 = vpop.eup %8595 }
 0x4ef   : > { %8603 = vrcp.f32 %v1634_v53 }
 0x51a   : > { %v9909_v50 = vpop.xlane.xlu1 %2240 }
 0x51b   : > { %v7196_v62 = vpop.f32.mrb[4].mxu1 }
 0x51c   : > { %v1324_v16 = vadd.f32 %v7196_v62, %v1207_v60  ;;  %v1304_v26 = vpop.f32.mrb[5].mxu1 }
 0x51d   : > { %v1323_v59 = vadd.f32 %v1304_v26, %v1206_v13  ;;  %v1617_v13 = vmul.f32 0.0, %v8594_v7  ;;  %v8598_v7 = vpop.eup %8597 }
 0x51e   : > { %v9911_v52 = vpop.xlane.xlu1 %2249  ;;  %v9913_v44 = vpop.xlane.xlu0 %2243  ;;  %v9915_v1 = vmul.f32 %v8590_v40, %v1324_v16 }
 0x51f   : > { %v1331_v22 = vmul.f32 %v8592_v21, %v1323_v59  ;;  %v1633_v26 = vadd.f32 %v1627_v4, %v1617_v13  ;;  %v8600_v27 = vpop.eup %8599 }
 0x521   : > { %8605 = vrcp.f32 %v1633_v26  ;;  %v8389_v26 = vunpack.i.h.bf16 %v9907_v30 }
 0x522   : > { %v9917_v60 = vpop.permute.xlu1 %8401  ;;  %v9919_v62 = vpop.xlane.xlu0 %2246 }
 0x526   : > { %v9921_v5 = vpop.permute.xlu1 %8406  ;;  %v9923_v15 = vpop.permute.xlu0 %8396 }
 0x527   : > { %v7199_v46 = vpop.f32.mrb[6].mxu1 }
 0x528   : > { %v1326_v47 = vadd.f32 %v7199_v46, %v1209_v12  ;;  %v1314_v41 = vpop.f32.mrb[7].mxu1  ;;  %v8602_v12 = vpop.eup %8601 }
 0x529   : > { %v1325_v6 = vadd.f32 %v1314_v41, %v1208_v3  ;;  %v8388_v3 = vunpack.i.l.bf16 %v9907_v30 }
 0x52a   : > { %v9925_v16 = vpop.permute.xlu1 %2479  ;;  %v9927_v40 = vpop.permute.xlu0 %2481  ;;  %v1334_v59 = vmul.f32 %v8596_v29, %v1326_v47 }
 0x52b   : > { %v1333_v55 = vmul.f32 %v8598_v7, %v1325_v6  ;;  %v7238_v36 = vpop.f32.mrb[8].mxu1  ;;  %v8604_v6 = vpop.eup %8603 }
 0x52c   : > { %v1749_v4 = vadd.f32 %v7238_v36, %v1616_v37  ;;  %v1729_v21 = vpop.f32.mrb[9].mxu1  ;;  %v8606_v36 = vpop.eup %8605 }
 0x52d   : > { %v1748_v42 = vadd.f32 %v1729_v21, %v1615_v57  ;;  %v9940_v21 = vpack.c.bf16 %v8389_v26, %v8388_v3 }
 0x52e   : > { %v9929_v20 = vpop.permute.xlu1 %8411  ;;  %v9931_v53 = vpop.permute.xlu0 %2483  ;;  %v1757_v46 = vmul.f32 %v8600_v27, %v1749_v4 }
 0x52f   : > { %v1756_v41 = vmul.f32 %v8602_v12, %v1748_v42  ;;  %v7241_v39 = vpop.f32.mrb[10].mxu1  ;;  %v2377_v12 = vld [vmem:[%s11275_s3 + $0x28] sm:$0xff] }
 0x530   : > { %v1751_v47 = vadd.f32 %v7241_v39, %v1618_v23  ;;  %v1739_v29 = vpop.f32.mrb[11].mxu1  ;;  %v8394_v23 = vunpack.i.h.bf16 %v9905_v24 }
 0x531   : > { %v1750_v37 = vadd.f32 %v1739_v29, %v1617_v13  ;;  %7246 = vmatprep.mubr.msk.f32.mxu1 %vm1762_vm8, %v1756_v41  ;;  %v8393_v13 = vunpack.i.l.bf16 %v9905_v24  ;;  %v8398_v41 = vunpack.i.l.bf16 %v9923_v15 }
 0x532   : > { %v9936_v57 = vpop.permute.xlu1 %2485  ;;  %v9938_v7 = vpop.permute.xlu0 %2596  ;;  %v1759_v48 = vmul.f32 %v8604_v6, %v1751_v47  ;;  %7247 = vmatmul.mubr.msk.f32.vlgmr.msra.gmra.mrb[12].mxu1 %vm1762_vm8, %v1757_v46  ;;  %v8399_v46 = vunpack.i.h.bf16 %v9923_v15 }
 0x533   : > { %v1758_v30 = vmul.f32 %v8606_v36, %v1750_v37  ;;  %7829 = vmatpush3.bf16.msra.mxu1 %v9806_v31  ;;  %v2376_v31 = vld [vmem:[%s11275_s3 + $0x20] sm:$0xff]  ;;  %v9962_v26 = vpack.c.bf16 %v8394_v23, %v8393_v13 }
 0x534   : > { %7855 = vmatprep.subr.bf16.mxu1 %v9940_v21  ;;  %v7862_v24 = vpack.c.bf16 %v2377_v12, %v2376_v31  ;;  %v9981_v6 = vpack.c.bf16 %v8399_v46, %v8398_v41  ;;  %v527_v41 = vmul.f32 %v9836_v2, %v9434_v38 }
 0x535   : > { %7249 = vmatprep.mubr.msk.f32.mxu1 %vm1762_vm8, %v1758_v30 }
 0x536   : > { %v9946_v39 = vpop.permute.xlu1 %2598  ;;  %v9948_v42 = vpop.permute.xlu0 %2600  ;;  %7250 = vmatmul.mubr.msk.f32.gmra.mrb[14].mxu1 %vm1762_vm8, %v1759_v48  ;;  %11410 = vst [vmem:[#allocation27_spill] sm:$0xff] %v9981_v6 }
 0x537   : > { %7256 = vmatprep.mubr.msk.f32.mxu1 %vm1762_vm8, %v1331_v22 }
 0x53a   : > { %v9954_v4 = vpop.permute.xlu1 %2602  ;;  %v628_v27 = vpop.permute.xlu0 %627  ;;  %7257 = vmatmul.mubr.msk.f32.vlgmr.msra.gmra.mrb[12].mxu1 %vm1762_vm8, %v9915_v1 }
 0x53b   : > { %7857 = vmatpush3.bf16.msra.mxu1 %v9940_v21  ;;  %7259 = vmatprep.mubr.msk.f32.mxu1 %vm1762_vm8, %v1333_v55  ;;  %v647_v48 = vmul.f32 %v628_v27, %v9434_v38 }
 0x53c   : > { %7859 = vmatprep.subr.bf16.mxu1 %v9962_v26 }
 0x53e   : > { %v630_v22 = vpop.permute.xlu1 %629  ;;  %v676_v3 = vpop.permute.xlu0 %675  ;;  %7260 = vmatmul.mubr.msk.f32.gmra.mrb[14].mxu1 %vm1762_vm8, %v1334_v59 }
 0x53f   : > { %v9972_v47 = vadd.f32 %v676_v3, %v647_v48  ;;  %7861 = vmatpush3.bf16.msra.mxu1 %v9962_v26  ;;  %7298 = vmatprep.mubr.msk.f32.mxu1 %vm1165_vm5, %v9766_v28  ;;  %v648_v1 = vmul.f32 %v630_v22, %v9440_v54 }
 0x540   : > { %7863 = vmatprep.subr.bf16.mxu1 %v7862_v24 }
 0x541   : > { %3013 = vrot.lane.b32.xlu0 %v9972_v47, %s8916_s28 }
 0x542   : > { %v678_v55 = vpop.permute.xlu1 %677  ;;  %v632_v29 = vpop.permute.xlu0 %631  ;;  %7299 = vmatmul.mubr.msk.f32.vlgmr.msra.gmra.mrb[16].mxu1 %vm1165_vm5, %v9768_v25 }
 0x543   : > { %v9983_v15 = vadd.f32 %v678_v55, %v648_v1  ;;  %7865 = vmatpush3.bf16.msra.mxu1 %v7862_v24  ;;  %7301 = vmatprep.mubr.msk.f32.mxu1 %vm1165_vm5, %v9778_v10  ;;  %v649_v28 = vmul.f32 %v632_v29, %v9598_v9 }
 0x544   : > { %7868 = vmatprep.subr.msk.bf16.mxu1 %vm9451_vm2, %v9981_v6 }
 0x545   : > { %3015 = vrot.lane.b32.xlu1 %v9983_v15, %s8916_s28 }
 0x546   : > { %v634_v59 = vpop.permute.xlu1 %633  ;;  %v680_v37 = vpop.permute.xlu0 %679  ;;  %7302 = vmatmul.mubr.msk.f32.gmra.mrb[18].mxu1 %vm1165_vm5, %v9772_v18 }
 0x547   : > { %v9995_v36 = vadd.f32 %v680_v37, %v649_v28  ;;  %v650_v25 = vmul.f32 %v634_v59, %v9600_v49 }
 0x549   : > { %3017 = vrot.lane.b32.xlu0 %v9995_v36, %s8916_s28 }
 0x54a   : > { %v682_v10 = vpop.permute.xlu1 %681  ;;  %v548_v30 = vpop.permute.xlu0 %547 }
 0x54b   : > { %v10002_v23 = vadd.f32 %v682_v10, %v650_v25  ;;  %v567_v13 = vmul.f32 %v548_v30, %v9434_v38  ;;  %v529_v25 = vmul.f32 %v9866_v11, %v9598_v9  ;;  %v530_v10 = vmul.f32 %v9854_v56, %v9600_v49 }
 0x54d   : > { %3019 = vrot.lane.b32.xlu1 %v10002_v23, %s8916_s28  ;;  %587 = vrot.lane.b32.xlu0 %v567_v13, %s8916_s28 }
 0x54e   : > { %v550_v27 = vpop.permute.xlu1 %549  ;;  %v552_v31 = vpop.permute.xlu0 %551 }
 0x54f   : > { %v568_v18 = vmul.f32 %v550_v27, %v9440_v54  ;;  %v569_v12 = vmul.f32 %v552_v31, %v9598_v9  ;;  %v11411_v27 = vmax.f32 %v9740_v33, -1e+30 }
 0x551   : > { %589 = vrot.lane.b32.xlu1 %v568_v18, %s8916_s28  ;;  %591 = vrot.lane.b32.xlu0 %v569_v12, %s8916_s28  ;;  %v2212_v31 = vsub.f32 -1e+30, %v11411_v27  ;;  %v11412_v18 = vmax.f32 %v9748_v19, -1e+30 }
 0x552   : > { %v554_v48 = vpop.permute.xlu1 %553 }
 0x553   : > { %v570_v24 = vmul.f32 %v554_v48, %v9600_v49  ;;  %v2211_v12 = vsub.f32 -1e+30, %v11412_v18  ;;  %v2217_v48 = vmul.f32 1.442695, %v2212_v31 }
 0x555   : > { %593 = vrot.lane.b32.xlu1 %v570_v24, %s8916_s28  ;;  %8607 = vpow2.f32 %v2217_v48 }
 0x5b3   : > { %v10014_v22 = vpop.permute.xlu0 %3013 }
 0x5b4   : > { %7374 = vmatprep.mubr.msk.f32.mxu0 %vm942_vm1, %v10014_v22 }
 0x5b7   : > { %v10018_v3 = vpop.permute.xlu1 %3015 }
 0x5b8   : > { %7375 = vmatmul.mubr.msk.f32.vlgmr.msra.gmra.mrb[24].mxu0 %vm942_vm1, %v10018_v3 }
 0x5b9   : > { %7919 = vmatpush3.bf16.xpose.msk.msra.mxu0 %vm9451_vm2, %v9475_v32  ;;  %v528_v32 = vmul.f32 %v9824_v35, %v9440_v54 }
 0x5ba   : > { %7922 = vmatprep.subr.msk.bf16.mxu0 %vm9451_vm2, %v9504_v61 }
 0x5bb   : > { %v10028_v46 = vpop.permute.xlu0 %3017 }
 0x5bc   : > { %7377 = vmatprep.mubr.msk.f32.mxu0 %vm942_vm1, %v10028_v46 }
 0x5bf   : > { %v10034_v1 = vpop.permute.xlu1 %3019  ;;  %v588_v55 = vpop.permute.xlu0 %587 }
 0x5c0   : > { %v10036_v29 = vsub.f32 %v527_v41, %v588_v55  ;;  %7378 = vmatmul.mubr.msk.f32.gmra.mrb[26].mxu0 %vm942_vm1, %v10034_v1  ;;  %v2215_v41 = vmul.f32 1.442695, %v2211_v12  ;;  %v11414_v55 = vmax.f32 %v9760_v8, -1e+30 }
 0x5c1   : > { %7925 = vmatpush3.bf16.xpose.msk.msra.mxu0 %vm9451_vm2, %v9504_v61 }
 0x5c2   : > { %7959 = vmatprep.subr.bf16.mxu0 %v9444_v58  ;;  %7388 = vmatprep.mubr.msk.f32.mxu0 %vm942_vm1, %v10036_v29  ;;  %8609 = vpow2.f32 %v2215_v41 }
 0x5c3   : > { %v590_v28 = vpop.permute.xlu1 %589  ;;  %v592_v37 = vpop.permute.xlu0 %591 }
 0x5c4   : > { %v10048_v59 = vsub.f32 %v528_v32, %v590_v28  ;;  %v10054_v30 = vsub.f32 %v529_v25, %v592_v37  ;;  %v2213_v32 = vsub.f32 -1e+30, %v11414_v55  ;;  %v8608_v37 = vpop.eup %8607 }
 0x5c5   : > { %v2236_v25 = vmul.f32 0.0, %v8608_v37 }
 0x5c6   : > { %v2219_v28 = vmul.f32 1.442695, %v2213_v32 }
 0x5c7   : > { %v594_v61 = vpop.permute.xlu1 %593  ;;  %v2252_v27 = vadd.f32 %v9913_v44, %v2236_v25  ;;  %v8404_v44 = vunpack.i.h.bf16 %v9917_v60 }
 0x5c8   : > { %v10056_v13 = vsub.f32 %v530_v10, %v594_v61  ;;  %7389 = vmatmul.mubr.msk.f32.vlgmr.msra.gmra.mrb[24].mxu0 %vm942_vm1, %v10048_v59 }
 0x5c9   : > { %7391 = vmatprep.mubr.msk.f32.mxu0 %vm942_vm1, %v10054_v30  ;;  %7961 = vmatpush3.bf16.msra.mxu0 %v9444_v58  ;;  %v11413_v58 = vmax.f32 %v9744_v14, -1e+30 }
 0x5ca   : > { %7963 = vmatprep.subr.bf16.mxu0 %v9604_v51 }
 0x5cb   : > { %v2214_v24 = vsub.f32 -1e+30, %v11413_v58 }
 0x5cc   : > { %7392 = vmatmul.mubr.msk.f32.gmra.mrb[26].mxu0 %vm942_vm1, %v10056_v13  ;;  %v8610_v33 = vpop.eup %8609 }
 0x5cd   : > { %7965 = vmatpush3.bf16.msra.mxu0 %v9604_v51  ;;  %v2221_v51 = vmul.f32 1.442695, %v2214_v24  ;;  %v2235_v19 = vmul.f32 0.0, %v8610_v33 }
 0x5ce   : > { %7968 = vmatprep.subr.msk.bf16.mxu0 %vm9451_vm2, %v9463_v63 }
 0x5cf   : > { %8611 = vpow2.f32 %v2221_v51  ;;  %v2251_v14 = vadd.f32 %v9909_v50, %v2235_v19  ;;  %v8403_v50 = vunpack.i.l.bf16 %v9917_v60  ;;  %v8409_v60 = vunpack.i.h.bf16 %v9921_v5 }
 0x5d0   : > { %8613 = vpow2.f32 %v2219_v28 }
 0x5d1   : > { %8615 = vrcp.f32 %v2252_v27  ;;  %v10085_v27 = vpack.c.bf16 %v8404_v44, %v8403_v50  ;;  %v11418_v44 = vld [vmem:[#allocation10_spill] sm:$0xff]  ;;  %v11419_v50 = vld [vmem:[#allocation24_spill] sm:$0xff] }
 0x5d2   : > { %8617 = vrcp.f32 %v2251_v14  ;;  %v8408_v14 = vunpack.i.l.bf16 %v9921_v5 }
 0x5d3   : > { %11415 = vst [vmem:[#allocation28_spill] sm:$0xff] %v10085_v27 }
 0x5d9   : > { %v8612_v10 = vpop.eup %8611 }
 0x5da   : > { %v8614_v61 = vpop.eup %8613  ;;  %v2238_v31 = vmul.f32 0.0, %v8612_v10 }
 0x5db   : > { %v2237_v18 = vmul.f32 0.0, %v8614_v61  ;;  %v8616_v41 = vpop.eup %8615 }
 0x5dc   : > { %v2254_v8 = vadd.f32 %v9911_v52, %v2238_v31  ;;  %v8618_v32 = vpop.eup %8617 }
 0x5dd   : > { %v2253_v12 = vadd.f32 %v9919_v62, %v2237_v18 }
 0x5de   : > { %8619 = vrcp.f32 %v2254_v8  ;;  %v8413_v8 = vunpack.i.l.bf16 %v9929_v20 }
 0x5df   : > { %8621 = vrcp.f32 %v2253_v12 }
 0x5e8   : > { %v8620_v10 = vpop.eup %8619 }
 0x5e9   : > { %v8622_v62 = vpop.eup %8621 }
 0x615   : > { %v7300_v48 = vpop.f32.mrb[16].mxu1 }
 0x616   : > { %v2365_v58 = vadd.f32 %v7300_v48, %v2236_v25  ;;  %v2345_v24 = vpop.f32.mrb[17].mxu1 }
 0x617   : > { %v2364_v55 = vadd.f32 %v2345_v24, %v2235_v19 }
 0x618   : > { %v2373_v51 = vmul.f32 %v8616_v41, %v2365_v58 }
 0x619   : > { %v2372_v28 = vmul.f32 %v8618_v32, %v2364_v55  ;;  %v7303_v37 = vpop.f32.mrb[18].mxu1 }
 0x61a   : > { %v2367_v52 = vadd.f32 %v7303_v37, %v2238_v31  ;;  %v2355_v33 = vpop.f32.mrb[19].mxu1  ;;  %v10100_v31 = vpack.c.bf16 %v8409_v60, %v8408_v14  ;;  %v11422_v37 = vld [vmem:[#allocation8_spill] sm:$0xff] }
 0x61b   : > { %v2366_v61 = vadd.f32 %v2355_v33, %v2237_v18  ;;  %7308 = vmatprep.mubr.msk.f32.mxu1 %vm1762_vm8, %v2372_v28  ;;  %v8414_v18 = vunpack.i.h.bf16 %v9929_v20  ;;  %v11421_v28 = vld [vmem:[#allocation25_spill] sm:$0xff] }
 0x61c   : > { %v2375_v25 = vmul.f32 %v8620_v10, %v2367_v52  ;;  %7309 = vmatmul.mubr.msk.f32.vlgmr.msra.gmra.mrb[12].mxu1 %vm1762_vm8, %v2373_v51  ;;  %11416 = vst [vmem:[#allocation29_spill] sm:$0xff] %v10100_v31  ;;  %v11420_v51 = vld [vmem:[#allocation23_spill] sm:$0xff]  ;;  %v11423_v52 = vld [vmem:[#allocation26_spill] sm:$0xff] }
 0x61d   : > { %v2374_v19 = vmul.f32 %v8622_v62, %v2366_v61  ;;  %7871 = vmatpush3.bf16.xpose.msk.msra.mxu1 %vm9451_vm2, %v9981_v6  ;;  %v10110_v5 = vpack.c.bf16 %v8414_v18, %v8413_v8 }
 0x61e   : > { %7874 = vmatprep.subr.msk.bf16.mxu1 %vm9451_vm2, %v10085_v27 }
 0x61f   : > { %7311 = vmatprep.mubr.msk.f32.mxu1 %vm1762_vm8, %v2374_v19  ;;  %11417 = vst [vmem:[#allocation30_spill] sm:$0xff] %v10110_v5 }
 0x620   : > { %7312 = vmatmul.mubr.msk.f32.gmra.mrb[14].mxu1 %vm1762_vm8, %v2375_v25 }
 0x621   : > { %7322 = vmatprep.mubr.msk.f32.mxu1 %vm942_vm1, %v9925_v16 }
 0x625   : > { %7877 = vmatpush3.bf16.xpose.msk.msra.mxu1 %vm9451_vm2, %v10085_v27 }
 0x626   : > { %7880 = vmatprep.subr.msk.bf16.mxu1 %vm9451_vm2, %v10100_v31 }
 0x62c   : > { %7323 = vmatmul.mubr.msk.f32.vlgmr.msra.gmra.mrb[20].mxu1 %vm942_vm1, %v9927_v40 }
 0x62d   : > { %7325 = vmatprep.mubr.msk.f32.mxu1 %vm942_vm1, %v9931_v53  ;;  %7883 = vmatpush3.bf16.xpose.msk.msra.mxu1 %vm9451_vm2, %v10100_v31 }
 0x62e   : > { %7886 = vmatprep.subr.msk.bf16.mxu1 %vm9451_vm2, %v10110_v5 }
 0x630   : > { %7326 = vmatmul.mubr.msk.f32.gmra.mrb[22].mxu1 %vm942_vm1, %v9936_v57 }
 0x631   : > { %7336 = vmatprep.mubr.msk.f32.mxu1 %vm942_vm1, %v9938_v7 }
 0x635   : > { %7889 = vmatpush3.bf16.xpose.msk.msra.mxu1 %vm9451_vm2, %v10110_v5 }
 0x63c   : > { %7337 = vmatmul.mubr.msk.f32.vlgmr.msra.gmra.mrb[20].mxu1 %vm942_vm1, %v9946_v39 }
 0x63d   : > { %7339 = vmatprep.mubr.msk.f32.mxu1 %vm942_vm1, %v9948_v42 }
 0x640   : > { %7340 = vmatmul.mubr.msk.f32.gmra.mrb[22].mxu1 %vm942_vm1, %v9954_v4 }
 0x69b   : > { %v10135_v20 = vpop.f32.mrb[24].mxu0 }
 0x69c   : > { %v10137_v16 = vpop.f32.mrb[25].mxu0 }
 0x69f   : > { %v10139_v40 = vpop.f32.mrb[26].mxu0 }
 0x6a0   : > { %v10141_v53 = vpop.f32.mrb[27].mxu0 }
 0x70f   : > { %v7338_v57 = vpop.f32.mrb[20].mxu1 }
 0x710   : > { %v2714_v7 = vsel %vm9606_vm3, %v7338_v57, -1e+30  ;;  %v2694_v12 = vpop.f32.mrb[21].mxu1 }
 0x711   : > { %v2720_v39 = vsel %vm1165_vm5, %v2714_v7, -inf  ;;  %v2713_v42 = vsel %vm9610_vm4, %v2694_v12, -1e+30 }
 0x712   : > { %v2717_v4 = vsel %vm1165_vm5, %v2713_v42, -inf  ;;  %2721 = vmax.xlane.f32.xlu1 %v2720_v39 }
 0x713   : > { %2718 = vmax.xlane.f32.xlu0 %v2717_v4  ;;  %v7341_v48 = vpop.f32.mrb[22].mxu1 }
 0x714   : > { %v2716_v58 = vsel %vm9622_vm6, %v7341_v48, -1e+30  ;;  %v2704_v24 = vpop.f32.mrb[23].mxu1 }
 0x715   : > { %v2726_v41 = vsel %vm1165_vm5, %v2716_v58, -inf  ;;  %v2715_v55 = vsel %vm9632_vm7, %v2704_v24, -1e+30 }
 0x716   : > { %v2723_v32 = vsel %vm1165_vm5, %v2715_v55, -inf }
 0x717   : > { %2727 = vmax.xlane.f32.xlu0 %v2726_v41 }
 0x71b   : > { %2724 = vmax.xlane.f32.xlu0 %v2723_v32 }
 0x723   : > { %8421 = vrot.lane.b32.xlu1 %v11418_v44, %s8924_s17 }
 0x727   : > { %843 = vrot.lane.b32.xlu1 %v11419_v50, %s8915_s19 }
 0x72b   : > { %845 = vrot.lane.b32.xlu1 %v11420_v51, %s8915_s19 }
 0x72f   : > { %849 = vrot.lane.b32.xlu1 %v11421_v28, %s8915_s19 }
 0x731   : > { %8416 = vrot.lane.b32.xlu0 %v11422_v37, %s8924_s17 }
 0x733   : > { %741 = vrot.lane.b32.xlu1 %v11420_v51, %s8916_s28 }
 0x735   : > { %847 = vrot.lane.b32.xlu0 %v11423_v52, %s8915_s19 }
 0x737   : > { %745 = vrot.lane.b32.xlu1 %v11421_v28, %s8916_s28 }
 0x739   : > { %739 = vrot.lane.b32.xlu0 %v11419_v50, %s8916_s28 }
 0x73b   : > { %813 = vrot.lane.b32.xlu1 %v9824_v35, %s8916_s28 }
 0x73d   : > { %743 = vrot.lane.b32.xlu0 %v11423_v52, %s8916_s28 }
 0x741   : > { %811 = vrot.lane.b32.xlu0 %v9836_v2, %s8916_s28 }
 0x79f   : > { %v10179_v33 = vpop.xlane.xlu1 %2721 }
 0x7a0   : > { %v10181_v10 = vpop.xlane.xlu0 %2718  ;;  %v2730_v62 = vmax.f32 %v10179_v33, -1e+30 }
 0x7a1   : > { %v2729_v61 = vmax.f32 %v10181_v10, -1e+30 }
 0x7a2   : > { %v2746_v18 = vsub.f32 %v2714_v7, %v2730_v62 }
 0x7a3   : > { %v2745_v25 = vsub.f32 %v2713_v42, %v2729_v61  ;;  %v8422_v19 = vpop.permute.xlu1 %8421 }
 0x7a4   : > { %v10187_v60 = vpop.xlane.xlu0 %2727  ;;  %v2751_v48 = vmul.f32 1.442695, %v2746_v18  ;;  %v8424_v41 = vunpack.i.h.bf16 %v8422_v19  ;;  %v8423_v50 = vunpack.i.l.bf16 %v8422_v19  ;;  %v2899_v19 = vld [vmem:[%s11275_s3 + $0x38] sm:$0xff] }
 0x7a5   : > { %v2749_v14 = vmul.f32 1.442695, %v2745_v25  ;;  %v2732_v8 = vmax.f32 %v10187_v60, -1e+30  ;;  %v2898_v25 = vld [vmem:[%s11275_s3 + $0x30] sm:$0xff] }
 0x7a7   : > { %v844_v57 = vpop.permute.xlu1 %843  ;;  %8623 = vpow2.f32 %v2749_v14  ;;  %v2748_v42 = vsub.f32 %v2716_v58, %v2732_v8  ;;  %v10213_v14 = vpack.c.bf16 %v8424_v41, %v8423_v50 }
 0x7a8   : > { %v863_v12 = vmul.f32 %v844_v57, %v9434_v38  ;;  %v10193_v39 = vpop.xlane.xlu0 %2724  ;;  %8625 = vpow2.f32 %v2751_v48  ;;  %v7898_v48 = vpack.c.bf16 %v2899_v19, %v2898_v25  ;;  %v3217_v25 = vsel %vm1165_vm5, %v10141_v53, -inf }
 0x7a9   : > { %v2731_v4 = vmax.f32 %v10193_v39, -1e+30  ;;  %v2755_v52 = vmul.f32 1.442695, %v2748_v42  ;;  %11425 = vst [vmem:[#allocation24_spill] sm:$0xff] %v10213_v14 }
 0x7aa   : > { %883 = vrot.lane.b32.xlu0 %v863_v12, %s8917_s13  ;;  %v2736_v39 = vsub.f32 -1e+30, %v2732_v8 }
 0x7ab   : > { %v2747_v24 = vsub.f32 %v2715_v55, %v2731_v4  ;;  %v846_v7 = vpop.permute.xlu1 %845 }
 0x7ac   : > { %v864_v32 = vmul.f32 %v846_v7, %v9440_v54  ;;  %v8417_v44 = vpop.permute.xlu0 %8416 }
 0x7ad   : > { %v2753_v51 = vmul.f32 1.442695, %v2747_v24  ;;  %v8419_v28 = vunpack.i.h.bf16 %v8417_v44  ;;  %v8418_v37 = vunpack.i.l.bf16 %v8417_v44 }
 0x7ae   : > { %885 = vrot.lane.b32.xlu1 %v864_v32, %s8917_s13  ;;  %815 = vrot.lane.b32.xlu0 %v9866_v11, %s8916_s28 }
 0x7af   : > { %v10205_v58 = vpack.c.bf16 %v8419_v28, %v8418_v37  ;;  %8627 = vpow2.f32 %v2753_v51  ;;  %v850_v18 = vpop.permute.xlu1 %849  ;;  %v3211_v37 = vsel %vm1165_vm5, %v10137_v16, -inf }
 0x7b0   : > { %v848_v55 = vpop.permute.xlu0 %847  ;;  %8629 = vpow2.f32 %v2755_v52  ;;  %v866_v42 = vmul.f32 %v850_v18, %v9600_v49 }
 0x7b1   : > { %11424 = vst [vmem:[#allocation10_spill] sm:$0xff] %v10205_v58  ;;  %v865_v57 = vmul.f32 %v848_v55, %v9598_v9  ;;  %7891 = vmatprep.subr.bf16.mxu1 %v10205_v58  ;;  %v8624_v12 = vpop.eup %8623 }
 0x7b2   : > { %817 = vrot.lane.b32.xlu1 %v9854_v56, %s8916_s28  ;;  %7893 = vmatpush3.bf16.msra.mxu1 %v10205_v58  ;;  %v8626_v7 = vpop.eup %8625  ;;  %v2761_v55 = vsel %vm1165_vm5, %v8624_v12, 0.0 }
 0x7b3   : > { %887 = vrot.lane.b32.xlu0 %v865_v57, %s8917_s13  ;;  %7895 = vmatprep.subr.bf16.mxu1 %v10213_v14  ;;  %v742_v41 = vpop.permute.xlu1 %741  ;;  %v2764_v52 = vsel %vm1165_vm5, %v8626_v7, 0.0 }
 0x7b4   : > { %7350 = vmatprep.mubr.msk.f32.mxu1 %vm1165_vm5, %v8624_v12  ;;  %v740_v24 = vpop.permute.xlu0 %739  ;;  %v760_v51 = vmul.f32 %v742_v41, %v9440_v54 }
 0x7b5   : > { %v759_v32 = vmul.f32 %v740_v24, %v9434_v38  ;;  %v3220_v24 = vsel %vm1165_vm5, %v10139_v40, -inf }
 0x7b6   : > { %889 = vrot.lane.b32.xlu1 %v866_v42, %s8917_s13  ;;  %7897 = vmatpush3.bf16.msra.mxu1 %v10213_v14 }
 0x7b7   : > { %707 = vrot.lane.b32.xlu0 %v9836_v2, %s8915_s19  ;;  %7899 = vmatprep.subr.bf16.mxu1 %v7898_v48  ;;  %v11426_v2 = vld [vmem:[#allocation9_spill] sm:$0xff]  ;;  %v746_v19 = vpop.permute.xlu1 %745 }
 0x7b8   : > { %v744_v28 = vpop.permute.xlu0 %743  ;;  %v762_v18 = vmul.f32 %v746_v19, %v9600_v49 }
 0x7b9   : > { %7351 = vmatmul.mubr.msk.f32.vlgmr.msra.gmra.mrb[24].mxu1 %vm1165_vm5, %v8626_v7  ;;  %v8628_v44 = vpop.eup %8627 }
 0x7ba   : > { %709 = vrot.lane.b32.xlu1 %v9824_v35, %s8915_s19  ;;  %7901 = vmatpush3.bf16.msra.mxu1 %v7898_v48  ;;  %v8630_v50 = vpop.eup %8629  ;;  %v761_v35 = vmul.f32 %v744_v28, %v9598_v9 }
 0x7bb   : > { %7353 = vmatprep.mubr.msk.f32.mxu1 %vm1165_vm5, %v8628_v44  ;;  %779 = vrot.lane.b32.xlu0 %v759_v32, %s8916_s28  ;;  %v2770_v12 = vsel %vm1165_vm5, %v8630_v50, 0.0  ;;  %v814_v48 = vpop.permute.xlu1 %813 }
 0x7bc   : > { %7927 = vmatprep.subr.bf16.mxu1 %v11426_v2  ;;  %v812_v57 = vpop.permute.xlu0 %811  ;;  %v832_v7 = vmul.f32 %v814_v48, %v9440_v54 }
 0x7bd   : > { %7354 = vmatmul.mubr.msk.f32.gmra.mrb[26].mxu1 %vm1165_vm5, %v8630_v50  ;;  %v831_v41 = vmul.f32 %v812_v57, %v9434_v38 }
 0x7be   : > { %781 = vrot.lane.b32.xlu1 %v760_v51, %s8916_s28 }
 0x7bf   : > { %711 = vrot.lane.b32.xlu0 %v9866_v11, %s8915_s19  ;;  %v3214_v11 = vsel %vm1165_vm5, %v10135_v20, -inf }
 0x7c2   : > { %713 = vrot.lane.b32.xlu1 %v9854_v56, %s8915_s19  ;;  %v2767_v56 = vsel %vm1165_vm5, %v8628_v44, 0.0 }
 0x7c3   : > { %783 = vrot.lane.b32.xlu0 %v761_v35, %s8916_s28 }
 0x7e2   : > { %3212 = vmax.xlane.f32.xlu0 %v3211_v37 }
 0x7e6   : > { %2765 = vadd.xlane.f32.xlu1 %v2764_v52  ;;  %2762 = vadd.xlane.f32.xlu0 %v2761_v55 }
 0x7ea   : > { %3215 = vmax.xlane.f32.xlu0 %v3214_v11 }
 0x7ee   : > { %3218 = vmax.xlane.f32.xlu0 %v3217_v25 }
 0x7f2   : > { %2768 = vadd.xlane.f32.xlu0 %v2767_v56 }
 0x7f7   : > { %785 = vrot.lane.b32.xlu1 %v762_v18, %s8916_s28 }
 0x81b   : > { %2771 = vadd.xlane.f32.xlu1 %v2770_v12 }
 0x81c   : > { %v884_v42 = vpop.permute.xlu0 %883 }
 0x81d   : > { %v903_v51 = vadd.f32 %v884_v42, %v831_v41 }
 0x81f   : > { %3221 = vmax.xlane.f32.xlu1 %v3220_v24 }
 0x820   : > { %v886_v32 = vpop.permute.xlu1 %885  ;;  %v816_v44 = vpop.permute.xlu0 %815 }
 0x821   : > { %v904_v28 = vadd.f32 %v886_v32, %v832_v7  ;;  %v833_v52 = vmul.f32 %v816_v44, %v9598_v9 }
 0x823   : > { %v10260_v35 = vpack.i.bf16 %v904_v28, %v903_v51  ;;  %v2734_v51 = vsub.f32 -1e+30, %v2730_v62 }
 0x824   : > { %v818_v37 = vpop.permute.xlu1 %817 }
 0x825   : > { %11427 = vst [vmem:[#allocation23_spill] sm:$0xff] %v10260_v35  ;;  %8426 = vrot.lane.b32.xlu0 %v10260_v35, %s8917_s13  ;;  %v888_v50 = vpop.permute.xlu0 %887  ;;  %v834_v55 = vmul.f32 %v818_v37, %v9600_v49 }
 0x826   : > { %v905_v25 = vadd.f32 %v888_v50, %v833_v52  ;;  %v2735_v50 = vsub.f32 -1e+30, %v2731_v4 }
 0x828   : > { %v890_v11 = vpop.permute.xlu1 %889 }
 0x829   : > { %v906_v56 = vadd.f32 %v890_v11, %v834_v55  ;;  %v708_v19 = vpop.permute.xlu0 %707  ;;  %v2741_v11 = vmul.f32 1.442695, %v2735_v50 }
 0x82a   : > { %v727_v48 = vmul.f32 %v708_v19, %v9434_v38  ;;  %v2733_v38 = vsub.f32 -1e+30, %v2729_v61 }
 0x82b   : > { %v10266_v18 = vpack.i.bf16 %v906_v56, %v905_v25 }
 0x82c   : > { %v710_v57 = vpop.permute.xlu1 %709  ;;  %v2737_v37 = vmul.f32 1.442695, %v2733_v38 }
 0x82d   : > { %11428 = vst [vmem:[#allocation25_spill] sm:$0xff] %v10266_v18  ;;  %v780_v12 = vpop.permute.xlu0 %779  ;;  %v728_v42 = vmul.f32 %v710_v57, %v9440_v54  ;;  %v2739_v54 = vmul.f32 1.442695, %v2734_v51 }
 0x82e   : > { %v799_v7 = vsub.f32 %v727_v48, %v780_v12 }
 0x82f   : > { %8631 = vpow2.f32 %v2739_v54 }
 0x830   : > { %v782_v24 = vpop.permute.xlu1 %781  ;;  %8431 = vrot.lane.b32.xlu1 %v10266_v18, %s8917_s13  ;;  %8633 = vpow2.f32 %v2737_v37 }
 0x831   : > { %v800_v41 = vsub.f32 %v728_v42, %v782_v24  ;;  %v712_v44 = vpop.permute.xlu0 %711  ;;  %8635 = vpow2.f32 %v2741_v11  ;;  %v2743_v24 = vmul.f32 1.442695, %v2736_v39 }
 0x832   : > { %v729_v33 = vmul.f32 %v712_v44, %v9598_v9 }
 0x833   : > { %v10272_v32 = vpack.i.bf16 %v800_v41, %v799_v7  ;;  %8637 = vpow2.f32 %v2743_v24 }
 0x834   : > { %v714_v52 = vpop.permute.xlu1 %713 }
 0x835   : > { %11429 = vst [vmem:[#allocation8_spill] sm:$0xff] %v10272_v32  ;;  %8436 = vrot.lane.b32.xlu1 %v10272_v32, %s8915_s19  ;;  %v784_v28 = vpop.permute.xlu0 %783  ;;  %v730_v62 = vmul.f32 %v714_v52, %v9600_v49 }
 0x836   : > { %v801_v19 = vsub.f32 %v729_v33, %v784_v28 }
 0x839   : > { %v8632_v12 = vpop.eup %8631 }
 0x83a   : > { %v8634_v48 = vpop.eup %8633  ;;  %v2758_v7 = vmul.f32 0.0, %v8632_v12 }
 0x83b   : > { %v2757_v9 = vmul.f32 0.0, %v8634_v48  ;;  %v8636_v41 = vpop.eup %8635  ;;  %v11431_v48 = vld [vmem:[#allocation11_spill] sm:$0xff] }
 0x83c   : > { %v2759_v38 = vmul.f32 0.0, %v8636_v41 }
 0x83d   : > { %v8638_v8 = vpop.eup %8637 }
 0x86f   : > { %v3213_v55 = vpop.xlane.xlu0 %3212 }
 0x873   : > { %v2766_v25 = vpop.xlane.xlu1 %2765  ;;  %v2763_v56 = vpop.xlane.xlu0 %2762 }
 0x874   : > { %v2774_v49 = vadd.f32 %v2766_v25, %v2758_v7  ;;  %v2773_v44 = vadd.f32 %v2763_v56, %v2757_v9 }
 0x876   : > { %8639 = vrcp.f32 %v2774_v49  ;;  %v10298_v49 = vmax.f32 %v3213_v55, -1e+30 }
 0x877   : > { %v786_v10 = vpop.permute.xlu1 %785  ;;  %v3216_v61 = vpop.xlane.xlu0 %3215  ;;  %8641 = vrcp.f32 %v2773_v44 }
 0x878   : > { %v802_v57 = vsub.f32 %v730_v62, %v786_v10  ;;  %v2760_v62 = vmul.f32 0.0, %v8638_v8  ;;  %v10300_v44 = vmax.f32 %v3216_v61, -1e+30 }
 0x87a   : > { %v10286_v4 = vpack.i.bf16 %v802_v57, %v801_v19 }
 0x87b   : > { %v3219_v42 = vpop.xlane.xlu0 %3218 }
 0x87c   : > { %11430 = vst [vmem:[#allocation26_spill] sm:$0xff] %v10286_v4  ;;  %8441 = vrot.lane.b32.xlu1 %v10286_v4, %s8915_s19  ;;  %s257_s19 = sand.u32 1, %s8901_s22  }
 0x87d   : > { %s6531_s13 = sshll.u32 %s257_s19, 6 }
 0x87e   : > { %s10370_s10 = scalar_lea.vmem [#allocation5], %s6531_s13  ;;  %s11459_s13 = smov 8  }
 0x87f   : > { %v2769_v51 = vpop.xlane.xlu0 %2768 }
 0x880   : > { %v2775_v60 = vadd.f32 %v2769_v51, %v2759_v38  ;;  %v8640_v50 = vpop.eup %8639  ;;  %v10304_v51 = vmax.f32 %v3219_v42, -1e+30 }
 0x881   : > { %v8642_v11 = vpop.eup %8641 }
 0x882   : > { %8643 = vrcp.f32 %v2775_v60  ;;  %v3240_v60 = vsub.f32 %v10135_v20, %v10300_v44 }
 0x884   : > { %v3245_v55 = vmul.f32 1.442695, %v3240_v60 }
 0x88c   : > { %v7352_v28 = vpop.f32.mrb[24].mxu1  ;;  %v8644_v39 = vpop.eup %8643 }
 0x88d   : > { %v2887_v54 = vadd.f32 %v7352_v28, %v2758_v7  ;;  %v2867_v37 = vpop.f32.mrb[25].mxu1 }
 0x88e   : > { %v2886_v52 = vadd.f32 %v2867_v37, %v2757_v9 }
 0x88f   : > { %v2895_v33 = vmul.f32 %v8640_v50, %v2887_v54  ;;  %v3241_v54 = vsub.f32 %v10141_v53, %v10304_v51 }
 0x890   : > { %v2894_v10 = vmul.f32 %v8642_v11, %v2886_v52  ;;  %v7355_v19 = vpop.f32.mrb[26].mxu1 }
 0x891   : > { %v2889_v25 = vadd.f32 %v7355_v19, %v2760_v62  ;;  %v2877_v56 = vpop.f32.mrb[27].mxu1  ;;  %v3247_v61 = vmul.f32 1.442695, %v3241_v54 }
 0x892   : > { %v2888_v57 = vadd.f32 %v2877_v56, %v2759_v38  ;;  %7360 = vmatprep.mubr.msk.f32.mxu1 %vm1762_vm8, %v2894_v10 }
 0x893   : > { %7361 = vmatmul.mubr.msk.f32.vlgmr.msra.gmra.mrb[12].mxu1 %vm1762_vm8, %v2895_v33 }
 0x894   : > { %v2896_v12 = vmul.f32 %v8644_v39, %v2888_v57  ;;  %7929 = vmatpush3.bf16.msra.mxu1 %v11426_v2  ;;  %v3239_v2 = vsub.f32 %v10137_v16, %v10298_v49 }
 0x895   : > { %7931 = vmatprep.subr.bf16.mxu1 %v11431_v48 }
 0x896   : > { %7363 = vmatprep.mubr.msk.f32.mxu1 %vm1762_vm8, %v2896_v12  ;;  %v3243_v28 = vmul.f32 1.442695, %v3239_v2 }
 0x897   : > { %v8427_v24 = vpop.permute.xlu0 %8426 }
 0x898   : > { %v8429_v7 = vunpack.i.h.bf16 %v8427_v24  ;;  %v8428_v9 = vunpack.i.l.bf16 %v8427_v24  ;;  %7933 = vmatpush3.bf16.msra.mxu1 %v11431_v48 }
 0x89a   : > { %v7934_v41 = vpack.c.bf16 %v8429_v7, %v8428_v9  ;;  %v8807_v9 = vld [vmem:[%s9055_s16 + $0x8] sm:$0xff] }
 0x89c   : > { %7936 = vmatprep.subr.msk.bf16.mxu1 %vm9451_vm2, %v7934_v41 }
 0x8a8   : > { %v2772_v38 = vpop.xlane.xlu1 %2771 }
 0x8a9   : > { %v2776_v8 = vadd.f32 %v2772_v38, %v2760_v62  ;;  %v8808_v38 = vld [vmem:[%s9055_s16] sm:$0xff] }
 0x8ab   : > { %8645 = vrcp.f32 %v2776_v8 }
 0x8ac   : > { %v3222_v37 = vpop.xlane.xlu1 %3221  ;;  %8647 = vpow2.f32 %v3243_v28  ;;  %v8809_v28 = vld [vmem:[%s9055_s16 + $0x18] sm:$0xff] }
 0x8ad   : > { %v10310_v50 = vmax.f32 %v3222_v37, -1e+30  ;;  %8649 = vpow2.f32 %v3245_v55  ;;  %v8810_v55 = vld [vmem:[%s9055_s16 + $0x10] sm:$0xff] }
 0x8ae   : > { %8651 = vpow2.f32 %v3247_v61 }
 0x8af   : > { %v3242_v16 = vsub.f32 %v10139_v40, %v10310_v50 }
 0x8b0   : > { %v8432_v20 = vpop.permute.xlu1 %8431 }
 0x8b1   : > { %v3249_v42 = vmul.f32 1.442695, %v3242_v16  ;;  %v8434_v53 = vunpack.i.h.bf16 %v8432_v20  ;;  %v8433_v62 = vunpack.i.l.bf16 %v8432_v20 }
 0x8b3   : > { %8653 = vpow2.f32 %v3249_v42  ;;  %v7940_v40 = vpack.c.bf16 %v8434_v53, %v8433_v62 }
 0x8b4   : > { %v8437_v56 = vpop.permute.xlu1 %8436 }
 0x8b5   : > { %v8646_v52 = vpop.eup %8645  ;;  %v8439_v57 = vunpack.i.h.bf16 %v8437_v56  ;;  %v8438_v39 = vunpack.i.l.bf16 %v8437_v56 }
 0x8b6   : > { %v2897_v11 = vmul.f32 %v8646_v52, %v2889_v25  ;;  %v10314_v33 = vpop.eup %8647 }
 0x8b7   : > { %v10319_v10 = vpop.eup %8649  ;;  %v7946_v12 = vpack.c.bf16 %v8439_v57, %v8438_v39 }
 0x8b8   : > { %7364 = vmatmul.mubr.msk.f32.gmra.mrb[14].mxu1 %vm1762_vm8, %v2897_v11  ;;  %v10321_v19 = vpop.eup %8651 }
 0x8b9   : > { %7402 = vmatprep.mubr.msk.f32.mxu1 %vm1165_vm5, %v10314_v33 }
 0x8bc   : > { %7403 = vmatmul.mubr.msk.f32.vlgmr.msra.gmra.mrb[28].mxu1 %vm1165_vm5, %v10319_v10 }
 0x8bd   : > { %7939 = vmatpush3.bf16.xpose.msk.msra.mxu1 %vm9451_vm2, %v7934_v41  ;;  %7405 = vmatprep.mubr.msk.f32.mxu1 %vm1165_vm5, %v10321_v19  ;;  %v10331_v25 = vpop.eup %8653 }
 0x8be   : > { %7942 = vmatprep.subr.msk.bf16.mxu1 %vm9451_vm2, %v7940_v40 }
 0x8c0   : > { %7406 = vmatmul.mubr.msk.f32.gmra.mrb[30].mxu1 %vm1165_vm5, %v10331_v25 }
 0x8c1   : > { %7416 = vmatprep.mubr.msk.f32.mxu1 %vm942_vm1, %v10014_v22 }
 0x8c5   : > { %7945 = vmatpush3.bf16.xpose.msk.msra.mxu1 %vm9451_vm2, %v7940_v40 }
 0x8c6   : > { %7948 = vmatprep.subr.msk.bf16.mxu1 %vm9451_vm2, %v7946_v12 }
 0x8cc   : > { %7417 = vmatmul.mubr.msk.f32.vlgmr.msra.gmra.mrb[32].mxu1 %vm942_vm1, %v10018_v3  ;;  %v11432_v3 = vld [vmem:[#allocation21_spill] sm:$0xff] }
 0x8cd   : > { %7419 = vmatprep.mubr.msk.f32.mxu1 %vm942_vm1, %v10028_v46  ;;  %7951 = vmatpush3.bf16.xpose.msk.msra.mxu1 %vm9451_vm2, %v7946_v12  ;;  %v11433_v46 = vld [vmem:[#allocation22_spill] sm:$0xff] }
 0x8d0   : > { %7420 = vmatmul.mubr.msk.f32.gmra.mrb[34].mxu1 %vm942_vm1, %v10034_v1 }
 0x8d1   : > { %7430 = vmatprep.mubr.msk.f32.mxu1 %vm942_vm1, %v10036_v29 }
 0x8ee   : > { %v8442_v22 = vpop.permute.xlu1 %8441 }
 0x8ef   : > { %v8444_v48 = vunpack.i.h.bf16 %v8442_v22  ;;  %v8443_v24 = vunpack.i.l.bf16 %v8442_v22 }
 0x8f1   : > { %v7952_v7 = vpack.c.bf16 %v8444_v48, %v8443_v24 }
 0x8f3   : > { %7954 = vmatprep.subr.msk.bf16.mxu1 %vm9451_vm2, %v7952_v7 }
 0x8f4   : > { %7957 = vmatpush3.bf16.xpose.msk.msra.mxu1 %vm9451_vm2, %v7952_v7 }
 0x8f5   : > { %7991 = vmatprep.subr.bf16.mxu1 %v11432_v3 }
 0x8fb   : > { %7431 = vmatmul.mubr.msk.f32.vlgmr.msra.gmra.mrb[32].mxu1 %vm942_vm1, %v10048_v59 }
 0x8fc   : > { %7433 = vmatprep.mubr.msk.f32.mxu1 %vm942_vm1, %v10054_v30  ;;  %7993 = vmatpush3.bf16.msra.mxu1 %v11432_v3  ;;  %v3228_v3 = vsub.f32 -1e+30, %v10300_v44 }
 0x8fd   : > { %7995 = vmatprep.subr.bf16.mxu1 %v11433_v46 }
 0x8ff   : > { %7434 = vmatmul.mubr.msk.f32.gmra.mrb[34].mxu1 %vm942_vm1, %v10056_v13 }
 0x900   : > { %7997 = vmatpush3.bf16.msra.mxu1 %v11433_v46  ;;  %v3227_v46 = vsub.f32 -1e+30, %v10298_v49 }
 0x966   : > { %v7362_v1 = vpop.f32.mrb[12].mxu1 }
 0x967   : > { %v3002_v41 = vadd.f32 %v8807_v9, %v7362_v1  ;;  %v2978_v2 = vpop.f32.mrb[13].mxu1  ;;  %v3233_v1 = vmul.f32 1.442695, %v3228_v3  ;;  %v3229_v9 = vsub.f32 -1e+30, %v10304_v51 }
 0x968   : > { %v3001_v60 = vadd.f32 %v8808_v38, %v2978_v2  ;;  %v3230_v2 = vsub.f32 -1e+30, %v10310_v50 }
 0x969   : > { %3006 = vst.msk [vmem:[%s10370_s10 + $0x8] sm:$0xff] %vm282_vm0, %v3002_v41  ;;  %v3231_v41 = vmul.f32 1.442695, %v3227_v46  ;;  %8655 = vpow2.f32 %v3233_v1 }
 0x96a   : > { %3005 = vst.msk [vmem:[%s10370_s10] sm:$0xff] %vm282_vm0, %v3001_v60 }
 0x96b   : > { %8657 = vpow2.f32 %v3231_v41 }
 0x98b   : > { %v7365_v8 = vpop.f32.mrb[14].mxu1 }
 0x98c   : > { %v3004_v54 = vadd.f32 %v8809_v28, %v7365_v8  ;;  %v2988_v37 = vpop.f32.mrb[15].mxu1  ;;  %v3235_v28 = vmul.f32 1.442695, %v3229_v9 }
 0x98d   : > { %v3003_v61 = vadd.f32 %v8810_v55, %v2988_v37 }
 0x98e   : > { %3008 = vst.msk [vmem:[%s10370_s10 + $0x18] sm:$0xff] %vm282_vm0, %v3004_v54  ;;  %8659 = vpow2.f32 %v3235_v28 }
 0x98f   : > { %3007 = vst.msk [vmem:[%s10370_s10 + $0x10] sm:$0xff] %vm282_vm0, %v3003_v61  ;;  %v10382_v16 = vpop.f32.mrb[28].mxu1  ;;  %v3237_v61 = vmul.f32 1.442695, %v3230_v2 }
 0x990   : > { %v10384_v42 = vpop.f32.mrb[29].mxu1 }
 0x993   : > { %v10386_v52 = vpop.f32.mrb[30].mxu1 }
 0x994   : > { %v10388_v20 = vpop.f32.mrb[31].mxu1 }
 0x9ce   : > { %v7432_v11 = vpop.f32.mrb[32].mxu1 }
 0x9cf   : > { %v3583_v53 = vsel %vm9606_vm3, %v7432_v11, -1e+30  ;;  %v3563_v62 = vpop.f32.mrb[33].mxu1 }
 0x9d0   : > { %v3589_v40 = vsel %vm1165_vm5, %v3583_v53, -inf  ;;  %v3582_v56 = vsel %vm9610_vm4, %v3563_v62, -1e+30 }
 0x9d1   : > { %v3586_v57 = vsel %vm1165_vm5, %v3582_v56, -inf  ;;  %3590 = vmax.xlane.f32.xlu1 %v3589_v40 }
 0x9d2   : > { %3587 = vmax.xlane.f32.xlu0 %v3586_v57  ;;  %v7435_v39 = vpop.f32.mrb[34].mxu1 }
 0x9d3   : > { %v3573_v12 = vpop.f32.mrb[35].mxu1  ;;  %v3585_v24 = vsel %vm9622_vm6, %v7435_v39, -1e+30 }
 0x9d4   : > { %v3584_v22 = vsel %vm9632_vm7, %v3573_v12, -1e+30  ;;  %v3595_v7 = vsel %vm1165_vm5, %v3585_v24, -inf }
 0x9d5   : > { %v3592_v48 = vsel %vm1165_vm5, %v3584_v22, -inf }
 0x9d6   : > { %3593 = vmax.xlane.f32.xlu0 %v3592_v48 }
 0x9da   : > { %3596 = vmax.xlane.f32.xlu0 %v3595_v7 }
 0x9e2   : > { %3763 = vrot.lane.b32.xlu1 %v9983_v15, %s8920_s15 }
 0x9e6   : > { %3765 = vrot.lane.b32.xlu1 %v9995_v36, %s8920_s15 }
 0x9ea   : > { %3767 = vrot.lane.b32.xlu1 %v10002_v23, %s8920_s15 }
 0x9ee   : > { %3864 = vrot.lane.b32.xlu1 %v10048_v59, %s11434_s12 }
 0x9f0   : > { %3761 = vrot.lane.b32.xlu0 %v9972_v47, %s8920_s15  ;;  %s11438_s15 = smov 24  }
 0x9f2   : > { %3868 = vrot.lane.b32.xlu1 %v10056_v13, %s11434_s12 }
 0x9f4   : > { %3862 = vrot.lane.b32.xlu0 %v10036_v29, %s11434_s12 }
 0x9f8   : > { %3866 = vrot.lane.b32.xlu0 %v10054_v30, %s11434_s12  ;;  %s11460_s12 = smov 40  }
 0xa5e   : > { %v3591_v38 = vpop.xlane.xlu1 %3590 }
 0xa5f   : > { %v3599_v60 = vmax.f32 %v10300_v44, %v3591_v38  ;;  %v3588_v8 = vpop.xlane.xlu0 %3587 }
 0xa60   : > { %v3598_v54 = vmax.f32 %v10298_v49, %v3588_v8 }
 0xa61   : > { %v3603_v37 = vsub.f32 %v10300_v44, %v3599_v60  ;;  %v3615_v55 = vsub.f32 %v3583_v53, %v3599_v60 }
 0xa62   : > { %v3602_v11 = vsub.f32 %v10298_v49, %v3598_v54  ;;  %v3614_v62 = vsub.f32 %v3582_v56, %v3598_v54  ;;  %v8656_v56 = vpop.eup %8655 }
 0xa63   : > { %v3608_v40 = vmul.f32 1.442695, %v3603_v37  ;;  %v3594_v57 = vpop.xlane.xlu0 %3593  ;;  %v3620_v7 = vmul.f32 1.442695, %v3615_v55  ;;  %v8658_v2 = vpop.eup %8657  ;;  %v10430_v38 = vmul.f32 0.0, %v8656_v56 }
 0xa64   : > { %v3606_v39 = vmul.f32 1.442695, %v3602_v11  ;;  %v3618_v12 = vmul.f32 1.442695, %v3614_v62  ;;  %v3600_v48 = vmax.f32 %v10304_v51, %v3594_v57  ;;  %v10434_v28 = vmul.f32 0.0, %v8658_v2 }
 0xa65   : > { %8661 = vpow2.f32 %v3608_v40  ;;  %v3369_v8 = vadd.f32 %v10382_v16, %v10430_v38 }
 0xa66   : > { %8663 = vpow2.f32 %v3237_v61  ;;  %v3604_v3 = vsub.f32 %v10304_v51, %v3600_v48  ;;  %v3616_v46 = vsub.f32 %v3584_v22, %v3600_v48  ;;  %v8660_v22 = vpop.eup %8659  ;;  %v11435_v48 = vld [vmem:[#allocation13_spill] sm:$0xff] }
 0xa67   : > { %8665 = vpow2.f32 %v3606_v39  ;;  %v3597_v44 = vpop.xlane.xlu0 %3596  ;;  %v10443_v61 = vmul.f32 0.0, %v8660_v22 }
 0xa68   : > { %8667 = vpow2.f32 %v3618_v12  ;;  %v3610_v53 = vmul.f32 1.442695, %v3604_v3  ;;  %v3622_v1 = vmul.f32 1.442695, %v3616_v46  ;;  %v3601_v49 = vmax.f32 %v10310_v50, %v3597_v44 }
 0xa69   : > { %8669 = vpow2.f32 %v3620_v7  ;;  %v3370_v40 = vadd.f32 %v10388_v20, %v10443_v61 }
 0xa6a   : > { %8671 = vpow2.f32 %v3610_v53  ;;  %v3605_v9 = vsub.f32 %v10310_v50, %v3601_v49  ;;  %v3617_v41 = vsub.f32 %v3585_v24, %v3601_v49  ;;  %v3368_v50 = vadd.f32 %v10384_v42, %v10434_v28 }
 0xa6b   : > { %8673 = vpow2.f32 %v3622_v1  ;;  %v10478_v44 = vpop.permute.xlu0 %3761  ;;  %v11437_v1 = vld [vmem:[#allocation15_spill] sm:$0xff] }
 0xa6c   : > { %v3612_v60 = vmul.f32 1.442695, %v3605_v9  ;;  %v3624_v51 = vmul.f32 1.442695, %v3617_v41 }
 0xa6e   : > { %8675 = vpow2.f32 %v3612_v60 }
 0xa6f   : > { %v10436_v54 = vpop.eup %8661  ;;  %8677 = vpow2.f32 %v3624_v51  ;;  %v10506_v56 = vpop.permute.xlu0 %3862 }
 0xa70   : > { %v8664_v37 = vpop.eup %8663  ;;  %v3647_v24 = vmul.f32 %v10436_v54, %v3369_v8 }
 0xa71   : > { %v10441_v55 = vpop.eup %8665  ;;  %v10460_v39 = vmul.f32 0.0, %v8664_v37 }
 0xa72   : > { %v10445_v11 = vpop.eup %8667  ;;  %v3646_v16 = vmul.f32 %v10441_v55, %v3368_v50 }
 0xa73   : > { %v10448_v62 = vpop.eup %8669  ;;  %7444 = vmatprep.mubr.msk.f32.mxu0 %vm1165_vm5, %v10445_v11  ;;  %v3371_v20 = vadd.f32 %v10386_v52, %v10460_v39  ;;  %v11436_v52 = vld [vmem:[#allocation14_spill] sm:$0xff]  ;;  %v10517_v41 = vpop.permute.xlu0 %3866 }
 0xa74   : > { %v10454_v57 = vpop.eup %8671  ;;  %7445 = vmatmul.mubr.msk.f32.vlgmr.msra.gmra.mrb[28].mxu0 %vm1165_vm5, %v10448_v62 }
 0xa75   : > { %v10458_v42 = vpop.eup %8673  ;;  %7971 = vmatpush3.bf16.xpose.msk.msra.mxu0 %vm9451_vm2, %v9463_v63  ;;  %v3648_v12 = vmul.f32 %v10454_v57, %v3370_v40  ;;  %v10482_v63 = vpop.permute.xlu1 %3763 }
 0xa76   : > { %7974 = vmatprep.subr.msk.bf16.mxu0 %vm9451_vm2, %v11435_v48  ;;  %7447 = vmatprep.mubr.msk.f32.mxu0 %vm1165_vm5, %v10458_v42 }
 0xa78   : > { %v10473_v7 = vpop.eup %8675 }
 0xa79   : > { %v10475_v3 = vpop.eup %8677  ;;  %v3649_v46 = vmul.f32 %v10473_v7, %v3371_v20  ;;  %v10492_v53 = vpop.permute.xlu1 %3765 }
 0xa7a   : > { %7448 = vmatmul.mubr.msk.f32.gmra.mrb[30].mxu0 %vm1165_vm5, %v10475_v3 }
 0xa7b   : > { %7458 = vmatprep.mubr.msk.f32.mxu0 %vm942_vm1, %v10478_v44 }
 0xa7d   : > { %7977 = vmatpush3.bf16.xpose.msk.msra.mxu0 %vm9451_vm2, %v11435_v48  ;;  %v10504_v49 = vpop.permute.xlu1 %3767 }
 0xa7e   : > { %7980 = vmatprep.subr.msk.bf16.mxu0 %vm9451_vm2, %v11436_v52 }
 0xa81   : > { %v10515_v9 = vpop.permute.xlu1 %3864 }
 0xa84   : > { %7459 = vmatmul.mubr.msk.f32.vlgmr.msra.gmra.mrb[32].mxu0 %vm942_vm1, %v10482_v63 }
 0xa85   : > { %7461 = vmatprep.mubr.msk.f32.mxu0 %vm942_vm1, %v10492_v53  ;;  %7983 = vmatpush3.bf16.xpose.msk.msra.mxu0 %vm9451_vm2, %v11436_v52  ;;  %v10523_v2 = vpop.permute.xlu1 %3868 }
 0xa86   : > { %7986 = vmatprep.subr.msk.bf16.mxu0 %vm9451_vm2, %v11437_v1 }
 0xa88   : > { %7462 = vmatmul.mubr.msk.f32.gmra.mrb[34].mxu0 %vm942_vm1, %v10504_v49 }
 0xa89   : > { %7472 = vmatprep.mubr.msk.f32.mxu0 %vm942_vm1, %v10506_v56 }
 0xa8d   : > { %7989 = vmatpush3.bf16.xpose.msk.msra.mxu0 %vm9451_vm2, %v11437_v1 }
 0xa94   : > { %7473 = vmatmul.mubr.msk.f32.vlgmr.msra.gmra.mrb[32].mxu0 %vm942_vm1, %v10515_v9 }
 0xa95   : > { %7475 = vmatprep.mubr.msk.f32.mxu0 %vm942_vm1, %v10517_v41 }
 0xa98   : > { %7476 = vmatmul.mubr.msk.f32.gmra.mrb[34].mxu0 %vm942_vm1, %v10523_v2 }
 0xb47   : > { %v7446_v60 = vpop.f32.mrb[28].mxu0 }
 0xb48   : > { %v10527_v51 = vadd.f32 %v7446_v60, %v3647_v24  ;;  %v3728_v22 = vpop.f32.mrb[29].mxu0 }
 0xb49   : > { %v10529_v8 = vadd.f32 %v3728_v22, %v3646_v16 }
 0xb4d   : > { %v7449_v37 = vpop.f32.mrb[30].mxu0 }
 0xb4e   : > { %v10531_v50 = vadd.f32 %v7449_v37, %v3649_v46  ;;  %v3738_v40 = vpop.f32.mrb[31].mxu0 }
 0xb4f   : > { %v10533_v48 = vadd.f32 %v3738_v40, %v3648_v12 }
 0xb67   : > { %v7474_v20 = vpop.f32.mrb[32].mxu0 }
 0xb68   : > { %v3944_v52 = vpop.f32.mrb[33].mxu0  ;;  %v3966_v1 = vsel %vm1165_vm5, %v7474_v20, -inf }
 0xb69   : > { %3967 = vmax.xlane.f32.xlu1 %v3966_v1  ;;  %v3963_v14 = vsel %vm1165_vm5, %v3944_v52, -inf }
 0xb6a   : > { %3964 = vmax.xlane.f32.xlu0 %v3963_v14 }
 0xb6b   : > { %v7477_v58 = vpop.f32.mrb[34].mxu0 }
 0xb6c   : > { %v3954_v24 = vpop.f32.mrb[35].mxu0  ;;  %v3972_v60 = vsel %vm1165_vm5, %v7477_v58, -inf }
 0xb6d   : > { %v3969_v16 = vsel %vm1165_vm5, %v3954_v24, -inf }
 0xb6e   : > { %3973 = vmax.xlane.f32.xlu0 %v3972_v60 }
 0xb72   : > { %3970 = vmax.xlane.f32.xlu0 %v3969_v16 }
 0xb7a   : > { %8451 = vrot.lane.b32.xlu1 %v10266_v18, %s11438_s15 }
 0xb7e   : > { %8456 = vrot.lane.b32.xlu1 %v10272_v32, %s11439_s26 }
 0xb82   : > { %8461 = vrot.lane.b32.xlu1 %v10286_v4, %s11439_s26 }
 0xb88   : > { %8446 = vrot.lane.b32.xlu0 %v10260_v35, %s11438_s15 }
 0xbf6   : > { %v3968_v14 = vpop.xlane.xlu1 %3967 }
 0xbf7   : > { %v10547_v12 = vmax.f32 %v3968_v14, -1e+30  ;;  %v3965_v46 = vpop.xlane.xlu0 %3964 }
 0xbf8   : > { %v10549_v22 = vmax.f32 %v3965_v46, -1e+30 }
 0xbf9   : > { %v3992_v37 = vsub.f32 %v7474_v20, %v10547_v12 }
 0xbfa   : > { %v3991_v40 = vsub.f32 %v3944_v52, %v10549_v22  ;;  %v8452_v46 = vpop.permute.xlu1 %8451 }
 0xbfb   : > { %v3997_v1 = vmul.f32 1.442695, %v3992_v37  ;;  %v3974_v60 = vpop.xlane.xlu0 %3973  ;;  %v8454_v37 = vunpack.i.h.bf16 %v8452_v46  ;;  %v8453_v18 = vunpack.i.l.bf16 %v8452_v46 }
 0xbfc   : > { %v3995_v16 = vmul.f32 1.442695, %v3991_v40  ;;  %v10553_v5 = vmax.f32 %v3974_v60, -1e+30 }
 0xbfe   : > { %8679 = vpow2.f32 %v3995_v16  ;;  %v3994_v31 = vsub.f32 %v7477_v58, %v10553_v5 }
 0xbff   : > { %8681 = vpow2.f32 %v3997_v1  ;;  %v3971_v27 = vpop.xlane.xlu0 %3970 }
 0xc00   : > { %v10556_v6 = vmax.f32 %v3971_v27, -1e+30  ;;  %v4001_v35 = vmul.f32 1.442695, %v3994_v31  ;;  %v8004_v27 = vpack.c.bf16 %v8454_v37, %v8453_v18  ;;  %v8457_v31 = vpop.permute.xlu1 %8456 }
 0xc02   : > { %v3993_v14 = vsub.f32 %v3954_v24, %v10556_v6 }
 0xc03   : > { %v8447_v4 = vpop.permute.xlu0 %8446 }
 0xc04   : > { %v3999_v20 = vmul.f32 1.442695, %v3993_v14  ;;  %v8449_v32 = vunpack.i.h.bf16 %v8447_v4  ;;  %v8448_v52 = vunpack.i.l.bf16 %v8447_v4  ;;  %v8462_v18 = vpop.permute.xlu1 %8461 }
 0xc05   : > { %v8464_v16 = vunpack.i.h.bf16 %v8462_v18  ;;  %v8463_v14 = vunpack.i.l.bf16 %v8462_v18 }
 0xc06   : > { %8683 = vpow2.f32 %v3999_v20  ;;  %v7998_v40 = vpack.c.bf16 %v8449_v32, %v8448_v52  ;;  %v8458_v32 = vunpack.i.l.bf16 %v8457_v31 }
 0xc07   : > { %8685 = vpow2.f32 %v4001_v35  ;;  %v8459_v35 = vunpack.i.h.bf16 %v8457_v31  ;;  %v8016_v46 = vpack.c.bf16 %v8464_v16, %v8463_v14 }
 0xc08   : > { %v8680_v60 = vpop.eup %8679  ;;  %8000 = vmatprep.subr.msk.bf16.mxu1 %vm9451_vm2, %v7998_v40 }
 0xc09   : > { %v10561_v58 = vpop.eup %8681  ;;  %7486 = vmatprep.mubr.msk.f32.mxu1 %vm1165_vm5, %v8680_v60  ;;  %v8010_v1 = vpack.c.bf16 %v8459_v35, %v8458_v32  ;;  %v11441_v35 = vld [vmem:[#allocation20_spill] sm:$0xff] }
 0xc0a   : > { %7487 = vmatmul.mubr.msk.f32.vlgmr.msra.gmra.mrb[36].mxu1 %vm1165_vm5, %v10561_v58  ;;  %v11442_v32 = vld [vmem:[#allocation12_spill] sm:$0xff]  ;;  %v4010_v14 = vsel %vm1165_vm5, %v10561_v58, 0.0 }
 0xc0b   : > { %8003 = vmatpush3.bf16.xpose.msk.msra.mxu1 %vm9451_vm2, %v7998_v40 }
 0xc0c   : > { %8006 = vmatprep.subr.msk.bf16.mxu1 %vm9451_vm2, %v8004_v27 }
 0xc10   : > { %v8684_v4 = vpop.eup %8683 }
 0xc11   : > { %v8686_v24 = vpop.eup %8685  ;;  %7489 = vmatprep.mubr.msk.f32.mxu1 %vm1165_vm5, %v8684_v4  ;;  %v4013_v18 = vsel %vm1165_vm5, %v8684_v4, 0.0 }
 0xc12   : > { %7490 = vmatmul.mubr.msk.f32.gmra.mrb[38].mxu1 %vm1165_vm5, %v8686_v24  ;;  %v4016_v16 = vsel %vm1165_vm5, %v8686_v24, 0.0 }
 0xc13   : > { %8009 = vmatpush3.bf16.xpose.msk.msra.mxu1 %vm9451_vm2, %v8004_v27  ;;  %7500 = vmatprep.mubr.msk.f32.mxu1 %vm942_vm1, %v10478_v44 }
 0xc14   : > { %8012 = vmatprep.subr.msk.bf16.mxu1 %vm9451_vm2, %v8010_v1 }
 0xc1a   : > { %7501 = vmatmul.mubr.msk.f32.vlgmr.msra.gmra.mrb[40].mxu1 %vm942_vm1, %v10482_v63 }
 0xc1b   : > { %7503 = vmatprep.mubr.msk.f32.mxu1 %vm942_vm1, %v10492_v53  ;;  %8015 = vmatpush3.bf16.xpose.msk.msra.mxu1 %vm9451_vm2, %v8010_v1  ;;  %v4007_v1 = vsel %vm1165_vm5, %v8680_v60, 0.0  ;;  %v3981_v60 = vsub.f32 -1e+30, %v10556_v6 }
 0xc1c   : > { %8018 = vmatprep.subr.msk.bf16.mxu1 %vm9451_vm2, %v8016_v46 }
 0xc1e   : > { %7504 = vmatmul.mubr.msk.f32.gmra.mrb[42].mxu1 %vm942_vm1, %v10504_v49 }
 0xc1f   : > { %7514 = vmatprep.mubr.msk.f32.mxu1 %vm942_vm1, %v10506_v56 }
 0xc23   : > { %8021 = vmatpush3.bf16.xpose.msk.msra.mxu1 %vm9451_vm2, %v8016_v46  ;;  %v3980_v46 = vsub.f32 -1e+30, %v10547_v12 }
 0xc24   : > { %8063 = vmatprep.subr.bf16.mxu1 %v9940_v21 }
 0xc2a   : > { %7515 = vmatmul.mubr.msk.f32.vlgmr.msra.gmra.mrb[40].mxu1 %vm942_vm1, %v10515_v9 }
 0xc2b   : > { %7517 = vmatprep.mubr.msk.f32.mxu1 %vm942_vm1, %v10517_v41  ;;  %8065 = vmatpush3.bf16.msra.mxu1 %v9940_v21 }
 0xc2c   : > { %8067 = vmatprep.subr.bf16.mxu1 %v9962_v26 }
 0xc2e   : > { %7518 = vmatmul.mubr.msk.f32.gmra.mrb[42].mxu1 %vm942_vm1, %v10523_v2 }
 0xc2f   : > { %8069 = vmatpush3.bf16.msra.mxu1 %v9962_v26 }
 0xcdd   : > { %v10602_v44 = vpop.f32.mrb[36].mxu1 }
 0xcde   : > { %v10604_v63 = vpop.f32.mrb[37].mxu1 }
 0xce5   : > { %v10606_v53 = vpop.f32.mrb[38].mxu1 }
 0xce6   : > { %v10608_v49 = vpop.f32.mrb[39].mxu1 }
 0xcfd   : > { %v7516_v56 = vpop.f32.mrb[40].mxu1 }
 0xcfe   : > { %v4327_v9 = vsel %vm9606_vm3, %v7516_v56, -1e+30  ;;  %v4307_v21 = vpop.f32.mrb[41].mxu1  ;;  %v3979_v56 = vsub.f32 -1e+30, %v10549_v22 }
 0xcff   : > { %v4333_v41 = vsel %vm1165_vm5, %v4327_v9, -inf  ;;  %v4326_v2 = vsel %vm9610_vm4, %v4307_v21, -1e+30  ;;  %v3985_v21 = vmul.f32 1.442695, %v3980_v46 }
 0xd00   : > { %v4330_v26 = vsel %vm1165_vm5, %v4326_v2, -inf  ;;  %4334 = vmax.xlane.f32.xlu1 %v4333_v41  ;;  %v3982_v41 = vsub.f32 -1e+30, %v10553_v5 }
 0xd01   : > { %4331 = vmax.xlane.f32.xlu0 %v4330_v26  ;;  %v7519_v20 = vpop.f32.mrb[42].mxu1  ;;  %v3983_v26 = vmul.f32 1.442695, %v3979_v56  ;;  %8687 = vpow2.f32 %v3985_v21 }
 0xd02   : > { %v10618_v52 = vsel %vm9622_vm6, %v7519_v20, -1e+30  ;;  %v4317_v37 = vpop.f32.mrb[43].mxu1  ;;  %v3989_v20 = vmul.f32 1.442695, %v3982_v41 }
 0xd03   : > { %v4339_v40 = vsel %vm1165_vm5, %v10618_v52, -inf  ;;  %v4328_v27 = vsel %vm9632_vm7, %v4317_v37, -1e+30  ;;  %8689 = vpow2.f32 %v3983_v26 }
 0xd04   : > { %v4336_v31 = vsel %vm1165_vm5, %v4328_v27, -inf  ;;  %8691 = vpow2.f32 %v3989_v20 }
 0xd05   : > { %4340 = vmax.xlane.f32.xlu0 %v4339_v40  ;;  %v3987_v40 = vmul.f32 1.442695, %v3981_v60 }
 0xd07   : > { %8693 = vpow2.f32 %v3987_v40 }
 0xd09   : > { %4337 = vmax.xlane.f32.xlu0 %v4336_v31 }
 0xd11   : > { %8471 = vrot.lane.b32.xlu1 %v11441_v35, %s11440_s14 }
 0xd1f   : > { %8466 = vrot.lane.b32.xlu0 %v11442_v32, %s11440_s14 }
 0xd35   : > { %4008 = vadd.xlane.f32.xlu1 %v4007_v1 }
 0xd39   : > { %4014 = vadd.xlane.f32.xlu1 %v4013_v18 }
 0xd3d   : > { %4017 = vadd.xlane.f32.xlu1 %v4016_v16 }
 0xd3e   : > { %4011 = vadd.xlane.f32.xlu0 %v4010_v14 }
 0xd8d   : > { %v4335_v4 = vpop.xlane.xlu1 %4334 }
 0xd8e   : > { %v4343_v24 = vmax.f32 %v10547_v12, %v4335_v4  ;;  %v4332_v37 = vpop.xlane.xlu0 %4331 }
 0xd8f   : > { %v4342_v58 = vmax.f32 %v10549_v22, %v4332_v37 }
 0xd90   : > { %v4347_v31 = vsub.f32 %v10547_v12, %v4343_v24  ;;  %v4359_v1 = vsub.f32 %v4327_v9, %v4343_v24  ;;  %v8688_v12 = vpop.eup %8687 }
 0xd91   : > { %v4346_v18 = vsub.f32 %v10549_v22, %v4342_v58  ;;  %v4358_v16 = vsub.f32 %v4326_v2, %v4342_v58  ;;  %v8472_v9 = vpop.permute.xlu1 %8471  ;;  %v8690_v40 = vpop.eup %8689  ;;  %v10647_v58 = vmul.f32 0.0, %v8688_v12 }
 0xd92   : > { %v4352_v14 = vmul.f32 1.442695, %v4347_v31  ;;  %v4364_v46 = vmul.f32 1.442695, %v4359_v1  ;;  %v4341_v56 = vpop.xlane.xlu0 %4340  ;;  %v8474_v31 = vunpack.i.h.bf16 %v8472_v9  ;;  %v8473_v1 = vunpack.i.l.bf16 %v8472_v9 }
 0xd93   : > { %v4350_v21 = vmul.f32 1.442695, %v4346_v18  ;;  %v4362_v41 = vmul.f32 1.442695, %v4358_v16  ;;  %v4345_v4 = vmax.f32 %v10553_v5, %v4341_v56  ;;  %v8692_v56 = vpop.eup %8691 }
 0xd94   : > { %8695 = vpow2.f32 %v4352_v14  ;;  %v8026_v12 = vpack.c.bf16 %v8474_v31, %v8473_v1 }
 0xd95   : > { %8697 = vpow2.f32 %v4364_v46  ;;  %v4349_v60 = vsub.f32 %v10553_v5, %v4345_v4  ;;  %v4361_v20 = vsub.f32 %v10618_v52, %v4345_v4  ;;  %v4121_v52 = vadd.f32 %v10602_v44, %v10647_v58 }
 0xd96   : > { %8699 = vpow2.f32 %v4350_v21  ;;  %v4338_v26 = vpop.xlane.xlu0 %4337  ;;  %v10651_v4 = vmul.f32 0.0, %v8690_v40 }
 0xd97   : > { %8701 = vpow2.f32 %v4362_v41  ;;  %v4356_v22 = vmul.f32 1.442695, %v4349_v60  ;;  %v4344_v2 = vmax.f32 %v10556_v6, %v4338_v26  ;;  %v4368_v21 = vmul.f32 1.442695, %v4361_v20  ;;  %v8694_v41 = vpop.eup %8693 }
 0xd98   : > { %v4120_v26 = vadd.f32 %v10604_v63, %v10651_v4  ;;  %v10673_v40 = vmul.f32 0.0, %v8694_v41  ;;  %v3633_v41 = vsel %vm1165_vm5, %v10448_v62, 0.0 }
 0xd99   : > { %8703 = vpow2.f32 %v4356_v22  ;;  %v4348_v24 = vsub.f32 %v10556_v6, %v4344_v2  ;;  %v4360_v37 = vsub.f32 %v4328_v27, %v4344_v2  ;;  %v10662_v2 = vmul.f32 0.0, %v8692_v56 }
 0xd9a   : > { %v8467_v5 = vpop.permute.xlu0 %8466 }
 0xd9b   : > { %v4354_v18 = vmul.f32 1.442695, %v4348_v24  ;;  %v4366_v16 = vmul.f32 1.442695, %v4360_v37  ;;  %v8469_v14 = vunpack.i.h.bf16 %v8467_v5  ;;  %v8468_v46 = vunpack.i.l.bf16 %v8467_v5 }
 0xd9c   : > { %v4123_v63 = vadd.f32 %v10606_v53, %v10662_v2  ;;  %v4122_v5 = vadd.f32 %v10608_v49, %v10673_v40  ;;  %v3258_v49 = vsel %vm1165_vm5, %v10319_v10, 0.0  ;;  %v3636_v10 = vsel %vm1165_vm5, %v10458_v42, 0.0  ;;  %v3759_v42 = vld [vmem:[%s11275_s3] sm:$0xff] }
 0xd9d   : > { %8705 = vpow2.f32 %v4354_v18  ;;  %v8022_v6 = vpack.c.bf16 %v8469_v14, %v8468_v46 }
 0xd9e   : > { %v10653_v27 = vpop.eup %8695  ;;  %8707 = vpow2.f32 %v4366_v16  ;;  %v3255_v16 = vsel %vm1165_vm5, %v10314_v33, 0.0  ;;  %v3630_v33 = vsel %vm1165_vm5, %v10445_v11, 0.0  ;;  %v3639_v11 = vsel %vm1165_vm5, %v10475_v3, 0.0  ;;  %v3760_v3 = vld [vmem:[%s11275_s3 + $0x8] sm:$0xff] }
 0xd9f   : > { %v8698_v60 = vpop.eup %8697  ;;  %8023 = vmatprep.subr.bf16.mxu0 %v8022_v6  ;;  %v10658_v9 = vmul.f32 %v10653_v27, %v4121_v52  ;;  %8709 = vpow2.f32 %v4368_v21  ;;  %v3261_v52 = vsel %vm1165_vm5, %v10321_v19, 0.0  ;;  %v4519_v19 = vld [vmem:[%s11275_s3 + $0x10] sm:$0xff] }
 0xda0   : > { %v10660_v22 = vpop.eup %8699  ;;  %v4377_v44 = vsel %vm1165_vm5, %v8698_v60, 0.0  ;;  %8025 = vmatpush3.bf16.msra.mxu0 %v8022_v6  ;;  %v3264_v6 = vsel %vm1165_vm5, %v10331_v25, 0.0  ;;  %v4520_v25 = vld [vmem:[%s11275_s3 + $0x18] sm:$0xff] }
 0xda1   : > { %v8702_v20 = vpop.eup %8701  ;;  %4378 = vadd.xlane.f32.xlu0 %v4377_v44  ;;  %8027 = vmatprep.subr.bf16.mxu0 %v8026_v12  ;;  %v10666_v24 = vmul.f32 %v10660_v22, %v4120_v26  ;;  %v8030_v62 = vpack.c.bf16 %v4520_v25, %v4519_v19 }
 0xda2   : > { %7528 = vmatprep.mubr.msk.f32.mxu0 %vm1165_vm5, %v8702_v20  ;;  %v4374_v31 = vsel %vm1165_vm5, %v8702_v20, 0.0 }
 0xda3   : > { %v10671_v37 = vpop.eup %8703 }
 0xda4   : > { %8029 = vmatpush3.bf16.msra.mxu0 %v8026_v12  ;;  %v10677_v1 = vmul.f32 %v10671_v37, %v4123_v63 }
 0xda5   : > { %4375 = vadd.xlane.f32.xlu0 %v4374_v31  ;;  %8031 = vmatprep.subr.bf16.mxu0 %v8030_v62 }
 0xda7   : > { %v10681_v18 = vpop.eup %8705  ;;  %7529 = vmatmul.mubr.msk.f32.vlgmr.msra.gmra.mrb[36].mxu0 %vm1165_vm5, %v8698_v60  ;;  %v10735_v60 = vpack.c.bf16 %v3760_v3, %v3759_v42 }
 0xda8   : > { %v8708_v53 = vpop.eup %8707  ;;  %v10687_v14 = vmul.f32 %v10681_v18, %v4122_v5  ;;  %8033 = vmatpush3.bf16.msra.mxu0 %v8030_v62 }
 0xda9   : > { %3256 = vadd.xlane.f32.xlu0 %v3255_v16  ;;  %7531 = vmatprep.mubr.msk.f32.mxu0 %vm1165_vm5, %v8708_v53  ;;  %v4380_v46 = vsel %vm1165_vm5, %v8708_v53, 0.0  ;;  %v8710_v56 = vpop.eup %8709 }
 0xdaa   : > { %4381 = vadd.xlane.f32.xlu1 %v4380_v46  ;;  %v4383_v21 = vsel %vm1165_vm5, %v8710_v56, 0.0  ;;  %8035 = vmatprep.subr.bf16.mxu0 %v10735_v60 }
 0xdab   : > { %7532 = vmatmul.mubr.msk.f32.gmra.mrb[38].mxu0 %vm1165_vm5, %v8710_v56 }
 0xdad   : > { %3259 = vadd.xlane.f32.xlu0 %v3258_v49 }
 0xdae   : > { %4384 = vadd.xlane.f32.xlu1 %v4383_v21 }
 0xdb1   : > { %3631 = vadd.xlane.f32.xlu0 %v3630_v33 }
 0xdb2   : > { %3634 = vadd.xlane.f32.xlu1 %v3633_v41 }
 0xdb5   : > { %3262 = vadd.xlane.f32.xlu0 %v3261_v52 }
 0xdb6   : > { %3265 = vadd.xlane.f32.xlu1 %v3264_v6 }
 0xdb9   : > { %3637 = vadd.xlane.f32.xlu0 %v3636_v10 }
 0xdba   : > { %3640 = vadd.xlane.f32.xlu1 %v3639_v11 }
 0xdc2   : > { %v4009_v26 = vpop.xlane.xlu1 %4008 }
 0xdc6   : > { %v4015_v44 = vpop.xlane.xlu1 %4014 }
 0xdca   : > { %v4018_v31 = vpop.xlane.xlu1 %4017 }
 0xdcb   : > { %4717 = vrot.lane.b32.xlu1 %v9983_v15, %s8924_s17  ;;  %v4012_v12 = vpop.xlane.xlu0 %4011 }
 0xdcf   : > { %4715 = vrot.lane.b32.xlu0 %v9972_v47, %s8924_s17  ;;  %4719 = vrot.lane.b32.xlu1 %v9995_v36, %s8924_s17 }
 0xdd3   : > { %4816 = vrot.lane.b32.xlu0 %v10036_v29, %s11440_s14  ;;  %4721 = vrot.lane.b32.xlu1 %v10002_v23, %s8924_s17 }
 0xdd7   : > { %4820 = vrot.lane.b32.xlu0 %v10054_v30, %s11440_s14  ;;  %4818 = vrot.lane.b32.xlu1 %v10048_v59, %s11440_s14 }
 0xddb   : > { %4822 = vrot.lane.b32.xlu1 %v10056_v13, %s11440_s14  ;;  %s11447_s14 = smov 16  }
 0xe2e   : > { %v4379_v20 = vpop.xlane.xlu0 %4378 }
 0xe32   : > { %v4376_v63 = vpop.xlane.xlu0 %4375 }
 0xe36   : > { %v3257_v5 = vpop.xlane.xlu0 %3256 }
 0xe37   : > { %v4382_v53 = vpop.xlane.xlu1 %4381  ;;  %v3267_v16 = vadd.f32 %v3257_v5, %v10434_v28 }
 0xe39   : > { %v3626_v21 = vmul.f32 %v10441_v55, %v3267_v16 }
 0xe3a   : > { %v3260_v46 = vpop.xlane.xlu0 %3259 }
 0xe3b   : > { %v3268_v56 = vadd.f32 %v3260_v46, %v10430_v38  ;;  %v4385_v49 = vpop.xlane.xlu1 %4384 }
 0xe3d   : > { %v3627_v33 = vmul.f32 %v10436_v54, %v3268_v56 }
 0xe3e   : > { %v3632_v41 = vpop.xlane.xlu0 %3631 }
 0xe3f   : > { %v3642_v52 = vadd.f32 %v3632_v41, %v3626_v21  ;;  %v3635_v6 = vpop.xlane.xlu1 %3634  ;;  %v4022_v41 = vadd.f32 %v4018_v31, %v10662_v2 }
 0xe40   : > { %v3643_v10 = vadd.f32 %v3635_v6, %v3627_v33  ;;  %v4020_v33 = vadd.f32 %v4012_v12, %v10647_v58  ;;  %v4021_v6 = vadd.f32 %v4015_v44, %v10673_v40 }
 0xe41   : > { %8711 = vrcp.f32 %v3642_v52 }
 0xe42   : > { %8713 = vrcp.f32 %v3643_v10  ;;  %v3263_v11 = vpop.xlane.xlu0 %3262  ;;  %v4371_v52 = vmul.f32 %v10653_v27, %v4020_v33  ;;  %v11450_v33 = vld [vmem:[#allocation8_spill] sm:$0xff] }
 0xe43   : > { %v3269_v19 = vadd.f32 %v3263_v11, %v10443_v61  ;;  %v3266_v25 = vpop.xlane.xlu1 %3265  ;;  %v4373_v11 = vmul.f32 %v10671_v37, %v4022_v41  ;;  %v11452_v41 = vld [vmem:[#allocation23_spill] sm:$0xff] }
 0xe44   : > { %v3270_v28 = vadd.f32 %v3266_v25, %v10460_v39  ;;  %v4387_v10 = vadd.f32 %v4379_v20, %v4371_v52 }
 0xe45   : > { %v3628_v62 = vmul.f32 %v10454_v57, %v3269_v19  ;;  %v11445_v19 = vld [vmem:[#allocation18_spill] sm:$0xff] }
 0xe46   : > { %v3638_v38 = vpop.xlane.xlu0 %3637  ;;  %v3629_v42 = vmul.f32 %v10473_v7, %v3270_v28  ;;  %v4019_v7 = vadd.f32 %v4009_v26, %v10651_v4  ;;  %v11446_v28 = vld [vmem:[#allocation19_spill] sm:$0xff] }
 0xe47   : > { %v3644_v55 = vadd.f32 %v3638_v38, %v3628_v62  ;;  %v3641_v3 = vpop.xlane.xlu1 %3640 }
 0xe48   : > { %v3645_v54 = vadd.f32 %v3641_v3, %v3629_v42 }
 0xe49   : > { %8715 = vrcp.f32 %v3644_v55 }
 0xe4a   : > { %8717 = vrcp.f32 %v3645_v54 }
 0xe4b   : > { %v8712_v5 = vpop.eup %8711  ;;  %8719 = vrcp.f32 %v4387_v10 }
 0xe4c   : > { %v8714_v16 = vpop.eup %8713  ;;  %v3755_v46 = vmul.f32 %v8712_v5, %v10529_v8  ;;  %v4370_v8 = vmul.f32 %v10660_v22, %v4019_v7  ;;  %v11451_v7 = vld [vmem:[#allocation26_spill] sm:$0xff] }
 0xe4d   : > { %v3756_v56 = vmul.f32 %v8714_v16, %v10527_v51 }
 0xe4e   : > { %v4386_v51 = vadd.f32 %v4376_v63, %v4370_v8 }
 0xe50   : > { %8721 = vrcp.f32 %v4386_v51 }
 0xe53   : > { %v8716_v61 = vpop.eup %8715 }
 0xe54   : > { %v8718_v21 = vpop.eup %8717  ;;  %v3757_v39 = vmul.f32 %v8716_v61, %v10533_v48  ;;  %v4372_v48 = vmul.f32 %v10681_v18, %v4021_v6 }
 0xe55   : > { %v3758_v57 = vmul.f32 %v8718_v21, %v10531_v50  ;;  %v4389_v50 = vadd.f32 %v4385_v49, %v4373_v11  ;;  %v8720_v26 = vpop.eup %8719 }
 0xe56   : > { %v4388_v58 = vadd.f32 %v4382_v53, %v4372_v48 }
 0xe57   : > { %8723 = vrcp.f32 %v4389_v50 }
 0xe58   : > { %8725 = vrcp.f32 %v4388_v58 }
 0xe5a   : > { %v8722_v22 = vpop.eup %8721 }
 0xe61   : > { %v8724_v63 = vpop.eup %8723 }
 0xe62   : > { %v8726_v53 = vpop.eup %8725 }
 0xe7a   : > { %v7530_v4 = vpop.f32.mrb[36].mxu0 }
 0xe7b   : > { %v4508_v2 = vadd.f32 %v7530_v4, %v10658_v9  ;;  %v4488_v27 = vpop.f32.mrb[37].mxu0 }
 0xe7c   : > { %v4507_v40 = vadd.f32 %v4488_v27, %v10666_v24  ;;  %v11443_v24 = vld [vmem:[#allocation16_spill] sm:$0xff] }
 0xe7d   : > { %v4516_v12 = vmul.f32 %v8720_v26, %v4508_v2 }
 0xe7e   : > { %v4515_v44 = vmul.f32 %v8722_v22, %v4507_v40  ;;  %v7533_v20 = vpop.f32.mrb[38].mxu0 }
 0xe7f   : > { %v4510_v37 = vadd.f32 %v7533_v20, %v10677_v1  ;;  %v4498_v18 = vpop.f32.mrb[39].mxu0  ;;  %v11444_v1 = vld [vmem:[#allocation17_spill] sm:$0xff] }
 0xe80   : > { %v4509_v31 = vadd.f32 %v4498_v18, %v10687_v14  ;;  %7538 = vmatprep.mubr.msk.f32.mxu0 %vm1762_vm8, %v4515_v44  ;;  %v10779_v14 = vpop.permute.xlu0 %4715 }
 0xe81   : > { %v4518_v49 = vmul.f32 %v8724_v63, %v4510_v37  ;;  %7539 = vmatmul.mubr.msk.f32.vlgmr.msra.gmra.mrb[40].mxu0 %vm1762_vm8, %v4516_v12 }
 0xe82   : > { %v4517_v9 = vmul.f32 %v8726_v53, %v4509_v31  ;;  %8037 = vmatpush3.bf16.msra.mxu0 %v10735_v60  ;;  %v10784_v60 = vpop.permute.xlu1 %4717 }
 0xe83   : > { %8040 = vmatprep.subr.msk.bf16.mxu0 %vm9451_vm2, %v11443_v24 }
 0xe84   : > { %7541 = vmatprep.mubr.msk.f32.mxu0 %vm1762_vm8, %v4517_v9  ;;  %v10806_v38 = vpop.permute.xlu0 %4816 }
 0xe85   : > { %7542 = vmatmul.mubr.msk.f32.gmra.mrb[42].mxu0 %vm1762_vm8, %v4518_v49 }
 0xe86   : > { %7548 = vmatprep.mubr.msk.f32.mxu0 %vm1762_vm8, %v3755_v46  ;;  %v10792_v25 = vpop.permute.xlu1 %4719 }
 0xe88   : > { %v10817_v55 = vpop.permute.xlu0 %4820 }
 0xe89   : > { %7549 = vmatmul.mubr.msk.f32.vlgmr.msra.gmra.mrb[40].mxu0 %vm1762_vm8, %v3756_v56 }
 0xe8a   : > { %7551 = vmatprep.mubr.msk.f32.mxu0 %vm1762_vm8, %v3757_v39  ;;  %v10804_v62 = vpop.permute.xlu1 %4721 }
 0xe8b   : > { %8043 = vmatpush3.bf16.xpose.msk.msra.mxu0 %vm9451_vm2, %v11443_v24 }
 0xe8c   : > { %8046 = vmatprep.subr.msk.bf16.mxu0 %vm9451_vm2, %v11444_v1 }
 0xe8d   : > { %7552 = vmatmul.mubr.msk.f32.gmra.mrb[42].mxu0 %vm1762_vm8, %v3758_v57  ;;  %v11448_v57 = vld [vmem:[#allocation25_spill] sm:$0xff] }
 0xe8e   : > { %7562 = vmatprep.mubr.msk.f32.mxu0 %vm942_vm1, %v10779_v14  ;;  %v10815_v42 = vpop.permute.xlu1 %4818 }
 0xe92   : > { %v10823_v3 = vpop.permute.xlu1 %4822 }
 0xe93   : > { %8049 = vmatpush3.bf16.xpose.msk.msra.mxu0 %vm9451_vm2, %v11444_v1 }
 0xe94   : > { %8052 = vmatprep.subr.msk.bf16.mxu0 %vm9451_vm2, %v11445_v19 }
 0xe9a   : > { %7563 = vmatmul.mubr.msk.f32.vlgmr.msra.gmra.mrb[44].mxu0 %vm942_vm1, %v10784_v60 }
 0xe9b   : > { %7565 = vmatprep.mubr.msk.f32.mxu0 %vm942_vm1, %v10792_v25  ;;  %8055 = vmatpush3.bf16.xpose.msk.msra.mxu0 %vm9451_vm2, %v11445_v19 }
 0xe9c   : > { %8058 = vmatprep.subr.msk.bf16.mxu0 %vm9451_vm2, %v11446_v28 }
 0xe9e   : > { %7566 = vmatmul.mubr.msk.f32.gmra.mrb[46].mxu0 %vm942_vm1, %v10804_v62 }
 0xe9f   : > { %7576 = vmatprep.mubr.msk.f32.mxu0 %vm942_vm1, %v10806_v38 }
 0xea3   : > { %8061 = vmatpush3.bf16.xpose.msk.msra.mxu0 %vm9451_vm2, %v11446_v28  ;;  %v11456_v28 = vld [vmem:[#allocation29_spill] sm:$0xff] }
 0xeaa   : > { %7577 = vmatmul.mubr.msk.f32.vlgmr.msra.gmra.mrb[44].mxu0 %vm942_vm1, %v10815_v42 }
 0xeab   : > { %7579 = vmatprep.mubr.msk.f32.mxu0 %vm942_vm1, %v10817_v55 }
 0xeae   : > { %7580 = vmatmul.mubr.msk.f32.gmra.mrb[46].mxu0 %vm942_vm1, %v10823_v3 }
 0xf7d   : > { %v7578_v54 = vpop.f32.mrb[44].mxu0 }
 0xf7e   : > { %v4898_v5 = vpop.f32.mrb[45].mxu0  ;;  %v4920_v16 = vsel %vm1165_vm5, %v7578_v54, -inf }
 0xf7f   : > { %4921 = vmax.xlane.f32.xlu1 %v4920_v16  ;;  %v4917_v46 = vsel %vm1165_vm5, %v4898_v5, -inf }
 0xf80   : > { %4918 = vmax.xlane.f32.xlu0 %v4917_v46 }
 0xf81   : > { %v7581_v56 = vpop.f32.mrb[46].mxu0 }
 0xf82   : > { %v4908_v61 = vpop.f32.mrb[47].mxu0  ;;  %v4926_v21 = vsel %vm1165_vm5, %v7581_v56, -inf }
 0xf83   : > { %v4923_v39 = vsel %vm1165_vm5, %v4908_v61, -inf }
 0xf84   : > { %4927 = vmax.xlane.f32.xlu0 %v4926_v21 }
 0xf88   : > { %4924 = vmax.xlane.f32.xlu0 %v4923_v39 }
 0xf90   : > { %8481 = vrot.lane.b32.xlu1 %v11448_v57, %s11447_s14 }
 0xf94   : > { %8486 = vrot.lane.b32.xlu1 %v11450_v33, %s11449_s11 }
 0xf98   : > { %8491 = vrot.lane.b32.xlu1 %v11451_v7, %s11449_s11  ;;  %s6821_s11 = sshll.u32 %s8988_s25, 10  ;;  %s11230_s25 = scalar_lea.sflag [#allocation4], %s257_s19 }
 0xf99   : > { %s11219_s20 = scalar_lea.hbm %s11278_s6, %s6821_s11 }
 0xf9c   : > { %5574 = vrot.lane.b32.xlu1 %v9983_v15, %s8928_s29 }
 0xf9e   : > { %8476 = vrot.lane.b32.xlu0 %v11452_v41, %s11447_s14 }
 0xfa0   : > { %5578 = vrot.lane.b32.xlu1 %v10002_v23, %s8928_s29 }
 0xfa2   : > { %5572 = vrot.lane.b32.xlu0 %v9972_v47, %s8928_s29 }
 0xfa4   : > { %5675 = vrot.lane.b32.xlu1 %v10048_v59, %s11453_s18 }
 0xfa6   : > { %5576 = vrot.lane.b32.xlu0 %v9995_v36, %s8928_s29 }
 0xfa8   : > { %5679 = vrot.lane.b32.xlu1 %v10056_v13, %s11453_s18 }
 0xfaa   : > { %5673 = vrot.lane.b32.xlu0 %v10036_v29, %s11453_s18 }
 0xfae   : > { %5677 = vrot.lane.b32.xlu0 %v10054_v30, %s11453_s18  ;;  %s6451_s18 = sshll.u32 %s10370_s10, 4  ;;  %s11222_s18 = int_to_ptr.vmem [resolvable:$true] %s6451_s18 }
 0xfaf   : > { %s8843_s9 = scalar_lea.vmem %s11222_s18, 1024 }
 0xfb0   : > { %p8844_p6 = scmp.ne.s32.totalorder %s11222_s18, %s8843_s9 }
 0xfb2   : > { %p8845_p10 = pnand %p8844_p6, %p11462_p9 }
 0xfb4   : > { %p8846_p12 = pneg %p8845_p10 }
0x100c   : > { %v4922_v15 = vpop.xlane.xlu1 %4921 }
0x100d   : > { %v10855_v23 = vmax.f32 %v4922_v15, -1e+30  ;;  %v4919_v52 = vpop.xlane.xlu0 %4918 }
0x100e   : > { %v10857_v47 = vmax.f32 %v4919_v52, -1e+30 }
0x100f   : > { %v4946_v59 = vsub.f32 %v7578_v54, %v10855_v23 }
0x1010   : > { %v4945_v6 = vsub.f32 %v4898_v5, %v10857_v47  ;;  %v8482_v48 = vpop.permute.xlu1 %8481 }
0x1011   : > { %v4951_v36 = vmul.f32 1.442695, %v4946_v59  ;;  %v4928_v8 = vpop.xlane.xlu0 %4927  ;;  %v8484_v26 = vunpack.i.h.bf16 %v8482_v48  ;;  %v8483_v40 = vunpack.i.l.bf16 %v8482_v48 }
0x1012   : > { %v4949_v10 = vmul.f32 1.442695, %v4945_v6  ;;  %v10861_v13 = vmax.f32 %v4928_v8, -1e+30 }
0x1013   : > { %v8076_v20 = vpack.c.bf16 %v8484_v26, %v8483_v40 }
0x1014   : > { %8727 = vpow2.f32 %v4949_v10  ;;  %v4948_v29 = vsub.f32 %v7581_v56, %v10861_v13  ;;  %v8487_v37 = vpop.permute.xlu1 %8486 }
0x1015   : > { %8729 = vpow2.f32 %v4951_v36  ;;  %v4925_v30 = vpop.xlane.xlu0 %4924  ;;  %v8489_v18 = vunpack.i.h.bf16 %v8487_v37  ;;  %v8488_v63 = vunpack.i.l.bf16 %v8487_v37  ;;  %v4933_v37 = vsub.f32 -1e+30, %v10857_v47 }
0x1016   : > { %v10864_v51 = vmax.f32 %v4925_v30, -1e+30  ;;  %v4955_v50 = vmul.f32 1.442695, %v4948_v29 }
0x1017   : > { %v8082_v49 = vpack.c.bf16 %v8489_v18, %v8488_v63 }
0x1018   : > { %v4947_v11 = vsub.f32 %v4908_v61, %v10864_v51  ;;  %v8492_v9 = vpop.permute.xlu1 %8491  ;;  %v4935_v63 = vsub.f32 -1e+30, %v10864_v51 }
0x1019   : > { %v8477_v58 = vpop.permute.xlu0 %8476  ;;  %v8494_v24 = vunpack.i.h.bf16 %v8492_v9  ;;  %v8493_v1 = vunpack.i.l.bf16 %v8492_v9 }
0x101a   : > { %v4953_v4 = vmul.f32 1.442695, %v4947_v11  ;;  %v8479_v2 = vunpack.i.h.bf16 %v8477_v58  ;;  %v8478_v27 = vunpack.i.l.bf16 %v8477_v58 }
0x101b   : > { %v8088_v19 = vpack.c.bf16 %v8494_v24, %v8493_v1  ;;  %v4941_v1 = vmul.f32 1.442695, %v4935_v63 }
0x101c   : > { %8731 = vpow2.f32 %v4953_v4  ;;  %v8070_v22 = vpack.c.bf16 %v8479_v2, %v8478_v27 }
0x101d   : > { %8733 = vpow2.f32 %v4955_v50 }
0x101e   : > { %v10867_v12 = vpop.eup %8727  ;;  %8072 = vmatprep.subr.msk.bf16.mxu1 %vm9451_vm2, %v8070_v22 }
0x101f   : > { %v10871_v44 = vpop.eup %8729  ;;  %7590 = vmatprep.mubr.msk.f32.mxu1 %vm1165_vm5, %v10867_v12  ;;  %v4961_v27 = vsel %vm1165_vm5, %v10867_v12, 0.0  ;;  %v4936_v12 = vsub.f32 -1e+30, %v10861_v13 }
0x1020   : > { %7591 = vmatmul.mubr.msk.f32.vlgmr.msra.gmra.mrb[44].mxu1 %vm1165_vm5, %v10871_v44  ;;  %v4964_v40 = vsel %vm1165_vm5, %v10871_v44, 0.0 }
0x1021   : > { %8075 = vmatpush3.bf16.xpose.msk.msra.mxu1 %vm9451_vm2, %v8070_v22  ;;  %v4943_v9 = vmul.f32 1.442695, %v4936_v12 }
0x1022   : > { %8078 = vmatprep.subr.msk.bf16.mxu1 %vm9451_vm2, %v8076_v20 }
0x1026   : > { %v10881_v31 = vpop.eup %8731 }
0x1027   : > { %v10883_v53 = vpop.eup %8733  ;;  %7593 = vmatprep.mubr.msk.f32.mxu1 %vm1165_vm5, %v10881_v31  ;;  %v4967_v22 = vsel %vm1165_vm5, %v10881_v31, 0.0 }
0x1028   : > { %7594 = vmatmul.mubr.msk.f32.gmra.mrb[46].mxu1 %vm1165_vm5, %v10883_v53  ;;  %v4970_v26 = vsel %vm1165_vm5, %v10883_v53, 0.0 }
0x1029   : > { %8081 = vmatpush3.bf16.xpose.msk.msra.mxu1 %vm9451_vm2, %v8076_v20  ;;  %7604 = vmatprep.mubr.msk.f32.mxu1 %vm942_vm1, %v10779_v14  ;;  %v11454_v14 = vld [vmem:[#allocation27_spill] sm:$0xff]  ;;  %v4934_v20 = vsub.f32 -1e+30, %v10855_v23 }
0x102a   : > { %8084 = vmatprep.subr.msk.bf16.mxu1 %vm9451_vm2, %v8082_v49 }
0x102b   : > { %v4939_v18 = vmul.f32 1.442695, %v4934_v20 }
0x102d   : > { %8735 = vpow2.f32 %v4939_v18 }
0x1030   : > { %7605 = vmatmul.mubr.msk.f32.vlgmr.msra.gmra.mrb[48].mxu1 %vm942_vm1, %v10784_v60  ;;  %v11455_v60 = vld [vmem:[#allocation28_spill] sm:$0xff] }
0x1031   : > { %7607 = vmatprep.mubr.msk.f32.mxu1 %vm942_vm1, %v10792_v25  ;;  %8087 = vmatpush3.bf16.xpose.msk.msra.mxu1 %vm9451_vm2, %v8082_v49  ;;  %v10922_v25 = vpop.permute.xlu0 %5572  ;;  %v4937_v49 = vmul.f32 1.442695, %v4933_v37 }
0x1032   : > { %8090 = vmatprep.subr.msk.bf16.mxu1 %vm9451_vm2, %v8088_v19 }
0x1033   : > { %8737 = vpow2.f32 %v4937_v49 }
0x1034   : > { %7608 = vmatmul.mubr.msk.f32.gmra.mrb[50].mxu1 %vm942_vm1, %v10804_v62  ;;  %v10934_v62 = vpop.permute.xlu1 %5574  ;;  %8739 = vpow2.f32 %v4943_v9 }
0x1035   : > { %7618 = vmatprep.mubr.msk.f32.mxu1 %vm942_vm1, %v10806_v38  ;;  %v10936_v38 = vpop.permute.xlu0 %5576  ;;  %8741 = vpow2.f32 %v4941_v1  ;;  %v5469_v1 = vld [vmem:[%s11275_s3 + $0x20] sm:$0xff] }
0x1039   : > { %8093 = vmatpush3.bf16.xpose.msk.msra.mxu1 %vm9451_vm2, %v8088_v19 }
0x103a   : > { %8108 = vmatprep.subr.msk.bf16.mxu1 %vm9451_vm2, %v11454_v14 }
0x1040   : > { %7619 = vmatmul.mubr.msk.f32.vlgmr.msra.gmra.mrb[48].mxu1 %vm942_vm1, %v10815_v42  ;;  %v11457_v42 = vld [vmem:[#allocation30_spill] sm:$0xff] }
0x1041   : > { %7621 = vmatprep.mubr.msk.f32.mxu1 %vm942_vm1, %v10817_v55  ;;  %8111 = vmatpush3.bf16.xpose.msk.msra.mxu1 %vm9451_vm2, %v11454_v14  ;;  %v10948_v55 = vpop.permute.xlu1 %5578 }
0x1042   : > { %8114 = vmatprep.subr.msk.bf16.mxu1 %vm9451_vm2, %v11455_v60 }
0x1044   : > { %7622 = vmatmul.mubr.msk.f32.gmra.mrb[50].mxu1 %vm942_vm1, %v10823_v3  ;;  %v10950_v3 = vpop.permute.xlu0 %5673 }
0x1045   : > { %7656 = vmatprep.mubr.msk.f32.mxu1 %vm942_vm1, %v10922_v25  ;;  %v10959_v54 = vpop.permute.xlu1 %5675 }
0x1048   : > { %v10961_v5 = vpop.permute.xlu0 %5677 }
0x1049   : > { %8117 = vmatpush3.bf16.xpose.msk.msra.mxu1 %vm9451_vm2, %v11455_v60  ;;  %v10967_v16 = vpop.permute.xlu1 %5679 }
0x104a   : > { %8120 = vmatprep.subr.msk.bf16.mxu1 %vm9451_vm2, %v11456_v28 }
0x1050   : > { %7657 = vmatmul.mubr.msk.f32.vlgmr.msra.gmra.mrb[52].mxu1 %vm942_vm1, %v10934_v62 }
0x1051   : > { %7659 = vmatprep.mubr.msk.f32.mxu1 %vm942_vm1, %v10936_v38  ;;  %8123 = vmatpush3.bf16.xpose.msk.msra.mxu1 %vm9451_vm2, %v11456_v28 }
0x1052   : > { %8126 = vmatprep.subr.msk.bf16.mxu1 %vm9451_vm2, %v11457_v42 }
0x1054   : > { %7660 = vmatmul.mubr.msk.f32.gmra.mrb[54].mxu1 %vm942_vm1, %v10948_v55 }
0x1055   : > { %7670 = vmatprep.mubr.msk.f32.mxu1 %vm942_vm1, %v10950_v3 }
0x1059   : > { %8129 = vmatpush3.bf16.xpose.msk.msra.mxu1 %vm9451_vm2, %v11457_v42 }
0x1060   : > { %7671 = vmatmul.mubr.msk.f32.vlgmr.msra.gmra.mrb[52].mxu1 %vm942_vm1, %v10959_v54 }
0x1061   : > { %7673 = vmatprep.mubr.msk.f32.mxu1 %vm942_vm1, %v10961_v5 }
0x1064   : > { %7674 = vmatmul.mubr.msk.f32.gmra.mrb[54].mxu1 %vm942_vm1, %v10967_v16 }
0x10f3   : > { %v10971_v46 = vpop.f32.mrb[44].mxu1 }
0x10f4   : > { %v10973_v56 = vpop.f32.mrb[45].mxu1 }
0x10fb   : > { %v10975_v61 = vpop.f32.mrb[46].mxu1 }
0x10fc   : > { %v10977_v21 = vpop.f32.mrb[47].mxu1 }
0x1113   : > { %v7620_v39 = vpop.f32.mrb[48].mxu1 }
0x1114   : > { %v5281_v15 = vsel %vm9606_vm3, %v7620_v39, -1e+30  ;;  %v5261_v52 = vpop.f32.mrb[49].mxu1 }
0x1115   : > { %v5287_v59 = vsel %vm1165_vm5, %v5281_v15, -inf  ;;  %v5280_v6 = vsel %vm9610_vm4, %v5261_v52, -1e+30 }
0x1116   : > { %v5284_v36 = vsel %vm1165_vm5, %v5280_v6, -inf  ;;  %5288 = vmax.xlane.f32.xlu1 %v5287_v59 }
0x1117   : > { %5285 = vmax.xlane.f32.xlu0 %v5284_v36  ;;  %v7623_v8 = vpop.f32.mrb[50].mxu1 }
0x1118   : > { %v5283_v10 = vsel %vm9622_vm6, %v7623_v8, -1e+30  ;;  %v5271_v29 = vpop.f32.mrb[51].mxu1 }
0x1119   : > { %v5293_v30 = vsel %vm1165_vm5, %v5283_v10, -inf  ;;  %v10990_v11 = vsel %vm9632_vm7, %v5271_v29, -1e+30 }
0x111a   : > { %v5290_v48 = vsel %vm1165_vm5, %v10990_v11, -inf }
0x111b   : > { %5294 = vmax.xlane.f32.xlu0 %v5293_v30 }
0x111f   : > { %5291 = vmax.xlane.f32.xlu0 %v5290_v48 }
0x1127   : > { %8501 = vrot.lane.b32.xlu1 %v11441_v35, %s8916_s28 }
0x1133   : > { %v10996_v50 = vpop.f32.mrb[52].mxu1 }
0x1134   : > { %v10998_v58 = vpop.f32.mrb[53].mxu1 }
0x1135   : > { %8496 = vrot.lane.b32.xlu0 %v11442_v32, %s8916_s28 }
0x1137   : > { %v11002_v4 = vpop.f32.mrb[54].mxu1 }
0x1138   : > { %v11004_v2 = vpop.f32.mrb[55].mxu1 }
0x114b   : > { %4962 = vadd.xlane.f32.xlu1 %v4961_v27 }
0x114f   : > { %4971 = vadd.xlane.f32.xlu1 %v4970_v26 }
0x1154   : > { %4965 = vadd.xlane.f32.xlu0 %v4964_v40 }
0x1158   : > { %4968 = vadd.xlane.f32.xlu0 %v4967_v22 }
0x11a3   : > { %v5289_v53 = vpop.xlane.xlu1 %5288 }
0x11a4   : > { %v5297_v44 = vmax.f32 %v10855_v23, %v5289_v53  ;;  %v5286_v24 = vpop.xlane.xlu0 %5285 }
0x11a5   : > { %v5296_v31 = vmax.f32 %v10857_v47, %v5286_v24 }
0x11a6   : > { %v5301_v19 = vsub.f32 %v10855_v23, %v5297_v44  ;;  %v5313_v14 = vsub.f32 %v5281_v15, %v5297_v44  ;;  %v8736_v15 = vpop.eup %8735 }
0x11a7   : > { %v5300_v60 = vsub.f32 %v10857_v47, %v5296_v31  ;;  %v5312_v28 = vsub.f32 %v5280_v6, %v5296_v31  ;;  %v8502_v47 = vpop.permute.xlu1 %8501  ;;  %v8738_v22 = vpop.eup %8737  ;;  %v11027_v20 = vmul.f32 0.0, %v8736_v15  ;;  %v5470_v31 = vld [vmem:[%s11275_s3 + $0x28] sm:$0xff]  ;;  %v5777_v15 = vsel %vm1165_vm5, %v10996_v50, -inf }
0x11a8   : > { %v5306_v42 = vmul.f32 1.442695, %v5301_v19  ;;  %v5318_v39 = vmul.f32 1.442695, %v5313_v14  ;;  %v5295_v52 = vpop.xlane.xlu0 %5294  ;;  %v8504_v37 = vunpack.i.h.bf16 %v8502_v47  ;;  %v8740_v53 = vpop.eup %8739  ;;  %v11031_v24 = vmul.f32 0.0, %v8738_v22 }
0x11a9   : > { %v5304_v59 = vmul.f32 1.442695, %v5300_v60  ;;  %v5316_v36 = vmul.f32 1.442695, %v5312_v28  ;;  %v5299_v8 = vmax.f32 %v10861_v13, %v5295_v52  ;;  %v8742_v9 = vpop.eup %8741  ;;  %v5075_v44 = vadd.f32 %v10971_v46, %v11027_v20 }
0x11aa   : > { %8743 = vpow2.f32 %v5306_v42  ;;  %v5074_v14 = vadd.f32 %v10973_v56, %v11031_v24  ;;  %v4960_v42 = vmul.f32 0.0, %v8740_v53  ;;  %v5780_v22 = vsel %vm1165_vm5, %v11004_v2, -inf }
0x11ab   : > { %8745 = vpow2.f32 %v5318_v39  ;;  %v5303_v29 = vsub.f32 %v10861_v13, %v5299_v8  ;;  %v5315_v30 = vsub.f32 %v5283_v10, %v5299_v8  ;;  %v8503_v13 = vunpack.i.l.bf16 %v8502_v47 }
0x11ac   : > { %8747 = vpow2.f32 %v5304_v59  ;;  %v5292_v23 = vpop.xlane.xlu0 %5291  ;;  %v8102_v59 = vpack.c.bf16 %v5470_v31, %v5469_v1  ;;  %v5077_v8 = vadd.f32 %v10975_v61, %v4960_v42  ;;  %v5774_v61 = vsel %vm1165_vm5, %v10998_v58, -inf }
0x11ad   : > { %8749 = vpow2.f32 %v5316_v36  ;;  %v5310_v6 = vmul.f32 1.442695, %v5303_v29  ;;  %v5322_v48 = vmul.f32 1.442695, %v5315_v30  ;;  %v5298_v27 = vmax.f32 %v10864_v51, %v5292_v23 }
0x11ae   : > { %v8098_v46 = vpack.c.bf16 %v8504_v37, %v8503_v13  ;;  %v4959_v23 = vmul.f32 0.0, %v8742_v9  ;;  %v5783_v37 = vsel %vm1165_vm5, %v11002_v4, -inf }
0x11af   : > { %8751 = vpow2.f32 %v5310_v6  ;;  %v5302_v26 = vsub.f32 %v10864_v51, %v5298_v27  ;;  %v5314_v40 = vsub.f32 %v10990_v11, %v5298_v27 }
0x11b0   : > { %8753 = vpow2.f32 %v5322_v48  ;;  %v8497_v10 = vpop.permute.xlu0 %8496  ;;  %v5076_v6 = vadd.f32 %v10977_v21, %v4959_v23  ;;  %v11458_v21 = vld [vmem:[#allocation10_spill] sm:$0xff] }
0x11b1   : > { %v5308_v18 = vmul.f32 1.442695, %v5302_v26  ;;  %v5320_v12 = vmul.f32 1.442695, %v5314_v40  ;;  %v8499_v63 = vunpack.i.h.bf16 %v8497_v10  ;;  %v8498_v49 = vunpack.i.l.bf16 %v8497_v10 }
0x11b3   : > { %8755 = vpow2.f32 %v5308_v18  ;;  %v8094_v51 = vpack.c.bf16 %v8499_v63, %v8498_v49 }
0x11b4   : > { %v11033_v11 = vpop.eup %8743  ;;  %8757 = vpow2.f32 %v5320_v12 }
0x11b5   : > { %v8746_v19 = vpop.eup %8745  ;;  %8095 = vmatprep.subr.bf16.mxu0 %v8094_v51  ;;  %v11044_v60 = vmul.f32 %v11033_v11, %v5075_v44 }
0x11b6   : > { %v8748_v28 = vpop.eup %8747  ;;  %v5331_v39 = vsel %vm1165_vm5, %v8746_v19, 0.0  ;;  %8097 = vmatpush3.bf16.msra.mxu0 %v8094_v51 }
0x11b7   : > { %v8750_v52 = vpop.eup %8749  ;;  %5332 = vadd.xlane.f32.xlu1 %v5331_v39  ;;  %8099 = vmatprep.subr.bf16.mxu0 %v8098_v46  ;;  %v11047_v36 = vmul.f32 %v8748_v28, %v5074_v14 }
0x11b8   : > { %7632 = vmatprep.mubr.msk.f32.mxu0 %vm1165_vm5, %v8750_v52  ;;  %v5328_v56 = vsel %vm1165_vm5, %v8750_v52, 0.0 }
0x11b9   : > { %v8752_v29 = vpop.eup %8751  ;;  %5329 = vadd.xlane.f32.xlu0 %v5328_v56 }
0x11ba   : > { %v8754_v30 = vpop.eup %8753  ;;  %8101 = vmatpush3.bf16.msra.mxu0 %v8098_v46  ;;  %v11054_v47 = vmul.f32 %v8752_v29, %v5077_v8 }
0x11bb   : > { %5778 = vmax.xlane.f32.xlu1 %v5777_v15  ;;  %8103 = vmatprep.subr.bf16.mxu0 %v8102_v59  ;;  %v5337_v26 = vsel %vm1165_vm5, %v8754_v30, 0.0 }
0x11bd   : > { %v8756_v48 = vpop.eup %8755  ;;  %5775 = vmax.xlane.f32.xlu0 %v5774_v61  ;;  %7633 = vmatmul.mubr.msk.f32.vlgmr.msra.gmra.mrb[48].mxu0 %vm1165_vm5, %v8746_v19 }
0x11be   : > { %v8758_v27 = vpop.eup %8757  ;;  %8105 = vmatpush3.bf16.msra.mxu0 %v8102_v59  ;;  %v11061_v40 = vmul.f32 %v8756_v48, %v5076_v6 }
0x11bf   : > { %5338 = vadd.xlane.f32.xlu1 %v5337_v26  ;;  %7635 = vmatprep.mubr.msk.f32.mxu0 %vm1165_vm5, %v8758_v27  ;;  %v5334_v13 = vsel %vm1165_vm5, %v8758_v27, 0.0 }
0x11c0   : > { %8131 = vmatprep.subr.bf16.mxu0 %v11458_v21 }
0x11c1   : > { %5781 = vmax.xlane.f32.xlu0 %v5780_v22  ;;  %7636 = vmatmul.mubr.msk.f32.gmra.mrb[50].mxu0 %vm1165_vm5, %v8754_v30 }
0x11c3   : > { %5784 = vmax.xlane.f32.xlu1 %v5783_v37 }
0x11c5   : > { %5335 = vadd.xlane.f32.xlu0 %v5334_v13 }
0x11d4   : > { %8511 = vrot.lane.b32.xlu1 %v11448_v57, %s11459_s13 }
0x11d8   : > { %8516 = vrot.lane.b32.xlu1 %v11450_v33, %s11460_s12  ;;  %v4963_v18 = vpop.xlane.xlu1 %4962 }
0x11d9   : > { %v4973_v57 = vadd.f32 %v4963_v18, %v11031_v24 }
0x11db   : > { %8506 = vrot.lane.b32.xlu0 %v11452_v41, %s11459_s13  ;;  %v5324_v19 = vmul.f32 %v8748_v28, %v4973_v57  ;;  %v11461_v57 = vld [vmem:[#allocation24_spill] sm:$0xff] }
0x11dc   : > { %8521 = vrot.lane.b32.xlu1 %v11451_v7, %s11460_s12  ;;  %v4972_v63 = vpop.xlane.xlu1 %4971  ;;  %s8930_s12 = smov [#allocation5]  }
0x11dd   : > { %v4976_v33 = vadd.f32 %v4972_v63, %v4960_v42 }
0x11df   : > { %v5327_v52 = vmul.f32 %v8752_v29, %v4976_v33 }
0x11e1   : > { %v4966_v10 = vpop.xlane.xlu0 %4965 }
0x11e2   : > { %v4974_v51 = vadd.f32 %v4966_v10, %v11027_v20 }
0x11e4   : > { %v5325_v31 = vmul.f32 %v11033_v11, %v4974_v51 }
0x11e5   : > { %v4969_v12 = vpop.xlane.xlu0 %4968 }
0x11e6   : > { %v4975_v41 = vadd.f32 %v4969_v12, %v4959_v23 }
0x11e8   : > { %v5326_v8 = vmul.f32 %v8756_v48, %v4975_v41 }
0x1244   : > { %v5333_v53 = vpop.xlane.xlu1 %5332 }
0x1245   : > { %v5341_v7 = vadd.f32 %v5333_v53, %v5325_v31 }
0x1246   : > { %v5330_v49 = vpop.xlane.xlu0 %5329 }
0x1247   : > { %v5340_v46 = vadd.f32 %v5330_v49, %v5324_v19  ;;  %8759 = vrcp.f32 %v5341_v7 }
0x1248   : > { %v5779_v44 = vpop.xlane.xlu1 %5778 }
0x1249   : > { %v11084_v56 = vmax.f32 %v5779_v44, -1e+30  ;;  %8761 = vrcp.f32 %v5340_v46 }
0x124a   : > { %v5776_v9 = vpop.xlane.xlu0 %5775 }
0x124b   : > { %v11082_v39 = vmax.f32 %v5776_v9, -1e+30  ;;  %v5803_v30 = vsub.f32 %v10996_v50, %v11084_v56 }
0x124c   : > { %v5339_v14 = vpop.xlane.xlu1 %5338 }
0x124d   : > { %v5343_v20 = vadd.f32 %v5339_v14, %v5327_v52  ;;  %v5802_v24 = vsub.f32 %v10998_v58, %v11082_v39  ;;  %v5808_v6 = vmul.f32 1.442695, %v5803_v30 }
0x124e   : > { %v5782_v1 = vpop.xlane.xlu0 %5781 }
0x124f   : > { %v11088_v42 = vmax.f32 %v5782_v1, -1e+30  ;;  %8763 = vrcp.f32 %v5343_v20  ;;  %v5806_v29 = vmul.f32 1.442695, %v5802_v24 }
0x1250   : > { %v5785_v11 = vpop.xlane.xlu1 %5784 }
0x1251   : > { %v11092_v23 = vmax.f32 %v5785_v11, -1e+30  ;;  %v5804_v15 = vsub.f32 %v11004_v2, %v11088_v42  ;;  %v8760_v22 = vpop.eup %8759 }
0x1252   : > { %v5336_v59 = vpop.xlane.xlu0 %5335 }
0x1253   : > { %v5342_v28 = vadd.f32 %v5336_v59, %v5326_v8  ;;  %v5805_v61 = vsub.f32 %v11002_v4, %v11092_v23  ;;  %v5810_v48 = vmul.f32 1.442695, %v5804_v15  ;;  %v8762_v37 = vpop.eup %8761 }
0x1255   : > { %8765 = vrcp.f32 %v5342_v28  ;;  %v5812_v10 = vmul.f32 1.442695, %v5805_v61 }
0x1256   : > { %8767 = vpow2.f32 %v5806_v29  ;;  %v8507_v18 = vpop.permute.xlu0 %8506 }
0x1257   : > { %8769 = vpow2.f32 %v5808_v6  ;;  %v8509_v9 = vunpack.i.h.bf16 %v8507_v18  ;;  %v8508_v44 = vunpack.i.l.bf16 %v8507_v18 }
0x1258   : > { %8771 = vpow2.f32 %v5810_v48  ;;  %v5791_v48 = vsub.f32 -1e+30, %v11084_v56 }
0x1259   : > { %v8764_v49 = vpop.eup %8763  ;;  %8773 = vpow2.f32 %v5812_v10  ;;  %v8138_v1 = vpack.c.bf16 %v8509_v9, %v8508_v44 }
0x1290   : > { %v7634_v58 = vpop.f32.mrb[48].mxu0 }
0x1291   : > { %v5458_v27 = vadd.f32 %v7634_v58, %v11044_v60  ;;  %v5438_v26 = vpop.f32.mrb[49].mxu0  ;;  %v8766_v60 = vpop.eup %8765 }
0x1292   : > { %v5457_v50 = vadd.f32 %v5438_v26, %v11047_v36  ;;  %v5793_v26 = vsub.f32 -1e+30, %v11092_v23 }
0x1293   : > { %v5466_v13 = vmul.f32 %v8760_v22, %v5458_v27  ;;  %v5790_v27 = vsub.f32 -1e+30, %v11082_v39  ;;  %v5792_v22 = vsub.f32 -1e+30, %v11088_v42 }
0x1294   : > { %v5465_v2 = vmul.f32 %v8762_v37, %v5457_v50  ;;  %v7637_v12 = vpop.f32.mrb[50].mxu0  ;;  %v5800_v10 = vmul.f32 1.442695, %v5793_v26 }
0x1295   : > { %v5460_v63 = vadd.f32 %v7637_v12, %v11054_v47  ;;  %v5448_v4 = vpop.f32.mrb[51].mxu0  ;;  %v8768_v47 = vpop.eup %8767 }
0x1296   : > { %v5459_v53 = vadd.f32 %v5448_v4, %v11061_v40  ;;  %7642 = vmatprep.mubr.msk.f32.mxu0 %vm1762_vm8, %v5465_v2  ;;  %v8512_v40 = vpop.permute.xlu1 %8511  ;;  %v8770_v33 = vpop.eup %8769  ;;  %v5818_v45 = vsel %vm1165_vm5, %v8768_v47, 0.0 }
0x1297   : > { %v5468_v36 = vmul.f32 %v8764_v49, %v5460_v63  ;;  %7643 = vmatmul.mubr.msk.f32.vlgmr.msra.gmra.mrb[40].mxu0 %vm1762_vm8, %v5466_v13  ;;  %v8772_v31 = vpop.eup %8771  ;;  %v8513_v41 = vunpack.i.l.bf16 %v8512_v40  ;;  %v5821_v0 = vsel %vm1165_vm5, %v8770_v33, 0.0  ;;  %v5798_v63 = vmul.f32 1.442695, %v5792_v22  ;;  %v6327_v22 = vld [vmem:[%s11275_s3 + $0x38] sm:$0xff] }
0x1298   : > { %v5467_v51 = vmul.f32 %v8766_v60, %v5459_v53  ;;  %8133 = vmatpush3.bf16.msra.mxu0 %v11458_v21  ;;  %v8514_v21 = vunpack.i.h.bf16 %v8512_v40  ;;  %v8774_v19 = vpop.eup %8773  ;;  %v5824_v58 = vsel %vm1165_vm5, %v8772_v31, 0.0 }
0x1299   : > { %8135 = vmatprep.subr.bf16.mxu0 %v11461_v57  ;;  %v5827_v43 = vsel %vm1165_vm5, %v8774_v19, 0.0 }
0x129a   : > { %7645 = vmatprep.mubr.msk.f32.mxu0 %vm1762_vm8, %v5467_v51  ;;  %v8144_v14 = vpack.c.bf16 %v8514_v21, %v8513_v41  ;;  %v8517_v7 = vpop.permute.xlu1 %8516 }
0x129b   : > { %7646 = vmatmul.mubr.msk.f32.gmra.mrb[42].mxu0 %vm1762_vm8, %v5468_v36  ;;  %v8519_v46 = vunpack.i.h.bf16 %v8517_v7  ;;  %v8518_v52 = vunpack.i.l.bf16 %v8517_v7 }
0x129c   : > { %8137 = vmatpush3.bf16.msra.mxu0 %v11461_v57  ;;  %7684 = vmatprep.mubr.msk.f32.mxu0 %vm1165_vm5, %v8768_v47 }
0x129d   : > { %8140 = vmatprep.subr.msk.bf16.mxu0 %vm9451_vm2, %v8138_v1  ;;  %v8150_v59 = vpack.c.bf16 %v8519_v46, %v8518_v52 }
0x129e   : > { %v8522_v8 = vpop.permute.xlu1 %8521 }
0x129f   : > { %7685 = vmatmul.mubr.msk.f32.vlgmr.msra.gmra.mrb[52].mxu0 %vm1165_vm5, %v8770_v33  ;;  %v8524_v20 = vunpack.i.h.bf16 %v8522_v8  ;;  %v8523_v24 = vunpack.i.l.bf16 %v8522_v8 }
0x12a0   : > { %7687 = vmatprep.mubr.msk.f32.mxu0 %vm1165_vm5, %v8772_v31 }
0x12a3   : > { %7688 = vmatmul.mubr.msk.f32.gmra.mrb[54].mxu0 %vm1165_vm5, %v8774_v19 }
0x12a4   : > { %7698 = vmatprep.mubr.msk.f32.mxu0 %vm942_vm1, %v10922_v25  ;;  %v8156_v25 = vpack.c.bf16 %v8524_v20, %v8523_v24 }
0x12a5   : > { %8143 = vmatpush3.bf16.xpose.msk.msra.mxu0 %vm9451_vm2, %v8138_v1 }
0x12a6   : > { %8146 = vmatprep.subr.msk.bf16.mxu0 %vm9451_vm2, %v8144_v14 }
0x12ad   : > { %8149 = vmatpush3.bf16.xpose.msk.msra.mxu0 %vm9451_vm2, %v8144_v14 }
0x12ae   : > { %8152 = vmatprep.subr.msk.bf16.mxu0 %vm9451_vm2, %v8150_v59 }
0x12b4   : > { %7699 = vmatmul.mubr.msk.f32.vlgmr.msra.gmra.mrb[56].mxu0 %vm942_vm1, %v10934_v62 }
0x12b5   : > { %7701 = vmatprep.mubr.msk.f32.mxu0 %vm942_vm1, %v10936_v38  ;;  %8155 = vmatpush3.bf16.xpose.msk.msra.mxu0 %vm9451_vm2, %v8150_v59 }
0x12b6   : > { %8158 = vmatprep.subr.msk.bf16.mxu0 %vm9451_vm2, %v8156_v25 }
0x12b8   : > { %7702 = vmatmul.mubr.msk.f32.gmra.mrb[58].mxu0 %vm942_vm1, %v10948_v55 }
0x12b9   : > { %7712 = vmatprep.mubr.msk.f32.mxu0 %vm942_vm1, %v10950_v3 }
0x12bd   : > { %8161 = vmatpush3.bf16.xpose.msk.msra.mxu0 %vm9451_vm2, %v8156_v25 }
0x12c4   : > { %7713 = vmatmul.mubr.msk.f32.vlgmr.msra.gmra.mrb[56].mxu0 %vm942_vm1, %v10959_v54 }
0x12c5   : > { %7715 = vmatprep.mubr.msk.f32.mxu0 %vm942_vm1, %v10961_v5 }
0x12c8   : > { %7716 = vmatmul.mubr.msk.f32.gmra.mrb[58].mxu0 %vm942_vm1, %v10967_v16 }
0x1372   : > { %v11145_v62 = vpop.f32.mrb[52].mxu0 }
0x1373   : > { %v11147_v38 = vpop.f32.mrb[53].mxu0 }
0x1376   : > { %v11149_v55 = vpop.f32.mrb[54].mxu0 }
0x1377   : > { %v11151_v11 = vpop.f32.mrb[55].mxu0 }
0x1397   : > { %v7714_v3 = vpop.f32.mrb[56].mxu0 }
0x1398   : > { %v6138_v34 = vsel %vm9606_vm3, %v7714_v3, -1e+30  ;;  %v6118_v28 = vpop.f32.mrb[57].mxu0 }
0x1399   : > { %v6144_v54 = vsel %vm1165_vm5, %v6138_v34, -inf  ;;  %v6137_v5 = vsel %vm9610_vm4, %v6118_v28, -1e+30 }
0x139a   : > { %v6141_v16 = vsel %vm1165_vm5, %v6137_v5, -inf  ;;  %6145 = vmax.xlane.f32.xlu1 %v6144_v54 }
0x139b   : > { %6142 = vmax.xlane.f32.xlu0 %v6141_v16  ;;  %v7717_v30 = vpop.f32.mrb[58].mxu0 }
0x139c   : > { %v6140_v29 = vsel %vm9622_vm6, %v7717_v30, -1e+30  ;;  %v6128_v15 = vpop.f32.mrb[59].mxu0 }
0x139d   : > { %v6150_v6 = vsel %vm1165_vm5, %v6140_v29, -inf  ;;  %v6139_v17 = vsel %vm9632_vm7, %v6128_v15, -1e+30 }
0x139e   : > { %v6147_v61 = vsel %vm1165_vm5, %v6139_v17, -inf }
0x139f   : > { %6151 = vmax.xlane.f32.xlu0 %v6150_v6 }
0x13a3   : > { %6148 = vmax.xlane.f32.xlu0 %v6147_v61 }
0x13ab   : > { %8531 = vrot.lane.b32.xlu1 %v11441_v35, %s8924_s17  ;;  %v5796_v35 = vmul.f32 1.442695, %v5791_v48 }
0x13ad   : > { %8775 = vpow2.f32 %v5796_v35 }
0x13b7   : > { %v8776_v1 = vpop.eup %8775 }
0x13b8   : > { %v5815_v14 = vmul.f32 0.0, %v8776_v1 }
0x13b9   : > { %8526 = vrot.lane.b32.xlu0 %v11442_v32, %s8924_s17  ;;  %v5794_v32 = vmul.f32 1.442695, %v5790_v27 }
0x13ba   : > { %v5932_v25 = vadd.f32 %v11145_v62, %v5815_v14 }
0x13bb   : > { %8777 = vpow2.f32 %v5794_v32 }
0x13bc   : > { %8779 = vpow2.f32 %v5800_v10 }
0x13c5   : > { %v8778_v19 = vpop.eup %8777 }
0x13c6   : > { %v8780_v24 = vpop.eup %8779  ;;  %v5814_v3 = vmul.f32 0.0, %v8778_v19 }
0x13c8   : > { %v5931_v54 = vadd.f32 %v11147_v38, %v5814_v3 }
0x13cf   : > { %5819 = vadd.xlane.f32.xlu1 %v5818_v45 }
0x13d8   : > { %5822 = vadd.xlane.f32.xlu0 %v5821_v0 }
0x13dc   : > { %5825 = vadd.xlane.f32.xlu0 %v5824_v58 }
0x13e0   : > { %5828 = vadd.xlane.f32.xlu0 %v5827_v43 }
0x1427   : > { %v6146_v50 = vpop.xlane.xlu1 %6145 }
0x1428   : > { %v6154_v37 = vmax.f32 %v11084_v56, %v6146_v50  ;;  %v6143_v13 = vpop.xlane.xlu0 %6142 }
0x1429   : > { %v6153_v18 = vmax.f32 %v11082_v39, %v6143_v13 }
0x142a   : > { %v6158_v2 = vsub.f32 %v11084_v56, %v6154_v37  ;;  %v6170_v12 = vsub.f32 %v6138_v34, %v6154_v37 }
0x142b   : > { %v6157_v4 = vsub.f32 %v11082_v39, %v6153_v18  ;;  %v6169_v49 = vsub.f32 %v6137_v5, %v6153_v18  ;;  %v8532_v40 = vpop.permute.xlu1 %8531 }
0x142c   : > { %v6163_v53 = vmul.f32 1.442695, %v6158_v2  ;;  %v6152_v60 = vpop.xlane.xlu0 %6151  ;;  %v6175_v51 = vmul.f32 1.442695, %v6170_v12  ;;  %v8534_v7 = vunpack.i.h.bf16 %v8532_v40  ;;  %v8533_v46 = vunpack.i.l.bf16 %v8532_v40 }
0x142d   : > { %v6161_v9 = vmul.f32 1.442695, %v6157_v4  ;;  %v6173_v44 = vmul.f32 1.442695, %v6169_v49  ;;  %v6156_v36 = vmax.f32 %v11092_v23, %v6152_v60 }
0x142e   : > { %8781 = vpow2.f32 %v6163_v53  ;;  %v8166_v5 = vpack.c.bf16 %v8534_v7, %v8533_v46 }
0x142f   : > { %8783 = vpow2.f32 %v5798_v63  ;;  %v6160_v57 = vsub.f32 %v11092_v23, %v6156_v36  ;;  %v6172_v47 = vsub.f32 %v6140_v29, %v6156_v36  ;;  %v5817_v29 = vmul.f32 0.0, %v8780_v24 }
0x1430   : > { %8785 = vpow2.f32 %v6161_v9  ;;  %v6149_v56 = vpop.xlane.xlu0 %6148 }
0x1431   : > { %8787 = vpow2.f32 %v6173_v44  ;;  %v6167_v39 = vmul.f32 1.442695, %v6160_v57  ;;  %v6155_v33 = vmax.f32 %v11088_v42, %v6149_v56  ;;  %v6179_v31 = vmul.f32 1.442695, %v6172_v47 }
0x1432   : > { %8789 = vpow2.f32 %v6175_v51  ;;  %v5934_v62 = vadd.f32 %v11149_v55, %v5817_v29 }
0x1433   : > { %8791 = vpow2.f32 %v6167_v39  ;;  %v6159_v21 = vsub.f32 %v11088_v42, %v6155_v33  ;;  %v6171_v41 = vsub.f32 %v6139_v17, %v6155_v33 }
0x1434   : > { %v8527_v23 = vpop.permute.xlu0 %8526  ;;  %8793 = vpow2.f32 %v6179_v31 }
0x1435   : > { %v6165_v52 = vmul.f32 1.442695, %v6159_v21  ;;  %v6177_v59 = vmul.f32 1.442695, %v6171_v41  ;;  %v8529_v8 = vunpack.i.h.bf16 %v8527_v23  ;;  %v8528_v20 = vunpack.i.l.bf16 %v8527_v23 }
0x1437   : > { %8795 = vpow2.f32 %v6165_v52  ;;  %v8162_v34 = vpack.c.bf16 %v8529_v8, %v8528_v20 }
0x1438   : > { %v8782_v28 = vpop.eup %8781  ;;  %8797 = vpow2.f32 %v6177_v59 }
0x1439   : > { %v8784_v42 = vpop.eup %8783  ;;  %8163 = vmatprep.subr.bf16.mxu1 %v8162_v34  ;;  %v6202_v16 = vmul.f32 %v8782_v28, %v5932_v25 }
0x143a   : > { %v8786_v30 = vpop.eup %8785  ;;  %8165 = vmatpush3.bf16.msra.mxu1 %v8162_v34  ;;  %v5816_v0 = vmul.f32 0.0, %v8784_v42  ;;  %v8811_v34 = vld [vmem:[%s9055_s16 + $0x28] sm:$0xff] }
0x143b   : > { %v8788_v15 = vpop.eup %8787  ;;  %8167 = vmatprep.subr.bf16.mxu1 %v8166_v5  ;;  %v6201_v6 = vmul.f32 %v8786_v30, %v5931_v54  ;;  %v8812_v54 = vld [vmem:[%s9055_s16 + $0x20] sm:$0xff] }
0x143c   : > { %v8790_v17 = vpop.eup %8789  ;;  %7726 = vmatprep.mubr.msk.f32.mxu1 %vm1165_vm5, %v8788_v15  ;;  %v6185_v61 = vsel %vm1165_vm5, %v8788_v15, 0.0  ;;  %v5933_v43 = vadd.f32 %v11151_v11, %v5816_v0  ;;  %v6326_v11 = vld [vmem:[%s11275_s3 + $0x30] sm:$0xff] }
0x143d   : > { %v8792_v45 = vpop.eup %8791  ;;  %6186 = vadd.xlane.f32.xlu1 %v6185_v61  ;;  %v6188_v48 = vsel %vm1165_vm5, %v8790_v17, 0.0  ;;  %v8170_v50 = vpack.c.bf16 %v6327_v22, %v6326_v11 }
0x143e   : > { %8169 = vmatpush3.bf16.msra.mxu1 %v8166_v5  ;;  %v6204_v38 = vmul.f32 %v8792_v45, %v5934_v62  ;;  %v8794_v58 = vpop.eup %8793 }
0x143f   : > { %v6194_v32 = vsel %vm1165_vm5, %v8794_v58, 0.0  ;;  %8171 = vmatprep.subr.bf16.mxu0 %v8170_v50 }
0x1440   : > { %8173 = vmatpush3.bf16.msra.mxu0 %v8170_v50 }
0x1441   : > { %v8796_v27 = vpop.eup %8795  ;;  %6189 = vadd.xlane.f32.xlu1 %v6188_v48  ;;  %7727 = vmatmul.mubr.msk.f32.vlgmr.msra.gmra.mrb[56].mxu1 %vm1165_vm5, %v8790_v17 }
0x1442   : > { %v8798_v35 = vpop.eup %8797  ;;  %v6203_v55 = vmul.f32 %v8796_v27, %v5933_v43 }
0x1443   : > { %7729 = vmatprep.mubr.msk.f32.mxu1 %vm1165_vm5, %v8798_v35  ;;  %v6191_v26 = vsel %vm1165_vm5, %v8798_v35, 0.0 }
0x1444   : > { %6192 = vadd.xlane.f32.xlu0 %v6191_v26 }
0x1445   : > { %6195 = vadd.xlane.f32.xlu1 %v6194_v32  ;;  %7730 = vmatmul.mubr.msk.f32.gmra.mrb[58].mxu1 %vm1165_vm5, %v8794_v58 }
0x145c   : > { %v5820_v13 = vpop.xlane.xlu1 %5819 }
0x145d   : > { %v5830_v12 = vadd.f32 %v5820_v13, %v5814_v3 }
0x145f   : > { %v6181_v9 = vmul.f32 %v8786_v30, %v5830_v12  ;;  %v8813_v30 = vld [vmem:[%s9055_s16 + $0x38] sm:$0xff] }
0x1465   : > { %v5823_v37 = vpop.xlane.xlu0 %5822 }
0x1466   : > { %v5831_v2 = vadd.f32 %v5823_v37, %v5815_v14 }
0x1468   : > { %v6182_v53 = vmul.f32 %v8782_v28, %v5831_v2 }
0x1469   : > { %v5826_v10 = vpop.xlane.xlu0 %5825 }
0x146a   : > { %v5832_v60 = vadd.f32 %v5826_v10, %v5816_v0 }
0x146c   : > { %v6183_v56 = vmul.f32 %v8796_v27, %v5832_v60 }
0x146d   : > { %v5829_v63 = vpop.xlane.xlu0 %5828 }
0x146e   : > { %v5833_v49 = vadd.f32 %v5829_v63, %v5817_v29 }
0x1470   : > { %v6184_v57 = vmul.f32 %v8792_v45, %v5833_v49 }
0x14ca   : > { %v6187_v18 = vpop.xlane.xlu1 %6186 }
0x14cb   : > { %v6197_v36 = vadd.f32 %v6187_v18, %v6181_v9 }
0x14ce   : > { %v6190_v4 = vpop.xlane.xlu1 %6189 }
0x14cf   : > { %v6198_v44 = vadd.f32 %v6190_v4, %v6182_v53 }
0x14d1   : > { %v6193_v47 = vpop.xlane.xlu0 %6192  ;;  %8799 = vrcp.f32 %v6198_v44 }
0x14d2   : > { %v6196_v51 = vpop.xlane.xlu1 %6195  ;;  %8801 = vrcp.f32 %v6197_v36  ;;  %v6199_v40 = vadd.f32 %v6193_v47, %v6183_v56 }
0x14d3   : > { %v6200_v1 = vadd.f32 %v6196_v51, %v6184_v57 }
0x14d5   : > { %8803 = vrcp.f32 %v6200_v1 }
0x14d6   : > { %8805 = vrcp.f32 %v6199_v40 }
0x14db   : > { %v8800_v21 = vpop.eup %8799 }
0x14dc   : > { %v8802_v19 = vpop.eup %8801 }
0x14df   : > { %v8804_v59 = vpop.eup %8803 }
0x14e0   : > { %v8806_v20 = vpop.eup %8805 }
0x1514   : > { %v7728_v39 = vpop.f32.mrb[56].mxu1 }
0x1515   : > { %v6315_v33 = vadd.f32 %v7728_v39, %v6202_v16  ;;  %v6295_v31 = vpop.f32.mrb[57].mxu1 }
0x1516   : > { %v6314_v41 = vadd.f32 %v6295_v31, %v6201_v6  ;;  %v8814_v6 = vld [vmem:[%s9055_s16 + $0x30] sm:$0xff]  ;;  %s8847_s16 = sshll.u32 %s8930_s12, 4  ;;  %s8848_s16 = int_to_ptr.vmem [resolvable:$false] %s8847_s16 }
0x1517   : > { %v6323_v14 = vmul.f32 %v8800_v21, %v6315_v33  ;;  %s8849_s17 = scalar_lea.vmem %s8848_s16, 2048  ;;  %p8850_p2 = scmp.lt.s32.totalorder %s11222_s18, %s8848_s16 }
0x1518   : > { %v6322_v7 = vmul.f32 %v8802_v19, %v6314_v41  ;;  %v7731_v46 = vpop.f32.mrb[58].mxu1  ;;  %p8851_p3 = scmp.lt.s32.totalorder %s8849_s17, %s8843_s9 }
0x1519   : > { %v6317_v23 = vadd.f32 %v7731_v46, %v6204_v38  ;;  %v6305_v52 = vpop.f32.mrb[59].mxu1 }
0x151a   : > { %v6316_v8 = vadd.f32 %v6305_v52, %v6203_v55  ;;  %7736 = vmatprep.mubr.msk.f32.mxu0 %vm1762_vm8, %v6322_v7  ;;  %p8852_p4 = por %p8851_p3, %p8850_p2 }
0x151b   : > { %v6325_v24 = vmul.f32 %v8804_v59, %v6317_v23  ;;  %7737 = vmatmul.mubr.msk.f32.vlgmr.msra.gmra.mrb[40].mxu0 %vm1762_vm8, %v6323_v14 }
0x151c   : > { %v6324_v25 = vmul.f32 %v8806_v20, %v6316_v8  ;;  %p8853_p7 = pnand %p8852_p4, %p8846_p12 }
0x151e   : > { %7739 = vmatprep.mubr.msk.f32.mxu0 %vm1762_vm8, %v6324_v25 }
0x151f   : > { %7740 = vmatmul.mubr.msk.f32.gmra.mrb[42].mxu0 %vm1762_vm8, %v6325_v24 }
0x15ee   : > { %v7738_v3 = vpop.f32.mrb[40].mxu0 }
0x15ef   : > { %v6430_v28 = vadd.f32 %v8811_v34, %v7738_v3  ;;  %v6406_v42 = vpop.f32.mrb[41].mxu0 }
0x15f0   : > { %v6429_v5 = vadd.f32 %v8812_v54, %v6406_v42 }
0x15f1   : > { %6434 = vst.msk [vmem:[%s10370_s10 + $0x28] sm:$0xff] %vm282_vm0, %v6430_v28 }
0x15f2   : > { %6433 = vst.msk [vmem:[%s10370_s10 + $0x20] sm:$0xff] %vm282_vm0, %v6429_v5  ;;  %v7741_v16 = vpop.f32.mrb[42].mxu0 }
0x15f3   : > { %v6432_v29 = vadd.f32 %v8813_v30, %v7741_v16  ;;  %v6416_v15 = vpop.f32.mrb[43].mxu0 }
0x15f4   : > { %v6431_v17 = vadd.f32 %v8814_v6, %v6416_v15 }
0x15f5   : > { %6436 = vst.msk [vmem:[%s10370_s10 + $0x38] sm:$0xff] %vm282_vm0, %v6432_v29 }
0x15f6   : > { %6435 = vst.msk [vmem:[%s10370_s10 + $0x30] sm:$0xff] %vm282_vm0, %v6431_v17 }
0x15f7   : > { %8856 = shalt.err (!%p8853_p7)
}
0x15f8   : > { %s8857_s19 = scalar_lea.hbm %s11219_s20, 1024  ;;  %s8861_s26 = scalar_lea.hbm %s11278_s6, 2048 }
0x15f9   : > { %p8858_p8 = scmp.ne.s32.totalorder %s11219_s20, %s8857_s19  ;;  %p8862_p1 = scmp.lt.u32.totalorder %s11219_s20, %s11278_s6 }
0x15fa   : > { %p8863_p0 = scmp.lt.u32.totalorder %s8861_s26, %s8857_s19  ;;  %p8865_p6 = scmp.lt.u32.totalorder %s8857_s19, %s11219_s20 }
0x15fb   : > { %p8859_p11 = pnand %p8858_p8, %p11462_p9 }
0x15fc   : > { %p8864_p5 = por %p8863_p0, %p8862_p1 }
0x15fd   : > { %p8860_p13 = pneg %p8859_p11 }
0x15fe   : > { %p8866_p10 = por %p8865_p6, %p8864_p5 }
0x1600   : > { %p8867_p12 = pnand %p8866_p10, %p8860_p13 }
0x1602   : > { %8870 = shalt.err (!%p8867_p12)
}
0x1603   : > { %s8931_s28 = smov 128  }
0x1604   : > { %8250 = dma.vmem_to_hbm [thread:$0]  (%p11462_p9), %s11222_s18, 1024, %s11219_s20, %s11230_s25, %s8931_s28, %s8931_s28, %s11459_s13  }
0x1605 PF: > { %p8262_p2 = scmp.ge.s32.totalorder %s8909_s24, 2  ;;  %s6466_s29 = sand.u32 1, %s8897_s21  }
0x1606   : > { %p11463_p3 = scmp.ne.s32.totalorder %s11367_s8, 0  ;;  %s6467_s9 = scalar_lea.sflag [#allocation4], %s6466_s29 }
0x1608   : > { %p8257_p4 = pnand %p8262_p2, %p11463_p3 }
0x160a   : > { %8892 = dma.done.wait (!%p8257_p4), %s6467_s9, 1024  }
0x160b   : > { %8894 = vsyncadd (!%p8257_p4), %s6467_s9, 4294966272  ;;  %p17_p7 = scmp.ge.s32.totalorder %s8992_s27, 4   ;;  %s11464_s21 = smov %s8901_s22 }
0x160c   : > { %s11465_s22 = smov %s8905_s23  ;;  %s11466_s23 = smov %s9003_s30 }
0x160d   : > { %s11467_s24 = smov %s8992_s27  ;;  %19 = sbr.rel (!%p17_p7) target bundleno = 4 (0x4), region = 84 }
0x1614   :  { %6472 = vsyncpa [#allocation3], 1 }
0x1615   :  { %6474 = vsyncpa [#allocation3 + $0x1], 1 }
0x1616   :  { %6475 = vsyncpa [#allocation4], 1 }
0x1617   :  { %6477 = vsyncpa [#allocation4 + $0x1], 1 }

</bundles_post_ra>
